<compile_context>
chip_gen: v5e
topology: v5e:2x2
jax: 0.10.0
libtpu: 0.0.40
codegen_flags: <defaults>
</compile_context>

<pallas_src>
import functools

import jax
import jax.numpy as jnp
from jax.experimental import pallas as pl
from jax.experimental.pallas import tpu as pltpu

N_FFT = 512
HOP = 256
F_BINS = N_FFT // 2 + 1          # 257


def _round_up(x, m):
    return (x + m - 1) // m * m


KP = _round_up(2 * F_BINS, 128)  # 640: packed [re | im] contraction dim
# MXU fast path for the iSTFT matmul; set to jnp.float32 if exact-f32 synthesis
# is required (validated-tolerable for a scalar training loss).
MATMUL_DTYPE = jnp.bfloat16


# ---------------------------------------------------------------------------
# Kernel 1: compressed-spectrum MSE partial sums (gridded, SMEM accumulator).
#   Inputs are the native interleaved layout reshaped to (B*F, 2*T):
#   lane 2k = real, lane 2k+1 = imag of frame k.
# ---------------------------------------------------------------------------
def _mse_kernel(p_ref, t_ref, q_ref, out_ref, *, rows, lanes, tile_r, tile_l):
    i = pl.program_id(0)
    j = pl.program_id(1)

    @pl.when(jnp.logical_and(i == 0, j == 0))
    def _init():
        out_ref[0, 0] = 0.0
        out_ref[0, 1] = 0.0

    x = p_ref[...]
    y = t_ref[...]
    shp = x.shape
    lane_ok = (j * tile_l + jax.lax.broadcasted_iota(jnp.int32, shp, 1)) < lanes
    row_ok = (i * tile_r + jax.lax.broadcasted_iota(jnp.int32, shp, 0)) < rows
    ok = jnp.logical_and(lane_ok, row_ok)
    q = q_ref[...]

    def compress(v):
        # Per-bin power (re^2 + im^2) broadcast to both lanes of the pair via
        # a constant 0/1 matmul (MXU), then 1 log + 2 exp on the EUP.
        p2 = jnp.where(lane_ok, v * v, 0.0)   # zero OOB lanes before the dot
        s = jnp.dot(p2, q, preferred_element_type=jnp.float32) + 1e-12
        ls = jnp.log(s)
        u = jnp.exp(-0.35 * ls)               # = mag ** -0.7
        m = jnp.exp(0.15 * ls)                # = mag ** 0.3
        return v * u, m

    xc, xm = compress(x)
    yc, ym = compress(y)
    d_ri = xc - yc                            # real + imag squared errors
    d_m = xm - ym                             # compressed-magnitude errors
    out_ref[0, 0] += jnp.sum(jnp.where(ok, d_ri * d_ri, 0.0))
    # the magnitude term is duplicated on both lanes of a pair -> count once
    out_ref[0, 1] += 0.5 * jnp.sum(jnp.where(ok, d_m * d_m, 0.0))


# ---------------------------------------------------------------------------
# Kernel 2: fused iSTFT (inverse-rDFT-basis matmul + overlap-add) + SI-SNR.
#   One grid step per batch element; waveforms stay in VMEM/vregs.
# ---------------------------------------------------------------------------
def _istft_sisnr_kernel(p_ref, t_ref, basis_ref, out_ref):
    basis = basis_ref[...]
    fp = jnp.dot(p_ref[0], basis, preferred_element_type=jnp.float32)  # (T, 512)
    ft = jnp.dot(t_ref[0], basis, preferred_element_type=jnp.float32)
    t = fp.shape[0]
    # overlap-add with hop = N_FFT/2 and center-trim of HOP on both sides:
    #   y[k*HOP:(k+1)*HOP] = frames[k, HOP:] + frames[k+1, :HOP],  k = 0..T-2
    # squared-window COLA envelope == 1 on this interior -> no normalization.
    yp = fp[:t - 1, HOP:] + fp[1:, :HOP]       # (T-1, HOP)
    yt = ft[:t - 1, HOP:] + ft[1:, :HOP]
    a = jnp.sum(yt * yp)
    e = jnp.sum(yt * yt)
    proj = (a / (e + 1e-8)) * yt               # projected "y_true"
    num = jnp.sum(proj * proj)                 # ||proj||^2
    den = jnp.sum((yp - proj) ** 2)
    ratio = num / (den + 1e-8) + 1e-8
    out_ref[...] = jnp.broadcast_to(-jnp.log10(ratio), out_ref.shape).astype(jnp.float32)


# ---------------------------------------------------------------------------
# Wrapper
# ---------------------------------------------------------------------------
def _make_basis():
    f32 = jnp.float32
    n_i = jnp.arange(N_FFT, dtype=jnp.int32)
    k_i = jnp.arange(F_BINS, dtype=jnp.int32)
    n = n_i.astype(f32)
    # torch.hann_window(512) is periodic; .pow(0.5); window + 1/N + Hermitian
    # doubling folded into the synthesis basis.
    win = jnp.sqrt(0.5 - 0.5 * jnp.cos(2.0 * jnp.pi * n / N_FFT))
    scale = jnp.where((k_i == 0) | (k_i == N_FFT // 2), 1.0, 2.0) / N_FFT
    kn = (k_i[:, None] * n_i[None, :]) % N_FFT          # exact arg reduction
    ang = 2.0 * jnp.pi * kn.astype(f32) / N_FFT
    br = (scale[:, None] * jnp.cos(ang)) * win[None, :]     # (257, 512)
    bi = (-scale[:, None] * jnp.sin(ang)) * win[None, :]
    basis = jnp.concatenate([br, bi], axis=0)               # (514, 512): [Br; Bi]
    return jnp.pad(basis, ((0, KP - 2 * F_BINS), (0, 0))).astype(MATMUL_DTYPE)


def hybrid_loss(pred_stft, true_stft):
    B, F, T, C = pred_stft.shape
    assert F == F_BINS and C == 2 and T >= 2
    f32 = jnp.float32
    pred = pred_stft.astype(f32)
    true = true_stft.astype(f32)

    # ---- compressed-spectrum MSE terms (native layout, no prep pass) -------
    rows = B * F
    lanes = 2 * T                              # interleaved re/im on lanes
    pred2d = pred.reshape(rows, lanes)         # free reshapes (contiguous)
    true2d = true.reshape(rows, lanes)

    tile_l = lanes if lanes <= 512 else 512    # pairs never straddle a tile
    tile_r = min(512, _round_up(rows, 8))
    grid_mse = (pl.cdiv(rows, tile_r), pl.cdiv(lanes, tile_l))

    lane = jnp.arange(tile_l, dtype=jnp.int32)
    q_pair = (lane[:, None] // 2 == lane[None, :] // 2).astype(f32)  # (Lt, Lt)

    sums = pl.pallas_call(
        functools.partial(_mse_kernel, rows=rows, lanes=lanes,
                          tile_r=tile_r, tile_l=tile_l),
        out_shape=jax.ShapeDtypeStruct((1, 2), f32),
        grid=grid_mse,
        in_specs=[
            pl.BlockSpec((tile_r, tile_l), lambda i, j: (i, j)),
            pl.BlockSpec((tile_r, tile_l), lambda i, j: (i, j)),
            pl.BlockSpec((tile_l, tile_l), lambda i, j: (0, 0)),   # resident
        ],
        out_specs=pl.BlockSpec((1, 2), lambda i, j: (0, 0),
                               memory_space=pltpu.MemorySpace.SMEM),
        compiler_params=pltpu.CompilerParams(
            dimension_semantics=("arbitrary", "arbitrary")),
    )(pred2d, true2d, q_pair)

    n_elem = float(B * F * T)                  # MSELoss divides by element count
    spec_loss = 30.0 * (sums[0, 0] / n_elem) + 70.0 * (sums[0, 1] / n_elem)

    # ---- fused iSTFT + SI-SNR ----------------------------------------------
    basis = _make_basis()

    def pack(x):   # [B, F, T, 2] -> [B, T, KP], contraction-packed [re | im]
        ri = jnp.concatenate([x[..., 0], x[..., 1]], axis=1)     # [B, 2F, T]
        ri = jnp.transpose(ri, (0, 2, 1))                        # [B, T, 2F]
        ri = jnp.pad(ri, ((0, 0), (0, 0), (0, KP - 2 * F_BINS)))
        return ri.astype(MATMUL_DTYPE)

    pp = pack(pred)
    tp = pack(true)

    # TODO(synk): torch.istft's runtime NOLA nonzero-envelope assertion is
    # skipped (the envelope is exactly 1 here, so it would always pass).
    sis = pl.pallas_call(
        _istft_sisnr_kernel,
        out_shape=jax.ShapeDtypeStruct((B, 1, 128), f32),
        grid=(B,),
        in_specs=[
            pl.BlockSpec((1, T, KP), lambda b: (b, 0, 0)),
            pl.BlockSpec((1, T, KP), lambda b: (b, 0, 0)),
            pl.BlockSpec((KP, N_FFT), lambda b: (0, 0)),          # resident
        ],
        out_specs=pl.BlockSpec((1, 1, 128), lambda b: (b, 0, 0)),
        compiler_params=pltpu.CompilerParams(
            dimension_semantics=("parallel",)),
    )(pp, tp, basis)
    sisnr = jnp.mean(sis[:, 0, 0])

    return spec_loss + sisnr


if __name__ == "__main__":
    key = jax.random.PRNGKey(0)
    k1, k2 = jax.random.split(key)
    B, T = 2, 8  # pred/true STFT: [batch, 257 freq bins, 8 frames, re/im]
    pred_stft = jax.random.normal(k1, (B, F_BINS, T, 2), dtype=jnp.float32)
    true_stft = jax.random.normal(k2, (B, F_BINS, T, 2), dtype=jnp.float32)

    loss = jax.jit(hybrid_loss)(pred_stft, true_stft)
    jax.block_until_ready(loss)
    assert loss.shape == ()
    assert bool(jnp.isfinite(loss))
    print("KERNEL_OK")
</pallas_src>

<mosaic_0001>
module attributes {stable_mosaic.version = 11 : i64} {
  func.func @_istft_sisnr_kernel(%arg0: i32, %arg1: memref<1x8x640xbf16, #tpu.memory_space<vmem>>, %arg2: memref<1x8x640xbf16, #tpu.memory_space<vmem>>, %arg3: memref<640x512xbf16, #tpu.memory_space<vmem>>, %arg4: memref<1x1x128xf32, #tpu.memory_space<vmem>>) attributes {dimension_semantics = [#tpu.dimension_semantics<parallel>], iteration_bounds = array<i64: 2>, scalar_prefetch = 0 : i64, scratch_operands = 0 : i64, tpu.core_type = #tpu.core_type<tc>, window_params = [{transform_indices = @transform_0, window_bounds = array<i64: 1, 8, 640>}, {transform_indices = @transform_1, window_bounds = array<i64: 1, 8, 640>}, {pipeline_mode = #tpu.pipeline_mode<synchronous>, transform_indices = @transform_2, window_bounds = array<i64: 640, 512>}, {transform_indices = @transform_3, window_bounds = array<i64: 1, 1, 128>}]} {
    %c0 = arith.constant 0 : index
    %c0_0 = arith.constant 0 : index
    %0 = vector.load %arg3[%c0, %c0_0] : memref<640x512xbf16, #tpu.memory_space<vmem>>, vector<640x512xbf16>
    %c0_1 = arith.constant 0 : index
    %c0_2 = arith.constant 0 : index
    %c0_3 = arith.constant 0 : index
    %1 = vector.load %arg1[%c0_1, %c0_2, %c0_3] : memref<1x8x640xbf16, #tpu.memory_space<vmem>>, vector<1x8x640xbf16>
    %2 = vector.shape_cast %1 : vector<1x8x640xbf16> to vector<8x640xbf16>
    %cst = arith.constant dense<0.000000e+00> : vector<8x512xf32>
    %3 = tpu.matmul %2, %0, %cst {dimension_numbers = #tpu.dot_dimension_numbers<[1], [0], [0], [1], [0, 0, 1, 1], [], []>} : vector<8x640xbf16>, vector<640x512xbf16>, vector<8x512xf32> -> vector<8x512xf32>
    %c0_4 = arith.constant 0 : index
    %c0_5 = arith.constant 0 : index
    %c0_6 = arith.constant 0 : index
    %4 = vector.load %arg2[%c0_4, %c0_5, %c0_6] : memref<1x8x640xbf16, #tpu.memory_space<vmem>>, vector<1x8x640xbf16>
    %5 = vector.shape_cast %4 : vector<1x8x640xbf16> to vector<8x640xbf16>
    %cst_7 = arith.constant dense<0.000000e+00> : vector<8x512xf32>
    %6 = tpu.matmul %5, %0, %cst_7 {dimension_numbers = #tpu.dot_dimension_numbers<[1], [0], [0], [1], [0, 0, 1, 1], [], []>} : vector<8x640xbf16>, vector<640x512xbf16>, vector<8x512xf32> -> vector<8x512xf32>
    %7 = vector.extract_strided_slice %3 {offsets = [0, 256], sizes = [7, 256], strides = [1, 1]} : vector<8x512xf32> to vector<7x256xf32>
    %8 = vector.extract_strided_slice %3 {offsets = [1, 0], sizes = [7, 256], strides = [1, 1]} : vector<8x512xf32> to vector<7x256xf32>
    %9 = arith.addf %7, %8 : vector<7x256xf32>
    %10 = vector.extract_strided_slice %6 {offsets = [0, 256], sizes = [7, 256], strides = [1, 1]} : vector<8x512xf32> to vector<7x256xf32>
    %11 = vector.extract_strided_slice %6 {offsets = [1, 0], sizes = [7, 256], strides = [1, 1]} : vector<8x512xf32> to vector<7x256xf32>
    %12 = arith.addf %10, %11 : vector<7x256xf32>
    %13 = arith.mulf %12, %9 : vector<7x256xf32>
    %14 = vector.shape_cast %13 : vector<7x256xf32> to vector<1x7x256xf32>
    %cst_8 = arith.constant dense<0.000000e+00> : vector<1xf32>
    %15 = vector.multi_reduction <add>, %14, %cst_8 [1, 2] : vector<1x7x256xf32> to vector<1xf32>
    %16 = vector.shape_cast %15 : vector<1xf32> to vector<1x1x1xf32>
    %17 = vector.extract %16[0, 0, 0] : f32 from vector<1x1x1xf32>
    %18 = arith.mulf %12, %12 : vector<7x256xf32>
    %19 = vector.shape_cast %18 : vector<7x256xf32> to vector<1x7x256xf32>
    %cst_9 = arith.constant dense<0.000000e+00> : vector<1xf32>
    %20 = vector.multi_reduction <add>, %19, %cst_9 [1, 2] : vector<1x7x256xf32> to vector<1xf32>
    %21 = vector.shape_cast %20 : vector<1xf32> to vector<1x1x1xf32>
    %22 = vector.extract %21[0, 0, 0] : f32 from vector<1x1x1xf32>
    %cst_10 = arith.constant 9.99999993E-9 : f32
    %23 = arith.addf %22, %cst_10 : f32
    %24 = arith.divf %17, %23 : f32
    %25 = vector.broadcast %24 : f32 to vector<7x256xf32>
    %26 = arith.mulf %25, %12 : vector<7x256xf32>
    %27 = arith.mulf %26, %26 : vector<7x256xf32>
    %28 = vector.shape_cast %27 : vector<7x256xf32> to vector<1x7x256xf32>
    %cst_11 = arith.constant dense<0.000000e+00> : vector<1xf32>
    %29 = vector.multi_reduction <add>, %28, %cst_11 [1, 2] : vector<1x7x256xf32> to vector<1xf32>
    %30 = vector.shape_cast %29 : vector<1xf32> to vector<1x1x1xf32>
    %31 = vector.extract %30[0, 0, 0] : f32 from vector<1x1x1xf32>
    %32 = arith.subf %9, %26 : vector<7x256xf32>
    %33 = arith.mulf %32, %32 : vector<7x256xf32>
    %34 = vector.shape_cast %33 : vector<7x256xf32> to vector<1x7x256xf32>
    %cst_12 = arith.constant dense<0.000000e+00> : vector<1xf32>
    %35 = vector.multi_reduction <add>, %34, %cst_12 [1, 2] : vector<1x7x256xf32> to vector<1xf32>
    %36 = vector.shape_cast %35 : vector<1xf32> to vector<1x1x1xf32>
    %37 = vector.extract %36[0, 0, 0] : f32 from vector<1x1x1xf32>
    %cst_13 = arith.constant 9.99999993E-9 : f32
    %38 = arith.addf %37, %cst_13 : f32
    %39 = arith.divf %31, %38 : f32
    %cst_14 = arith.constant 9.99999993E-9 : f32
    %40 = arith.addf %39, %cst_14 : f32
    %41 = math.log %40 : f32
    %cst_15 = arith.constant 0.434294492 : f32
    %42 = arith.mulf %41, %cst_15 : f32
    %cst_16 = arith.constant 0.000000e+00 : f32
    %43 = arith.subf %cst_16, %42 : f32
    %44 = vector.broadcast %43 : f32 to vector<1x1x128xf32>
    %c0_17 = arith.constant 0 : index
    %c0_18 = arith.constant 0 : index
    %c0_19 = arith.constant 0 : index
    %45 = vector.load %arg4[%c0_17, %c0_18, %c0_19] : memref<1x1x128xf32, #tpu.memory_space<vmem>>, vector<1x1x128xf32>
    tpu.vector_store %arg4[%c0_17, %c0_18, %c0_19], %44 {strides = array<i32>} : memref<1x1x128xf32, #tpu.memory_space<vmem>>, vector<1x1x128xf32>,
    return
  }
  func.func @transform_0(%arg0: i32) -> (i32, i32, i32) {
    %c0_i32 = arith.constant 0 : i32
    %c0_i32_0 = arith.constant 0 : i32
    %c0_i32_1 = arith.constant 0 : i32
    return %arg0, %c0_i32, %c0_i32_0 : i32, i32, i32
  }
  func.func @transform_1(%arg0: i32) -> (i32, i32, i32) {
    %c0_i32 = arith.constant 0 : i32
    %c0_i32_0 = arith.constant 0 : i32
    %c0_i32_1 = arith.constant 0 : i32
    return %arg0, %c0_i32, %c0_i32_0 : i32, i32, i32
  }
  func.func @transform_2(%arg0: i32) -> (i32, i32) {
    %c0_i32 = arith.constant 0 : i32
    %c0_i32_0 = arith.constant 0 : i32
    %c0_i32_1 = arith.constant 0 : i32
    return %c0_i32, %c0_i32_0 : i32, i32
  }
  func.func @transform_3(%arg0: i32) -> (i32, i32, i32) {
    %c0_i32 = arith.constant 0 : i32
    %c0_i32_0 = arith.constant 0 : i32
    %c0_i32_1 = arith.constant 0 : i32
    return %arg0, %c0_i32, %c0_i32_0 : i32, i32, i32
  }
}

module attributes {stable_mosaic.version = 11 : i64} {
  func.func @_mse_kernel(%arg0: i32, %arg1: i32, %arg2: memref<512x16xf32, #tpu.memory_space<vmem>>, %arg3: memref<512x16xf32, #tpu.memory_space<vmem>>, %arg4: memref<16x16xf32, #tpu.memory_space<vmem>>, %arg5: memref<1x2xf32, #tpu.memory_space<smem>>) attributes {dimension_semantics = [#tpu.dimension_semantics<arbitrary>, #tpu.dimension_semantics<arbitrary>], iteration_bounds = array<i64: 2, 1>, scalar_prefetch = 0 : i64, scratch_operands = 0 : i64, tpu.core_type = #tpu.core_type<tc>, window_params = [{transform_indices = @transform_0, window_bounds = array<i64: 512, 16>}, {transform_indices = @transform_1, window_bounds = array<i64: 512, 16>}, {pipeline_mode = #tpu.pipeline_mode<synchronous>, transform_indices = @transform_2, window_bounds = array<i64: 16, 16>}, {transform_indices = @transform_3, window_bounds = array<i64: 1, 2>}]} {
    %c0_i32 = arith.constant 0 : i32
    %0 = arith.cmpi eq, %arg0, %c0_i32 : i32
    %c0_i32_0 = arith.constant 0 : i32
    %1 = arith.cmpi eq, %arg1, %c0_i32_0 : i32
    %2 = arith.andi %0, %1 : i1
    %3 = arith.extui %2 : i1 to i32
    %c0_i32_1 = arith.constant 0 : i32
    %4 = arith.cmpi ne, %3, %c0_i32_1 : i32
    scf.if %4 {
      %cst_29 = arith.constant 0.000000e+00 : f32
      %c0_30 = arith.constant 0 : index
      %c0_31 = arith.constant 0 : index
      %72 = memref.load %arg5[%c0_30, %c0_31] : memref<1x2xf32, #tpu.memory_space<smem>>
      memref.store %cst_29, %arg5[%c0_30, %c0_31] : memref<1x2xf32, #tpu.memory_space<smem>>
      %cst_32 = arith.constant 0.000000e+00 : f32
      %c0_33 = arith.constant 0 : index
      %c1_34 = arith.constant 1 : index
      %73 = memref.load %arg5[%c0_33, %c1_34] : memref<1x2xf32, #tpu.memory_space<smem>>
      memref.store %cst_32, %arg5[%c0_33, %c1_34] : memref<1x2xf32, #tpu.memory_space<smem>>
    } else {
    }
    %c0 = arith.constant 0 : index
    %c0_2 = arith.constant 0 : index
    %5 = vector.load %arg2[%c0, %c0_2] : memref<512x16xf32, #tpu.memory_space<vmem>>, vector<512x16xf32>
    %c0_3 = arith.constant 0 : index
    %c0_4 = arith.constant 0 : index
    %6 = vector.load %arg3[%c0_3, %c0_4] : memref<512x16xf32, #tpu.memory_space<vmem>>, vector<512x16xf32>
    %c16_i32 = arith.constant 16 : i32
    %7 = arith.muli %arg1, %c16_i32 : i32
    %8 = tpu.iota {dimensions = array<i32: 1>} : vector<512x16xi32>
    %9 = vector.broadcast %7 : i32 to vector<512x16xi32>
    %10 = arith.addi %9, %8 : vector<512x16xi32>
    %c16_i32_5 = arith.constant 16 : i32
    %11 = vector.broadcast %c16_i32_5 : i32 to vector<512x16xi32>
    %12 = arith.cmpi slt, %10, %11 : vector<512x16xi32>
    %c512_i32 = arith.constant 512 : i32
    %13 = arith.muli %arg0, %c512_i32 : i32
    %14 = tpu.iota {dimensions = array<i32: 0>} : vector<512x16xi32>
    %15 = vector.broadcast %13 : i32 to vector<512x16xi32>
    %16 = arith.addi %15, %14 : vector<512x16xi32>
    %c514_i32 = arith.constant 514 : i32
    %17 = vector.broadcast %c514_i32 : i32 to vector<512x16xi32>
    %18 = arith.cmpi slt, %16, %17 : vector<512x16xi32>
    %19 = arith.andi %12, %18 : vector<512x16xi1>
    %c0_6 = arith.constant 0 : index
    %c0_7 = arith.constant 0 : index
    %20 = vector.load %arg4[%c0_6, %c0_7] : memref<16x16xf32, #tpu.memory_space<vmem>>, vector<16x16xf32>
    %21 = arith.mulf %5, %5 : vector<512x16xf32>
    %cst = arith.constant 0.000000e+00 : f32
    %22 = vector.broadcast %cst : f32 to vector<512x16xf32>
    %23 = arith.select %12, %21, %22 : vector<512x16xi1>, vector<512x16xf32>
    %cst_8 = arith.constant dense<0.000000e+00> : vector<512x16xf32>
    %24 = tpu.matmul %23, %20, %cst_8 {dimension_numbers = #tpu.dot_dimension_numbers<[1], [0], [0], [1], [0, 0, 1, 1], [], []>} : vector<512x16xf32>, vector<16x16xf32>, vector<512x16xf32> -> vector<512x16xf32>
    %cst_9 = arith.constant 9.99999996E-13 : f32
    %25 = vector.broadcast %cst_9 : f32 to vector<512x16xf32>
    %26 = arith.addf %24, %25 : vector<512x16xf32>
    %27 = math.log %26 : vector<512x16xf32>
    %cst_10 = arith.constant -3.500000e-01 : f32
    %28 = vector.broadcast %cst_10 : f32 to vector<512x16xf32>
    %29 = arith.mulf %28, %27 : vector<512x16xf32>
    %30 = math.exp %29 : vector<512x16xf32>
    %cst_11 = arith.constant 1.500000e-01 : f32
    %31 = vector.broadcast %cst_11 : f32 to vector<512x16xf32>
    %32 = arith.mulf %31, %27 : vector<512x16xf32>
    %33 = math.exp %32 : vector<512x16xf32>
    %34 = arith.mulf %5, %30 : vector<512x16xf32>
    %35 = arith.mulf %6, %6 : vector<512x16xf32>
    %cst_12 = arith.constant 0.000000e+00 : f32
    %36 = vector.broadcast %cst_12 : f32 to vector<512x16xf32>
    %37 = arith.select %12, %35, %36 : vector<512x16xi1>, vector<512x16xf32>
    %cst_13 = arith.constant dense<0.000000e+00> : vector<512x16xf32>
    %38 = tpu.matmul %37, %20, %cst_13 {dimension_numbers = #tpu.dot_dimension_numbers<[1], [0], [0], [1], [0, 0, 1, 1], [], []>} : vector<512x16xf32>, vector<16x16xf32>, vector<512x16xf32> -> vector<512x16xf32>
    %cst_14 = arith.constant 9.99999996E-13 : f32
    %39 = vector.broadcast %cst_14 : f32 to vector<512x16xf32>
    %40 = arith.addf %38, %39 : vector<512x16xf32>
    %41 = math.log %40 : vector<512x16xf32>
    %cst_15 = arith.constant -3.500000e-01 : f32
    %42 = vector.broadcast %cst_15 : f32 to vector<512x16xf32>
    %43 = arith.mulf %42, %41 : vector<512x16xf32>
    %44 = math.exp %43 : vector<512x16xf32>
    %cst_16 = arith.constant 1.500000e-01 : f32
    %45 = vector.broadcast %cst_16 : f32 to vector<512x16xf32>
    %46 = arith.mulf %45, %41 : vector<512x16xf32>
    %47 = math.exp %46 : vector<512x16xf32>
    %48 = arith.mulf %6, %44 : vector<512x16xf32>
    %49 = arith.subf %34, %48 : vector<512x16xf32>
    %50 = arith.subf %33, %47 : vector<512x16xf32>
    %c0_17 = arith.constant 0 : index
    %c0_18 = arith.constant 0 : index
    %51 = memref.load %arg5[%c0_17, %c0_18] : memref<1x2xf32, #tpu.memory_space<smem>>
    %52 = arith.mulf %49, %49 : vector<512x16xf32>
    %cst_19 = arith.constant 0.000000e+00 : f32
    %53 = vector.broadcast %cst_19 : f32 to vector<512x16xf32>
    %54 = arith.select %19, %52, %53 : vector<512x16xi1>, vector<512x16xf32>
    %55 = vector.shape_cast %54 : vector<512x16xf32> to vector<1x512x16xf32>
    %cst_20 = arith.constant dense<0.000000e+00> : vector<1xf32>
    %56 = vector.multi_reduction <add>, %55, %cst_20 [1, 2] : vector<1x512x16xf32> to vector<1xf32>
    %57 = vector.shape_cast %56 : vector<1xf32> to vector<1x1x1xf32>
    %58 = vector.extract %57[0, 0, 0] : f32 from vector<1x1x1xf32>
    %59 = arith.addf %51, %58 : f32
    %c0_21 = arith.constant 0 : index
    %c0_22 = arith.constant 0 : index
    %60 = memref.load %arg5[%c0_21, %c0_22] : memref<1x2xf32, #tpu.memory_space<smem>>
    memref.store %59, %arg5[%c0_21, %c0_22] : memref<1x2xf32, #tpu.memory_space<smem>>
    %c0_23 = arith.constant 0 : index
    %c1 = arith.constant 1 : index
    %61 = memref.load %arg5[%c0_23, %c1] : memref<1x2xf32, #tpu.memory_space<smem>>
    %62 = arith.mulf %50, %50 : vector<512x16xf32>
    %cst_24 = arith.constant 0.000000e+00 : f32
    %63 = vector.broadcast %cst_24 : f32 to vector<512x16xf32>
    %64 = arith.select %19, %62, %63 : vector<512x16xi1>, vector<512x16xf32>
    %65 = vector.shape_cast %64 : vector<512x16xf32> to vector<1x512x16xf32>
    %cst_25 = arith.constant dense<0.000000e+00> : vector<1xf32>
    %66 = vector.multi_reduction <add>, %65, %cst_25 [1, 2] : vector<1x512x16xf32> to vector<1xf32>
    %67 = vector.shape_cast %66 : vector<1xf32> to vector<1x1x1xf32>
    %68 = vector.extract %67[0, 0, 0] : f32 from vector<1x1x1xf32>
    %cst_26 = arith.constant 5.000000e-01 : f32
    %69 = arith.mulf %cst_26, %68 : f32
    %70 = arith.addf %61, %69 : f32
    %c0_27 = arith.constant 0 : index
    %c1_28 = arith.constant 1 : index
    %71 = memref.load %arg5[%c0_27, %c1_28] : memref<1x2xf32, #tpu.memory_space<smem>>
    memref.store %70, %arg5[%c0_27, %c1_28] : memref<1x2xf32, #tpu.memory_space<smem>>
    return
  }
  func.func @transform_0(%arg0: i32, %arg1: i32) -> (i32, i32) {
    %c0_i32 = arith.constant 0 : i32
    return %arg0, %arg1 : i32, i32
  }
  func.func @transform_1(%arg0: i32, %arg1: i32) -> (i32, i32) {
    %c0_i32 = arith.constant 0 : i32
    return %arg0, %arg1 : i32, i32
  }
  func.func @transform_2(%arg0: i32, %arg1: i32) -> (i32, i32) {
    %c0_i32 = arith.constant 0 : i32
    %c0_i32_0 = arith.constant 0 : i32
    %c0_i32_1 = arith.constant 0 : i32
    return %c0_i32, %c0_i32_0 : i32, i32
  }
  func.func @transform_3(%arg0: i32, %arg1: i32) -> (i32, i32) {
    %c0_i32 = arith.constant 0 : i32
    %c0_i32_0 = arith.constant 0 : i32
    %c0_i32_1 = arith.constant 0 : i32
    return %c0_i32, %c0_i32_0 : i32, i32
  }
}

</mosaic_0001>

<bundles_post_ra>
// kernel: hybrid_loss.3
= control target key start
LH: loop header
LB: loop body
LE: loop exit
PB: predicated region body
PF: predicated region fallthrough
CT: control target
= control target key end

     0   :  { %s2757_s12 = smov 0   ;;  %s4481_s0 = inlined_call_operand.vmem [shape: bf16[2,8,640], index: 0, kind: input, shape index: {}]   ;;  %s4482_s1 = inlined_call_operand.vmem [shape: bf16[2,8,640], index: 1, kind: input, shape index: {}]   ;;  %s4483_s2 = inlined_call_operand.vmem [shape: bf16[640,512], index: 2, kind: input, shape index: {}]   ;;  %s4484_s3 = inlined_call_operand.vmem [shape: f32[2,1,128], index: 3, kind: output, shape index: {}]  }
   0x1 LB: > { %s1891_s13 = sadd.s32 4294967295, %s2735_s12   ;;  %p1895_p0 = scmp.ge.s32.totalorder %s2735_s12, 1  ;;  %s2735_s12 = sphi %s2757_s12, %s13_s12  }
   0x2   : > { %p147_p1 = scmp.lt.s32.totalorder %s2735_s12, 3 }
   0x4   : > { %p148_p2 = pnand %p1895_p0, %p147_p1 }
   0x6   : > { %151 = sbr.rel (%p148_p2) target bundleno = 1070 (0x42e), region = 32 }
   0xb   : > { %v2012_v0 = vld [vmem:[%s4483_s2 + $0xe0] sm:$0xf]  ;;  %v2570_v1 = vld [vmem:[%s4483_s2 + $0xec] sm:$0xf0]  ;;  %p174_p3 = scmp.lt.s32.totalorder %s1891_s13, 1  ;;  %vm1727_vm0 = vcmask 1046528  }
   0xc   : > { %v2140_v2 = vld [vmem:[%s4483_s2 + $0x1e0] sm:$0xf]  ;;  %v2774_v3 = vor.u32 %v2570_v1, %v2012_v0  ;;  %v2602_v4 = vld [vmem:[%s4483_s2 + $0x1ec] sm:$0xf0] }
   0xd   : > { %v2268_v5 = vld [vmem:[%s4483_s2 + $0x2e0] sm:$0xf]  ;;  %v2634_v6 = vld [vmem:[%s4483_s2 + $0x2ec] sm:$0xf0]  ;;  %v2785_v7 = vor.u32 %v2602_v4, %v2140_v2  ;;  %s4810_s13 = smov (!%p174_p3, %s1891_s13), 1 }
   0xe   : > { %v2787_v8 = vor.u32 %v2634_v6, %v2268_v5  ;;  %v2396_v9 = vld [vmem:[%s4483_s2 + $0x3e0] sm:$0xf]  ;;  %v2666_v10 = vld [vmem:[%s4483_s2 + $0x3ec] sm:$0xf0]  ;;  %1168 = vmatpush.bf16.msra.mxu0 %v2774_v3  ;;  %s2700_s8 = smul.u32 20, %s4810_s13  ;;  %s186_s21 = scalar_lea.vmem %s4484_s3, %s4810_s13 }
   0xf   : > { %v1996_v11 = vld [vmem:[%s4483_s2 + $0xc0] sm:$0xf]  ;;  %v2799_v12 = vor.u32 %v2666_v10, %v2396_v9  ;;  %v2566_v13 = vld [vmem:[%s4483_s2 + $0xcc] sm:$0xf0]  ;;  %1181 = vmatpush.bf16.msra.mxu1 %v2785_v7 }
  0x10   : > { %v2124_v14 = vld [vmem:[%s4483_s2 + $0x1c0] sm:$0xf]  ;;  %v2598_v15 = vld [vmem:[%s4483_s2 + $0x1cc] sm:$0xf0]  ;;  %1194 = vmatpush.bf16.msra.mxu2 %v2787_v8  ;;  %v2812_v16 = vor.u32 %v2566_v13, %v1996_v11  ;;  %s3226_s23 = scalar_lea.vmem %s4481_s0, %s2700_s8  ;;  %s4277_s30 = scalar_lea.vmem %s4482_s1, %s2700_s8 }
  0x11   : > { %v2814_v17 = vor.u32 %v2598_v15, %v2124_v14  ;;  %v2252_v18 = vld [vmem:[%s4483_s2 + $0x2c0] sm:$0xf]  ;;  %v2630_v19 = vld [vmem:[%s4483_s2 + $0x2cc] sm:$0xf0]  ;;  %1207 = vmatpush.bf16.msra.mxu3 %v2799_v12 }
  0x12   : > { %v2380_v20 = vld [vmem:[%s4483_s2 + $0x3c0] sm:$0xf]  ;;  %v2826_v21 = vor.u32 %v2630_v19, %v2252_v18  ;;  %v2662_v22 = vld [vmem:[%s4483_s2 + $0x3cc] sm:$0xf0]  ;;  %1169 = vmatpush.bf16.msra.mxu0 %v2812_v16 }
  0x13   : > { %v1980_v23 = vld [vmem:[%s4483_s2 + $0xa0] sm:$0xf]  ;;  %v2562_v24 = vld [vmem:[%s4483_s2 + $0xac] sm:$0xf0]  ;;  %v2837_v25 = vor.u32 %v2662_v22, %v2380_v20  ;;  %1182 = vmatpush.bf16.msra.mxu1 %v2814_v17 }
  0x14   : > { %v2108_v26 = vld [vmem:[%s4483_s2 + $0x1a0] sm:$0xf]  ;;  %v2594_v27 = vld [vmem:[%s4483_s2 + $0x1ac] sm:$0xf0]  ;;  %v2849_v29 = vor.u32 %v2562_v24, %v1980_v23  ;;  %1195 = vmatpush.bf16.msra.mxu2 %v2826_v21 }
  0x15   : > { %v2236_v28 = vld [vmem:[%s4483_s2 + $0x2a0] sm:$0xf]  ;;  %v2626_v30 = vld [vmem:[%s4483_s2 + $0x2ac] sm:$0xf0]  ;;  %v2862_v33 = vor.u32 %v2594_v27, %v2108_v26  ;;  %1208 = vmatpush.bf16.msra.mxu3 %v2837_v25 }
  0x16   : > { %v2364_v31 = vld [vmem:[%s4483_s2 + $0x3a0] sm:$0xf]  ;;  %v2658_v32 = vld [vmem:[%s4483_s2 + $0x3ac] sm:$0xf0]  ;;  %v2864_v34 = vor.u32 %v2626_v30, %v2236_v28  ;;  %1170 = vmatpush.bf16.msra.mxu0 %v2849_v29 }
  0x17   : > { %v1964_v35 = vld [vmem:[%s4483_s2 + $0x80] sm:$0xf]  ;;  %v2558_v36 = vld [vmem:[%s4483_s2 + $0x8c] sm:$0xf0]  ;;  %v2876_v38 = vor.u32 %v2658_v32, %v2364_v31  ;;  %1183 = vmatpush.bf16.msra.mxu1 %v2862_v33 }
  0x18   : > { %v2092_v37 = vld [vmem:[%s4483_s2 + $0x180] sm:$0xf]  ;;  %v2590_v39 = vld [vmem:[%s4483_s2 + $0x18c] sm:$0xf0]  ;;  %v2894_v44 = vor.u32 %v2558_v36, %v1964_v35  ;;  %1196 = vmatpush.bf16.msra.mxu2 %v2864_v34 }
  0x19   : > { %v2220_v40 = vld [vmem:[%s4483_s2 + $0x280] sm:$0xf]  ;;  %v2622_v41 = vld [vmem:[%s4483_s2 + $0x28c] sm:$0xf0]  ;;  %v2898_v45 = vor.u32 %v2590_v39, %v2092_v37  ;;  %1209 = vmatpush.bf16.msra.mxu3 %v2876_v38 }
  0x1a   : > { %v2348_v42 = vld [vmem:[%s4483_s2 + $0x380] sm:$0xf]  ;;  %v2654_v43 = vld [vmem:[%s4483_s2 + $0x38c] sm:$0xf0]  ;;  %v2900_v46 = vor.u32 %v2622_v41, %v2220_v40  ;;  %1171 = vmatpush.bf16.msra.mxu0 %v2894_v44 }
  0x1b   : > { %v1948_v47 = vld [vmem:[%s4483_s2 + $0x60] sm:$0xf]  ;;  %v2554_v48 = vld [vmem:[%s4483_s2 + $0x6c] sm:$0xf0]  ;;  %v2912_v50 = vor.u32 %v2654_v43, %v2348_v42  ;;  %1184 = vmatpush.bf16.msra.mxu1 %v2898_v45  ;;  %v2568_v42 = vld [vmem:[%s4483_s2 + $0xe4] sm:$0xf] }
  0x1c   : > { %v2076_v49 = vld [vmem:[%s4483_s2 + $0x160] sm:$0xf]  ;;  %v2586_v51 = vld [vmem:[%s4483_s2 + $0x16c] sm:$0xf0]  ;;  %v2930_v56 = vor.u32 %v2554_v48, %v1948_v47  ;;  %1197 = vmatpush.bf16.msra.mxu2 %v2900_v46  ;;  %v2014_v47 = vld [vmem:[%s4483_s2 + $0xf0] sm:$0xf0] }
  0x1d   : > { %v2204_v52 = vld [vmem:[%s4483_s2 + $0x260] sm:$0xf]  ;;  %v2618_v53 = vld [vmem:[%s4483_s2 + $0x26c] sm:$0xf0]  ;;  %v2934_v57 = vor.u32 %v2586_v51, %v2076_v49  ;;  %1210 = vmatpush.bf16.msra.mxu3 %v2912_v50  ;;  %v2600_v48 = vld [vmem:[%s4483_s2 + $0x1e4] sm:$0xf] }
  0x1e   : > { %v2332_v54 = vld [vmem:[%s4483_s2 + $0x360] sm:$0xf]  ;;  %v2650_v55 = vld [vmem:[%s4483_s2 + $0x36c] sm:$0xf0]  ;;  %v2936_v58 = vor.u32 %v2618_v53, %v2204_v52  ;;  %1172 = vmatpush.bf16.msra.mxu0 %v2930_v56  ;;  %v2142_v49 = vld [vmem:[%s4483_s2 + $0x1f0] sm:$0xf0] }
  0x1f   : > { %v1932_v59 = vld [vmem:[%s4483_s2 + $0x40] sm:$0xf]  ;;  %v2550_v60 = vld [vmem:[%s4483_s2 + $0x4c] sm:$0xf0]  ;;  %v2948_v62 = vor.u32 %v2650_v55, %v2332_v54  ;;  %1185 = vmatpush.bf16.msra.mxu1 %v2934_v57  ;;  %v2632_v53 = vld [vmem:[%s4483_s2 + $0x2e4] sm:$0xf] }
  0x20   : > { %v2060_v61 = vld [vmem:[%s4483_s2 + $0x140] sm:$0xf]  ;;  %v2582_v63 = vld [vmem:[%s4483_s2 + $0x14c] sm:$0xf0]  ;;  %v2966_v5 = vor.u32 %v2550_v60, %v1932_v59  ;;  %1198 = vmatpush.bf16.msra.mxu2 %v2936_v58  ;;  %v2270_v54 = vld [vmem:[%s4483_s2 + $0x2f0] sm:$0xf0]  ;;  %v3075_v60 = vor.u32 %v2568_v42, %v2014_v47 }
  0x21   : > { %v2188_v0 = vld [vmem:[%s4483_s2 + $0x240] sm:$0xf]  ;;  %v2614_v1 = vld [vmem:[%s4483_s2 + $0x24c] sm:$0xf0]  ;;  %v2970_v6 = vor.u32 %v2582_v63, %v2060_v61  ;;  %1211 = vmatpush.bf16.msra.mxu3 %v2948_v62  ;;  %v3077_v61 = vor.u32 %v2600_v48, %v2142_v49  ;;  %v2556_v49 = vld [vmem:[%s4483_s2 + $0x84] sm:$0xf] }
  0x22   : > { %v2316_v2 = vld [vmem:[%s4483_s2 + $0x340] sm:$0xf]  ;;  %v2646_v4 = vld [vmem:[%s4483_s2 + $0x34c] sm:$0xf0]  ;;  %v2972_v9 = vor.u32 %v2614_v1, %v2188_v0  ;;  %1173 = vmatpush.bf16.msra.mxu0 %v2966_v5  ;;  %v2564_v1 = vld [vmem:[%s4483_s2 + $0xc4] sm:$0xf] }
  0x23   : > { %v1916_v10 = vld [vmem:[%s4483_s2 + $0x20] sm:$0xf]  ;;  %v2546_v11 = vld [vmem:[%s4483_s2 + $0x2c] sm:$0xf0]  ;;  %v2984_v14 = vor.u32 %v2646_v4, %v2316_v2  ;;  %1186 = vmatpush.bf16.msra.mxu1 %v2970_v6  ;;  %v3089_v2 = vor.u32 %v2632_v53, %v2270_v54  ;;  %v1998_v4 = vld [vmem:[%s4483_s2 + $0xd0] sm:$0xf0] }
  0x24   : > { %v2044_v13 = vld [vmem:[%s4483_s2 + $0x120] sm:$0xf]  ;;  %v2578_v15 = vld [vmem:[%s4483_s2 + $0x12c] sm:$0xf0]  ;;  %v3002_v23 = vor.u32 %v2546_v11, %v1916_v10  ;;  %1199 = vmatpush.bf16.msra.mxu2 %v2972_v9  ;;  %v2596_v10 = vld [vmem:[%s4483_s2 + $0x1c4] sm:$0xf] }
  0x25   : > { %v2172_v18 = vld [vmem:[%s4483_s2 + $0x220] sm:$0xf]  ;;  %v2610_v19 = vld [vmem:[%s4483_s2 + $0x22c] sm:$0xf0]  ;;  %v3012_v27 = vor.u32 %v2578_v15, %v2044_v13  ;;  %1212 = vmatpush.bf16.msra.mxu3 %v2984_v14  ;;  %v2126_v11 = vld [vmem:[%s4483_s2 + $0x1d0] sm:$0xf0] }
  0x26   : > { %v2300_v20 = vld [vmem:[%s4483_s2 + $0x320] sm:$0xf]  ;;  %v2642_v22 = vld [vmem:[%s4483_s2 + $0x32c] sm:$0xf0]  ;;  %v3014_v28 = vor.u32 %v2610_v19, %v2172_v18  ;;  %1174 = vmatpush.bf16.msra.mxu0 %v3002_v23  ;;  %v2628_v13 = vld [vmem:[%s4483_s2 + $0x2c4] sm:$0xf]  ;;  %v3114_v19 = vor.u32 %v2564_v1, %v1998_v4 }
  0x27   : > { %v1900_v24 = vld [vmem:[%s4483_s2] sm:$0xf]  ;;  %v2542_v26 = vld [vmem:[%s4483_s2 + $0xc] sm:$0xf0]  ;;  %v3026_v35 = vor.u32 %v2642_v22, %v2300_v20  ;;  %1187 = vmatpush.bf16.msra.mxu1 %v3012_v27  ;;  %v2254_v15 = vld [vmem:[%s4483_s2 + $0x2d0] sm:$0xf0]  ;;  %v3116_v20 = vor.u32 %v2596_v10, %v2126_v11 }
  0x28   : > { %v2028_v30 = vld [vmem:[%s4483_s2 + $0x100] sm:$0xf]  ;;  %v2574_v31 = vld [vmem:[%s4483_s2 + $0x10c] sm:$0xf0]  ;;  %v3047_v43 = vor.u32 %v2542_v26, %v1900_v24  ;;  %1200 = vmatpush.bf16.msra.mxu2 %v3014_v28  ;;  %4593 = vst [vmem:[#allocation2_spill] sm:$0xff] %v3114_v19 }
  0x29   : > { %v2156_v32 = vld [vmem:[%s4483_s2 + $0x200] sm:$0xf]  ;;  %v2606_v36 = vld [vmem:[%s4483_s2 + $0x20c] sm:$0xf0]  ;;  %v3060_v51 = vor.u32 %v2574_v31, %v2028_v30  ;;  %1213 = vmatpush.bf16.msra.mxu3 %v3026_v35  ;;  %4594 = vst [vmem:[#allocation3_spill] sm:$0xff] %v3116_v20  ;;  %v3128_v30 = vor.u32 %v2628_v13, %v2254_v15 }
  0x2a   : > { %v2284_v37 = vld [vmem:[%s4483_s2 + $0x300] sm:$0xf]  ;;  %v2638_v39 = vld [vmem:[%s4483_s2 + $0x30c] sm:$0xf0]  ;;  %v3062_v52 = vor.u32 %v2606_v36, %v2156_v32  ;;  %1175 = vmatpush.bf16.msra.mxu0 %v3047_v43  ;;  %v2560_v26 = vld [vmem:[%s4483_s2 + $0xa4] sm:$0xf] }
  0x2b   : > { %v2524_v40 = vld [vmem:[%s4483_s2 + $0x4e0] sm:$0xf]  ;;  %v2698_v41 = vld [vmem:[%s4483_s2 + $0x4ec] sm:$0xf0]  ;;  %v3071_v55 = vor.u32 %v2638_v39, %v2284_v37  ;;  %1188 = vmatpush.bf16.msra.mxu1 %v3060_v51  ;;  %4595 = vst [vmem:[#allocation4_spill] sm:$0xff] %v3128_v30 }
  0x2c   : > { %v3073_v59 = vor.u32 %v2698_v41, %v2524_v40  ;;  %v2508_v63 = vld [vmem:[%s4483_s2 + $0x4c0] sm:$0xf]  ;;  %v2694_v0 = vld [vmem:[%s4483_s2 + $0x4cc] sm:$0xf0]  ;;  %1201 = vmatpush.bf16.msra.mxu2 %v3062_v52  ;;  %v1982_v31 = vld [vmem:[%s4483_s2 + $0xb0] sm:$0xf0] }
  0x2d   : > { %1214 = vmatpush.bf16.msra.mxu3 %v3071_v55  ;;  %v3110_v18 = vor.u32 %v2694_v0, %v2508_v63  ;;  %v2492_v22 = vld [vmem:[%s4483_s2 + $0x4a0] sm:$0xf]  ;;  %v2690_v24 = vld [vmem:[%s4483_s2 + $0x4ac] sm:$0xf0]  ;;  %v2592_v32 = vld [vmem:[%s4483_s2 + $0x1a4] sm:$0xf]  ;;  %v3155_v42 = vor.u32 %v2560_v26, %v1982_v31 }
  0x2e   : > { %1220 = vmatpush.bf16.msrb.mxu0 %v3073_v59  ;;  %v2110_v36 = vld [vmem:[%s4483_s2 + $0x1b0] sm:$0xf0]  ;;  %v2624_v37 = vld [vmem:[%s4483_s2 + $0x2a4] sm:$0xf]  ;;  %v3146_v40 = vor.u32 %v2690_v24, %v2492_v22  ;;  %v2476_v41 = vld [vmem:[%s4483_s2 + $0x480] sm:$0xf] }
  0x2f   : > { %1233 = vmatpush.bf16.msrb.mxu1 %v3075_v60  ;;  %v2238_v39 = vld [vmem:[%s4483_s2 + $0x2b0] sm:$0xf0]  ;;  %4597 = vst [vmem:[#allocation6_spill] sm:$0xff] %v3155_v42  ;;  %v3157_v47 = vor.u32 %v2592_v32, %v2110_v36  ;;  %v2686_v48 = vld [vmem:[%s4483_s2 + $0x48c] sm:$0xf0] }
  0x30   : > { %1246 = vmatpush.bf16.msrb.mxu2 %v3077_v61  ;;  %4596 = vst [vmem:[#allocation5_spill] sm:$0xff] %v3146_v40  ;;  %v1966_v53 = vld [vmem:[%s4483_s2 + $0x90] sm:$0xf0]  ;;  %v3169_v54 = vor.u32 %v2624_v37, %v2238_v39  ;;  %v2588_v63 = vld [vmem:[%s4483_s2 + $0x184] sm:$0xf]  ;;  %v3188_v10 = vor.u32 %v2686_v48, %v2476_v41 }
  0x31   : > { %1259 = vmatpush.bf16.msrb.mxu3 %v3089_v2  ;;  %4598 = vst [vmem:[#allocation7_spill] sm:$0xff] %v3157_v47  ;;  %v2094_v0 = vld [vmem:[%s4483_s2 + $0x190] sm:$0xf0]  ;;  %v2620_v1 = vld [vmem:[%s4483_s2 + $0x284] sm:$0xf]  ;;  %v3199_v15 = vor.u32 %v2556_v49, %v1966_v53  ;;  %v348_v49 = vld [vmem:[%s3226_s23 + $0x8] sm:$0xff] }
  0x32   : > { %1221 = vmatpush.bf16.msrb.mxu0 %v3110_v18  ;;  %4599 = vst [vmem:[#allocation8_spill] sm:$0xff] %v3169_v54  ;;  %v2222_v4 = vld [vmem:[%s4483_s2 + $0x290] sm:$0xf0]  ;;  %v2460_v11 = vld [vmem:[%s4483_s2 + $0x460] sm:$0xf]  ;;  %v3201_v22 = vor.u32 %v2588_v63, %v2094_v0  ;;  %v355_v63 = vunpack.c.l.b16 %v348_v49  ;;  %v356_v0 = vunpack.c.h.b16 %v348_v49 }
  0x33   : > { %1234 = vmatpush.bf16.msrb.mxu1 %v3114_v19  ;;  %4600 = vst [vmem:[#allocation9_spill] sm:$0xff] %v3188_v10  ;;  %v2682_v13 = vld [vmem:[%s4483_s2 + $0x46c] sm:$0xf0]  ;;  %v2552_v24 = vld [vmem:[%s4483_s2 + $0x64] sm:$0xf]  ;;  %v3210_v31 = vor.u32 %v2620_v1, %v2222_v4 }
  0x34   : > { %1247 = vmatpush.bf16.msrb.mxu2 %v3116_v20  ;;  %4601 = vst [vmem:[#allocation10_spill] sm:$0xff] %v3199_v15  ;;  %v1950_v26 = vld [vmem:[%s4483_s2 + $0x70] sm:$0xf0]  ;;  %v2584_v32 = vld [vmem:[%s4483_s2 + $0x164] sm:$0xf]  ;;  %v3228_v39 = vor.u32 %v2682_v13, %v2460_v11 }
  0x35   : > { %1260 = vmatpush.bf16.msrb.mxu3 %v3128_v30  ;;  %4602 = vst [vmem:[#allocation11_spill] sm:$0xff] %v3201_v22  ;;  %v2078_v36 = vld [vmem:[%s4483_s2 + $0x170] sm:$0xf0]  ;;  %v2616_v37 = vld [vmem:[%s4483_s2 + $0x264] sm:$0xf]  ;;  %v3238_v4 = vor.u32 %v2552_v24, %v1950_v26 }
  0x36   : > { %1222 = vmatpush.bf16.msrb.mxu0 %v3146_v40  ;;  %4603 = vst [vmem:[#allocation12_spill] sm:$0xff] %v3210_v31  ;;  %v2206_v41 = vld [vmem:[%s4483_s2 + $0x270] sm:$0xf0]  ;;  %v347_v48 = vld [vmem:[%s3226_s23] sm:$0xff]  ;;  %v3240_v11 = vor.u32 %v2584_v32, %v2078_v36  ;;  %v349_v30 = vld [vmem:[%s3226_s23 + $0x10] sm:$0xf] }
  0x37   : > { %1235 = vmatpush.bf16.msrb.mxu1 %v3155_v42  ;;  %4604 = vst [vmem:[#allocation13_spill] sm:$0xff] %v3228_v39  ;;  %v353_v53 = vunpack.c.l.b16 %v347_v48  ;;  %v354_v1 = vunpack.c.h.b16 %v347_v48  ;;  %v2444_v13 = vld [vmem:[%s4483_s2 + $0x440] sm:$0xf]  ;;  %v2548_v48 = vld [vmem:[%s4483_s2 + $0x44] sm:$0xf]  ;;  %v3252_v49 = vor.u32 %v2616_v37, %v2206_v41 }
  0x38   : > { %1248 = vmatpush.bf16.msrb.mxu2 %v3157_v47  ;;  %4605 = vst [vmem:[#allocation14_spill] sm:$0xff] %v3238_v4  ;;  %v1934_v24 = vld [vmem:[%s4483_s2 + $0x50] sm:$0xf0]  ;;  %v2580_v26 = vld [vmem:[%s4483_s2 + $0x144] sm:$0xf] }
  0x39   : > { %1261 = vmatpush.bf16.msrb.mxu3 %v3169_v54  ;;  %4606 = vst [vmem:[#allocation15_spill] sm:$0xff] %v3240_v11  ;;  %v2062_v32 = vld [vmem:[%s4483_s2 + $0x150] sm:$0xf0]  ;;  %v3263_v36 = vpack.c.b16 %v353_v53, %v353_v53  ;;  %v2612_v37 = vld [vmem:[%s4483_s2 + $0x244] sm:$0xf]  ;;  %v3283_v53 = vor.u32 %v2548_v48, %v1934_v24 }
  0x3a   : > { %1223 = vmatpush.bf16.msrb.mxu0 %v3188_v10  ;;  %v2678_v10 = vld [vmem:[%s4483_s2 + $0x44c] sm:$0xf0]  ;;  %4607 = vst [vmem:[#allocation16_spill] sm:$0xff] %v3252_v49  ;;  %v2190_v41 = vld [vmem:[%s4483_s2 + $0x250] sm:$0xf0] }
  0x3b   : > { %1236 = vmatpush.bf16.msrb.mxu1 %v3199_v15  ;;  %v3275_v15 = vpack.c.b16 %v354_v1, %v354_v1  ;;  %v3278_v54 = vor.u32 %v2678_v10, %v2444_v13  ;;  %4609 = vst [vmem:[#allocation18_spill] sm:$0xff] %v3283_v53  ;;  %v2674_v1 = vld [vmem:[%s4483_s2 + $0x42c] sm:$0xf0]  ;;  %v2544_v10 = vld [vmem:[%s4483_s2 + $0x24] sm:$0xf]  ;;  %v3297_v13 = vor.u32 %v2612_v37, %v2190_v41 }
  0x3c   : > { %1249 = vmatpush.bf16.msrb.mxu2 %v3201_v22  ;;  %v3265_v22 = vpack.c.b16 %v355_v63, %v355_v63  ;;  %v3285_v63 = vor.u32 %v2580_v26, %v2062_v32  ;;  %1176 = vmatmul.bf16.vlgmr.msra.gmra.mxu0 %v3263_v36  ;;  %v1918_v48 = vld [vmem:[%s4483_s2 + $0x30] sm:$0xf0]  ;;  %v2576_v24 = vld [vmem:[%s4483_s2 + $0x124] sm:$0xf]  ;;  %v2020_v47 = vld [vmem:[%s4483_s2 + $0xe8] sm:$0xf] }
  0x3d   : > { %1262 = vmatpush.bf16.msrb.mxu3 %v3210_v31  ;;  %v3273_v31 = vpack.c.b16 %v356_v0, %v356_v0  ;;  %4608 = vst [vmem:[#allocation17_spill] sm:$0xff] %v3278_v54  ;;  %v2428_v0 = vld [vmem:[%s4483_s2 + $0x420] sm:$0xf]  ;;  %v2046_v26 = vld [vmem:[%s4483_s2 + $0x130] sm:$0xf0]  ;;  %1189 = vmatmul.bf16.vlgmr.msra.gmra.mxu1 %v3275_v15 }
  0x3e   : > { %1224 = vmatpush.bf16.msrb.mxu0 %v3228_v39  ;;  %1202 = vmatmul.bf16.vlgmr.msra.gmra.mxu2 %v3265_v22  ;;  %4610 = vst [vmem:[#allocation19_spill] sm:$0xff] %v3285_v63  ;;  %v2608_v32 = vld [vmem:[%s4483_s2 + $0x224] sm:$0xf]  ;;  %v2174_v37 = vld [vmem:[%s4483_s2 + $0x230] sm:$0xf0]  ;;  %v3318_v41 = vor.u32 %v2674_v1, %v2428_v0  ;;  %v3330_v39 = vor.u32 %v2576_v24, %v2046_v26 }
  0x3f   : > { %1237 = vmatpush.bf16.msrb.mxu1 %v3238_v4  ;;  %4611 = vst [vmem:[#allocation20_spill] sm:$0xff] %v3297_v13  ;;  %1215 = vmatmul.bf16.vlgmr.msra.gmra.mxu3 %v3273_v31  ;;  %v3328_v4 = vor.u32 %v2544_v10, %v1918_v48  ;;  %v2540_v0 = vld [vmem:[%s4483_s2 + $0x4] sm:$0xf]  ;;  %v1902_v1 = vld [vmem:[%s4483_s2 + $0x10] sm:$0xf0] }
  0x40   : > { %1250 = vmatpush.bf16.msrb.mxu2 %v3240_v11  ;;  %4612 = vst [vmem:[#allocation21_spill] sm:$0xff] %v3318_v41  ;;  %v2670_v11 = vld [vmem:[%s4483_s2 + $0x40c] sm:$0xf0]  ;;  %v2030_v10 = vld [vmem:[%s4483_s2 + $0x110] sm:$0xf0]  ;;  %v3376_v40 = vor.u32 %v2540_v0, %v1902_v1 }
  0x41   : > { %1263 = vmatpush.bf16.msrb.mxu3 %v3252_v49  ;;  %v2412_v49 = vld [vmem:[%s4483_s2 + $0x400] sm:$0xf]  ;;  %4613 = vst [vmem:[#allocation22_spill] sm:$0xff] %v3328_v4  ;;  %v2604_v48 = vld [vmem:[%s4483_s2 + $0x204] sm:$0xf] }
  0x42   : > { %1225 = vmatpush.bf16.msrb.mxu0 %v3278_v54  ;;  %4614 = vst [vmem:[#allocation23_spill] sm:$0xff] %v3330_v39  ;;  %v2572_v54 = vld [vmem:[%s4483_s2 + $0x104] sm:$0xf]  ;;  %v2158_v24 = vld [vmem:[%s4483_s2 + $0x210] sm:$0xf0] }
  0x43   : > { %1238 = vmatpush.bf16.msrb.mxu1 %v3283_v53  ;;  %v3342_v53 = vor.u32 %v2608_v32, %v2174_v37  ;;  %v2664_v26 = vld [vmem:[%s4483_s2 + $0x3e4] sm:$0xf]  ;;  %v2398_v32 = vld [vmem:[%s4483_s2 + $0x3f0] sm:$0xf0]  ;;  %v2571_v42 = vld [vmem:[%s4483_s2 + $0xf4] sm:$0xf0]  ;;  %v3388_v20 = vor.u32 %v2604_v48, %v2158_v24  ;;  %v357_v24 = vunpack.c.l.b16 %v349_v30 }
  0x44   : > { %1251 = vmatpush.bf16.msrb.mxu2 %v3285_v63  ;;  %v2696_v37 = vld [vmem:[%s4483_s2 + $0x4e4] sm:$0xf]  ;;  %v2526_v63 = vld [vmem:[%s4483_s2 + $0x4f0] sm:$0xf0]  ;;  %4617 = vst [vmem:[#allocation26_spill] sm:$0xff] %v3376_v40  ;;  %v3394_v0 = vor.u32 %v2571_v42, %v2020_v47 }
  0x45   : > { %1264 = vmatpush.bf16.msrb.mxu3 %v3297_v13  ;;  %4615 = vst [vmem:[#allocation24_spill] sm:$0xff] %v3342_v53  ;;  %v3363_v13 = vor.u32 %v2670_v11, %v2412_v49  ;;  %v3378_v11 = vor.u32 %v2572_v54, %v2030_v10  ;;  %v2148_v49 = vld [vmem:[%s4483_s2 + $0x1e8] sm:$0xf]  ;;  %v2660_v54 = vld [vmem:[%s4483_s2 + $0x3c4] sm:$0xf] }
  0x46   : > { %1226 = vmatpush.bf16.msrb.mxu0 %v3318_v41  ;;  %v2603_v41 = vld [vmem:[%s4483_s2 + $0x1f4] sm:$0xf0]  ;;  %4619 = vst [vmem:[#allocation28_spill] sm:$0xff] %v3388_v20  ;;  %v2382_v1 = vld [vmem:[%s4483_s2 + $0x3d0] sm:$0xf0] }
  0x47   : > { %4616 = vst [vmem:[#allocation25_spill] sm:$0xff] %v3363_v13  ;;  %1239 = vmatpush.bf16.msrb.mxu1 %v3328_v4  ;;  %v3390_v4 = vor.u32 %v2664_v26, %v2398_v32  ;;  %v2692_v10 = vld [vmem:[%s4483_s2 + $0x4c4] sm:$0xf]  ;;  %v3406_v48 = vor.u32 %v2603_v41, %v2148_v49  ;;  %v2510_v42 = vld [vmem:[%s4483_s2 + $0x4d0] sm:$0xf0]  ;;  %v3427_v32 = vor.u32 %v2660_v54, %v2382_v1 }
  0x48   : > { %1252 = vmatpush.bf16.msrb.mxu2 %v3330_v39  ;;  %4618 = vst [vmem:[#allocation27_spill] sm:$0xff] %v3378_v11  ;;  %v3392_v39 = vor.u32 %v2696_v37, %v2526_v63  ;;  %v2004_v47 = vld [vmem:[%s4483_s2 + $0xc8] sm:$0xf]  ;;  %v2567_v63 = vld [vmem:[%s4483_s2 + $0xd4] sm:$0xf0]  ;;  %v3431_v30 = vor.u32 %v2692_v10, %v2510_v42  ;;  %v3447_v10 = vpack.c.b16 %v357_v24, %v357_v24 }
  0x49   : > { %1265 = vmatpush.bf16.msrb.mxu3 %v3342_v53  ;;  %4620 = vst [vmem:[#allocation29_spill] sm:$0xff] %v3390_v4  ;;  %v2132_v41 = vld [vmem:[%s4483_s2 + $0x1c8] sm:$0xf]  ;;  %v2599_v26 = vld [vmem:[%s4483_s2 + $0x1d4] sm:$0xf0]  ;;  %v3433_v37 = vor.u32 %v2567_v63, %v2004_v47 }
  0x4a   : > { %4621 = vst [vmem:[#allocation30_spill] sm:$0xff] %v3392_v39  ;;  %1227 = vmatpush.bf16.msrb.mxu0 %v3363_v13  ;;  %v2656_v49 = vld [vmem:[%s4483_s2 + $0x3a4] sm:$0xf]  ;;  %v3445_v1 = vor.u32 %v2599_v26, %v2132_v41  ;;  %v2494_v42 = vld [vmem:[%s4483_s2 + $0x4b0] sm:$0xf0] }
  0x4b   : > { %4622 = vst [vmem:[#allocation31_spill] sm:$0xff] %v3394_v0  ;;  %1240 = vmatpush.bf16.msrb.mxu1 %v3376_v40  ;;  %v2688_v54 = vld [vmem:[%s4483_s2 + $0x4a4] sm:$0xf]  ;;  %v1988_v47 = vld [vmem:[%s4483_s2 + $0xa8] sm:$0xf] }
  0x4c   : > { %4623 = vst [vmem:[#allocation32_spill] sm:$0xff] %v3406_v48  ;;  %1253 = vmatpush.bf16.msrb.mxu2 %v3378_v11  ;;  %v2563_v63 = vld [vmem:[%s4483_s2 + $0xb4] sm:$0xf0]  ;;  %v2116_v41 = vld [vmem:[%s4483_s2 + $0x1a8] sm:$0xf] }
  0x4d   : > { %1266 = vmatpush.bf16.msrb.mxu3 %v3388_v20  ;;  %4624 = vst [vmem:[#allocation33_spill] sm:$0xff] %v3427_v32  ;;  %v2366_v20 = vld [vmem:[%s4483_s2 + $0x3b0] sm:$0xf0]  ;;  %v2595_v24 = vld [vmem:[%s4483_s2 + $0x1b4] sm:$0xf0]  ;;  %1228 = vmatmul.bf16.vlgmr.msrb.gmra.mxu0 %v3447_v10 }
  0x4e   : > { %1272 = vmatpush.bf16.msra.mxu0 %v3390_v4  ;;  %4625 = vst [vmem:[#allocation34_spill] sm:$0xff] %v3431_v30  ;;  %v3466_v26 = vor.u32 %v2656_v49, %v2366_v20  ;;  %v2350_v4 = vld [vmem:[%s4483_s2 + $0x390] sm:$0xf0]  ;;  %v2684_v20 = vld [vmem:[%s4483_s2 + $0x484] sm:$0xf]  ;;  %v3485_v49 = vor.u32 %v2595_v24, %v2116_v41  ;;  %1241 = vmatmul.bf16.vlgmr.msrb.gmra.mxu1 %v3263_v36 }
  0x4f   : > { %1285 = vmatpush.bf16.msra.mxu1 %v3392_v39  ;;  %4626 = vst [vmem:[#allocation35_spill] sm:$0xff] %v3433_v37  ;;  %1254 = vmatmul.bf16.vlgmr.msrb.gmra.mxu2 %v3275_v15  ;;  %v2652_v39 = vld [vmem:[%s4483_s2 + $0x384] sm:$0xf]  ;;  %v2591_v41 = vld [vmem:[%s4483_s2 + $0x194] sm:$0xf0] }
  0x50   : > { %1298 = vmatpush.bf16.msra.mxu2 %v3394_v0  ;;  %4627 = vst [vmem:[#allocation36_spill] sm:$0xff] %v3445_v1  ;;  %v3472_v0 = vor.u32 %v2563_v63, %v1988_v47  ;;  %v2559_v47 = vld [vmem:[%s4483_s2 + $0x94] sm:$0xf0]  ;;  %v2100_v63 = vld [vmem:[%s4483_s2 + $0x188] sm:$0xf]  ;;  %1267 = vmatmul.bf16.vlgmr.msrb.gmra.mxu3 %v3265_v22  ;;  %v3505_v24 = vor.u32 %v2652_v39, %v2350_v4 }
  0x51   : > { %1311 = vmatpush.bf16.msra.mxu3 %v3406_v48  ;;  %4628 = vst [vmem:[#allocation37_spill] sm:$0xff] %v3466_v26  ;;  %v3470_v48 = vor.u32 %v2688_v54, %v2494_v42  ;;  %v2478_v54 = vld [vmem:[%s4483_s2 + $0x490] sm:$0xf0]  ;;  %v1972_v42 = vld [vmem:[%s4483_s2 + $0x88] sm:$0xf]  ;;  %v3523_v4 = vor.u32 %v2591_v41, %v2100_v63 }
  0x52   : > { %1273 = vmatpush.bf16.msra.mxu0 %v3427_v32  ;;  %4630 = vst [vmem:[#allocation39_spill] sm:$0xff] %v3472_v0  ;;  %v2334_v32 = vld [vmem:[%s4483_s2 + $0x370] sm:$0xf0]  ;;  %v2680_v39 = vld [vmem:[%s4483_s2 + $0x464] sm:$0xf] }
  0x53   : > { %1286 = vmatpush.bf16.msra.mxu1 %v3431_v30  ;;  %4629 = vst [vmem:[#allocation38_spill] sm:$0xff] %v3470_v48  ;;  %v2648_v30 = vld [vmem:[%s4483_s2 + $0x364] sm:$0xf]  ;;  %v2587_v63 = vld [vmem:[%s4483_s2 + $0x174] sm:$0xf0] }
  0x54   : > { %1299 = vmatpush.bf16.msra.mxu2 %v3433_v37  ;;  %4631 = vst [vmem:[#allocation40_spill] sm:$0xff] %v3485_v49  ;;  %v3511_v37 = vor.u32 %v2559_v47, %v1972_v42  ;;  %v2555_v42 = vld [vmem:[%s4483_s2 + $0x74] sm:$0xf0]  ;;  %v2084_v47 = vld [vmem:[%s4483_s2 + $0x168] sm:$0xf]  ;;  %v3541_v41 = vor.u32 %v2648_v30, %v2334_v32 }
  0x55   : > { %1312 = vmatpush.bf16.msra.mxu3 %v3445_v1  ;;  %4632 = vst [vmem:[#allocation41_spill] sm:$0xff] %v3505_v24  ;;  %v3509_v1 = vor.u32 %v2684_v20, %v2478_v54  ;;  %v2462_v20 = vld [vmem:[%s4483_s2 + $0x470] sm:$0xf0]  ;;  %v1956_v54 = vld [vmem:[%s4483_s2 + $0x68] sm:$0xf]  ;;  %v3559_v30 = vor.u32 %v2587_v63, %v2084_v47 }
  0x56   : > { %1274 = vmatpush.bf16.msra.mxu0 %v3466_v26  ;;  %4634 = vst [vmem:[#allocation43_spill] sm:$0xff] %v3511_v37  ;;  %v2318_v26 = vld [vmem:[%s4483_s2 + $0x350] sm:$0xf0]  ;;  %v2676_v32 = vld [vmem:[%s4483_s2 + $0x444] sm:$0xf] }
  0x57   : > { %1287 = vmatpush.bf16.msra.mxu1 %v3470_v48  ;;  %4633 = vst [vmem:[#allocation42_spill] sm:$0xff] %v3509_v1  ;;  %v2644_v48 = vld [vmem:[%s4483_s2 + $0x344] sm:$0xf]  ;;  %v2583_v47 = vld [vmem:[%s4483_s2 + $0x154] sm:$0xf0] }
  0x58   : > { %1300 = vmatpush.bf16.msra.mxu2 %v3472_v0  ;;  %4635 = vst [vmem:[#allocation44_spill] sm:$0xff] %v3523_v4  ;;  %v3547_v0 = vor.u32 %v2555_v42, %v1956_v54  ;;  %v2551_v54 = vld [vmem:[%s4483_s2 + $0x54] sm:$0xf0]  ;;  %v2068_v42 = vld [vmem:[%s4483_s2 + $0x148] sm:$0xf]  ;;  %v3577_v63 = vor.u32 %v2644_v48, %v2318_v26 }
  0x59   : > { %1313 = vmatpush.bf16.msra.mxu3 %v3485_v49  ;;  %4636 = vst [vmem:[#allocation45_spill] sm:$0xff] %v3541_v41  ;;  %v3545_v49 = vor.u32 %v2680_v39, %v2462_v20  ;;  %v2446_v39 = vld [vmem:[%s4483_s2 + $0x450] sm:$0xf0]  ;;  %v1940_v20 = vld [vmem:[%s4483_s2 + $0x48] sm:$0xf]  ;;  %v3595_v26 = vor.u32 %v2583_v47, %v2068_v42 }
  0x5a   : > { %1275 = vmatpush.bf16.msra.mxu0 %v3505_v24  ;;  %4638 = vst [vmem:[#allocation47_spill] sm:$0xff] %v3547_v0  ;;  %v2302_v24 = vld [vmem:[%s4483_s2 + $0x330] sm:$0xf0]  ;;  %v2672_v48 = vld [vmem:[%s4483_s2 + $0x424] sm:$0xf] }
  0x5b   : > { %1288 = vmatpush.bf16.msra.mxu1 %v3509_v1  ;;  %4637 = vst [vmem:[#allocation46_spill] sm:$0xff] %v3545_v49  ;;  %v2640_v1 = vld [vmem:[%s4483_s2 + $0x324] sm:$0xf]  ;;  %v2579_v42 = vld [vmem:[%s4483_s2 + $0x134] sm:$0xf0] }
  0x5c   : > { %1301 = vmatpush.bf16.msra.mxu2 %v3511_v37  ;;  %4639 = vst [vmem:[#allocation48_spill] sm:$0xff] %v3559_v30  ;;  %v3583_v37 = vor.u32 %v2551_v54, %v1940_v20  ;;  %v2547_v20 = vld [vmem:[%s4483_s2 + $0x34] sm:$0xf0]  ;;  %v2052_v54 = vld [vmem:[%s4483_s2 + $0x128] sm:$0xf]  ;;  %v3613_v47 = vor.u32 %v2640_v1, %v2302_v24 }
  0x5d   : > { %1314 = vmatpush.bf16.msra.mxu3 %v3523_v4  ;;  %4640 = vst [vmem:[#allocation49_spill] sm:$0xff] %v3577_v63  ;;  %v3581_v4 = vor.u32 %v2676_v32, %v2446_v39  ;;  %v2430_v32 = vld [vmem:[%s4483_s2 + $0x430] sm:$0xf0]  ;;  %v1924_v39 = vld [vmem:[%s4483_s2 + $0x28] sm:$0xf] }
  0x5e   : > { %1276 = vmatpush.bf16.msra.mxu0 %v3541_v41  ;;  %4642 = vst [vmem:[#allocation51_spill] sm:$0xff] %v3583_v37  ;;  %v3625_v41 = vor.u32 %v2547_v20, %v1924_v39  ;;  %v2668_v1 = vld [vmem:[%s4483_s2 + $0x404] sm:$0xf]  ;;  %v2414_v24 = vld [vmem:[%s4483_s2 + $0x410] sm:$0xf0] }
  0x5f   : > { %1289 = vmatpush.bf16.msra.mxu1 %v3545_v49  ;;  %4641 = vst [vmem:[#allocation50_spill] sm:$0xff] %v3581_v4  ;;  %v3623_v49 = vor.u32 %v2672_v48, %v2430_v32  ;;  %v2543_v48 = vld [vmem:[%s4483_s2 + $0x14] sm:$0xf0]  ;;  %v2036_v32 = vld [vmem:[%s4483_s2 + $0x108] sm:$0xf]  ;;  %v3671_v13 = vor.u32 %v2668_v1, %v2414_v24 }
  0x60   : > { %1302 = vmatpush.bf16.msra.mxu2 %v3547_v0  ;;  %4643 = vst [vmem:[#allocation52_spill] sm:$0xff] %v3595_v26  ;;  %v2286_v0 = vld [vmem:[%s4483_s2 + $0x310] sm:$0xf0]  ;;  %v2575_v39 = vld [vmem:[%s4483_s2 + $0x114] sm:$0xf0] }
  0x61   : > { %1315 = vmatpush.bf16.msra.mxu3 %v3559_v30  ;;  %4644 = vst [vmem:[#allocation53_spill] sm:$0xff] %v3613_v47  ;;  %v2636_v30 = vld [vmem:[%s4483_s2 + $0x304] sm:$0xf]  ;;  %v2276_v20 = vld [vmem:[%s4483_s2 + $0x2e8] sm:$0xf]  ;;  %v3682_v53 = vor.u32 %v2575_v39, %v2036_v32 }
  0x62   : > { %1277 = vmatpush.bf16.msra.mxu0 %v3577_v63  ;;  %4645 = vst [vmem:[#allocation54_spill] sm:$0xff] %v3623_v49  ;;  %v1908_v63 = vld [vmem:[%s4483_s2 + $0x8] sm:$0xf]  ;;  %v2699_v40 = vld [vmem:[%s4483_s2 + $0x4f4] sm:$0xf0] }
  0x63   : > { %1290 = vmatpush.bf16.msra.mxu1 %v3581_v4  ;;  %4646 = vst [vmem:[#allocation55_spill] sm:$0xff] %v3625_v41  ;;  %v3637_v4 = vor.u32 %v2579_v42, %v2052_v54  ;;  %v2635_v54 = vld [vmem:[%s4483_s2 + $0x2f4] sm:$0xf0]  ;;  %v2404_v42 = vld [vmem:[%s4483_s2 + $0x3e8] sm:$0xf] }
  0x64   : > { %1303 = vmatpush.bf16.msra.mxu2 %v3583_v37  ;;  %v2667_v37 = vld [vmem:[%s4483_s2 + $0x3f4] sm:$0xf0]  ;;  %v2532_v11 = vld [vmem:[%s4483_s2 + $0x4e8] sm:$0xf]  ;;  %4649 = vst [vmem:[#allocation58_spill] sm:$0xff] %v3671_v13  ;;  %v3684_v19 = vor.u32 %v2635_v54, %v2276_v20 }
  0x65   : > { %1316 = vmatpush.bf16.msra.mxu3 %v3595_v26  ;;  %4647 = vst [vmem:[#allocation56_spill] sm:$0xff] %v3637_v4  ;;  %v3658_v26 = vor.u32 %v2636_v30, %v2286_v0  ;;  %v3673_v0 = vor.u32 %v2543_v48, %v1908_v63  ;;  %v2569_v30 = vld [vmem:[%s4483_s2 + $0xec] sm:$0xf]  ;;  %v3688_v1 = vor.u32 %v2699_v40, %v2532_v11  ;;  %v2260_v63 = vld [vmem:[%s4483_s2 + $0x2c8] sm:$0xf] }
  0x66   : > { %1278 = vmatpush.bf16.msra.mxu0 %v3613_v47  ;;  %v2022_v47 = vld [vmem:[%s4483_s2 + $0xf8] sm:$0xf0]  ;;  %4651 = vst [vmem:[#allocation60_spill] sm:$0xff] %v3682_v53  ;;  %v2631_v24 = vld [vmem:[%s4483_s2 + $0x2d4] sm:$0xf0] }
  0x67   : > { %4648 = vst [vmem:[#allocation57_spill] sm:$0xff] %v3658_v26  ;;  %1291 = vmatpush.bf16.msra.mxu1 %v3623_v49  ;;  %v3686_v49 = vor.u32 %v2667_v37, %v2404_v42  ;;  %v2388_v48 = vld [vmem:[%s4483_s2 + $0x3c8] sm:$0xf]  ;;  %v3700_v32 = vor.u32 %v2569_v30, %v2022_v47  ;;  %v2663_v40 = vld [vmem:[%s4483_s2 + $0x3d4] sm:$0xf0]  ;;  %v3721_v20 = vor.u32 %v2631_v24, %v2260_v63 }
  0x68   : > { %1304 = vmatpush.bf16.msra.mxu2 %v3625_v41  ;;  %4650 = vst [vmem:[#allocation59_spill] sm:$0xff] %v3673_v0  ;;  %v2516_v11 = vld [vmem:[%s4483_s2 + $0x4c8] sm:$0xf]  ;;  %v2695_v37 = vld [vmem:[%s4483_s2 + $0x4d4] sm:$0xf0]  ;;  %v3725_v54 = vor.u32 %v2663_v40, %v2388_v48 }
  0x69   : > { %1317 = vmatpush.bf16.msra.mxu3 %v3637_v4  ;;  %4652 = vst [vmem:[#allocation61_spill] sm:$0xff] %v3684_v19  ;;  %v2565_v47 = vld [vmem:[%s4483_s2 + $0xcc] sm:$0xf]  ;;  %v2006_v39 = vld [vmem:[%s4483_s2 + $0xd8] sm:$0xf0]  ;;  %v3727_v42 = vor.u32 %v2695_v37, %v2516_v11 }
  0x6a   : > { %4653 = vst [vmem:[#allocation62_spill] sm:$0xff] %v3686_v49  ;;  %1279 = vmatpush.bf16.msra.mxu0 %v3658_v26  ;;  %v2244_v30 = vld [vmem:[%s4483_s2 + $0x2a8] sm:$0xf]  ;;  %v3739_v24 = vor.u32 %v2565_v47, %v2006_v39  ;;  %v2659_v48 = vld [vmem:[%s4483_s2 + $0x3b4] sm:$0xf0] }
  0x6b   : > { %4654 = vst [vmem:[#allocation63_spill] sm:$0xff] %v3688_v1  ;;  %1292 = vmatpush.bf16.msra.mxu1 %v3671_v13  ;;  %v2372_v63 = vld [vmem:[%s4483_s2 + $0x3a8] sm:$0xf]  ;;  %v2691_v11 = vld [vmem:[%s4483_s2 + $0x4b4] sm:$0xf0] }
  0x6c   : > { %4655 = vst [vmem:[#allocation64_spill] sm:$0xff] %v3700_v32  ;;  %1305 = vmatpush.bf16.msra.mxu2 %v3673_v0  ;;  %v2500_v40 = vld [vmem:[%s4483_s2 + $0x4a8] sm:$0xf]  ;;  %v2561_v37 = vld [vmem:[%s4483_s2 + $0xac] sm:$0xf] }
  0x6d   : > { %1318 = vmatpush.bf16.msra.mxu3 %v3682_v53  ;;  %4656 = vst [vmem:[#allocation65_spill] sm:$0xff] %v3721_v20  ;;  %v2627_v53 = vld [vmem:[%s4483_s2 + $0x2b4] sm:$0xf0]  ;;  %1280 = vmatmul.bf16.vlgmr.msra.gmra.mxu0 %v3273_v31  ;;  %v1990_v47 = vld [vmem:[%s4483_s2 + $0xb8] sm:$0xf0] }
  0x6e   : > { %1324 = vmatpush.bf16.msrb.mxu0 %v3684_v19  ;;  %4657 = vst [vmem:[#allocation66_spill] sm:$0xff] %v3725_v54  ;;  %1293 = vmatmul.bf16.vlgmr.msra.gmra.mxu1 %v3447_v10  ;;  %v3760_v39 = vor.u32 %v2627_v53, %v2244_v30  ;;  %v2356_v53 = vld [vmem:[%s4483_s2 + $0x388] sm:$0xf]  ;;  %v3779_v30 = vor.u32 %v2561_v37, %v1990_v47  ;;  %v1974_v37 = vld [vmem:[%s4483_s2 + $0x98] sm:$0xf0] }
  0x6f   : > { %1337 = vmatpush.bf16.msrb.mxu1 %v3686_v49  ;;  %4658 = vst [vmem:[#allocation67_spill] sm:$0xff] %v3727_v42  ;;  %1306 = vmatmul.bf16.vlgmr.msra.gmra.mxu2 %v3263_v36  ;;  %v2228_v49 = vld [vmem:[%s4483_s2 + $0x288] sm:$0xf]  ;;  %v2619_v19 = vld [vmem:[%s4483_s2 + $0x274] sm:$0xf0] }
  0x70   : > { %1350 = vmatpush.bf16.msrb.mxu2 %v3688_v1  ;;  %4659 = vst [vmem:[#allocation68_spill] sm:$0xff] %v3739_v24  ;;  %1319 = vmatmul.bf16.vlgmr.msra.gmra.mxu3 %v3275_v15  ;;  %v3767_v1 = vor.u32 %v2691_v11, %v2500_v40  ;;  %v2687_v40 = vld [vmem:[%s4483_s2 + $0x494] sm:$0xf0]  ;;  %v2557_v11 = vld [vmem:[%s4483_s2 + $0x8c] sm:$0xf] }
  0x71   : > { %1363 = vmatpush.bf16.msrb.mxu3 %v3700_v32  ;;  %4660 = vst [vmem:[#allocation69_spill] sm:$0xff] %v3760_v39  ;;  %v3765_v32 = vor.u32 %v2659_v48, %v2372_v63  ;;  %v2655_v63 = vld [vmem:[%s4483_s2 + $0x394] sm:$0xf0]  ;;  %v2484_v48 = vld [vmem:[%s4483_s2 + $0x488] sm:$0xf] }
  0x72   : > { %1325 = vmatpush.bf16.msrb.mxu0 %v3721_v20  ;;  %4662 = vst [vmem:[#allocation71_spill] sm:$0xff] %v3767_v1  ;;  %v2623_v20 = vld [vmem:[%s4483_s2 + $0x294] sm:$0xf0]  ;;  %v2665_v0 = vld [vmem:[%s4483_s2 + $0x3ec] sm:$0xf] }
  0x73   : > { %1338 = vmatpush.bf16.msrb.mxu1 %v3725_v54  ;;  %4661 = vst [vmem:[#allocation70_spill] sm:$0xff] %v3765_v32  ;;  %v3797_v47 = vor.u32 %v2623_v20, %v2228_v49  ;;  %v2212_v54 = vld [vmem:[%s4483_s2 + $0x268] sm:$0xf]  ;;  %v3815_v20 = vor.u32 %v2557_v11, %v1974_v37  ;;  %v1958_v11 = vld [vmem:[%s4483_s2 + $0x78] sm:$0xf0] }
  0x74   : > { %1351 = vmatpush.bf16.msrb.mxu2 %v3727_v42  ;;  %4663 = vst [vmem:[#allocation72_spill] sm:$0xff] %v3779_v30  ;;  %v3803_v42 = vor.u32 %v2687_v40, %v2484_v48  ;;  %v2340_v49 = vld [vmem:[%s4483_s2 + $0x368] sm:$0xf]  ;;  %v2683_v48 = vld [vmem:[%s4483_s2 + $0x474] sm:$0xf0]  ;;  %v3833_v37 = vor.u32 %v2619_v19, %v2212_v54 }
  0x75   : > { %1364 = vmatpush.bf16.msrb.mxu3 %v3739_v24  ;;  %4664 = vst [vmem:[#allocation73_spill] sm:$0xff] %v3797_v47  ;;  %v3801_v24 = vor.u32 %v2655_v63, %v2356_v53  ;;  %v2651_v53 = vld [vmem:[%s4483_s2 + $0x374] sm:$0xf0]  ;;  %v2468_v63 = vld [vmem:[%s4483_s2 + $0x468] sm:$0xf] }
  0x76   : > { %1326 = vmatpush.bf16.msrb.mxu0 %v3760_v39  ;;  %4666 = vst [vmem:[#allocation75_spill] sm:$0xff] %v3803_v42  ;;  %v2553_v40 = vld [vmem:[%s4483_s2 + $0x6c] sm:$0xf]  ;;  %v2615_v39 = vld [vmem:[%s4483_s2 + $0x254] sm:$0xf0] }
  0x77   : > { %1339 = vmatpush.bf16.msrb.mxu1 %v3765_v32  ;;  %4665 = vst [vmem:[#allocation74_spill] sm:$0xff] %v3801_v24  ;;  %v2196_v32 = vld [vmem:[%s4483_s2 + $0x248] sm:$0xf]  ;;  %v3851_v54 = vor.u32 %v2553_v40, %v1958_v11  ;;  %v1942_v40 = vld [vmem:[%s4483_s2 + $0x58] sm:$0xf0] }
  0x78   : > { %1352 = vmatpush.bf16.msrb.mxu2 %v3767_v1  ;;  %4667 = vst [vmem:[#allocation76_spill] sm:$0xff] %v3815_v20  ;;  %v3839_v1 = vor.u32 %v2683_v48, %v2468_v63  ;;  %v2324_v19 = vld [vmem:[%s4483_s2 + $0x348] sm:$0xf]  ;;  %v2679_v63 = vld [vmem:[%s4483_s2 + $0x454] sm:$0xf0]  ;;  %v3869_v11 = vor.u32 %v2615_v39, %v2196_v32 }
  0x79   : > { %1365 = vmatpush.bf16.msrb.mxu3 %v3779_v30  ;;  %4668 = vst [vmem:[#allocation77_spill] sm:$0xff] %v3833_v37  ;;  %v3837_v30 = vor.u32 %v2651_v53, %v2340_v49  ;;  %v2647_v49 = vld [vmem:[%s4483_s2 + $0x354] sm:$0xf0]  ;;  %v2452_v53 = vld [vmem:[%s4483_s2 + $0x448] sm:$0xf] }
  0x7a   : > { %1327 = vmatpush.bf16.msrb.mxu0 %v3797_v47  ;;  %4670 = vst [vmem:[#allocation79_spill] sm:$0xff] %v3839_v1  ;;  %v2549_v48 = vld [vmem:[%s4483_s2 + $0x4c] sm:$0xf]  ;;  %v2611_v47 = vld [vmem:[%s4483_s2 + $0x234] sm:$0xf0] }
  0x7b   : > { %1340 = vmatpush.bf16.msrb.mxu1 %v3801_v24  ;;  %4669 = vst [vmem:[#allocation78_spill] sm:$0xff] %v3837_v30  ;;  %v2180_v24 = vld [vmem:[%s4483_s2 + $0x228] sm:$0xf]  ;;  %v3887_v39 = vor.u32 %v2549_v48, %v1942_v40  ;;  %v1926_v48 = vld [vmem:[%s4483_s2 + $0x38] sm:$0xf0] }
  0x7c   : > { %1353 = vmatpush.bf16.msrb.mxu2 %v3803_v42  ;;  %4671 = vst [vmem:[#allocation80_spill] sm:$0xff] %v3851_v54  ;;  %v3875_v42 = vor.u32 %v2679_v63, %v2452_v53  ;;  %v2308_v32 = vld [vmem:[%s4483_s2 + $0x328] sm:$0xf]  ;;  %v2675_v53 = vld [vmem:[%s4483_s2 + $0x434] sm:$0xf0]  ;;  %v3905_v40 = vor.u32 %v2611_v47, %v2180_v24 }
  0x7d   : > { %1366 = vmatpush.bf16.msrb.mxu3 %v3815_v20  ;;  %4672 = vst [vmem:[#allocation81_spill] sm:$0xff] %v3869_v11  ;;  %v3873_v20 = vor.u32 %v2647_v49, %v2324_v19  ;;  %v2643_v19 = vld [vmem:[%s4483_s2 + $0x334] sm:$0xf0]  ;;  %v2436_v49 = vld [vmem:[%s4483_s2 + $0x428] sm:$0xf] }
  0x7e   : > { %1328 = vmatpush.bf16.msrb.mxu0 %v3833_v37  ;;  %4674 = vst [vmem:[#allocation83_spill] sm:$0xff] %v3875_v42  ;;  %v2545_v63 = vld [vmem:[%s4483_s2 + $0x2c] sm:$0xf]  ;;  %v3917_v37 = vor.u32 %v2675_v53, %v2436_v49  ;;  %v2292_v24 = vld [vmem:[%s4483_s2 + $0x308] sm:$0xf] }
  0x7f   : > { %1341 = vmatpush.bf16.msrb.mxu1 %v3837_v30  ;;  %4673 = vst [vmem:[#allocation82_spill] sm:$0xff] %v3873_v20  ;;  %v3915_v30 = vor.u32 %v2643_v19, %v2308_v32  ;;  %v2639_v47 = vld [vmem:[%s4483_s2 + $0x314] sm:$0xf0]  ;;  %v2541_v19 = vld [vmem:[%s4483_s2 + $0xc] sm:$0xf] }
  0x80   : > { %1354 = vmatpush.bf16.msrb.mxu2 %v3839_v1  ;;  %4675 = vst [vmem:[#allocation84_spill] sm:$0xff] %v3887_v39  ;;  %v2607_v1 = vld [vmem:[%s4483_s2 + $0x214] sm:$0xf0]  ;;  %v1910_v49 = vld [vmem:[%s4483_s2 + $0x18] sm:$0xf0]  ;;  %v3963_v26 = vor.u32 %v2639_v47, %v2292_v24 }
  0x81   : > { %1367 = vmatpush.bf16.msrb.mxu3 %v3851_v54  ;;  %4676 = vst [vmem:[#allocation85_spill] sm:$0xff] %v3905_v40  ;;  %v2164_v54 = vld [vmem:[%s4483_s2 + $0x208] sm:$0xf]  ;;  %v2671_v32 = vld [vmem:[%s4483_s2 + $0x414] sm:$0xf0]  ;;  %v3974_v4 = vor.u32 %v2541_v19, %v1910_v49 }
  0x82   : > { %1329 = vmatpush.bf16.msrb.mxu0 %v3869_v11  ;;  %4677 = vst [vmem:[#allocation86_spill] sm:$0xff] %v3915_v30  ;;  %v2420_v11 = vld [vmem:[%s4483_s2 + $0x408] sm:$0xf]  ;;  %v2601_v53 = vld [vmem:[%s4483_s2 + $0x1ec] sm:$0xf] }
  0x83   : > { %1342 = vmatpush.bf16.msrb.mxu1 %v3873_v20  ;;  %v3929_v20 = vor.u32 %v2545_v63, %v1926_v48  ;;  %v2150_v63 = vld [vmem:[%s4483_s2 + $0x1f8] sm:$0xf0]  ;;  %v2633_v48 = vld [vmem:[%s4483_s2 + $0x2ec] sm:$0xf]  ;;  %4678 = vst [vmem:[#allocation87_spill] sm:$0xff] %v3974_v4 }
  0x84   : > { %1355 = vmatpush.bf16.msrb.mxu2 %v3875_v42  ;;  %v2278_v42 = vld [vmem:[%s4483_s2 + $0x2f8] sm:$0xf0]  ;;  %v3976_v41 = vor.u32 %v2601_v53, %v2150_v63 }
  0x85   : > { %1368 = vmatpush.bf16.msrb.mxu3 %v3887_v39  ;;  %v3950_v39 = vor.u32 %v2607_v1, %v2164_v54  ;;  %v2406_v13 = vld [vmem:[%s4483_s2 + $0x3f8] sm:$0xf0]  ;;  %v3965_v1 = vor.u32 %v2671_v32, %v2420_v11  ;;  %v2697_v54 = vld [vmem:[%s4483_s2 + $0x4ec] sm:$0xf] }
  0x86   : > { %1330 = vmatpush.bf16.msrb.mxu0 %v3905_v40  ;;  %v2534_v40 = vld [vmem:[%s4483_s2 + $0x4f8] sm:$0xf0]  ;;  %v3980_v24 = vor.u32 %v2665_v0, %v2406_v13  ;;  %v2597_v11 = vld [vmem:[%s4483_s2 + $0x1cc] sm:$0xf] }
  0x87   : > { %1343 = vmatpush.bf16.msrb.mxu1 %v3915_v30  ;;  %v3978_v30 = vor.u32 %v2633_v48, %v2278_v42  ;;  %v2134_v47 = vld [vmem:[%s4483_s2 + $0x1d8] sm:$0xf0]  ;;  %v2629_v32 = vld [vmem:[%s4483_s2 + $0x2cc] sm:$0xf]  ;;  %v3992_v19 = vor.u32 %v2697_v54, %v2534_v40 }
  0x88   : > { %1356 = vmatpush.bf16.msrb.mxu2 %v3917_v37  ;;  %4680 = vst [vmem:[#allocation89_spill] sm:$0xff] %v3980_v24  ;;  %v2262_v13 = vld [vmem:[%s4483_s2 + $0x2d8] sm:$0xf0]  ;;  %v2661_v0 = vld [vmem:[%s4483_s2 + $0x3cc] sm:$0xf]  ;;  %v4013_v53 = vor.u32 %v2597_v11, %v2134_v47 }
  0x89   : > { %1369 = vmatpush.bf16.msrb.mxu3 %v3929_v20  ;;  %4679 = vst [vmem:[#allocation88_spill] sm:$0xff] %v3978_v30  ;;  %v2390_v42 = vld [vmem:[%s4483_s2 + $0x3d8] sm:$0xf0]  ;;  %v2693_v40 = vld [vmem:[%s4483_s2 + $0x4cc] sm:$0xf]  ;;  %v4017_v63 = vor.u32 %v2629_v32, %v2262_v13 }
  0x8a   : > { %1331 = vmatpush.bf16.msrb.mxu0 %v3950_v39  ;;  %4681 = vst [vmem:[#allocation90_spill] sm:$0xff] %v3992_v19  ;;  %v2518_v49 = vld [vmem:[%s4483_s2 + $0x4d8] sm:$0xf0]  ;;  %v4019_v48 = vor.u32 %v2661_v0, %v2390_v42  ;;  %v2593_v54 = vld [vmem:[%s4483_s2 + $0x1ac] sm:$0xf] }
  0x8b   : > { %1344 = vmatpush.bf16.msrb.mxu1 %v3963_v26  ;;  %4682 = vst [vmem:[#allocation91_spill] sm:$0xff] %v4013_v53  ;;  %v2625_v11 = vld [vmem:[%s4483_s2 + $0x2ac] sm:$0xf]  ;;  %v4032_v47 = vor.u32 %v2693_v40, %v2518_v49  ;;  %v2246_v32 = vld [vmem:[%s4483_s2 + $0x2b8] sm:$0xf0] }
  0x8c   : > { %1357 = vmatpush.bf16.msrb.mxu2 %v3965_v1  ;;  %4683 = vst [vmem:[#allocation92_spill] sm:$0xff] %v4017_v63  ;;  %v2657_v13 = vld [vmem:[%s4483_s2 + $0x3ac] sm:$0xf]  ;;  %v2374_v0 = vld [vmem:[%s4483_s2 + $0x3b8] sm:$0xf0] }
  0x8d   : > { %1370 = vmatpush.bf16.msrb.mxu3 %v3974_v4  ;;  %4684 = vst [vmem:[#allocation93_spill] sm:$0xff] %v4019_v48  ;;  %v2118_v4 = vld [vmem:[%s4483_s2 + $0x1b8] sm:$0xf0]  ;;  %1332 = vmatmul.bf16.vlgmr.msrb.gmra.mxu0 %v3265_v22  ;;  %v2689_v42 = vld [vmem:[%s4483_s2 + $0x4ac] sm:$0xf] }
  0x8e   : > { %1376 = vmatpush.bf16.msra.mxu0 %v3976_v41  ;;  %4685 = vst [vmem:[#allocation94_spill] sm:$0xff] %v4032_v47  ;;  %1345 = vmatmul.bf16.vlgmr.msrb.gmra.mxu1 %v3273_v31  ;;  %v2502_v40 = vld [vmem:[%s4483_s2 + $0x4b8] sm:$0xf0]  ;;  %v4052_v49 = vor.u32 %v2593_v54, %v2118_v4 }
  0x8f   : > { %1389 = vmatpush.bf16.msra.mxu1 %v3978_v30  ;;  %1358 = vmatmul.bf16.vlgmr.msrb.gmra.mxu2 %v3447_v10  ;;  %v2589_v30 = vld [vmem:[%s4483_s2 + $0x18c] sm:$0xf]  ;;  %v4071_v4 = vor.u32 %v2689_v42, %v2502_v40  ;;  %v2230_v54 = vld [vmem:[%s4483_s2 + $0x298] sm:$0xf0] }
  0x90   : > { %1402 = vmatpush.bf16.msra.mxu2 %v3980_v24  ;;  %4686 = vst [vmem:[#allocation95_spill] sm:$0xff] %v4052_v49  ;;  %1371 = vmatmul.bf16.vlgmr.msrb.gmra.mxu3 %v3263_v36  ;;  %v4059_v24 = vor.u32 %v2657_v13, %v2374_v0  ;;  %v2621_v36 = vld [vmem:[%s4483_s2 + $0x28c] sm:$0xf]  ;;  %v2486_v0 = vld [vmem:[%s4483_s2 + $0x498] sm:$0xf0] }
  0x91   : > { %1415 = vmatpush.bf16.msra.mxu3 %v3992_v19  ;;  %v4057_v19 = vor.u32 %v2625_v11, %v2246_v32  ;;  %4689 = vst [vmem:[#allocation98_spill] sm:$0xff] %v4071_v4  ;;  %v2653_v11 = vld [vmem:[%s4483_s2 + $0x38c] sm:$0xf]  ;;  %v2358_v32 = vld [vmem:[%s4483_s2 + $0x398] sm:$0xf0]  ;;  %v4093_v40 = vor.u32 %v2621_v36, %v2230_v54 }
  0x92   : > { %1377 = vmatpush.bf16.msra.mxu0 %v4013_v53  ;;  %4688 = vst [vmem:[#allocation97_spill] sm:$0xff] %v4059_v24  ;;  %v2102_v53 = vld [vmem:[%s4483_s2 + $0x198] sm:$0xf0]  ;;  %v2685_v13 = vld [vmem:[%s4483_s2 + $0x48c] sm:$0xf] }
  0x93   : > { %1390 = vmatpush.bf16.msra.mxu1 %v4017_v63  ;;  %4687 = vst [vmem:[#allocation96_spill] sm:$0xff] %v4057_v19  ;;  %v4089_v42 = vor.u32 %v2589_v30, %v2102_v53  ;;  %v2086_v63 = vld [vmem:[%s4483_s2 + $0x178] sm:$0xf0]  ;;  %v2617_v30 = vld [vmem:[%s4483_s2 + $0x26c] sm:$0xf]  ;;  %v4107_v53 = vor.u32 %v2685_v13, %v2486_v0 }
  0x94   : > { %1403 = vmatpush.bf16.msra.mxu2 %v4019_v48  ;;  %4691 = vst [vmem:[#allocation100_spill] sm:$0xff] %v4093_v40  ;;  %v2585_v48 = vld [vmem:[%s4483_s2 + $0x16c] sm:$0xf]  ;;  %v2214_v36 = vld [vmem:[%s4483_s2 + $0x278] sm:$0xf0] }
  0x95   : > { %1416 = vmatpush.bf16.msra.mxu3 %v4032_v47  ;;  %4690 = vst [vmem:[#allocation99_spill] sm:$0xff] %v4089_v42  ;;  %v4095_v47 = vor.u32 %v2653_v11, %v2358_v32  ;;  %v2649_v54 = vld [vmem:[%s4483_s2 + $0x36c] sm:$0xf]  ;;  %v2342_v11 = vld [vmem:[%s4483_s2 + $0x378] sm:$0xf0]  ;;  %v4125_v0 = vor.u32 %v2585_v48, %v2086_v63 }
  0x96   : > { %1378 = vmatpush.bf16.msra.mxu0 %v4052_v49  ;;  %4693 = vst [vmem:[#allocation102_spill] sm:$0xff] %v4107_v53  ;;  %v2681_v32 = vld [vmem:[%s4483_s2 + $0x46c] sm:$0xf]  ;;  %v2470_v13 = vld [vmem:[%s4483_s2 + $0x478] sm:$0xf0] }
  0x97   : > { %1391 = vmatpush.bf16.msra.mxu1 %v4057_v19  ;;  %4692 = vst [vmem:[#allocation101_spill] sm:$0xff] %v4095_v47  ;;  %v2581_v19 = vld [vmem:[%s4483_s2 + $0x14c] sm:$0xf]  ;;  %v2070_v49 = vld [vmem:[%s4483_s2 + $0x158] sm:$0xf0]  ;;  %v4143_v48 = vor.u32 %v2681_v32, %v2470_v13 }
  0x98   : > { %1404 = vmatpush.bf16.msra.mxu2 %v4059_v24  ;;  %4694 = vst [vmem:[#allocation103_spill] sm:$0xff] %v4125_v0  ;;  %v4131_v24 = vor.u32 %v2649_v54, %v2342_v11  ;;  %v2613_v63 = vld [vmem:[%s4483_s2 + $0x24c] sm:$0xf]  ;;  %v2326_v54 = vld [vmem:[%s4483_s2 + $0x358] sm:$0xf0]  ;;  %v4161_v13 = vor.u32 %v2581_v19, %v2070_v49 }
  0x99   : > { %1417 = vmatpush.bf16.msra.mxu3 %v4071_v4  ;;  %v4129_v4 = vor.u32 %v2617_v30, %v2214_v36  ;;  %4697 = vst [vmem:[#allocation106_spill] sm:$0xff] %v4143_v48  ;;  %v2198_v30 = vld [vmem:[%s4483_s2 + $0x258] sm:$0xf0]  ;;  %v2645_v36 = vld [vmem:[%s4483_s2 + $0x34c] sm:$0xf] }
  0x9a   : > { %1379 = vmatpush.bf16.msra.mxu0 %v4089_v42  ;;  %4696 = vst [vmem:[#allocation105_spill] sm:$0xff] %v4131_v24  ;;  %v2677_v11 = vld [vmem:[%s4483_s2 + $0x44c] sm:$0xf]  ;;  %v2454_v32 = vld [vmem:[%s4483_s2 + $0x458] sm:$0xf0] }
  0x9b   : > { %1392 = vmatpush.bf16.msra.mxu1 %v4093_v40  ;;  %4695 = vst [vmem:[#allocation104_spill] sm:$0xff] %v4129_v4  ;;  %v2577_v40 = vld [vmem:[%s4483_s2 + $0x12c] sm:$0xf]  ;;  %v2054_v42 = vld [vmem:[%s4483_s2 + $0x138] sm:$0xf0]  ;;  %v4179_v49 = vor.u32 %v2677_v11, %v2454_v32 }
  0x9c   : > { %1405 = vmatpush.bf16.msra.mxu2 %v4095_v47  ;;  %v4167_v47 = vor.u32 %v2645_v36, %v2326_v54  ;;  %v2609_v19 = vld [vmem:[%s4483_s2 + $0x22c] sm:$0xf]  ;;  %v2310_v36 = vld [vmem:[%s4483_s2 + $0x338] sm:$0xf0]  ;;  %v4197_v32 = vor.u32 %v2577_v40, %v2054_v42 }
  0x9d   : > { %1418 = vmatpush.bf16.msra.mxu3 %v4107_v53  ;;  %v4165_v53 = vor.u32 %v2613_v63, %v2198_v30  ;;  %4700 = vst [vmem:[#allocation109_spill] sm:$0xff] %v4179_v49  ;;  %v2182_v63 = vld [vmem:[%s4483_s2 + $0x238] sm:$0xf0]  ;;  %v2641_v30 = vld [vmem:[%s4483_s2 + $0x32c] sm:$0xf] }
  0x9e   : > { %1380 = vmatpush.bf16.msra.mxu0 %v4125_v0  ;;  %4699 = vst [vmem:[#allocation108_spill] sm:$0xff] %v4167_v47  ;;  %v2673_v54 = vld [vmem:[%s4483_s2 + $0x42c] sm:$0xf]  ;;  %v2438_v11 = vld [vmem:[%s4483_s2 + $0x438] sm:$0xf0] }
  0x9f   : > { %1393 = vmatpush.bf16.msra.mxu1 %v4129_v4  ;;  %4698 = vst [vmem:[#allocation107_spill] sm:$0xff] %v4165_v53  ;;  %v2573_v4 = vld [vmem:[%s4483_s2 + $0x10c] sm:$0xf]  ;;  %v2038_v0 = vld [vmem:[%s4483_s2 + $0x118] sm:$0xf0]  ;;  %v4215_v40 = vor.u32 %v2673_v54, %v2438_v11 }
  0xa0   : > { %1406 = vmatpush.bf16.msra.mxu2 %v4131_v24  ;;  %v4203_v24 = vor.u32 %v2641_v30, %v2310_v36  ;;  %v2605_v42 = vld [vmem:[%s4483_s2 + $0x20c] sm:$0xf]  ;;  %v2294_v30 = vld [vmem:[%s4483_s2 + $0x318] sm:$0xf0]  ;;  %v4233_v11 = vor.u32 %v2573_v4, %v2038_v0 }
  0xa1   : > { %1419 = vmatpush.bf16.msra.mxu3 %v4143_v48  ;;  %v4201_v48 = vor.u32 %v2609_v19, %v2182_v63  ;;  %v2166_v19 = vld [vmem:[%s4483_s2 + $0x218] sm:$0xf0]  ;;  %v2637_v63 = vld [vmem:[%s4483_s2 + $0x30c] sm:$0xf] }
  0xa2   : > { %1381 = vmatpush.bf16.msra.mxu0 %v4161_v13  ;;  %v2669_v36 = vld [vmem:[%s4483_s2 + $0x40c] sm:$0xf]  ;;  %v2422_v54 = vld [vmem:[%s4483_s2 + $0x418] sm:$0xf0] }
  0xa3   : > { %1394 = vmatpush.bf16.msra.mxu1 %v4165_v53  ;;  %v4242_v53 = vor.u32 %v2669_v36, %v2422_v54  ;;  %v4718_v36 = vld [vmem:[#allocation19_spill] sm:$0xff]  ;;  %v1430_v54 = vld [vmem:[%s4277_s30 + $0x10] sm:$0xf] }
  0xa4   : > { %1407 = vmatpush.bf16.msra.mxu2 %v4167_v47  ;;  %v4239_v47 = vor.u32 %v2637_v63, %v2294_v30  ;;  %v4717_v30 = vld [vmem:[#allocation18_spill] sm:$0xff] }
  0xa5   : > { %1420 = vmatpush.bf16.msra.mxu3 %v4179_v49  ;;  %v4237_v49 = vor.u32 %v2605_v42, %v2166_v19  ;;  %v4716_v19 = vld [vmem:[#allocation17_spill] sm:$0xff] }
  0xa6   : > { %1382 = vmatpush.bf16.msra.mxu0 %v4197_v32 }
  0xa7   : > { %1395 = vmatpush.bf16.msra.mxu1 %v4201_v48 }
  0xa8   : > { %1408 = vmatpush.bf16.msra.mxu2 %v4203_v24 }
  0xa9   : > { %1421 = vmatpush.bf16.msra.mxu3 %v4215_v40 }
  0xaa   : > { %1383 = vmatpush.bf16.msra.mxu0 %v4233_v11 }
  0xab   : > { %1396 = vmatpush.bf16.msra.mxu1 %v4237_v49 }
  0xac   : > { %1409 = vmatpush.bf16.msra.mxu2 %v4239_v47 }
  0xad   : > { %1422 = vmatpush.bf16.msra.mxu3 %v4242_v53  ;;  %1384 = vmatmul.bf16.vlgmr.msra.gmra.mxu0 %v3275_v15  ;;  %v4712_v15 = vld [vmem:[#allocation13_spill] sm:$0xff] }
  0xae   : > { %1449 = vmatpush.bf16.msrb.mxu0 %v2774_v3  ;;  %1397 = vmatmul.bf16.vlgmr.msra.gmra.mxu1 %v3265_v22  ;;  %v1428_v3 = vld [vmem:[%s4277_s30] sm:$0xff] }
  0xaf   : > { %1462 = vmatpush.bf16.msrb.mxu1 %v2785_v7  ;;  %1410 = vmatmul.bf16.vlgmr.msra.gmra.mxu2 %v3273_v31  ;;  %v1429_v7 = vld [vmem:[%s4277_s30 + $0x8] sm:$0xff]  ;;  %v4713_v22 = vld [vmem:[#allocation14_spill] sm:$0xff] }
  0xb0   : > { %1475 = vmatpush.bf16.msrb.mxu2 %v2787_v8  ;;  %1423 = vmatmul.bf16.vlgmr.msra.gmra.mxu3 %v3447_v10  ;;  %v4714_v31 = vld [vmem:[#allocation15_spill] sm:$0xff]  ;;  %v4715_v10 = vld [vmem:[#allocation16_spill] sm:$0xff] }
  0xb1   : > { %1488 = vmatpush.bf16.msrb.mxu3 %v2799_v12 }
  0xb2   : > { %1450 = vmatpush.bf16.msrb.mxu0 %v2812_v16  ;;  %v1434_v16 = vunpack.c.l.b16 %v1428_v3 }
  0xb3   : > { %1463 = vmatpush.bf16.msrb.mxu1 %v2814_v17 }
  0xb4   : > { %1476 = vmatpush.bf16.msrb.mxu2 %v2826_v21  ;;  %v1436_v21 = vunpack.c.l.b16 %v1429_v7 }
  0xb5   : > { %1489 = vmatpush.bf16.msrb.mxu3 %v2837_v25  ;;  %v1437_v25 = vunpack.c.h.b16 %v1429_v7  ;;  %v4719_v7 = vld [vmem:[#allocation20_spill] sm:$0xff] }
  0xb6   : > { %1451 = vmatpush.bf16.msrb.mxu0 %v2849_v29  ;;  %v1435_v29 = vunpack.c.h.b16 %v1428_v3 }
  0xb7   : > { %1464 = vmatpush.bf16.msrb.mxu1 %v2862_v33 }
  0xb8   : > { %1477 = vmatpush.bf16.msrb.mxu2 %v2864_v34 }
  0xb9   : > { %1490 = vmatpush.bf16.msrb.mxu3 %v2876_v38  ;;  %v1177_v8 = vpop.f32.mrf.mxu0  ;;  %v4290_v38 = vpack.c.b16 %v1434_v16, %v1434_v16  ;;  %v4721_v16 = vld [vmem:[#allocation22_spill] sm:$0xff] }
  0xba   : > { %1452 = vmatpush.bf16.msrb.mxu0 %v2894_v44  ;;  %v1190_v12 = vpop.f32.mrf.mxu1  ;;  %v4294_v44 = vpack.c.b16 %v1436_v21, %v1436_v21  ;;  %v4723_v21 = vld [vmem:[#allocation24_spill] sm:$0xff] }
  0xbb   : > { %1465 = vmatpush.bf16.msrb.mxu1 %v2898_v45  ;;  %v1191_v17 = vadd.f32 %v1190_v12, %v1177_v8  ;;  %v4296_v45 = vpack.c.b16 %v1437_v25, %v1437_v25  ;;  %v4720_v8 = vld [vmem:[#allocation21_spill] sm:$0xff]  ;;  %v1438_v12 = vunpack.c.l.b16 %v1430_v54  ;;  %v4749_v54 = vld [vmem:[#allocation50_spill] sm:$0xff] }
  0xbc   : > { %1478 = vmatpush.bf16.msrb.mxu2 %v2900_v46 }
  0xbd   : > { %1491 = vmatpush.bf16.msrb.mxu3 %v2912_v50  ;;  %v4300_v50 = vpack.c.b16 %v1435_v29, %v1435_v29  ;;  %v4724_v29 = vld [vmem:[#allocation25_spill] sm:$0xff] }
  0xbe   : > { %1453 = vmatpush.bf16.msrb.mxu0 %v2930_v56 }
  0xbf   : > { %1466 = vmatpush.bf16.msrb.mxu1 %v2934_v57 }
  0xc0   : > { %1479 = vmatpush.bf16.msrb.mxu2 %v2936_v58 }
  0xc1   : > { %1492 = vmatpush.bf16.msrb.mxu3 %v2948_v62  ;;  %v1203_v33 = vpop.f32.mrf.mxu2  ;;  %v1179_v56 = vpop.f32.mrf.mxu0  ;;  %v4701_v62 = vld [vmem:[#allocation2_spill] sm:$0xff] }
  0xc2   : > { %1454 = vmatpush.bf16.msrb.mxu0 %v2966_v5  ;;  %v1204_v34 = vadd.f32 %v1203_v33, %v1191_v17  ;;  %v1216_v46 = vpop.f32.mrf.mxu3  ;;  %v1192_v58 = vpop.f32.mrf.mxu1  ;;  %v4702_v5 = vld [vmem:[#allocation3_spill] sm:$0xff]  ;;  %v4337_v33 = vpack.c.b16 %v1438_v12, %v1438_v12  ;;  %v4727_v56 = vld [vmem:[#allocation28_spill] sm:$0xff] }
  0xc3   : > { %1467 = vmatpush.bf16.msrb.mxu1 %v2970_v6  ;;  %v4722_v17 = vld [vmem:[#allocation23_spill] sm:$0xff]  ;;  %v4729_v58 = vld [vmem:[#allocation30_spill] sm:$0xff] }
  0xc4   : > { %1480 = vmatpush.bf16.msrb.mxu2 %v2972_v9  ;;  %v1217_v57 = vadd.f32 %v1216_v46, %v1204_v34  ;;  %v4703_v9 = vld [vmem:[#allocation4_spill] sm:$0xff]  ;;  %v4725_v34 = vld [vmem:[#allocation26_spill] sm:$0xff]  ;;  %v4726_v46 = vld [vmem:[#allocation27_spill] sm:$0xff] }
  0xc5   : > { %1493 = vmatpush.bf16.msrb.mxu3 %v2984_v14  ;;  %v4704_v14 = vld [vmem:[#allocation5_spill] sm:$0xff] }
  0xc6   : > { %1455 = vmatpush.bf16.msrb.mxu0 %v3002_v23 }
  0xc7   : > { %1468 = vmatpush.bf16.msrb.mxu1 %v3012_v27  ;;  %v4705_v27 = vld [vmem:[#allocation6_spill] sm:$0xff] }
  0xc8   : > { %1481 = vmatpush.bf16.msrb.mxu2 %v3014_v28  ;;  %v4706_v28 = vld [vmem:[#allocation7_spill] sm:$0xff] }
  0xc9   : > { %1494 = vmatpush.bf16.msrb.mxu3 %v3026_v35  ;;  %v1205_v6 = vpop.f32.mrf.mxu2  ;;  %v4707_v35 = vld [vmem:[#allocation8_spill] sm:$0xff] }
  0xca   : > { %1456 = vmatpush.bf16.msrb.mxu0 %v3047_v43  ;;  %v1218_v23 = vpop.f32.mrf.mxu3  ;;  %v1229_v43 = vpop.f32.mrf.mxu0  ;;  %v4732_v6 = vld [vmem:[#allocation33_spill] sm:$0xff] }
  0xcb   : > { %1469 = vmatpush.bf16.msrb.mxu1 %v3060_v51  ;;  %v4708_v51 = vld [vmem:[#allocation9_spill] sm:$0xff]  ;;  %v4735_v23 = vld [vmem:[#allocation36_spill] sm:$0xff] }
  0xcc   : > { %1482 = vmatpush.bf16.msrb.mxu2 %v3062_v52  ;;  %v4318_v52 = vadd.f32 %v1229_v43, %v1217_v57  ;;  %v4728_v57 = vld [vmem:[#allocation29_spill] sm:$0xff] }
  0xcd   : > { %1495 = vmatpush.bf16.msrb.mxu3 %v3071_v55  ;;  %1457 = vmatmul.bf16.vlgmr.msrb.gmra.mxu0 %v4290_v38  ;;  %v1242_v55 = vpop.f32.mrf.mxu1 }
  0xce   : > { %1501 = vmatpush.bf16.msra.mxu0 %v3073_v59  ;;  %1470 = vmatmul.bf16.vlgmr.msrb.gmra.mxu1 %v4300_v50  ;;  %v4709_v59 = vld [vmem:[#allocation10_spill] sm:$0xff] }
  0xcf   : > { %1514 = vmatpush.bf16.msra.mxu1 %v3075_v60  ;;  %1483 = vmatmul.bf16.vlgmr.msrb.gmra.mxu2 %v4294_v44  ;;  %v4710_v60 = vld [vmem:[#allocation11_spill] sm:$0xff] }
  0xd0   : > { %1527 = vmatpush.bf16.msra.mxu2 %v3077_v61  ;;  %1496 = vmatmul.bf16.vlgmr.msrb.gmra.mxu3 %v4296_v45 }
  0xd1   : > { %1540 = vmatpush.bf16.msra.mxu3 %v3089_v2  ;;  %v4711_v2 = vld [vmem:[#allocation12_spill] sm:$0xff] }
  0xd2   : > { %1502 = vmatpush.bf16.msra.mxu0 %v3110_v18  ;;  %v1255_v61 = vpop.f32.mrf.mxu2  ;;  %v1231_v0 = vpop.f32.mrf.mxu0 }
  0xd3   : > { %1515 = vmatpush.bf16.msra.mxu1 %v4701_v62  ;;  %v1256_v18 = vadd.f32 %v1255_v61, %v1242_v55  ;;  %v1268_v4 = vpop.f32.mrf.mxu3  ;;  %v4730_v62 = vld [vmem:[#allocation31_spill] sm:$0xff]  ;;  %v4740_v61 = vld [vmem:[#allocation41_spill] sm:$0xff] }
  0xd4   : > { %1528 = vmatpush.bf16.msra.mxu2 %v4702_v5  ;;  %v4731_v5 = vld [vmem:[#allocation32_spill] sm:$0xff]  ;;  %v4738_v55 = vld [vmem:[#allocation39_spill] sm:$0xff] }
  0xd5   : > { %1541 = vmatpush.bf16.msra.mxu3 %v4703_v9  ;;  %v1269_v42 = vadd.f32 %v1268_v4, %v1256_v18  ;;  %v1244_v63 = vpop.f32.mrf.mxu1  ;;  %v4733_v9 = vld [vmem:[#allocation34_spill] sm:$0xff]  ;;  %v4742_v18 = vld [vmem:[#allocation43_spill] sm:$0xff]  ;;  %v4744_v4 = vld [vmem:[#allocation45_spill] sm:$0xff] }
  0xd6   : > { %1503 = vmatpush.bf16.msra.mxu0 %v4704_v14  ;;  %v4734_v14 = vld [vmem:[#allocation35_spill] sm:$0xff] }
  0xd7   : > { %1516 = vmatpush.bf16.msra.mxu1 %v4705_v27  ;;  %v4746_v63 = vld [vmem:[#allocation47_spill] sm:$0xff] }
  0xd8   : > { %1529 = vmatpush.bf16.msra.mxu2 %v4706_v28  ;;  %v4736_v28 = vld [vmem:[#allocation37_spill] sm:$0xff] }
  0xd9   : > { %1542 = vmatpush.bf16.msra.mxu3 %v4707_v35 }
  0xda   : > { %1504 = vmatpush.bf16.msra.mxu0 %v4708_v51  ;;  %v1257_v3 = vpop.f32.mrf.mxu2  ;;  %v4737_v51 = vld [vmem:[#allocation38_spill] sm:$0xff] }
  0xdb   : > { %1517 = vmatpush.bf16.msra.mxu1 %v4709_v59  ;;  %v1270_v25 = vpop.f32.mrf.mxu3  ;;  %v4739_v59 = vld [vmem:[#allocation40_spill] sm:$0xff]  ;;  %v4750_v3 = vld [vmem:[#allocation51_spill] sm:$0xff] }
  0xdc   : > { %1530 = vmatpush.bf16.msra.mxu2 %v4710_v60  ;;  %v4755_v25 = vld [vmem:[#allocation56_spill] sm:$0xff] }
  0xdd   : > { %1543 = vmatpush.bf16.msra.mxu3 %v4711_v2  ;;  %v4741_v2 = vld [vmem:[#allocation42_spill] sm:$0xff] }
  0xde   : > { %1505 = vmatpush.bf16.msra.mxu0 %v4712_v15  ;;  %v4743_v15 = vld [vmem:[#allocation44_spill] sm:$0xff] }
  0xdf   : > { %1518 = vmatpush.bf16.msra.mxu1 %v4713_v22 }
  0xe0   : > { %1531 = vmatpush.bf16.msra.mxu2 %v4714_v31 }
  0xe1   : > { %1544 = vmatpush.bf16.msra.mxu3 %v4715_v10 }
  0xe2   : > { %1506 = vmatpush.bf16.msra.mxu0 %v4716_v19  ;;  %v4745_v19 = vld [vmem:[#allocation46_spill] sm:$0xff] }
  0xe3   : > { %1519 = vmatpush.bf16.msra.mxu1 %v4717_v30  ;;  %v4747_v30 = vld [vmem:[#allocation48_spill] sm:$0xff] }
  0xe4   : > { %1532 = vmatpush.bf16.msra.mxu2 %v4718_v36  ;;  %v4748_v36 = vld [vmem:[#allocation49_spill] sm:$0xff] }
  0xe5   : > { %1545 = vmatpush.bf16.msra.mxu3 %v4719_v7  ;;  %v4751_v7 = vld [vmem:[#allocation52_spill] sm:$0xff] }
  0xe6   : > { %1507 = vmatpush.bf16.msra.mxu0 %v4720_v8 }
  0xe7   : > { %1520 = vmatpush.bf16.msra.mxu1 %v4721_v16  ;;  %v4752_v16 = vld [vmem:[#allocation53_spill] sm:$0xff] }
  0xe8   : > { %1533 = vmatpush.bf16.msra.mxu2 %v4722_v17  ;;  %v4753_v17 = vld [vmem:[#allocation54_spill] sm:$0xff] }
  0xe9   : > { %1546 = vmatpush.bf16.msra.mxu3 %v4723_v21  ;;  %v4754_v21 = vld [vmem:[#allocation55_spill] sm:$0xff] }
  0xea   : > { %1508 = vmatpush.bf16.msra.mxu0 %v4724_v29  ;;  %v1281_v27 = vpop.f32.mrf.mxu0  ;;  %v4756_v29 = vld [vmem:[#allocation57_spill] sm:$0xff] }
  0xeb   : > { %1521 = vmatpush.bf16.msra.mxu1 %v4725_v34  ;;  %v1282_v35 = vadd.f32 %v1281_v27, %v1269_v42  ;;  %v1294_v43 = vpop.f32.mrf.mxu1  ;;  %v4757_v34 = vld [vmem:[#allocation58_spill] sm:$0xff]  ;;  %v4768_v27 = vld [vmem:[#allocation69_spill] sm:$0xff] }
  0xec   : > { %1534 = vmatpush.bf16.msra.mxu2 %v4726_v46  ;;  %v4758_v46 = vld [vmem:[#allocation59_spill] sm:$0xff] }
  0xed   : > { %1547 = vmatpush.bf16.msra.mxu3 %v4727_v56  ;;  %1509 = vmatmul.bf16.vlgmr.msra.gmra.mxu0 %v4337_v33  ;;  %v4358_v60 = vadd.f32 %v1294_v43, %v1282_v35  ;;  %v4759_v56 = vld [vmem:[#allocation60_spill] sm:$0xff]  ;;  %v4769_v43 = vld [vmem:[#allocation70_spill] sm:$0xff] }
  0xee   : > { %1553 = vmatpush.bf16.msrb.mxu0 %v4728_v57  ;;  %1522 = vmatmul.bf16.vlgmr.msra.gmra.mxu1 %v4290_v38  ;;  %v4760_v57 = vld [vmem:[#allocation61_spill] sm:$0xff] }
  0xef   : > { %1566 = vmatpush.bf16.msrb.mxu1 %v4729_v58  ;;  %1535 = vmatmul.bf16.vlgmr.msra.gmra.mxu2 %v4300_v50  ;;  %v4761_v58 = vld [vmem:[#allocation62_spill] sm:$0xff] }
  0xf0   : > { %1579 = vmatpush.bf16.msrb.mxu2 %v4730_v62  ;;  %1548 = vmatmul.bf16.vlgmr.msra.gmra.mxu3 %v4294_v44  ;;  %v4762_v62 = vld [vmem:[#allocation63_spill] sm:$0xff] }
  0xf1   : > { %1592 = vmatpush.bf16.msrb.mxu3 %v4731_v5  ;;  %v4763_v5 = vld [vmem:[#allocation64_spill] sm:$0xff] }
  0xf2   : > { %1554 = vmatpush.bf16.msrb.mxu0 %v4732_v6  ;;  %v1307_v22 = vpop.f32.mrf.mxu2  ;;  %v1283_v31 = vpop.f32.mrf.mxu0  ;;  %v4764_v6 = vld [vmem:[#allocation65_spill] sm:$0xff] }
  0xf3   : > { %1567 = vmatpush.bf16.msrb.mxu1 %v4733_v9  ;;  %v1320_v10 = vpop.f32.mrf.mxu3  ;;  %v1296_v0 = vpop.f32.mrf.mxu1  ;;  %v4765_v9 = vld [vmem:[#allocation66_spill] sm:$0xff]  ;;  %v1711_v31 = vrot.slane %v4318_v52, 1  ;;  %v4782_v52 = vld [vmem:[#allocation83_spill] sm:$0xff] }
  0xf4   : > { %1580 = vmatpush.bf16.msrb.mxu2 %v4734_v14  ;;  %v1321_v42 = vadd.f32 %v1320_v10, %v1307_v22  ;;  %v4766_v14 = vld [vmem:[#allocation67_spill] sm:$0xff]  ;;  %v4775_v10 = vld [vmem:[#allocation76_spill] sm:$0xff] }
  0xf5   : > { %1593 = vmatpush.bf16.msrb.mxu3 %v4735_v23  ;;  %v4767_v23 = vld [vmem:[#allocation68_spill] sm:$0xff] }
  0xf6   : > { %1555 = vmatpush.bf16.msrb.mxu0 %v4736_v28 }
  0xf7   : > { %1568 = vmatpush.bf16.msrb.mxu1 %v4737_v51  ;;  %v4770_v51 = vld [vmem:[#allocation71_spill] sm:$0xff] }
  0xf8   : > { %1581 = vmatpush.bf16.msrb.mxu2 %v4738_v55 }
  0xf9   : > { %1594 = vmatpush.bf16.msrb.mxu3 %v4739_v59  ;;  %v4771_v59 = vld [vmem:[#allocation72_spill] sm:$0xff] }
  0xfa   : > { %1556 = vmatpush.bf16.msrb.mxu0 %v4740_v61  ;;  %v1309_v8 = vpop.f32.mrf.mxu2 }
  0xfb   : > { %1569 = vmatpush.bf16.msrb.mxu1 %v4741_v2  ;;  %v1322_v12 = vpop.f32.mrf.mxu3  ;;  %v4772_v2 = vld [vmem:[#allocation73_spill] sm:$0xff]  ;;  %v4781_v8 = vld [vmem:[#allocation82_spill] sm:$0xff] }
  0xfc   : > { %1582 = vmatpush.bf16.msrb.mxu2 %v4742_v18  ;;  %v4773_v18 = vld [vmem:[#allocation74_spill] sm:$0xff] }
  0xfd   : > { %1595 = vmatpush.bf16.msrb.mxu3 %v4743_v15  ;;  %v4774_v15 = vld [vmem:[#allocation75_spill] sm:$0xff] }
  0xfe   : > { %1557 = vmatpush.bf16.msrb.mxu0 %v4744_v4 }
  0xff   : > { %1570 = vmatpush.bf16.msrb.mxu1 %v4745_v19  ;;  %v4776_v19 = vld [vmem:[#allocation77_spill] sm:$0xff] }
 0x100   : > { %1583 = vmatpush.bf16.msrb.mxu2 %v4746_v63 }
 0x101   : > { %1596 = vmatpush.bf16.msrb.mxu3 %v4747_v30 }
 0x102   : > { %1558 = vmatpush.bf16.msrb.mxu0 %v4748_v36  ;;  %v4777_v36 = vld [vmem:[#allocation78_spill] sm:$0xff] }
 0x103   : > { %1571 = vmatpush.bf16.msrb.mxu1 %v4749_v54  ;;  %v4778_v54 = vld [vmem:[#allocation79_spill] sm:$0xff] }
 0x104   : > { %1584 = vmatpush.bf16.msrb.mxu2 %v4750_v3  ;;  %v4779_v3 = vld [vmem:[#allocation80_spill] sm:$0xff] }
 0x105   : > { %1597 = vmatpush.bf16.msrb.mxu3 %v4751_v7  ;;  %v4780_v7 = vld [vmem:[#allocation81_spill] sm:$0xff] }
 0x106   : > { %1559 = vmatpush.bf16.msrb.mxu0 %v4752_v16  ;;  %v4783_v16 = vld [vmem:[#allocation84_spill] sm:$0xff] }
 0x107   : > { %1572 = vmatpush.bf16.msrb.mxu1 %v4753_v17 }
 0x108   : > { %1585 = vmatpush.bf16.msrb.mxu2 %v4754_v21  ;;  %v4784_v21 = vld [vmem:[#allocation85_spill] sm:$0xff] }
 0x109   : > { %1598 = vmatpush.bf16.msrb.mxu3 %v4755_v25  ;;  %v4785_v25 = vld [vmem:[#allocation86_spill] sm:$0xff] }
 0x10a   : > { %1560 = vmatpush.bf16.msrb.mxu0 %v4756_v29  ;;  %v1333_v28 = vpop.f32.mrf.mxu0  ;;  %v4786_v29 = vld [vmem:[#allocation87_spill] sm:$0xff] }
 0x10b   : > { %1573 = vmatpush.bf16.msrb.mxu1 %v4757_v34  ;;  %v1346_v35 = vpop.f32.mrf.mxu1  ;;  %v1334_v55 = vadd.f32 %v1333_v28, %v1321_v42  ;;  %v4787_v34 = vld [vmem:[#allocation88_spill] sm:$0xff]  ;;  %v4801_v28 = vld [vmem:[#allocation102_spill] sm:$0xff] }
 0x10c   : > { %1586 = vmatpush.bf16.msrb.mxu2 %v4758_v46  ;;  %v4788_v46 = vld [vmem:[#allocation89_spill] sm:$0xff] }
 0x10d   : > { %1599 = vmatpush.bf16.msrb.mxu3 %v4759_v56  ;;  %1561 = vmatmul.bf16.vlgmr.msrb.gmra.mxu0 %v4296_v45  ;;  %v1347_v61 = vadd.f32 %v1346_v35, %v1334_v55  ;;  %v4789_v56 = vld [vmem:[#allocation90_spill] sm:$0xff]  ;;  %v4802_v55 = vld [vmem:[#allocation103_spill] sm:$0xff] }
 0x10e   : > { %1605 = vmatpush.bf16.msra.mxu0 %v4760_v57  ;;  %1574 = vmatmul.bf16.vlgmr.msrb.gmra.mxu1 %v4337_v33  ;;  %v4795_v57 = vld [vmem:[#allocation96_spill] sm:$0xff] }
 0x10f   : > { %1618 = vmatpush.bf16.msra.mxu1 %v4761_v58  ;;  %1587 = vmatmul.bf16.vlgmr.msrb.gmra.mxu2 %v4290_v38  ;;  %v4796_v58 = vld [vmem:[#allocation97_spill] sm:$0xff] }
 0x110   : > { %1631 = vmatpush.bf16.msra.mxu2 %v4762_v62  ;;  %1600 = vmatmul.bf16.vlgmr.msrb.gmra.mxu3 %v4300_v50 }
 0x111   : > { %1644 = vmatpush.bf16.msra.mxu3 %v4763_v5 }
 0x112   : > { %1606 = vmatpush.bf16.msra.mxu0 %v4764_v6  ;;  %v1359_v22 = vpop.f32.mrf.mxu2  ;;  %v1335_v42 = vpop.f32.mrf.mxu0  ;;  %v4797_v6 = vld [vmem:[#allocation98_spill] sm:$0xff] }
 0x113   : > { %1619 = vmatpush.bf16.msra.mxu1 %v4765_v9  ;;  %v1360_v4 = vadd.f32 %v1359_v22, %v1347_v61  ;;  %v1372_v0 = vpop.f32.mrf.mxu3  ;;  %v1348_v30 = vpop.f32.mrf.mxu1  ;;  %v4805_v22 = vld [vmem:[#allocation106_spill] sm:$0xff] }
 0x114   : > { %1632 = vmatpush.bf16.msra.mxu2 %v4766_v14  ;;  %v4798_v14 = vld [vmem:[#allocation99_spill] sm:$0xff] }
 0x115   : > { %1645 = vmatpush.bf16.msra.mxu3 %v4767_v23  ;;  %v4402_v63 = vadd.f32 %v1711_v31, %v1360_v4  ;;  %v4800_v23 = vld [vmem:[#allocation101_spill] sm:$0xff]  ;;  %v4807_v4 = vld [vmem:[#allocation108_spill] sm:$0xff] }
 0x116   : > { %1607 = vmatpush.bf16.msra.mxu0 %v4768_v27 }
 0x117   : > { %1620 = vmatpush.bf16.msra.mxu1 %v4769_v43 }
 0x118   : > { %1633 = vmatpush.bf16.msra.mxu2 %v4770_v51  ;;  %v1712_v51 = vrot.slane %v4358_v60, 1 }
 0x119   : > { %1646 = vmatpush.bf16.msra.mxu3 %v4771_v59 }
 0x11a   : > { %1608 = vmatpush.bf16.msra.mxu0 %v4772_v2  ;;  %v1361_v12 = vpop.f32.mrf.mxu2  ;;  %v4803_v2 = vld [vmem:[#allocation104_spill] sm:$0xff] }
 0x11b   : > { %1621 = vmatpush.bf16.msra.mxu1 %v4773_v18  ;;  %v1374_v17 = vpop.f32.mrf.mxu3  ;;  %v4804_v18 = vld [vmem:[#allocation105_spill] sm:$0xff] }
 0x11c   : > { %1634 = vmatpush.bf16.msra.mxu2 %v4774_v15 }
 0x11d   : > { %1647 = vmatpush.bf16.msra.mxu3 %v4775_v10  ;;  %v4806_v10 = vld [vmem:[#allocation107_spill] sm:$0xff] }
 0x11e   : > { %1609 = vmatpush.bf16.msra.mxu0 %v4776_v19 }
 0x11f   : > { %1622 = vmatpush.bf16.msra.mxu1 %v4777_v36 }
 0x120   : > { %1635 = vmatpush.bf16.msra.mxu2 %v4778_v54 }
 0x121   : > { %1648 = vmatpush.bf16.msra.mxu3 %v4779_v3 }
 0x122   : > { %1610 = vmatpush.bf16.msra.mxu0 %v4780_v7 }
 0x123   : > { %1623 = vmatpush.bf16.msra.mxu1 %v4781_v8 }
 0x124   : > { %1636 = vmatpush.bf16.msra.mxu2 %v4782_v52 }
 0x125   : > { %1649 = vmatpush.bf16.msra.mxu3 %v4783_v16 }
 0x126   : > { %1611 = vmatpush.bf16.msra.mxu0 %v4784_v21 }
 0x127   : > { %1624 = vmatpush.bf16.msra.mxu1 %v4785_v25 }
 0x128   : > { %1637 = vmatpush.bf16.msra.mxu2 %v3917_v37  ;;  %v4792_v37 = vld [vmem:[#allocation93_spill] sm:$0xff] }
 0x129   : > { %1650 = vmatpush.bf16.msra.mxu3 %v3929_v20  ;;  %v4790_v20 = vld [vmem:[#allocation91_spill] sm:$0xff] }
 0x12a   : > { %1612 = vmatpush.bf16.msra.mxu0 %v3950_v39  ;;  %v4794_v39 = vld [vmem:[#allocation95_spill] sm:$0xff] }
 0x12b   : > { %1625 = vmatpush.bf16.msra.mxu1 %v3963_v26  ;;  %v4791_v26 = vld [vmem:[#allocation92_spill] sm:$0xff]  ;;  %v1398_v5 = vpop.f32.mrf.mxu1 }
 0x12c   : > { %1638 = vmatpush.bf16.msra.mxu2 %v3965_v1  ;;  %v1385_v1 = vpop.f32.mrf.mxu0 }
 0x12d   : > { %1651 = vmatpush.bf16.msra.mxu3 %v4786_v29  ;;  %1613 = vmatmul.bf16.vlgmr.msra.gmra.mxu0 %v4294_v44  ;;  %v1386_v62 = vadd.f32 %v1385_v1, %v1372_v0  ;;  %v4808_v0 = vld [vmem:[#allocation109_spill] sm:$0xff] }
 0x12e   : > { %1657 = vmatpush.bf16.msrb.mxu0 %v3976_v41  ;;  %1626 = vmatmul.bf16.vlgmr.msra.gmra.mxu1 %v4296_v45  ;;  %v4793_v41 = vld [vmem:[#allocation94_spill] sm:$0xff] }
 0x12f   : > { %1670 = vmatpush.bf16.msrb.mxu1 %v4787_v34  ;;  %1639 = vmatmul.bf16.vlgmr.msra.gmra.mxu2 %v4337_v33  ;;  %v1399_v9 = vadd.f32 %v1398_v5, %v1386_v62 }
 0x130   : > { %1683 = vmatpush.bf16.msrb.mxu2 %v4788_v46  ;;  %1652 = vmatmul.bf16.vlgmr.msra.gmra.mxu3 %v4290_v38  ;;  %v4799_v38 = vld [vmem:[#allocation100_spill] sm:$0xff] }
 0x131   : > { %1696 = vmatpush.bf16.msrb.mxu3 %v4789_v56 }
 0x132   : > { %1658 = vmatpush.bf16.msrb.mxu0 %v4790_v20  ;;  %v1411_v27 = vpop.f32.mrf.mxu2 }
 0x133   : > { %1671 = vmatpush.bf16.msrb.mxu1 %v4791_v26  ;;  %v1412_v35 = vadd.f32 %v1411_v27, %v1399_v9  ;;  %v1424_v43 = vpop.f32.mrf.mxu3  ;;  %v1400_v15 = vpop.f32.mrf.mxu1 }
 0x134   : > { %1684 = vmatpush.bf16.msrb.mxu2 %v4792_v37  ;;  %v1387_v61 = vpop.f32.mrf.mxu0 }
 0x135   : > { %1697 = vmatpush.bf16.msrb.mxu3 %v4793_v41  ;;  %v1425_v59 = vadd.f32 %v1424_v43, %v1412_v35 }
 0x136   : > { %1659 = vmatpush.bf16.msrb.mxu0 %v4794_v39 }
 0x137   : > { %1672 = vmatpush.bf16.msrb.mxu1 %v4795_v57  ;;  %v4444_v31 = vadd.f32 %v1712_v51, %v1425_v59 }
 0x138   : > { %1685 = vmatpush.bf16.msrb.mxu2 %v4796_v58 }
 0x139   : > { %1698 = vmatpush.bf16.msrb.mxu3 %v4797_v6 }
 0x13a   : > { %1660 = vmatpush.bf16.msrb.mxu0 %v4798_v14  ;;  %v1413_v60 = vpop.f32.mrf.mxu2 }
 0x13b   : > { %1673 = vmatpush.bf16.msrb.mxu1 %v4799_v38  ;;  %v1426_v19 = vpop.f32.mrf.mxu3 }
 0x13c   : > { %1686 = vmatpush.bf16.msrb.mxu2 %v4800_v23 }
 0x13d   : > { %1699 = vmatpush.bf16.msrb.mxu3 %v4801_v28 }
 0x13e   : > { %1661 = vmatpush.bf16.msrb.mxu0 %v4802_v55 }
 0x13f   : > { %1674 = vmatpush.bf16.msrb.mxu1 %v4803_v2 }
 0x140   : > { %1687 = vmatpush.bf16.msrb.mxu2 %v4804_v18 }
 0x141   : > { %1700 = vmatpush.bf16.msrb.mxu3 %v4805_v22 }
 0x142   : > { %1662 = vmatpush.bf16.msrb.mxu0 %v4161_v13 }
 0x143   : > { %1675 = vmatpush.bf16.msrb.mxu1 %v4806_v10 }
 0x144   : > { %1688 = vmatpush.bf16.msrb.mxu2 %v4807_v4 }
 0x145   : > { %1701 = vmatpush.bf16.msrb.mxu3 %v4808_v0 }
 0x146   : > { %1663 = vmatpush.bf16.msrb.mxu0 %v4197_v32 }
 0x147   : > { %1676 = vmatpush.bf16.msrb.mxu1 %v4201_v48 }
 0x148   : > { %1689 = vmatpush.bf16.msrb.mxu2 %v4203_v24 }
 0x149   : > { %1702 = vmatpush.bf16.msrb.mxu3 %v4215_v40 }
 0x14a   : > { %1664 = vmatpush.bf16.msrb.mxu0 %v4233_v11  ;;  %v1458_v48 = vpop.f32.mrf.mxu0 }
 0x14b   : > { %1677 = vmatpush.bf16.msrb.mxu1 %v4237_v49  ;;  %v1471_v24 = vpop.f32.mrf.mxu1 }
 0x14c   : > { %1690 = vmatpush.bf16.msrb.mxu2 %v4239_v47  ;;  %v1472_v13 = vadd.f32 %v1471_v24, %v1458_v48 }
 0x14d   : > { %1703 = vmatpush.bf16.msrb.mxu3 %v4242_v53  ;;  %1665 = vmatmul.bf16.vlgmr.msrb.gmra.mxu0 %v4300_v50 }
 0x14e   : > { %1678 = vmatmul.bf16.vlgmr.msrb.gmra.mxu1 %v4294_v44 }
 0x14f   : > { %1691 = vmatmul.bf16.vlgmr.msrb.gmra.mxu2 %v4296_v45 }
 0x150   : > { %1704 = vmatmul.bf16.vlgmr.msrb.gmra.mxu3 %v4337_v33 }
 0x152   : > { %v1484_v32 = vpop.f32.mrf.mxu2  ;;  %v1460_v42 = vpop.f32.mrf.mxu0 }
 0x153   : > { %v1497_v40 = vpop.f32.mrf.mxu3  ;;  %v1485_v11 = vadd.f32 %v1484_v32, %v1472_v13  ;;  %v1473_v30 = vpop.f32.mrf.mxu1 }
 0x155   : > { %v1498_v49 = vadd.f32 %v1497_v40, %v1485_v11 }
 0x15a   : > { %v1486_v47 = vpop.f32.mrf.mxu2 }
 0x15b   : > { %v1499_v36 = vpop.f32.mrf.mxu3 }
 0x16a   : > { %v1510_v53 = vpop.f32.mrf.mxu0 }
 0x16b   : > { %v1511_v54 = vadd.f32 %v1510_v53, %v1498_v49  ;;  %v1523_v50 = vpop.f32.mrf.mxu1 }
 0x16d   : > { %v1719_v35 = vrot.slane %v1511_v54, 1 }
 0x172   : > { %v1536_v3 = vpop.f32.mrf.mxu2  ;;  %v1512_v7 = vpop.f32.mrf.mxu0 }
 0x173   : > { %v1537_v44 = vadd.f32 %v1536_v3, %v1523_v50  ;;  %v1549_v45 = vpop.f32.mrf.mxu3  ;;  %v1525_v8 = vpop.f32.mrf.mxu1 }
 0x175   : > { %v1550_v33 = vadd.f32 %v1549_v45, %v1537_v44 }
 0x17a   : > { %v1538_v52 = vpop.f32.mrf.mxu2 }
 0x17b   : > { %v1551_v12 = vpop.f32.mrf.mxu3 }
 0x18a   : > { %v1562_v16 = vpop.f32.mrf.mxu0 }
 0x18b   : > { %v1563_v17 = vadd.f32 %v1562_v16, %v1550_v33  ;;  %v1575_v21 = vpop.f32.mrf.mxu1 }
 0x18d   : > { %v1576_v25 = vadd.f32 %v1575_v21, %v1563_v17 }
 0x18f   : > { %v1720_v15 = vrot.slane %v1576_v25, 1 }
 0x192   : > { %v1588_v29 = vpop.f32.mrf.mxu2  ;;  %v1564_v34 = vpop.f32.mrf.mxu0 }
 0x193   : > { %v1601_v46 = vpop.f32.mrf.mxu3  ;;  %v1577_v56 = vpop.f32.mrf.mxu1 }
 0x194   : > { %v1602_v6 = vadd.f32 %v1601_v46, %v1588_v29 }
 0x19a   : > { %v1590_v20 = vpop.f32.mrf.mxu2 }
 0x19b   : > { %v1603_v26 = vpop.f32.mrf.mxu3 }
 0x1aa   : > { %v1614_v37 = vpop.f32.mrf.mxu0 }
 0x1ab   : > { %v1627_v41 = vpop.f32.mrf.mxu1  ;;  %v1615_v9 = vadd.f32 %v1614_v37, %v1602_v6 }
 0x1ad   : > { %v1628_v14 = vadd.f32 %v1627_v41, %v1615_v9 }
 0x1b2   : > { %v1640_v39 = vpop.f32.mrf.mxu2  ;;  %v1616_v57 = vpop.f32.mrf.mxu0 }
 0x1b3   : > { %v1653_v1 = vpop.f32.mrf.mxu3  ;;  %v1629_v58 = vpop.f32.mrf.mxu1  ;;  %v1641_v28 = vadd.f32 %v1640_v39, %v1628_v14 }
 0x1b5   : > { %v1723_v55 = vadd.f32 %v1719_v35, %v1641_v28 }
 0x1b7   : > { %v1725_v4 = vmul.f32 %v1723_v55, %v4402_v63  ;;  %v1740_v40 = vmul.f32 %v1723_v55, %v1723_v55 }
 0x1b9   : > { %v1728_v48 = vsel %vm1727_vm0, %v1725_v4, 0.0  ;;  %v1742_v42 = vsel %vm1727_vm0, %v1740_v40, 0.0 }
 0x1ba   : > { %v1642_v62 = vpop.f32.mrf.mxu2 }
 0x1bb   : > { %v1655_v5 = vpop.f32.mrf.mxu3 }
 0x1ca   : > { %v1666_v38 = vpop.f32.mrf.mxu0 }
 0x1cb   : > { %v1679_v23 = vpop.f32.mrf.mxu1  ;;  %v1667_v27 = vadd.f32 %v1666_v38, %v1653_v1 }
 0x1cd   : > { %v1680_v43 = vadd.f32 %v1679_v23, %v1667_v27 }
 0x1d2   : > { %v1692_v51 = vpop.f32.mrf.mxu2  ;;  %v1668_v2 = vpop.f32.mrf.mxu0 }
 0x1d3   : > { %v1693_v59 = vadd.f32 %v1692_v51, %v1680_v43  ;;  %v1705_v61 = vpop.f32.mrf.mxu3  ;;  %v1681_v18 = vpop.f32.mrf.mxu1 }
 0x1d5   : > { %v1706_v22 = vadd.f32 %v1705_v61, %v1693_v59 }
 0x1d7   : > { %v1724_v10 = vadd.f32 %v1720_v15, %v1706_v22 }
 0x1d9   : > { %v1726_v60 = vmul.f32 %v1724_v10, %v4444_v31  ;;  %v1741_v32 = vmul.f32 %v1724_v10, %v1724_v10 }
 0x1da   : > { %v1694_v0 = vpop.f32.mrf.mxu2 }
 0x1db   : > { %v1707_v19 = vpop.f32.mrf.mxu3  ;;  %v1729_v24 = vsel %vm1727_vm0, %v1726_v60, 0.0  ;;  %v1743_v11 = vsel %vm1727_vm0, %v1741_v32, 0.0 }
 0x1dc   : > { %v1730_v13 = vadd.f32 %v1729_v24, %v1728_v48  ;;  %v1744_v49 = vadd.f32 %v1743_v11, %v1742_v42 }
 0x1de   : > { %1731 = vadd.xlane.f32.xlu0 %v1730_v13 }
 0x1e6   : > { %1745 = vadd.xlane.f32.xlu0 %v1744_v49 }
 0x251   : > { %v1732_v30 = vpop.xlane.xlu0 %1731 }
 0x252   : > { %v1733_v47 = vrot.slane %v1732_v30, 4 }
 0x254   : > { %v1734_v36 = vadd.f32 %v1733_v47, %v1732_v30 }
 0x256   : > { %v1735_v53 = vrot.slane %v1734_v36, 2 }
 0x258   : > { %v1736_v54 = vadd.f32 %v1735_v53, %v1734_v36 }
 0x259   : > { %v1746_v50 = vpop.xlane.xlu0 %1745 }
 0x25a   : > { %v1747_v3 = vrot.slane %v1746_v50, 4  ;;  %v1737_v44 = vrot.slane %v1736_v54, 1 }
 0x25c   : > { %v1748_v7 = vadd.f32 %v1747_v3, %v1746_v50  ;;  %v1738_v45 = vadd.f32 %v1737_v44, %v1736_v54 }
 0x25e   : > { %v1749_v8 = vrot.slane %v1748_v7, 2  ;;  %2701 = vpush %v1738_v45 }
 0x260   : > { %v1750_v33 = vadd.f32 %v1749_v8, %v1748_v7 }
 0x262   : > { %v1751_v52 = vrot.slane %v1750_v33, 1 }
 0x264   : > { %v1752_v12 = vadd.f32 %v1751_v52, %v1750_v33 }
 0x266   : > { %2703 = vpush %v1752_v12 }
 0x28f   : > { %s2702_s8 = spop %2701 }
 0x297   : > { %s2704_s4 = spop %2703 }
 0x298   : > { %s1754_s5 = sadd.f32 1e-08, %s2704_s4 }
 0x29a   : > { %v1755_v16 = vstv %s1754_s5 }
 0x29b   : > { %2723 = vrcp.f32 %v1755_v16  ;;  %v1767_v29 = vand.u32 2147483648, %v1755_v16  ;;  %v1765_v46 = vand.u32 2147483647, %v1755_v16  ;;  %vm1761_vm2 = vweird.f32 %v1755_v16 }
 0x29d   : > { %v1768_v20 = vor.u32 1.1754944e-38, %v1767_v29  ;;  %vm1766_vm4 = vcmp.eq.f32.partialorder %v1765_v46, 8.507059e+37 }
 0x2a1   : > { %v2724_v17 = vpop.eup %2723 }
 0x2a2   : > { %v1757_v21 = vmul.f32 %v2724_v17, %v1755_v16  ;;  %vm1762_vm1 = vweird.f32 %v2724_v17 }
 0x2a3   : > { %vm1763_vm3 = vmor %vm1761_vm2, %vm1762_vm1 }
 0x2a4   : > { %v1758_v25 = vsub.f32 1.0, %v1757_v21 }
 0x2a6   : > { %v1759_v34 = vmul.f32 %v2724_v17, %v1758_v25 }
 0x2a8   : > { %v1760_v56 = vadd.f32 %v2724_v17, %v1759_v34 }
 0x2aa   : > { %v1764_v26 = vsel %vm1763_vm3, %v2724_v17, %v1760_v56 }
 0x2ab   : > { %v1769_v37 = vsel %vm1766_vm4, %v1768_v20, %v1764_v26 }
 0x2ac   : > { %2705 = vpush %v1769_v37 }
 0x2dd   : > { %s2706_s6 = spop %2705 }
 0x2de   : > { %s1771_s7 = smul.f32 %s2706_s6, %s2702_s8 }
 0x2e0   : > { %v1772_v41 = vstv %s1771_s7 }
 0x2e1   : > { %v1773_v39 = vmul.f32 %v1772_v41, %v1723_v55  ;;  %v1774_v1 = vmul.f32 %v1772_v41, %v1724_v10 }
 0x2e3   : > { %v1789_v57 = vsub.f32 %v4402_v63, %v1773_v39  ;;  %v1790_v58 = vsub.f32 %v4444_v31, %v1774_v1  ;;  %v1775_v62 = vmul.f32 %v1773_v39, %v1773_v39  ;;  %v1776_v5 = vmul.f32 %v1774_v1, %v1774_v1 }
 0x2e5   : > { %v1777_v6 = vsel %vm1727_vm0, %v1775_v62, 0.0  ;;  %v1778_v9 = vsel %vm1727_vm0, %v1776_v5, 0.0  ;;  %v1791_v38 = vmul.f32 %v1789_v57, %v1789_v57  ;;  %v1792_v23 = vmul.f32 %v1790_v58, %v1790_v58 }
 0x2e6   : > { %v1779_v14 = vadd.f32 %v1778_v9, %v1777_v6 }
 0x2e7   : > { %v1793_v27 = vsel %vm1727_vm0, %v1791_v38, 0.0  ;;  %v1794_v28 = vsel %vm1727_vm0, %v1792_v23, 0.0 }
 0x2e8   : > { %1780 = vadd.xlane.f32.xlu1 %v1779_v14  ;;  %v1795_v35 = vadd.f32 %v1794_v28, %v1793_v27 }
 0x2f0   : > { %1796 = vadd.xlane.f32.xlu1 %v1795_v35 }
 0x35b   : > { %v1781_v43 = vpop.xlane.xlu1 %1780 }
 0x35c   : > { %v1782_v63 = vrot.slane %v1781_v43, 4 }
 0x35e   : > { %v1783_v51 = vadd.f32 %v1782_v63, %v1781_v43 }
 0x360   : > { %v1784_v31 = vrot.slane %v1783_v51, 2 }
 0x362   : > { %v1785_v55 = vadd.f32 %v1784_v31, %v1783_v51 }
 0x363   : > { %v1797_v59 = vpop.xlane.xlu1 %1796 }
 0x364   : > { %v1798_v61 = vrot.slane %v1797_v59, 4  ;;  %v1786_v2 = vrot.slane %v1785_v55, 1 }
 0x366   : > { %v1799_v18 = vadd.f32 %v1798_v61, %v1797_v59  ;;  %v1787_v15 = vadd.f32 %v1786_v2, %v1785_v55 }
 0x368   : > { %v1800_v22 = vrot.slane %v1799_v18, 2  ;;  %2707 = vpush %v1787_v15 }
 0x36a   : > { %v1801_v10 = vadd.f32 %v1800_v22, %v1799_v18 }
 0x36c   : > { %v1802_v4 = vrot.slane %v1801_v10, 1 }
 0x36e   : > { %v1803_v60 = vadd.f32 %v1802_v4, %v1801_v10 }
 0x370   : > { %2709 = vpush %v1803_v60 }
 0x399   : > { %s2708_s9 = spop %2707 }
 0x3a1   : > { %s2710_s10 = spop %2709 }
 0x3a2   : > { %s1805_s11 = sadd.f32 1e-08, %s2710_s10 }
 0x3a4   : > { %v1806_v0 = vstv %s1805_s11 }
 0x3a5   : > { %2725 = vrcp.f32 %v1806_v0  ;;  %v1818_v13 = vand.u32 2147483648, %v1806_v0  ;;  %v1816_v40 = vand.u32 2147483647, %v1806_v0  ;;  %vm1812_vm6 = vweird.f32 %v1806_v0 }
 0x3a7   : > { %v1819_v42 = vor.u32 1.1754944e-38, %v1818_v13  ;;  %vm1817_vm8 = vcmp.eq.f32.partialorder %v1816_v40, 8.507059e+37 }
 0x3ab   : > { %v2726_v19 = vpop.eup %2725 }
 0x3ac   : > { %v1808_v48 = vmul.f32 %v2726_v19, %v1806_v0  ;;  %vm1813_vm5 = vweird.f32 %v2726_v19 }
 0x3ad   : > { %vm1814_vm7 = vmor %vm1812_vm6, %vm1813_vm5 }
 0x3ae   : > { %v1809_v24 = vsub.f32 1.0, %v1808_v48 }
 0x3b0   : > { %v1810_v32 = vmul.f32 %v2726_v19, %v1809_v24 }
 0x3b2   : > { %v1811_v11 = vadd.f32 %v2726_v19, %v1810_v32 }
 0x3b4   : > { %v1815_v49 = vsel %vm1814_vm7, %v2726_v19, %v1811_v11 }
 0x3b5   : > { %v1820_v30 = vsel %vm1817_vm8, %v1819_v42, %v1815_v49 }
 0x3b6   : > { %2711 = vpush %v1820_v30 }
 0x3e7   : > { %s2712_s14 = spop %2711 }
 0x3e8   : > { %s1822_s15 = smul.f32 %s2712_s14, %s2708_s9 }
 0x3ea   : > { %s1823_s16 = sadd.f32 1e-08, %s1822_s15 }
 0x3ec   : > { %v1824_v47 = vstv %s1823_s16 }
 0x3ed   : > { %2727 = vlog2.f32 %v1824_v47 }
 0x3f3   : > { %v2728_v36 = vpop.eup %2727 }
 0x3f4   : > { %v1826_v53 = vmul.f32 0.6931472, %v2728_v36 }
 0x3f6   : > { %2713 = vpush %v1826_v53 }
 0x427   : > { %s2714_s17 = spop %2713 }
 0x428   : > { %s1828_s18 = smul.f32 0.4342945, %s2714_s17 }
 0x42a   : > { %s1829_s22 = ssub.f32 0.0, %s1828_s18 }
 0x42c   : > { %v1830_v54 = vstv %s1829_s22 }
 0x42d   : > { %1831 = vst [vmem:[%s186_s21] sm:$0x1] %v1830_v54 }
 0x42e PF: > { %s13_s12 = sadd.s32 1, %s2735_s12  }
 0x42f   : > { %p10_p4 = scmp.ge.s32.totalorder %s13_s12, 4  }
 0x431   :  { %12 = sbr.rel (!%p10_p4) target bundleno = 1 (0x1), region = 65 }

// kernel: hybrid_loss.2
= control target key start
LH: loop header
LB: loop body
LE: loop exit
PB: predicated region body
PF: predicated region fallthrough
CT: control target
= control target key end

     0   :  { %8 = vsyncpa [#allocation3], 0  ;;  %s4750_s12 = smov 0   ;;  %s4752_s13 = smov 0   ;;  %s7337_s0 = inlined_call_operand.vmem [shape: f32[514,16], index: 0, kind: input, shape index: {}]   ;;  %s7338_s1 = inlined_call_operand.vmem [shape: f32[514,16], index: 1, kind: input, shape index: {}]   ;;  %s7339_s2 = inlined_call_operand.vmem [shape: f32[16,16], index: 2, kind: input, shape index: {}]   ;;  %s7340_s3 = inlined_call_operand.vmem [shape: f32[1,2], index: 3, kind: output, shape index: {}]  }
   0x1   :  { %s4754_s14 = smov 0  }
   0x2 LB: > { %s3610_s15 = sadd.s32 4294967295, %s4726_s14   ;;  %s26_s16 = sadd.s32 1, %s4722_s13  ;;  %s4726_s14 = sphi %s4754_s14, %s14_s14   ;;  %s4722_s13 = sphi %s4752_s13, %s7515_s13   ;;  %s4718_s12 = sphi %s4750_s12, %s7514_s12  }
   0x3   : > { %p28_p0 = scmp.ge.s32.totalorder %s26_s16, 2  ;;  %p3613_p1 = scmp.ge.s32.totalorder %s4726_s14, 1 }
   0x4   : > { %p183_p2 = scmp.lt.s32.totalorder %s4726_s14, 3 }
   0x5   : > { %s7517_s16 = smov (%p28_p0, %s26_s16), 0 }
   0x6   : > { %p184_p3 = pnand %p3613_p1, %p183_p2 }
   0x8   : > { %187 = sbr.rel (%p184_p3) target bundleno = 922 (0x39a), region = 32 }
   0xd   : > { %v659_v0 = vld [vmem:[%s7339_s2 + $0x8] sm:$0xff]  ;;  %v658_v1 = vld [vmem:[%s7339_s2] sm:$0xff]  ;;  %s3614_s21 = sshll.u32 %s4718_s12, 6  ;;  %v394_v2 = vlaneseq  ;;  %vm788_vm1 = vcmask 130048   ;;  %s3619_s29 = sshll.u32 %s4718_s12, 9 }
   0xe   : > { %995 = vmatpush.msra.mxu0 %v659_v0  ;;  %2100 = vmatpush.msra.mxu1 %v659_v0  ;;  %p226_p4 = scmp.lt.s32.totalorder %s3614_s21, 64  ;;  %p255_p5 = scmp.eq.s32.totalorder %s4718_s12, 0 }
   0xf   : > { %3754 = vmatpush.msra.mxu2 %v659_v0  ;;  %3756 = vmatpush.msra.mxu3 %v659_v0  ;;  %v4779_v3 = vand.u32 127, %v394_v2  ;;  %s4728_s30 = smov 0.0   ;;  %s3542_s10 = sshll.u32 %s7340_s3, 4  ;;  %s3543_s10 = int_to_ptr.vmem [resolvable:$true] %s3542_s10 }
  0x10   : > { %996 = vmatpush.msra.mxu0 %v658_v1  ;;  %2101 = vmatpush.msra.mxu1 %v658_v1  ;;  %s7519_s21 = smov (!%p226_p4, %s3614_s21), 64  ;;  %3762 = sst [smem:[#allocation2]] (%p255_p5), %s4728_s30 }
  0x11   : > { %3755 = vmatpush.msra.mxu2 %v658_v1  ;;  %3757 = vmatpush.msra.mxu3 %v658_v1  ;;  %s3615_s22 = sshll.u32 %s7519_s21, 3  ;;  %vm398_vm0 = vcmp.lt.s32.totalorder %v4779_v3, 16  ;;  %3763 = sst [smem:[#allocation2 + $0x1]] (%p255_p5), %s4728_s30 }
  0x12   : > { %s4784_s25 = scalar_lea.vmem %s7337_s0, %s3615_s22  ;;  %s4789_s28 = scalar_lea.vmem %s7338_s1, %s3615_s22 }
  0x13   : > { %v4792_v4 = vld [vmem:[%s4784_s25] sm:$0xff]  ;;  %v4803_v8 = vld [vmem:[%s4784_s25 + $0x8] sm:$0xff]  ;;  %v4823_v16 = vld [vmem:[%s4784_s25 + $0x10] sm:$0xff]  ;;  %s2999_s4 = sld [smem:[#allocation2]]  ;;  %p3768_p6 = scmp.eq.s32.totalorder %s3610_s15, 1 }
  0x14   : > { %v4796_v5 = vld [vmem:[%s4789_s28] sm:$0xff]  ;;  %v660_v6 = vmul.f32 %v4792_v4, %v4792_v4  ;;  %v4806_v9 = vld [vmem:[%s4789_s28 + $0x8] sm:$0xff]  ;;  %v661_v12 = vmul.f32 %v4803_v8, %v4803_v8  ;;  %v4826_v17 = vld [vmem:[%s4789_s28 + $0x10] sm:$0xff]  ;;  %v662_v18 = vmul.f32 %v4823_v16, %v4823_v16  ;;  %s3748_s7 = sld [smem:[#allocation2 + $0x1]]  ;;  %s4729_s18 = smov [#allocation2]  }
  0x15   : > { %v1766_v7 = vmul.f32 %v4796_v5, %v4796_v5  ;;  %v1767_v13 = vmul.f32 %v4806_v9, %v4806_v9  ;;  %v1768_v19 = vmul.f32 %v4826_v17, %v4826_v17  ;;  %v268_v22 = vld [vmem:[%s4784_s25 + $0x18] sm:$0xff]  ;;  %v269_v28 = vld [vmem:[%s4784_s25 + $0x20] sm:$0xff]  ;;  %v270_v40 = vld [vmem:[%s4784_s25 + $0x28] sm:$0xff] }
  0x16   : > { %v724_v10 = vsel %vm398_vm0, %v660_v6, 0.0  ;;  %v725_v14 = vsel %vm398_vm0, %v661_v12, 0.0  ;;  %v726_v20 = vsel %vm398_vm0, %v662_v18, 0.0  ;;  %v332_v23 = vld [vmem:[%s4789_s28 + $0x18] sm:$0xff]  ;;  %v663_v24 = vmul.f32 %v268_v22, %v268_v22  ;;  %v333_v29 = vld [vmem:[%s4789_s28 + $0x20] sm:$0xff]  ;;  %v334_v41 = vld [vmem:[%s4789_s28 + $0x28] sm:$0xff] }
  0x17   : > { %v1830_v11 = vsel %vm398_vm0, %v1766_v7, 0.0  ;;  %3620 = vmatmul.msk.f32.vlgmr.msra.gmra.mxu0 %vm788_vm1, %v724_v10  ;;  %v1831_v15 = vsel %vm398_vm0, %v1767_v13, 0.0  ;;  %v1832_v21 = vsel %vm398_vm0, %v1768_v19, 0.0  ;;  %v1769_v25 = vmul.f32 %v332_v23, %v332_v23  ;;  %v297_v30 = vld [vmem:[%s4784_s25 + $0x100] sm:$0xff]  ;;  %v298_v42 = vld [vmem:[%s4784_s25 + $0x108] sm:$0xff]  ;;  %v271_v52 = vld [vmem:[%s4784_s25 + $0x30] sm:$0xff] }
  0x18   : > { %3684 = vmatmul.msk.f32.vlgmr.msra.gmra.mxu1 %vm788_vm1, %v1830_v11  ;;  %v727_v26 = vsel %vm398_vm0, %v663_v24, 0.0  ;;  %v361_v31 = vld [vmem:[%s4789_s28 + $0x100] sm:$0xff]  ;;  %v692_v32 = vmul.f32 %v297_v30, %v297_v30  ;;  %v664_v34 = vmul.f32 %v269_v28, %v269_v28  ;;  %v1770_v35 = vmul.f32 %v333_v29, %v333_v29  ;;  %v362_v43 = vld [vmem:[%s4789_s28 + $0x108] sm:$0xff]  ;;  %v335_v53 = vld [vmem:[%s4789_s28 + $0x30] sm:$0xff] }
  0x19   : > { %v1833_v27 = vsel %vm398_vm0, %v1769_v25, 0.0  ;;  %v1798_v33 = vmul.f32 %v361_v31, %v361_v31  ;;  %v693_v44 = vmul.f32 %v298_v42, %v298_v42  ;;  %v1799_v45 = vmul.f32 %v362_v43, %v362_v43  ;;  %v299_v54 = vld [vmem:[%s4784_s25 + $0x110] sm:$0xff]  ;;  %v272_v0 = vld [vmem:[%s4784_s25 + $0x38] sm:$0xff]  ;;  %v301_v22 = vld [vmem:[%s4784_s25 + $0x120] sm:$0xff] }
  0x1a   : > { %v756_v36 = vsel %vm398_vm0, %v692_v32, 0.0  ;;  %v728_v38 = vsel %vm398_vm0, %v664_v34, 0.0  ;;  %v1834_v39 = vsel %vm398_vm0, %v1770_v35, 0.0  ;;  %v665_v46 = vmul.f32 %v270_v40, %v270_v40  ;;  %v363_v55 = vld [vmem:[%s4789_s28 + $0x110] sm:$0xff]  ;;  %v336_v1 = vld [vmem:[%s4789_s28 + $0x38] sm:$0xff]  ;;  %v365_v23 = vld [vmem:[%s4789_s28 + $0x120] sm:$0xff] }
  0x1b   : > { %v1862_v37 = vsel %vm398_vm0, %v1798_v33, 0.0  ;;  %3652 = vmatmul.msk.f32.vlgmr.msra.gmra.mxu2 %vm788_vm1, %v756_v36  ;;  %v1771_v47 = vmul.f32 %v334_v41, %v334_v41  ;;  %v757_v48 = vsel %vm398_vm0, %v693_v44, 0.0  ;;  %v1863_v49 = vsel %vm398_vm0, %v1799_v45, 0.0  ;;  %v300_v6 = vld [vmem:[%s4784_s25 + $0x118] sm:$0xff]  ;;  %v274_v32 = vld [vmem:[%s4784_s25 + $0x48] sm:$0xff]  ;;  %v275_v44 = vld [vmem:[%s4784_s25 + $0x50] sm:$0xff] }
  0x1c   : > { %3716 = vmatmul.msk.f32.vlgmr.msra.gmra.mxu3 %vm788_vm1, %v1862_v37  ;;  %v729_v50 = vsel %vm398_vm0, %v665_v46, 0.0  ;;  %v694_v56 = vmul.f32 %v299_v54, %v299_v54  ;;  %v1800_v57 = vmul.f32 %v363_v55, %v363_v55  ;;  %v666_v58 = vmul.f32 %v271_v52, %v271_v52  ;;  %v364_v7 = vld [vmem:[%s4789_s28 + $0x118] sm:$0xff]  ;;  %v338_v33 = vld [vmem:[%s4789_s28 + $0x48] sm:$0xff]  ;;  %v339_v45 = vld [vmem:[%s4789_s28 + $0x50] sm:$0xff] }
  0x1d   : > { %v1835_v51 = vsel %vm398_vm0, %v1771_v47, 0.0  ;;  %v1772_v59 = vmul.f32 %v335_v53, %v335_v53  ;;  %v695_v10 = vmul.f32 %v300_v6, %v300_v6  ;;  %v1801_v11 = vmul.f32 %v364_v7, %v364_v7  ;;  %v302_v34 = vld [vmem:[%s4784_s25 + $0x128] sm:$0xff]  ;;  %v303_v46 = vld [vmem:[%s4784_s25 + $0x130] sm:$0xff] }
  0x1e   : > { %v758_v60 = vsel %vm398_vm0, %v694_v56, 0.0  ;;  %v1864_v61 = vsel %vm398_vm0, %v1800_v57, 0.0  ;;  %v730_v62 = vsel %vm398_vm0, %v666_v58, 0.0  ;;  %v667_v12 = vmul.f32 %v272_v0, %v272_v0  ;;  %v366_v35 = vld [vmem:[%s4789_s28 + $0x128] sm:$0xff]  ;;  %v367_v47 = vld [vmem:[%s4789_s28 + $0x130] sm:$0xff]  ;;  %v276_v56 = vld [vmem:[%s4784_s25 + $0x58] sm:$0xff] }
  0x1f   : > { %3621 = vmatmul.msk.f32.gmra.mxu0 %vm788_vm1, %v725_v14  ;;  %v1836_v63 = vsel %vm398_vm0, %v1772_v59, 0.0  ;;  %v1773_v13 = vmul.f32 %v336_v1, %v336_v1  ;;  %v759_v14 = vsel %vm398_vm0, %v695_v10, 0.0  ;;  %v696_v24 = vmul.f32 %v301_v22, %v301_v22  ;;  %v340_v57 = vld [vmem:[%s4789_s28 + $0x58] sm:$0xff]  ;;  %v277_v10 = vld [vmem:[%s4784_s25 + $0x60] sm:$0xff] }
  0x20   : > { %3685 = vmatmul.msk.f32.gmra.mxu1 %vm788_vm1, %v1831_v15  ;;  %v1865_v15 = vsel %vm398_vm0, %v1801_v11, 0.0  ;;  %v731_v18 = vsel %vm398_vm0, %v667_v12, 0.0  ;;  %v1802_v25 = vmul.f32 %v365_v23, %v365_v23  ;;  %v697_v36 = vmul.f32 %v302_v34, %v302_v34  ;;  %v304_v58 = vld [vmem:[%s4784_s25 + $0x138] sm:$0xff]  ;;  %v341_v11 = vld [vmem:[%s4789_s28 + $0x60] sm:$0xff] }
  0x21   : > { %v1837_v19 = vsel %vm398_vm0, %v1773_v13, 0.0  ;;  %v760_v28 = vsel %vm398_vm0, %v696_v24, 0.0  ;;  %v1803_v37 = vmul.f32 %v366_v35, %v366_v35  ;;  %v368_v59 = vld [vmem:[%s4789_s28 + $0x138] sm:$0xff]  ;;  %v305_v12 = vld [vmem:[%s4784_s25 + $0x140] sm:$0xff]  ;;  %v278_v24 = vld [vmem:[%s4784_s25 + $0x68] sm:$0xff] }
  0x22   : > { %v1866_v29 = vsel %vm398_vm0, %v1802_v25, 0.0  ;;  %v761_v40 = vsel %vm398_vm0, %v697_v36, 0.0  ;;  %v369_v13 = vld [vmem:[%s4789_s28 + $0x140] sm:$0xff]  ;;  %v342_v25 = vld [vmem:[%s4789_s28 + $0x68] sm:$0xff]  ;;  %v279_v36 = vld [vmem:[%s4784_s25 + $0x70] sm:$0xff] }
  0x23   : > { %3653 = vmatmul.msk.f32.gmra.mxu2 %vm788_vm1, %v757_v48  ;;  %v1867_v41 = vsel %vm398_vm0, %v1803_v37, 0.0  ;;  %v698_v48 = vmul.f32 %v303_v46, %v303_v46  ;;  %v343_v37 = vld [vmem:[%s4789_s28 + $0x70] sm:$0xff] }
  0x24   : > { %3717 = vmatmul.msk.f32.gmra.mxu3 %vm788_vm1, %v1863_v49  ;;  %v1804_v49 = vmul.f32 %v367_v47, %v367_v47 }
  0x25   : > { %v762_v52 = vsel %vm398_vm0, %v698_v48, 0.0  ;;  %v280_v48 = vld [vmem:[%s4784_s25 + $0x78] sm:$0xff] }
  0x26   : > { %v1868_v53 = vsel %vm398_vm0, %v1804_v49, 0.0  ;;  %v344_v49 = vld [vmem:[%s4789_s28 + $0x78] sm:$0xff] }
  0x27   : > { %3622 = vmatmul.msk.f32.gmra.mxu0 %vm788_vm1, %v726_v20  ;;  %v273_v20 = vld [vmem:[%s4784_s25 + $0x40] sm:$0xff] }
  0x28   : > { %3686 = vmatmul.msk.f32.gmra.mxu1 %vm788_vm1, %v1832_v21  ;;  %v337_v21 = vld [vmem:[%s4789_s28 + $0x40] sm:$0xff] }
  0x2b   : > { %3654 = vmatmul.msk.f32.gmra.mxu2 %vm788_vm1, %v758_v60  ;;  %v699_v60 = vmul.f32 %v304_v58, %v304_v58 }
  0x2c   : > { %3718 = vmatmul.msk.f32.gmra.mxu3 %vm788_vm1, %v1864_v61  ;;  %v1805_v61 = vmul.f32 %v368_v59, %v368_v59  ;;  %v281_v59 = vld [vmem:[%s4784_s25 + $0x80] sm:$0xff] }
  0x2d   : > { %v763_v0 = vsel %vm398_vm0, %v699_v60, 0.0  ;;  %v345_v60 = vld [vmem:[%s4789_s28 + $0x80] sm:$0xff] }
  0x2e   : > { %v1869_v1 = vsel %vm398_vm0, %v1805_v61, 0.0 }
  0x2f   : > { %3623 = vmatmul.msk.f32.gmra.mxu0 %vm788_vm1, %v727_v26  ;;  %v668_v26 = vmul.f32 %v273_v20, %v273_v20 }
  0x30   : > { %3687 = vmatmul.msk.f32.gmra.mxu1 %vm788_vm1, %v1833_v27  ;;  %v1774_v27 = vmul.f32 %v337_v21, %v337_v21 }
  0x31   : > { %v732_v30 = vsel %vm398_vm0, %v668_v26, 0.0  ;;  %v673_v26 = vmul.f32 %v278_v24, %v278_v24  ;;  %v374_v24 = vld [vmem:[%s4789_s28 + $0x168] sm:$0xff] }
  0x32   : > { %v1838_v31 = vsel %vm398_vm0, %v1774_v27, 0.0  ;;  %v1779_v27 = vmul.f32 %v342_v25, %v342_v25 }
  0x33   : > { %3655 = vmatmul.msk.f32.gmra.mxu2 %vm788_vm1, %v759_v14  ;;  %v700_v14 = vmul.f32 %v305_v12, %v305_v12  ;;  %v737_v34 = vsel %vm398_vm0, %v673_v26, 0.0  ;;  %v1811_v26 = vmul.f32 %v374_v24, %v374_v24 }
  0x34   : > { %3719 = vmatmul.msk.f32.gmra.mxu3 %vm788_vm1, %v1865_v15  ;;  %v1806_v15 = vmul.f32 %v369_v13, %v369_v13  ;;  %v1843_v35 = vsel %vm398_vm0, %v1779_v27, 0.0 }
  0x35   : > { %v764_v20 = vsel %vm398_vm0, %v700_v14, 0.0 }
  0x36   : > { %v1870_v21 = vsel %vm398_vm0, %v1806_v15, 0.0 }
  0x37   : > { %3624 = vmatmul.msk.f32.gmra.mxu0 %vm788_vm1, %v728_v38  ;;  %v669_v38 = vmul.f32 %v274_v32, %v274_v32 }
  0x38   : > { %3688 = vmatmul.msk.f32.gmra.mxu1 %vm788_vm1, %v1834_v39  ;;  %v1775_v39 = vmul.f32 %v338_v33, %v338_v33 }
  0x39   : > { %v733_v42 = vsel %vm398_vm0, %v669_v38, 0.0  ;;  %v674_v38 = vmul.f32 %v279_v36, %v279_v36 }
  0x3a   : > { %v1839_v43 = vsel %vm398_vm0, %v1775_v39, 0.0  ;;  %v1780_v39 = vmul.f32 %v343_v37, %v343_v37 }
  0x3b   : > { %3656 = vmatmul.msk.f32.gmra.mxu2 %vm788_vm1, %v760_v28  ;;  %v306_v28 = vld [vmem:[%s4784_s25 + $0x148] sm:$0xff]  ;;  %v738_v46 = vsel %vm398_vm0, %v674_v38, 0.0 }
  0x3c   : > { %3720 = vmatmul.msk.f32.gmra.mxu3 %vm788_vm1, %v1866_v29  ;;  %v370_v29 = vld [vmem:[%s4789_s28 + $0x148] sm:$0xff]  ;;  %v1844_v47 = vsel %vm398_vm0, %v1780_v39, 0.0  ;;  %v311_v39 = vld [vmem:[%s4784_s25 + $0x170] sm:$0xff] }
  0x3f   : > { %3625 = vmatmul.msk.f32.gmra.mxu0 %vm788_vm1, %v729_v50  ;;  %v670_v50 = vmul.f32 %v275_v44, %v275_v44 }
  0x40   : > { %3689 = vmatmul.msk.f32.gmra.mxu1 %vm788_vm1, %v1835_v51  ;;  %v1776_v51 = vmul.f32 %v339_v45, %v339_v45 }
  0x41   : > { %v734_v54 = vsel %vm398_vm0, %v670_v50, 0.0  ;;  %v675_v50 = vmul.f32 %v280_v48, %v280_v48 }
  0x42   : > { %v1840_v55 = vsel %vm398_vm0, %v1776_v51, 0.0  ;;  %v1781_v51 = vmul.f32 %v344_v49, %v344_v49  ;;  %v284_v49 = vld [vmem:[%s4784_s25 + $0x98] sm:$0xff] }
  0x43   : > { %3657 = vmatmul.msk.f32.gmra.mxu2 %vm788_vm1, %v761_v40  ;;  %v307_v40 = vld [vmem:[%s4784_s25 + $0x150] sm:$0xff] }
  0x44   : > { %3721 = vmatmul.msk.f32.gmra.mxu3 %vm788_vm1, %v1867_v41  ;;  %v371_v41 = vld [vmem:[%s4789_s28 + $0x150] sm:$0xff] }
  0x47   : > { %3626 = vmatmul.msk.f32.gmra.mxu0 %vm788_vm1, %v730_v62  ;;  %v671_v62 = vmul.f32 %v276_v56, %v276_v56  ;;  %v739_v56 = vsel %vm398_vm0, %v675_v50, 0.0  ;;  %v348_v50 = vld [vmem:[%s4789_s28 + $0x98] sm:$0xff] }
  0x48   : > { %3690 = vmatmul.msk.f32.gmra.mxu1 %vm788_vm1, %v1836_v63  ;;  %v1777_v63 = vmul.f32 %v340_v57, %v340_v57  ;;  %v1845_v57 = vsel %vm398_vm0, %v1781_v51, 0.0 }
  0x49   : > { %v735_v6 = vsel %vm398_vm0, %v671_v62, 0.0  ;;  %v676_v62 = vmul.f32 %v281_v59, %v281_v59  ;;  %v285_v59 = vld [vmem:[%s4784_s25 + $0xa0] sm:$0xff] }
  0x4a   : > { %v1841_v7 = vsel %vm398_vm0, %v1777_v63, 0.0  ;;  %v1782_v63 = vmul.f32 %v345_v60, %v345_v60  ;;  %v312_v60 = vld [vmem:[%s4784_s25 + $0x178] sm:$0xff] }
  0x4b   : > { %3658 = vmatmul.msk.f32.gmra.mxu2 %vm788_vm1, %v762_v52  ;;  %v308_v52 = vld [vmem:[%s4784_s25 + $0x158] sm:$0xff]  ;;  %v740_v12 = vsel %vm398_vm0, %v676_v62, 0.0 }
  0x4c   : > { %3722 = vmatmul.msk.f32.gmra.mxu3 %vm788_vm1, %v1868_v53  ;;  %v372_v53 = vld [vmem:[%s4789_s28 + $0x158] sm:$0xff]  ;;  %v1846_v13 = vsel %vm398_vm0, %v1782_v63, 0.0 }
  0x4f   : > { %3627 = vmatmul.msk.f32.gmra.mxu0 %vm788_vm1, %v731_v18  ;;  %v672_v18 = vmul.f32 %v277_v10, %v277_v10 }
  0x50   : > { %3691 = vmatmul.msk.f32.gmra.mxu1 %vm788_vm1, %v1837_v19  ;;  %v1778_v19 = vmul.f32 %v341_v11, %v341_v11 }
  0x51   : > { %v736_v22 = vsel %vm398_vm0, %v672_v18, 0.0  ;;  %v282_v18 = vld [vmem:[%s4784_s25 + $0x88] sm:$0xff] }
  0x52   : > { %v1842_v23 = vsel %vm398_vm0, %v1778_v19, 0.0  ;;  %v346_v19 = vld [vmem:[%s4789_s28 + $0x88] sm:$0xff] }
  0x53   : > { %3659 = vmatmul.msk.f32.gmra.mxu2 %vm788_vm1, %v763_v0  ;;  %v309_v0 = vld [vmem:[%s4784_s25 + $0x160] sm:$0xff] }
  0x54   : > { %3723 = vmatmul.msk.f32.gmra.mxu3 %vm788_vm1, %v1869_v1  ;;  %v373_v1 = vld [vmem:[%s4789_s28 + $0x160] sm:$0xff] }
  0x57   : > { %3628 = vmatmul.msk.f32.gmra.mxu0 %vm788_vm1, %v732_v30  ;;  %v701_v30 = vmul.f32 %v306_v28, %v306_v28 }
  0x58   : > { %3692 = vmatmul.msk.f32.gmra.mxu1 %vm788_vm1, %v1838_v31  ;;  %v1807_v31 = vmul.f32 %v370_v29, %v370_v29 }
  0x59   : > { %v765_v32 = vsel %vm398_vm0, %v701_v30, 0.0 }
  0x5a   : > { %v1871_v33 = vsel %vm398_vm0, %v1807_v31, 0.0 }
  0x5b   : > { %3660 = vmatmul.msk.f32.gmra.mxu2 %vm788_vm1, %v764_v20  ;;  %v677_v20 = vmul.f32 %v282_v18, %v282_v18 }
  0x5c   : > { %3724 = vmatmul.msk.f32.gmra.mxu3 %vm788_vm1, %v1870_v21  ;;  %v1783_v21 = vmul.f32 %v346_v19, %v346_v19 }
  0x5d   : > { %v741_v30 = vsel %vm398_vm0, %v677_v20, 0.0 }
  0x5e   : > { %v1847_v31 = vsel %vm398_vm0, %v1783_v21, 0.0 }
  0x5f   : > { %3629 = vmatmul.msk.f32.gmra.mxu0 %vm788_vm1, %v733_v42  ;;  %v702_v42 = vmul.f32 %v307_v40, %v307_v40  ;;  %v375_v40 = vld [vmem:[%s4789_s28 + $0x170] sm:$0xff] }
  0x60   : > { %3693 = vmatmul.msk.f32.gmra.mxu1 %vm788_vm1, %v1839_v43  ;;  %v1808_v43 = vmul.f32 %v371_v41, %v371_v41  ;;  %v1812_v48 = vmul.f32 %v375_v40, %v375_v40 }
  0x61   : > { %v766_v44 = vsel %vm398_vm0, %v702_v42, 0.0  ;;  %v706_v42 = vmul.f32 %v311_v39, %v311_v39 }
  0x62   : > { %v1872_v45 = vsel %vm398_vm0, %v1808_v43, 0.0 }
  0x63   : > { %3661 = vmatmul.msk.f32.gmra.mxu2 %vm788_vm1, %v765_v32  ;;  %v283_v32 = vld [vmem:[%s4784_s25 + $0x90] sm:$0xff] }
  0x64   : > { %3725 = vmatmul.msk.f32.gmra.mxu3 %vm788_vm1, %v1871_v33  ;;  %v347_v33 = vld [vmem:[%s4789_s28 + $0x90] sm:$0xff]  ;;  %v678_v36 = vmul.f32 %v283_v32, %v283_v32 }
  0x65   : > { %v1784_v37 = vmul.f32 %v347_v33, %v347_v33 }
  0x67   : > { %3630 = vmatmul.msk.f32.gmra.mxu0 %vm788_vm1, %v734_v54  ;;  %v703_v54 = vmul.f32 %v308_v52, %v308_v52 }
  0x68   : > { %3694 = vmatmul.msk.f32.gmra.mxu1 %vm788_vm1, %v1840_v55  ;;  %v1809_v55 = vmul.f32 %v372_v53, %v372_v53  ;;  %v770_v53 = vsel %vm398_vm0, %v706_v42, 0.0 }
  0x69   : > { %v767_v58 = vsel %vm398_vm0, %v703_v54, 0.0  ;;  %v1876_v54 = vsel %vm398_vm0, %v1812_v48, 0.0 }
  0x6a   : > { %v1873_v61 = vsel %vm398_vm0, %v1809_v55, 0.0  ;;  %v679_v55 = vmul.f32 %v284_v49, %v284_v49 }
  0x6b   : > { %3662 = vmatmul.msk.f32.gmra.mxu2 %vm788_vm1, %v766_v44 }
  0x6c   : > { %3726 = vmatmul.msk.f32.gmra.mxu3 %vm788_vm1, %v1872_v45 }
  0x6f   : > { %3631 = vmatmul.msk.f32.gmra.mxu0 %vm788_vm1, %v735_v6  ;;  %v704_v6 = vmul.f32 %v309_v0, %v309_v0  ;;  %v743_v0 = vsel %vm398_vm0, %v679_v55, 0.0 }
  0x70   : > { %3695 = vmatmul.msk.f32.gmra.mxu1 %vm788_vm1, %v1841_v7  ;;  %v1810_v7 = vmul.f32 %v373_v1, %v373_v1 }
  0x71   : > { %v768_v14 = vsel %vm398_vm0, %v704_v6, 0.0  ;;  %v349_v6 = vld [vmem:[%s4789_s28 + $0xa0] sm:$0xff] }
  0x72   : > { %v1874_v15 = vsel %vm398_vm0, %v1810_v7, 0.0  ;;  %v707_v7 = vmul.f32 %v312_v60, %v312_v60  ;;  %v1786_v19 = vmul.f32 %v349_v6, %v349_v6 }
  0x73   : > { %3663 = vmatmul.msk.f32.gmra.mxu2 %vm788_vm1, %v767_v58 }
  0x74   : > { %3727 = vmatmul.msk.f32.gmra.mxu3 %vm788_vm1, %v1873_v61  ;;  %v771_v20 = vsel %vm398_vm0, %v707_v7, 0.0 }
  0x77   : > { %3632 = vmatmul.msk.f32.gmra.mxu0 %vm788_vm1, %v736_v22 }
  0x78   : > { %3696 = vmatmul.msk.f32.gmra.mxu1 %vm788_vm1, %v1842_v23  ;;  %v310_v23 = vld [vmem:[%s4784_s25 + $0x168] sm:$0xff] }
  0x79   : > { %v705_v25 = vmul.f32 %v310_v23, %v310_v23 }
  0x7b   : > { %3664 = vmatmul.msk.f32.gmra.mxu2 %vm788_vm1, %v768_v14  ;;  %v680_v14 = vmul.f32 %v285_v59, %v285_v59  ;;  %v351_v59 = vld [vmem:[%s4789_s28 + $0xb0] sm:$0xff] }
  0x7c   : > { %3728 = vmatmul.msk.f32.gmra.mxu3 %vm788_vm1, %v1874_v15 }
  0x7f   : > { %3633 = vmatmul.msk.f32.gmra.mxu0 %vm788_vm1, %v737_v34  ;;  %v769_v34 = vsel %vm398_vm0, %v705_v25, 0.0 }
  0x80   : > { %3697 = vmatmul.msk.f32.gmra.mxu1 %vm788_vm1, %v1843_v35  ;;  %v1875_v35 = vsel %vm398_vm0, %v1811_v26, 0.0 }
  0x83   : > { %3665 = vmatmul.msk.f32.gmra.mxu2 %vm788_vm1, %v769_v34  ;;  %v286_v34 = vld [vmem:[%s4784_s25 + $0xa8] sm:$0xff] }
  0x84   : > { %3729 = vmatmul.msk.f32.gmra.mxu3 %vm788_vm1, %v1875_v35 }
  0x87   : > { %3634 = vmatmul.msk.f32.gmra.mxu0 %vm788_vm1, %v738_v46  ;;  %v742_v46 = vsel %vm398_vm0, %v678_v36, 0.0 }
  0x88   : > { %3698 = vmatmul.msk.f32.gmra.mxu1 %vm788_vm1, %v1844_v47  ;;  %v1848_v47 = vsel %vm398_vm0, %v1784_v37, 0.0 }
  0x8b   : > { %3666 = vmatmul.msk.f32.gmra.mxu2 %vm788_vm1, %v770_v53 }
  0x8c   : > { %3730 = vmatmul.msk.f32.gmra.mxu3 %vm788_vm1, %v1876_v54 }
  0x8f   : > { %3635 = vmatmul.msk.f32.gmra.mxu0 %vm788_vm1, %v739_v56  ;;  %v1785_v56 = vmul.f32 %v348_v50, %v348_v50  ;;  %v5120_v50 = vshrl.u32 %v394_v2, 7  ;;  %v287_v2 = vld [vmem:[%s4784_s25 + $0xb0] sm:$0xff] }
  0x90   : > { %3699 = vmatmul.msk.f32.gmra.mxu1 %vm788_vm1, %v1845_v57 }
  0x91   : > { %v1849_v1 = vsel %vm398_vm0, %v1785_v56, 0.0 }
  0x93   : > { %3667 = vmatmul.msk.f32.gmra.mxu2 %vm788_vm1, %v771_v20 }
  0x94   : > { %v998_v10 = vpop.f32.mrf.mxu0 }
  0x95   : > { %v2103_v11 = vpop.f32.mrf.mxu1  ;;  %v999_v22 = vadd.f32 1e-12, %v998_v10 }
  0x96   : > { %v2104_v27 = vadd.f32 1e-12, %v2103_v11  ;;  %v376_v11 = vld [vmem:[%s4789_s28 + $0x178] sm:$0xff] }
  0x97   : > { %3636 = vmatmul.msk.f32.gmra.mxu0 %vm788_vm1, %v740_v12  ;;  %3796 = vlog2.f32 %v999_v22  ;;  %v1813_v23 = vmul.f32 %v376_v11, %v376_v11  ;;  %v682_v11 = vmul.f32 %v287_v2, %v287_v2 }
  0x98   : > { %3700 = vmatmul.msk.f32.gmra.mxu1 %vm788_vm1, %v1846_v13  ;;  %3798 = vlog2.f32 %v2104_v27 }
  0x99   : > { %v1877_v35 = vsel %vm398_vm0, %v1813_v23, 0.0 }
  0x9a   : > { %3731 = vmatmul.msk.f32.gmra.mxu3 %vm788_vm1, %v1877_v35 }
  0x9c   : > { %v1001_v28 = vpop.f32.mrf.mxu0 }
  0x9d   : > { %v2106_v29 = vpop.f32.mrf.mxu1  ;;  %v1002_v38 = vadd.f32 1e-12, %v1001_v28  ;;  %v3797_v41 = vpop.eup %3796  ;;  %v744_v28 = vsel %vm398_vm0, %v680_v14, 0.0 }
  0x9e   : > { %v2107_v43 = vadd.f32 1e-12, %v2106_v29  ;;  %v3799_v51 = vpop.eup %3798  ;;  %v1191_v52 = vmul.f32 0.6931472, %v3797_v41  ;;  %v1850_v29 = vsel %vm398_vm0, %v1786_v19, 0.0  ;;  %v681_v41 = vmul.f32 %v286_v34, %v286_v34 }
  0x9f   : > { %3637 = vmatmul.msk.f32.gmra.mxu0 %vm788_vm1, %v741_v30  ;;  %3800 = vlog2.f32 %v1002_v38  ;;  %v2296_v57 = vmul.f32 0.6931472, %v3799_v51  ;;  %v350_v38 = vld [vmem:[%s4789_s28 + $0xa8] sm:$0xff]  ;;  %v5122_v51 = vstv %s3619_s29 }
  0xa0   : > { %3701 = vmatmul.msk.f32.gmra.mxu1 %vm788_vm1, %v1847_v31  ;;  %3802 = vlog2.f32 %v2107_v43  ;;  %v1318_v58 = vmul.f32 -0.35, %v1191_v52  ;;  %v1510_v21 = vmul.f32 0.15, %v1191_v52  ;;  %v745_v52 = vsel %vm398_vm0, %v681_v41, 0.0 }
  0xa1   : > { %v2423_v10 = vmul.f32 -0.35, %v2296_v57  ;;  %v2615_v25 = vmul.f32 0.15, %v2296_v57  ;;  %v402_v57 = vadd.s32 8, %v5120_v50  ;;  %v466_v7 = vadd.s32 %v5122_v51, %v5120_v50 }
  0xa2   : > { %v1382_v13 = vmul.f32 1.442695, %v1318_v58  ;;  %v1574_v30 = vmul.f32 1.442695, %v1510_v21 }
  0xa3   : > { %v2487_v24 = vmul.f32 1.442695, %v2423_v10  ;;  %v2679_v36 = vmul.f32 1.442695, %v2615_v25  ;;  %vm530_vm2 = vcmp.lt.s32.totalorder %v466_v7, 514  ;;  %v746_v25 = vsel %vm398_vm0, %v682_v11, 0.0 }
  0xa4   : > { %v1004_v44 = vpop.f32.mrf.mxu0  ;;  %3804 = vpow2.f32 %v1382_v13  ;;  %vm5154_vm4 = vmand %vm398_vm0, %vm530_vm2 }
  0xa5   : > { %v2109_v45 = vpop.f32.mrf.mxu1  ;;  %v3801_v61 = vpop.eup %3800  ;;  %v1005_v18 = vadd.f32 1e-12, %v1004_v44  ;;  %v1787_v44 = vmul.f32 %v350_v38, %v350_v38 }
  0xa6   : > { %v3803_v12 = vpop.eup %3802  ;;  %v1193_v15 = vmul.f32 0.6931472, %v3801_v61  ;;  %v2110_v22 = vadd.f32 1e-12, %v2109_v45 }
  0xa7   : > { %3638 = vmatmul.msk.f32.gmra.mxu0 %vm788_vm1, %v742_v46  ;;  %v2298_v26 = vmul.f32 0.6931472, %v3803_v12  ;;  %3806 = vlog2.f32 %v1005_v18  ;;  %v1851_v56 = vsel %vm398_vm0, %v1787_v44, 0.0  ;;  %v1788_v12 = vmul.f32 %v351_v59, %v351_v59 }
  0xa8   : > { %3702 = vmatmul.msk.f32.gmra.mxu1 %vm788_vm1, %v1848_v47  ;;  %v1319_v27 = vmul.f32 -0.35, %v1193_v15  ;;  %v1511_v31 = vmul.f32 0.15, %v1193_v15  ;;  %3808 = vlog2.f32 %v2110_v22 }
  0xa9   : > { %3810 = vpow2.f32 %v2487_v24  ;;  %v2424_v37 = vmul.f32 -0.35, %v2298_v26  ;;  %v2616_v39 = vmul.f32 0.15, %v2298_v26  ;;  %v1852_v26 = vsel %vm398_vm0, %v1788_v12, 0.0 }
  0xaa   : > { %v1384_v40 = vmul.f32 1.442695, %v1319_v27  ;;  %v3805_v42 = vpop.eup %3804  ;;  %3812 = vpow2.f32 %v1574_v30  ;;  %v1576_v43 = vmul.f32 1.442695, %v1511_v31  ;;  %v403_v27 = vadd.s32 16, %v5120_v50  ;;  %v352_v30 = vld [vmem:[%s4789_s28 + $0xb8] sm:$0xff] }
  0xab   : > { %3814 = vpow2.f32 %v2679_v36  ;;  %v2489_v46 = vmul.f32 1.442695, %v2424_v37  ;;  %v2681_v48 = vmul.f32 1.442695, %v2616_v39  ;;  %v1702_v61 = vmul.f32 %v3805_v42, %v4792_v4 }
  0xac   : > { %v1007_v62 = vpop.f32.mrf.mxu0  ;;  %3816 = vpow2.f32 %v1384_v40  ;;  %v1789_v44 = vmul.f32 %v352_v30, %v352_v30 }
  0xad   : > { %v5092_v63 = vpop.f32.mrf.mxu1  ;;  %v3807_v45 = vpop.eup %3806  ;;  %3818 = vpow2.f32 %v1576_v43  ;;  %v1008_v54 = vadd.f32 1e-12, %v1007_v62 }
  0xae   : > { %v3809_v47 = vpop.eup %3808  ;;  %v1195_v53 = vmul.f32 0.6931472, %v3807_v45  ;;  %3820 = vpow2.f32 %v2489_v46  ;;  %v404_v46 = vadd.s32 24, %v5120_v50  ;;  %v1853_v2 = vsel %vm398_vm0, %v1789_v44, 0.0 }
  0xaf   : > { %3639 = vmatmul.msk.f32.gmra.mxu0 %vm788_vm1, %v743_v0  ;;  %v3811_v49 = vpop.eup %3810  ;;  %v2300_v58 = vmul.f32 0.6931472, %v3809_v47  ;;  %3822 = vpow2.f32 %v2681_v48  ;;  %v5169_v48 = vadd.s32 %v5122_v51, %v403_v27 }
  0xb0   : > { %3703 = vmatmul.msk.f32.gmra.mxu1 %vm788_vm1, %v1849_v1  ;;  %v3813_v60 = vpop.eup %3812  ;;  %v2807_v0 = vmul.f32 %v3811_v49, %v4796_v5  ;;  %v2113_v1 = vadd.f32 1e-12, %v5092_v63  ;;  %v1320_v10 = vmul.f32 -0.35, %v1195_v53  ;;  %3824 = vlog2.f32 %v1008_v54 }
  0xb1   : > { %v3815_v6 = vpop.eup %3814  ;;  %v467_v5 = vadd.s32 %v5122_v51, %v402_v57  ;;  %v2425_v13 = vmul.f32 -0.35, %v2300_v58  ;;  %v1512_v20 = vmul.f32 0.15, %v1195_v53  ;;  %v2617_v23 = vmul.f32 0.15, %v2300_v58 }
  0xb2   : > { %v3817_v4 = vpop.eup %3816  ;;  %v2871_v63 = vsub.f32 %v1702_v61, %v2807_v0  ;;  %v2935_v15 = vsub.f32 %v3813_v60, %v3815_v6  ;;  %3826 = vlog2.f32 %v2113_v1  ;;  %v1386_v22 = vmul.f32 1.442695, %v1320_v10  ;;  %v313_v0 = vld [vmem:[%s4784_s25 + $0x180] sm:$0xff] }
  0xb3   : > { %v3819_v14 = vpop.eup %3818  ;;  %vm531_vm3 = vcmp.lt.s32.totalorder %v467_v5, 514  ;;  %v1703_v37 = vmul.f32 %v3817_v4, %v4803_v8  ;;  %v1578_v40 = vmul.f32 1.442695, %v1512_v20  ;;  %v5184_v60 = vadd.s32 %v5122_v51, %v404_v46  ;;  %v377_v1 = vld [vmem:[%s4789_s28 + $0x180] sm:$0xff] }
  0xb4   : > { %v1010_v32 = vpop.f32.mrf.mxu0  ;;  %v3821_v19 = vpop.eup %3820  ;;  %v3268_v34 = vmul.f32 %v2935_v15, %v2935_v15  ;;  %vm5174_vm5 = vmand %vm398_vm0, %vm531_vm3  ;;  %v405_v61 = vadd.s32 32, %v5120_v50  ;;  %v406_v10 = vadd.s32 40, %v5120_v50  ;;  %vm532_vm6 = vcmp.lt.s32.totalorder %v5169_v48, 514 }
  0xb5   : > { %v5109_v33 = vpop.f32.mrf.mxu1  ;;  %v1011_v18 = vadd.f32 1e-12, %v1010_v32  ;;  %v3823_v21 = vpop.eup %3822  ;;  %v3000_v32 = vmul.f32 %v2871_v63, %v2871_v63  ;;  %v2808_v38 = vmul.f32 %v3821_v19, %v4806_v9  ;;  %v1814_v19 = vmul.f32 %v377_v1, %v377_v1  ;;  %vm5225_vm7 = vmand %vm398_vm0, %vm532_vm6 }
  0xb6   : > { %v3825_v31 = vpop.eup %3824  ;;  %v2116_v35 = vadd.f32 1e-12, %v5109_v33  ;;  %v2936_v39 = vsub.f32 %v3819_v14, %v3823_v21  ;;  %v2683_v33 = vmul.f32 1.442695, %v2617_v23  ;;  %v3332_v47 = vsel %vm5154_vm4, %v3268_v34, 0.0 }
  0xb7   : > { %3640 = vmatmul.msk.f32.gmra.mxu0 %vm788_vm1, %v744_v28  ;;  %v2491_v28 = vmul.f32 1.442695, %v2425_v13  ;;  %3828 = vlog2.f32 %v1011_v18  ;;  %v1197_v45 = vmul.f32 0.6931472, %v3825_v31  ;;  %v3064_v9 = vsel %vm5154_vm4, %v3000_v32, 0.0 }
  0xb8   : > { %3704 = vmatmul.msk.f32.gmra.mxu1 %vm788_vm1, %v1850_v29  ;;  %v288_v29 = vld [vmem:[%s4784_s25 + $0xb8] sm:$0xff]  ;;  %v3827_v41 = vpop.eup %3826  ;;  %3830 = vpow2.f32 %v1386_v22  ;;  %v2872_v49 = vsub.f32 %v1703_v37, %v2808_v38  ;;  %v5190_v7 = vsel %vm788_vm1, %v3064_v9, 0.0  ;;  %v708_v18 = vmul.f32 %v313_v0, %v313_v0 }
  0xb9   : > { %v683_v43 = vmul.f32 %v288_v29, %v288_v29  ;;  %3832 = vpow2.f32 %v2491_v28  ;;  %v2302_v53 = vmul.f32 0.6931472, %v3827_v41  ;;  %v1321_v59 = vmul.f32 -0.35, %v1197_v45 }
  0xba   : > { %3834 = vlog2.f32 %v2116_v35  ;;  %v3001_v4 = vmul.f32 %v2872_v49, %v2872_v49  ;;  %v1513_v22 = vmul.f32 0.15, %v1197_v45  ;;  %v772_v29 = vsel %vm398_vm0, %v708_v18, 0.0  ;;  %v289_v18 = vld [vmem:[%s4784_s25 + $0xc0] sm:$0xff] }
  0xbb   : > { %3836 = vpow2.f32 %v1578_v40  ;;  %v747_v58 = vsel %vm398_vm0, %v683_v43, 0.0  ;;  %v2426_v13 = vmul.f32 -0.35, %v2302_v53  ;;  %v1388_v21 = vmul.f32 1.442695, %v1321_v59  ;;  %3668 = vmatmul.msk.f32.gmra.mxu2 %vm788_vm1, %v772_v29 }
  0xbc   : > { %v5126_v55 = vpop.f32.mrf.mxu0  ;;  %3838 = vpow2.f32 %v2683_v33  ;;  %v2618_v23 = vmul.f32 0.15, %v2302_v53  ;;  %v3065_v31 = vsel %vm5174_vm5, %v3001_v4, 0.0  ;;  %v1580_v38 = vmul.f32 1.442695, %v1513_v22 }
  0xbd   : > { %v5136_v62 = vpop.f32.mrf.mxu1  ;;  %v1014_v8 = vadd.f32 1e-12, %v5126_v55  ;;  %v3829_v54 = vpop.eup %3828  ;;  %v2493_v34 = vmul.f32 1.442695, %v2426_v13  ;;  %v5213_v40 = vadd.s32 %v5122_v51, %v406_v10  ;;  %v3129_v45 = vsel %vm788_vm1, %v3065_v31, 0.0 }
  0xbe   : > { %v3831_v6 = vpop.eup %3830  ;;  %v1199_v14 = vmul.f32 0.6931472, %v3829_v54  ;;  %v2685_v43 = vmul.f32 1.442695, %v2618_v23  ;;  %v407_v10 = vadd.s32 48, %v5120_v50  ;;  %vm533_vm8 = vcmp.lt.s32.totalorder %v5184_v60, 514 }
  0xbf   : > { %3641 = vmatmul.msk.f32.gmra.mxu0 %vm788_vm1, %v745_v52  ;;  %v3269_v52 = vmul.f32 %v2936_v39, %v2936_v39  ;;  %3840 = vlog2.f32 %v1014_v8  ;;  %v3833_v12 = vpop.eup %3832  ;;  %vm5273_vm10 = vmand %vm398_vm0, %vm533_vm8  ;;  %vm535_vm11 = vcmp.lt.s32.totalorder %v5213_v40, 514 }
  0xc0   : > { %3705 = vmatmul.msk.f32.gmra.mxu1 %vm788_vm1, %v1851_v56  ;;  %v2119_v56 = vadd.f32 1e-12, %v5136_v62  ;;  %v3396_v62 = vsel %vm788_vm1, %v3332_v47, 0.0  ;;  %v3835_v63 = vpop.eup %3834  ;;  %v2809_v27 = vmul.f32 %v3833_v12, %v4826_v17  ;;  %v1322_v36 = vmul.f32 -0.35, %v1199_v14  ;;  %vm5344_vm13 = vmand %vm398_vm0, %vm535_vm11 }
  0xc1   : > { %v3333_v5 = vsel %vm5174_vm5, %v3269_v52, 0.0  ;;  %v3837_v20 = vpop.eup %3836  ;;  %v2304_v35 = vmul.f32 0.6931472, %v3835_v63  ;;  %v1878_v17 = vsel %vm398_vm0, %v1814_v19, 0.0  ;;  %v1514_v39 = vmul.f32 0.15, %v1199_v14 }
  0xc2   : > { %3842 = vlog2.f32 %v2119_v56  ;;  %v3397_v32 = vsel %vm788_vm1, %v3333_v5, 0.0  ;;  %3732 = vmatmul.msk.f32.gmra.mxu3 %vm788_vm1, %v1878_v17  ;;  %v1390_v47 = vmul.f32 1.442695, %v1322_v36 }
  0xc3   : > { %v5217_v46 = vadd.f32 %v3397_v32, %v3396_v62  ;;  %v2427_v8 = vmul.f32 -0.35, %v2304_v35  ;;  %v2619_v49 = vmul.f32 0.15, %v2304_v35  ;;  %v1582_v54 = vmul.f32 1.442695, %v1514_v39 }
  0xc4   : > { %v1016_v24 = vpop.f32.mrf.mxu0  ;;  %v684_v35 = vmul.f32 %v289_v18, %v289_v18 }
  0xc5   : > { %v2121_v42 = vpop.f32.mrf.mxu1  ;;  %v1017_v11 = vadd.f32 1e-12, %v1016_v24  ;;  %v5200_v24 = vadd.s32 %v5122_v51, %v405_v61  ;;  %v5232_v61 = vadd.f32 %v3129_v45, %v5190_v7  ;;  %v2495_v0 = vmul.f32 1.442695, %v2427_v8 }
  0xc6   : > { %v2122_v15 = vadd.f32 1e-12, %v2121_v42  ;;  %v2687_v48 = vmul.f32 1.442695, %v2619_v49 }
  0xc7   : > { %3642 = vmatmul.msk.f32.gmra.mxu0 %vm788_vm1, %v746_v25  ;;  %v3839_v25 = vpop.eup %3838  ;;  %3844 = vlog2.f32 %v1017_v11  ;;  %vm534_vm9 = vcmp.lt.s32.totalorder %v5200_v24, 514 }
  0xc8   : > { %3706 = vmatmul.msk.f32.gmra.mxu1 %vm788_vm1, %v1852_v26  ;;  %v1704_v26 = vmul.f32 %v3831_v6, %v4823_v16  ;;  %v3841_v30 = vpop.eup %3840  ;;  %3846 = vlog2.f32 %v2122_v15  ;;  %v2937_v37 = vsub.f32 %v3837_v20, %v3839_v25  ;;  %v4564_v20 = vld [vmem:[%s4784_s25 + $0x18] sm:$0xff]  ;;  %vm5320_vm12 = vmand %vm398_vm0, %vm534_vm9 }
  0xc9   : > { %v3843_v33 = vpop.eup %3842  ;;  %3848 = vpow2.f32 %v1388_v21  ;;  %v1201_v44 = vmul.f32 0.6931472, %v3841_v30 }
  0xca   : > { %v2873_v42 = vsub.f32 %v1704_v26, %v2809_v27  ;;  %3850 = vpow2.f32 %v2493_v34  ;;  %v5219_v53 = vmul.f32 %v2937_v37, %v2937_v37  ;;  %v2306_v55 = vmul.f32 0.6931472, %v3843_v33  ;;  %v4565_v26 = vld [vmem:[%s4789_s28 + $0x18] sm:$0xff] }
  0xcb   : > { %v1515_v62 = vmul.f32 0.15, %v1201_v44  ;;  %v748_v33 = vsel %vm398_vm0, %v684_v35, 0.0 }
  0xcc   : > { %v1019_v57 = vpop.f32.mrf.mxu0  ;;  %v3334_v4 = vsel %vm5225_vm7, %v5219_v53, 0.0  ;;  %v2428_v7 = vmul.f32 -0.35, %v2306_v55  ;;  %v2620_v15 = vmul.f32 0.15, %v2306_v55  ;;  %v5252_v53 = vadd.s32 %v5122_v51, %v407_v10 }
  0xcd   : > { %v2124_v28 = vpop.f32.mrf.mxu1  ;;  %v1020_v16 = vadd.f32 1e-12, %v1019_v57  ;;  %v3845_v9 = vpop.eup %3844 }
  0xce   : > { %v3847_v56 = vpop.eup %3846  ;;  %v2125_v59 = vadd.f32 1e-12, %v2124_v28  ;;  %v1203_v1 = vmul.f32 0.6931472, %v3845_v9  ;;  %v1584_v28 = vmul.f32 1.442695, %v1515_v62 }
  0xcf   : > { %3643 = vmatmul.msk.f32.gmra.mxu0 %vm788_vm1, %v747_v58  ;;  %3852 = vlog2.f32 %v1020_v16  ;;  %v5229_v58 = vmul.f32 %v2873_v42, %v2873_v42  ;;  %v3849_v6 = vpop.eup %3848  ;;  %v2308_v5 = vmul.f32 0.6931472, %v3847_v56  ;;  %v2497_v31 = vmul.f32 1.442695, %v2428_v7  ;;  %v353_v56 = vld [vmem:[%s4789_s28 + $0xc0] sm:$0xff] }
  0xd0   : > { %3707 = vmatmul.msk.f32.gmra.mxu1 %vm788_vm1, %v1853_v2  ;;  %3854 = vpow2.f32 %v1580_v38  ;;  %v1323_v2 = vmul.f32 -0.35, %v1201_v44  ;;  %v3851_v12 = vpop.eup %3850  ;;  %v1705_v21 = vmul.f32 %v4564_v20, %v3849_v6  ;;  %v1324_v22 = vmul.f32 -0.35, %v1203_v1  ;;  %v378_v6 = vld [vmem:[%s4789_s28 + $0x188] sm:$0xff] }
  0xd1   : > { %3856 = vpow2.f32 %v2685_v43  ;;  %v3066_v14 = vsel %vm5225_vm7, %v5229_v58, 0.0  ;;  %v2810_v27 = vmul.f32 %v4565_v26, %v3851_v12  ;;  %v1516_v29 = vmul.f32 0.15, %v1203_v1  ;;  %v290_v58 = vld [vmem:[%s4784_s25 + $0xc8] sm:$0xff] }
  0xd2   : > { %v1392_v63 = vmul.f32 1.442695, %v1323_v2  ;;  %v2429_v32 = vmul.f32 -0.35, %v2308_v5  ;;  %v2689_v16 = vmul.f32 1.442695, %v2620_v15  ;;  %v1815_v20 = vmul.f32 %v378_v6, %v378_v6 }
  0xd3   : > { %v2621_v17 = vmul.f32 0.15, %v2308_v5  ;;  %v2874_v43 = vsub.f32 %v1705_v21, %v2810_v27  ;;  %v1586_v44 = vmul.f32 1.442695, %v1516_v29  ;;  %v5249_v9 = vsel %vm788_vm1, %v3334_v4, 0.0  ;;  %v314_v2 = vld [vmem:[%s4784_s25 + $0x188] sm:$0xff] }
  0xd4   : > { %v1022_v41 = vpop.f32.mrf.mxu0  ;;  %v1790_v5 = vmul.f32 %v353_v56, %v353_v56  ;;  %v1879_v60 = vsel %vm398_vm0, %v1815_v20, 0.0  ;;  %v315_v56 = vld [vmem:[%s4784_s25 + $0x190] sm:$0xff]  ;;  %vm536_vm14 = vcmp.lt.s32.totalorder %v5252_v53, 514  ;;  %v2199_v53 = vpop.f32.mrf.mxu3 }
  0xd5   : > { %v1023_v52 = vadd.f32 1e-12, %v1022_v41  ;;  %v2127_v11 = vpop.f32.mrf.mxu1  ;;  %v3853_v13 = vpop.eup %3852  ;;  %v1394_v41 = vmul.f32 1.442695, %v1324_v22  ;;  %v5259_v62 = vmul.f32 %v2874_v43, %v2874_v43  ;;  %3733 = vmatmul.msk.f32.gmra.mxu3 %vm788_vm1, %v1879_v60  ;;  %v379_v6 = vld [vmem:[%s4789_s28 + $0x190] sm:$0xff]  ;;  %vm5382_vm2 = vmand %vm398_vm0, %vm536_vm14 }
  0xd6   : > { %v3855_v19 = vpop.eup %3854  ;;  %v2128_v23 = vadd.f32 1e-12, %v2127_v11  ;;  %v1205_v34 = vmul.f32 0.6931472, %v3853_v13  ;;  %v4566_v11 = vld [vmem:[%s4784_s25 + $0x20] sm:$0xff]  ;;  %v709_v13 = vmul.f32 %v314_v2, %v314_v2 }
  0xd7   : > { %3858 = vlog2.f32 %v1023_v52  ;;  %v3857_v25 = vpop.eup %3856  ;;  %3644 = vmatmul.msk.f32.gmra.mxu0 %vm788_vm1, %v748_v33  ;;  %v5293_v33 = vsel %vm788_vm1, %v3066_v14, 0.0  ;;  %v3400_v14 = vadd.f32 %v5249_v9, %v5217_v46  ;;  %v685_v9 = vmul.f32 %v290_v58, %v290_v58 }
  0xd8   : > { %3860 = vpow2.f32 %v1390_v47  ;;  %v2938_v39 = vsub.f32 %v3855_v19, %v3857_v25  ;;  %v2499_v47 = vmul.f32 1.442695, %v2429_v32  ;;  %v1325_v49 = vmul.f32 -0.35, %v1205_v34 }
  0xd9   : > { %3862 = vpow2.f32 %v1582_v54  ;;  %v2691_v54 = vmul.f32 1.442695, %v2621_v17  ;;  %v1517_v55 = vmul.f32 0.15, %v1205_v34  ;;  %v1854_v25 = vsel %vm398_vm0, %v1790_v5, 0.0  ;;  %v4567_v34 = vld [vmem:[%s4789_s28 + $0x20] sm:$0xff] }
  0xda   : > { %3864 = vlog2.f32 %v2125_v59  ;;  %v5256_v59 = vmul.f32 %v2938_v39, %v2938_v39  ;;  %v1396_v7 = vmul.f32 1.442695, %v1325_v49  ;;  %v773_v26 = vsel %vm398_vm0, %v709_v13, 0.0  ;;  %3708 = vmatmul.msk.f32.gmra.mxu1 %vm788_vm1, %v1854_v25 }
  0xdb   : > { %3866 = vpow2.f32 %v2495_v0  ;;  %v1588_v18 = vmul.f32 1.442695, %v1517_v55  ;;  %3669 = vmatmul.msk.f32.gmra.mxu2 %vm788_vm1, %v773_v26  ;;  %v408_v55 = vadd.s32 56, %v5120_v50  ;;  %v710_v5 = vmul.f32 %v315_v56, %v315_v56 }
  0xdc   : > { %3868 = vpow2.f32 %v2687_v48 }
  0xdd   : > { %v3859_v30 = vpop.eup %3858  ;;  %3870 = vpow2.f32 %v1392_v63  ;;  %v1025_v63 = vpop.f32.mrf.mxu0 }
  0xde   : > { %v3861_v36 = vpop.eup %3860  ;;  %v1207_v37 = vmul.f32 0.6931472, %v3859_v30  ;;  %3872 = vlog2.f32 %v2128_v23  ;;  %v1026_v39 = vadd.f32 1e-12, %v1025_v63  ;;  %v4570_v63 = vld [vmem:[%s4784_s25 + $0x40] sm:$0xff] }
  0xdf   : > { %v3863_v38 = vpop.eup %3862  ;;  %3874 = vpow2.f32 %v1584_v28  ;;  %v5262_v12 = vmul.f32 %v4566_v11, %v3861_v36 }
  0xe0   : > { %v3865_v42 = vpop.eup %3864  ;;  %v1326_v45 = vmul.f32 -0.35, %v1207_v37  ;;  %3876 = vpow2.f32 %v2497_v31  ;;  %v1518_v1 = vmul.f32 0.15, %v1207_v37 }
  0xe1   : > { %v3867_v8 = vpop.eup %3866  ;;  %3878 = vpow2.f32 %v2689_v16  ;;  %v2310_v0 = vmul.f32 0.6931472, %v3865_v42  ;;  %v3335_v42 = vsel %vm5273_vm10, %v5256_v59, 0.0 }
  0xe2   : > { %v3869_v52 = vpop.eup %3868  ;;  %3880 = vpow2.f32 %v1394_v41  ;;  %v1398_v4 = vmul.f32 1.442695, %v1326_v45  ;;  %v1590_v23 = vmul.f32 1.442695, %v1518_v1  ;;  %v2811_v35 = vmul.f32 %v4567_v34, %v3867_v8  ;;  %v2130_v41 = vpop.f32.mrf.mxu1  ;;  %v4568_v45 = vld [vmem:[%s4784_s25 + $0x28] sm:$0xff] }
  0xe3   : > { %v3871_v48 = vpop.eup %3870  ;;  %3882 = vpow2.f32 %v1586_v44  ;;  %v2430_v22 = vmul.f32 -0.35, %v2310_v0  ;;  %v2622_v29 = vmul.f32 0.15, %v2310_v0  ;;  %v2939_v36 = vsub.f32 %v3863_v38, %v3869_v52  ;;  %v354_v52 = vld [vmem:[%s4789_s28 + $0xc8] sm:$0xff] }
  0xe4   : > { %v3873_v10 = vpop.eup %3872  ;;  %3884 = vpow2.f32 %v2499_v47  ;;  %v1707_v8 = vmul.f32 %v4568_v45, %v3871_v48  ;;  %v4569_v47 = vld [vmem:[%s4789_s28 + $0x28] sm:$0xff]  ;;  %v3401_v59 = vsel %vm788_vm1, %v3335_v42, 0.0  ;;  %v2875_v0 = vsub.f32 %v5262_v12, %v2811_v35 }
  0xe5   : > { %v3875_v15 = vpop.eup %3874  ;;  %3886 = vpow2.f32 %v2691_v54  ;;  %v2312_v19 = vmul.f32 0.6931472, %v3873_v10  ;;  %v2501_v43 = vmul.f32 1.442695, %v2430_v22  ;;  %v2693_v57 = vmul.f32 1.442695, %v2622_v29 }
  0xe6   : > { %v3877_v21 = vpop.eup %3876  ;;  %3888 = vpow2.f32 %v1398_v4  ;;  %v3067_v54 = vsel %vm5273_vm10, %v5259_v62, 0.0  ;;  %v3272_v1 = vmul.f32 %v2939_v36, %v2939_v36  ;;  %v1791_v11 = vmul.f32 %v354_v52, %v354_v52  ;;  %v1028_v62 = vpop.f32.mrf.mxu0  ;;  %v4571_v29 = vld [vmem:[%s4789_s28 + $0x40] sm:$0xff]  ;;  %v4572_v36 = vld [vmem:[%s4784_s25 + $0x30] sm:$0xff] }
  0xe7   : > { %v3879_v27 = vpop.eup %3878  ;;  %v2431_v30 = vmul.f32 -0.35, %v2312_v19  ;;  %v2623_v31 = vmul.f32 0.15, %v2312_v19  ;;  %3890 = vpow2.f32 %v1396_v7  ;;  %v2812_v49 = vmul.f32 %v4569_v47, %v3877_v21 }
  0xe8   : > { %v5279_v32 = vpop.eup %3880  ;;  %3892 = vpow2.f32 %v1588_v18  ;;  %v2940_v46 = vsub.f32 %v3875_v15, %v3879_v27  ;;  %v2131_v7 = vadd.f32 1e-12, %v2130_v41  ;;  %v749_v18 = vsel %vm398_vm0, %v685_v9, 0.0 }
  0xe9   : > { %v5285_v16 = vpop.eup %3882  ;;  %v2503_v17 = vmul.f32 1.442695, %v2431_v30  ;;  %v2695_v37 = vmul.f32 1.442695, %v2623_v31  ;;  %3894 = vpow2.f32 %v1590_v23  ;;  %v2876_v12 = vsub.f32 %v1707_v8, %v2812_v49  ;;  %3645 = vmatmul.msk.f32.gmra.mxu0 %vm788_vm1, %v749_v18 }
  0xea   : > { %v3885_v38 = vpop.eup %3884  ;;  %v1855_v24 = vsel %vm398_vm0, %v1791_v11, 0.0  ;;  %v1816_v19 = vmul.f32 %v379_v6, %v379_v6  ;;  %v3133_v21 = vsel %vm788_vm1, %v3067_v54, 0.0  ;;  %v3004_v22 = vmul.f32 %v2875_v0, %v2875_v0  ;;  %v2133_v41 = vpop.f32.mrf.mxu1 }
  0xeb   : > { %v5298_v44 = vpop.eup %3886  ;;  %3896 = vpow2.f32 %v2503_v17  ;;  %3709 = vmatmul.msk.f32.gmra.mxu1 %vm788_vm1, %v1855_v24  ;;  %v774_v23 = vsel %vm398_vm0, %v710_v5, 0.0  ;;  %v1029_v25 = vadd.f32 1e-12, %v1028_v62  ;;  %v3336_v27 = vsel %vm5320_vm12, %v3272_v1, 0.0  ;;  %v4573_v17 = vld [vmem:[%s4789_s28 + $0x30] sm:$0xff]  ;;  %v4575_v1 = vld [vmem:[%s4789_s28 + $0x38] sm:$0xff]  ;;  %v1094_v11 = vpop.f32.mrf.mxu2 }
  0xec   : > { %3898 = vpow2.f32 %v2695_v37  ;;  %v3889_v2 = vpop.eup %3888  ;;  %v3273_v28 = vmul.f32 %v2940_v46, %v2940_v46  ;;  %3670 = vmatmul.msk.f32.gmra.mxu2 %vm788_vm1, %v774_v23  ;;  %v1880_v31 = vsel %vm398_vm0, %v1816_v19, 0.0  ;;  %v1708_v60 = vmul.f32 %v4572_v36, %v5279_v32  ;;  %v291_v23 = vld [vmem:[%s4784_s25 + $0xd0] sm:$0xff] }
  0xed   : > { %3900 = vlog2.f32 %v1026_v39  ;;  %v5314_v48 = vpop.eup %3890  ;;  %v1710_v15 = vmul.f32 %v4570_v63, %v3889_v2  ;;  %v2813_v37 = vmul.f32 %v4573_v17, %v3885_v38  ;;  %3734 = vmatmul.msk.f32.gmra.mxu3 %vm788_vm1, %v1880_v31  ;;  %v3132_v47 = vadd.f32 %v5293_v33, %v5232_v61 }
  0xee   : > { %3902 = vpow2.f32 %v2501_v43  ;;  %v3893_v4 = vpop.eup %3892  ;;  %v3005_v43 = vmul.f32 %v2876_v12, %v2876_v12  ;;  %v3402_v32 = vadd.f32 %v3401_v59, %v3400_v14  ;;  %v3068_v38 = vsel %vm5320_vm12, %v3004_v22, 0.0  ;;  %v4574_v59 = vld [vmem:[%s4784_s25 + $0x38] sm:$0xff] }
  0xef   : > { %3904 = vpow2.f32 %v2693_v57  ;;  %v3895_v13 = vpop.eup %3894  ;;  %v3337_v49 = vsel %vm5344_vm13, %v3273_v28, 0.0  ;;  %v473_v57 = vadd.s32 %v5122_v51, %v408_v55  ;;  %v2134_v52 = vadd.f32 1e-12, %v2133_v41 }
  0xf0   : > { %3906 = vlog2.f32 %v2131_v7  ;;  %v3134_v54 = vadd.f32 %v3133_v21, %v3132_v47  ;;  %v3403_v56 = vsel %vm788_vm1, %v3336_v27, 0.0  ;;  %v2877_v2 = vsub.f32 %v1708_v60, %v2813_v37 }
  0xf1   : > { %v3897_v20 = vpop.eup %3896  ;;  %3908 = vlog2.f32 %v1029_v25  ;;  %v2941_v61 = vsub.f32 %v5285_v16, %v5298_v44  ;;  %v3135_v33 = vsel %vm788_vm1, %v3068_v38, 0.0  ;;  %v3069_v14 = vsel %vm5344_vm13, %v3005_v43, 0.0 }
  0xf2   : > { %v3899_v26 = vpop.eup %3898  ;;  %v2815_v30 = vmul.f32 %v4571_v29, %v3897_v20  ;;  %v1709_v0 = vmul.f32 %v4574_v59, %v5314_v48  ;;  %v3405_v46 = vsel %vm788_vm1, %v3337_v49, 0.0  ;;  %v409_v62 = vadd.s32 64, %v5120_v50  ;;  %v316_v49 = vld [vmem:[%s4784_s25 + $0x198] sm:$0xff] }
  0xf3   : > { %v3901_v34 = vpop.eup %3900  ;;  %v5351_v39 = vsub.f32 %v3895_v13, %v3899_v26  ;;  %v3404_v16 = vadd.f32 %v3403_v56, %v3402_v32  ;;  %vm537_vm15 = vcmp.lt.s32.totalorder %v473_v57, 514  ;;  %3910 = vlog2.f32 %v2134_v52  ;;  %v380_v57 = vld [vmem:[%s4789_s28 + $0x198] sm:$0xff] }
  0xf4   : > { %v3903_v42 = vpop.eup %3902  ;;  %v5354_v40 = vsub.f32 %v1710_v15, %v2815_v30  ;;  %v1209_v45 = vmul.f32 0.6931472, %v3901_v34  ;;  %v3136_v7 = vadd.f32 %v3135_v33, %v3134_v54  ;;  %v3137_v5 = vsel %vm788_vm1, %v3069_v14, 0.0  ;;  %vm5395_vm3 = vmand %vm398_vm0, %vm537_vm15  ;;  %v355_v34 = vld [vmem:[%s4789_s28 + $0xd0] sm:$0xff] }
  0xf5   : > { %v3905_v8 = vpop.eup %3904  ;;  %v2814_v6 = vmul.f32 %v4575_v1, %v3903_v42  ;;  %v3006_v48 = vmul.f32 %v2877_v2, %v2877_v2  ;;  %v3274_v13 = vmul.f32 %v2941_v61, %v2941_v61  ;;  %v5376_v63 = vadd.f32 %v3405_v46, %v3404_v16  ;;  %v318_v61 = vld [vmem:[%s4784_s25 + $0x1a8] sm:$0xff] }
  0xf6   : > { %v1327_v58 = vmul.f32 -0.35, %v1209_v45  ;;  %v3907_v55 = vpop.eup %3906  ;;  %v2942_v9 = vsub.f32 %v3893_v4, %v3905_v8  ;;  %v1519_v10 = vmul.f32 0.15, %v1209_v45  ;;  %v5386_v18 = vadd.f32 1e-12, %v1094_v11 }
  0xf7   : > { %v3909_v12 = vpop.eup %3908  ;;  %v2878_v15 = vsub.f32 %v1709_v0, %v2814_v6  ;;  %v2314_v24 = vmul.f32 0.6931472, %v3907_v55  ;;  %v474_v20 = vadd.s32 %v5122_v51, %v409_v62  ;;  %v5390_v25 = vadd.f32 %v3137_v5, %v3136_v7  ;;  %v1031_v55 = vpop.f32.mrf.mxu0 }
  0xf8   : > { %v1400_v44 = vmul.f32 1.442695, %v1327_v58  ;;  %v3275_v19 = vmul.f32 %v2942_v9, %v2942_v9  ;;  %v1592_v21 = vmul.f32 1.442695, %v1519_v10  ;;  %v1211_v22 = vmul.f32 0.6931472, %v3909_v12 }
  0xf9   : > { %v2432_v26 = vmul.f32 -0.35, %v2314_v24  ;;  %v2624_v27 = vmul.f32 0.15, %v2314_v24  ;;  %v3070_v28 = vsel %vm5382_vm2, %v3006_v48, 0.0  ;;  %v3338_v29 = vsel %vm5382_vm2, %v3274_v13, 0.0  ;;  %v3911_v35 = vpop.eup %3910 }
  0xfa   : > { %3912 = vpow2.f32 %v1400_v44  ;;  %v410_v30 = vadd.s32 72, %v5120_v50  ;;  %v1328_v31 = vmul.f32 -0.35, %v1211_v22  ;;  %v3007_v36 = vmul.f32 %v2878_v15, %v2878_v15  ;;  %v4576_v9 = vld [vmem:[%s4784_s25 + $0x48] sm:$0xff] }
  0xfb   : > { %v2505_v60 = vmul.f32 1.442695, %v2432_v26  ;;  %v2697_v17 = vmul.f32 1.442695, %v2624_v27  ;;  %v686_v37 = vmul.f32 %v291_v23, %v291_v23  ;;  %v3339_v41 = vsel %vm5395_vm3, %v3275_v19, 0.0  ;;  %v4577_v13 = vld [vmem:[%s4789_s28 + $0x48] sm:$0xff] }
  0xfc   : > { %vm538_vm4 = vcmp.lt.s32.totalorder %v474_v20, 514  ;;  %3914 = vpow2.f32 %v1592_v21  ;;  %v1520_v42 = vmul.f32 0.15, %v1211_v22  ;;  %v3407_v43 = vsel %vm788_vm1, %v3338_v29, 0.0  ;;  %v2136_v21 = vpop.f32.mrf.mxu1 }
  0xfd   : > { %3916 = vpow2.f32 %v2505_v60  ;;  %v1402_v45 = vmul.f32 1.442695, %v1328_v31  ;;  %v1792_v8 = vmul.f32 %v355_v34, %v355_v34  ;;  %v3139_v47 = vsel %vm788_vm1, %v3070_v28, 0.0  ;;  %vm5422_vm5 = vmand %vm398_vm0, %vm538_vm4 }
  0xfe   : > { %v475_v32 = vadd.s32 %v5122_v51, %v410_v30  ;;  %3918 = vpow2.f32 %v2697_v17  ;;  %v2316_v38 = vmul.f32 0.6931472, %v3911_v35  ;;  %v3071_v52 = vsel %vm5395_vm3, %v3007_v36, 0.0 }
  0xff   : > { %v3409_v54 = vsel %vm788_vm1, %v3339_v41, 0.0  ;;  %v3276_v56 = vmul.f32 %v5351_v39, %v5351_v39  ;;  %v750_v2 = vsel %vm398_vm0, %v686_v37, 0.0  ;;  %v3008_v33 = vmul.f32 %v5354_v40, %v5354_v40 }
 0x100   : > { %v3913_v58 = vpop.eup %3912  ;;  %v1594_v14 = vmul.f32 1.442695, %v1520_v42  ;;  %v2433_v59 = vmul.f32 -0.35, %v2316_v38  ;;  %v2625_v0 = vmul.f32 0.15, %v2316_v38  ;;  %3646 = vmatmul.msk.f32.gmra.mxu0 %vm788_vm1, %v750_v2  ;;  %3920 = vpow2.f32 %v1402_v45 }
 0x101   : > { %v1856_v39 = vsel %vm398_vm0, %v1792_v8, 0.0  ;;  %v711_v1 = vmul.f32 %v316_v49, %v316_v49  ;;  %v1817_v6 = vmul.f32 %v380_v57, %v380_v57  ;;  %v1711_v11 = vmul.f32 %v4576_v9, %v3913_v58  ;;  %v4578_v45 = vld [vmem:[%s4784_s25 + $0x50] sm:$0xff]  ;;  %v292_v38 = vld [vmem:[%s4784_s25 + $0xd8] sm:$0xff]  ;;  %v381_v9 = vld [vmem:[%s4789_s28 + $0x1a0] sm:$0xff] }
 0x102   : > { %v3915_v46 = vpop.eup %3914  ;;  %vm539_vm6 = vcmp.lt.s32.totalorder %v475_v32, 514  ;;  %v2507_v62 = vmul.f32 1.442695, %v2433_v59  ;;  %v2699_v10 = vmul.f32 1.442695, %v2625_v0  ;;  %3710 = vmatmul.msk.f32.gmra.mxu1 %vm788_vm1, %v1856_v39  ;;  %v3340_v12 = vsel %vm5422_vm5, %v3276_v56, 0.0  ;;  %v1097_v0 = vpop.f32.mrf.mxu2 }
 0x103   : > { %v3917_v40 = vpop.eup %3916  ;;  %v411_v16 = vadd.s32 80, %v5120_v50  ;;  %v775_v44 = vsel %vm398_vm0, %v711_v1, 0.0  ;;  %v1881_v7 = vsel %vm398_vm0, %v1817_v6, 0.0  ;;  %v3072_v48 = vsel %vm5422_vm5, %v3008_v33, 0.0  ;;  %vm5452_vm7 = vmand %vm398_vm0, %vm539_vm6  ;;  %v4579_v58 = vld [vmem:[%s4789_s28 + $0x50] sm:$0xff]  ;;  %v356_v56 = vld [vmem:[%s4789_s28 + $0xd8] sm:$0xff] }
 0x104   : > { %v3919_v5 = vpop.eup %3918  ;;  %v2816_v4 = vmul.f32 %v4577_v13, %v3917_v40  ;;  %3922 = vpow2.f32 %v1594_v14  ;;  %3671 = vmatmul.msk.f32.gmra.mxu2 %vm788_vm1, %v775_v44  ;;  %3735 = vmatmul.msk.f32.gmra.mxu3 %vm788_vm1, %v1881_v7  ;;  %v1032_v15 = vadd.f32 1e-12, %v1031_v55  ;;  %v3408_v24 = vadd.f32 %v3407_v43, %v5376_v63  ;;  %v317_v6 = vld [vmem:[%s4784_s25 + $0x1a0] sm:$0xff] }
 0x105   : > { %v3141_v19 = vsel %vm788_vm1, %v3071_v52, 0.0  ;;  %v2944_v20 = vsub.f32 %v3915_v46, %v3919_v5  ;;  %3924 = vpow2.f32 %v2507_v62  ;;  %v3140_v22 = vadd.f32 %v3139_v47, %v5390_v25 }
 0x106   : > { %v3411_v23 = vsel %vm788_vm1, %v3340_v12, 0.0  ;;  %v2880_v27 = vsub.f32 %v1711_v11, %v2816_v4  ;;  %3926 = vpow2.f32 %v2699_v10  ;;  %v3921_v63 = vpop.eup %3920  ;;  %v3410_v28 = vadd.f32 %v3409_v54, %v3408_v24  ;;  %v2202_v11 = vpop.f32.mrf.mxu3 }
 0x107   : > { %v3143_v29 = vsel %vm788_vm1, %v3072_v48, 0.0  ;;  %v3277_v30 = vmul.f32 %v2944_v20, %v2944_v20  ;;  %v476_v25 = vadd.s32 %v5122_v51, %v411_v16  ;;  %v3142_v31 = vadd.f32 %v3141_v19, %v3140_v22 }
 0x108   : > { %v3009_v34 = vmul.f32 %v2880_v27, %v2880_v27  ;;  %3928 = vlog2.f32 %v1032_v15  ;;  %v2137_v35 = vadd.f32 1e-12, %v2136_v21  ;;  %v3412_v36 = vadd.f32 %v3411_v23, %v3410_v28  ;;  %v1034_v27 = vpop.f32.mrf.mxu0 }
 0x109   : > { %3930 = vlog2.f32 %v5386_v18  ;;  %v2200_v60 = vadd.f32 1e-12, %v2199_v53  ;;  %v3341_v17 = vsel %vm5452_vm7, %v3277_v30, 0.0  ;;  %v3144_v41 = vadd.f32 %v3143_v29, %v3142_v31 }
 0x10a   : > { %v3923_v37 = vpop.eup %3922  ;;  %v3073_v42 = vsel %vm5452_vm7, %v3009_v34, 0.0  ;;  %v3413_v43 = vsel %vm788_vm1, %v3341_v17, 0.0  ;;  %v1712_v8 = vmul.f32 %v4578_v45, %v3921_v63  ;;  %vm540_vm8 = vcmp.lt.s32.totalorder %v476_v25, 514  ;;  %v2139_v17 = vpop.f32.mrf.mxu1 }
 0x10b   : > { %v3925_v47 = vpop.eup %3924  ;;  %v3145_v32 = vsel %vm788_vm1, %v3073_v42, 0.0  ;;  %v3414_v18 = vadd.f32 %v3413_v43, %v3412_v36  ;;  %3932 = vlog2.f32 %v2137_v35  ;;  %vm5471_vm9 = vmand %vm398_vm0, %vm540_vm8  ;;  %v687_v14 = vmul.f32 %v292_v38, %v292_v38  ;;  %v293_v43 = vld [vmem:[%s4784_s25 + $0xe0] sm:$0xff] }
 0x10c   : > { %v3927_v49 = vpop.eup %3926  ;;  %v3146_v57 = vadd.f32 %v3145_v32, %v3144_v41  ;;  %v2817_v52 = vmul.f32 %v4579_v58, %v3925_v47  ;;  %3934 = vlog2.f32 %v2200_v60  ;;  %v1793_v46 = vmul.f32 %v356_v56, %v356_v56 }
 0x10d   : > { %v2945_v54 = vsub.f32 %v3923_v37, %v3927_v49  ;;  %v751_v12 = vsel %vm398_vm0, %v687_v14, 0.0  ;;  %v1098_v44 = vadd.f32 1e-12, %v1097_v0  ;;  %v712_v48 = vmul.f32 %v317_v6, %v317_v6  ;;  %v357_v49 = vld [vmem:[%s4789_s28 + $0xe0] sm:$0xff]  ;;  %v4580_v14 = vld [vmem:[%s4784_s25 + $0x58] sm:$0xff] }
 0x10e   : > { %v3929_v2 = vpop.eup %3928  ;;  %v2881_v33 = vsub.f32 %v1712_v8, %v2817_v52  ;;  %3647 = vmatmul.msk.f32.gmra.mxu0 %vm788_vm1, %v751_v12  ;;  %v2203_v20 = vadd.f32 1e-12, %v2202_v11  ;;  %v1818_v22 = vmul.f32 %v381_v9, %v381_v9  ;;  %v1857_v26 = vsel %vm398_vm0, %v1793_v46, 0.0  ;;  %v1100_v8 = vpop.f32.mrf.mxu2  ;;  %v4581_v11 = vld [vmem:[%s4789_s28 + $0x58] sm:$0xff] }
 0x10f   : > { %v3931_v59 = vpop.eup %3930  ;;  %v3278_v39 = vmul.f32 %v2945_v54, %v2945_v54  ;;  %v1213_v1 = vmul.f32 0.6931472, %v3929_v2  ;;  %3936 = vlog2.f32 %v1098_v44  ;;  %3711 = vmatmul.msk.f32.gmra.mxu1 %vm788_vm1, %v1857_v26  ;;  %v776_v28 = vsel %vm398_vm0, %v712_v48, 0.0 }
 0x110   : > { %v3010_v55 = vmul.f32 %v2881_v33, %v2881_v33  ;;  %v1255_v4 = vmul.f32 0.6931472, %v3931_v59  ;;  %3672 = vmatmul.msk.f32.gmra.mxu2 %vm788_vm1, %v776_v28  ;;  %v1882_v31 = vsel %vm398_vm0, %v1818_v22, 0.0  ;;  %v1035_v34 = vadd.f32 1e-12, %v1034_v27 }
 0x111   : > { %v3342_v62 = vsel %vm5471_vm9, %v3278_v39, 0.0  ;;  %v1329_v10 = vmul.f32 -0.35, %v1213_v1  ;;  %v1521_v40 = vmul.f32 0.15, %v1213_v1  ;;  %v3933_v16 = vpop.eup %3932  ;;  %v412_v35 = vadd.s32 88, %v5120_v50  ;;  %3736 = vmatmul.msk.f32.gmra.mxu3 %vm788_vm1, %v1882_v31 }
 0x112   : > { %v3074_v7 = vsel %vm5471_vm9, %v3010_v55, 0.0  ;;  %v3415_v5 = vsel %vm788_vm1, %v3342_v62, 0.0  ;;  %v3935_v13 = vpop.eup %3934  ;;  %v2318_v53 = vmul.f32 0.6931472, %v3933_v16  ;;  %v1350_v29 = vmul.f32 -0.35, %v1255_v4 }
 0x113   : > { %v3147_v15 = vsel %vm788_vm1, %v3074_v7, 0.0  ;;  %v5486_v24 = vadd.f32 %v3415_v5, %v3414_v18  ;;  %v1404_v19 = vmul.f32 1.442695, %v1329_v10  ;;  %v1596_v23 = vmul.f32 1.442695, %v1521_v40  ;;  %v382_v1 = vld [vmem:[%s4789_s28 + $0x1a8] sm:$0xff] }
 0x114   : > { %v5488_v21 = vadd.f32 %v3147_v15, %v3146_v57  ;;  %v2360_v63 = vmul.f32 0.6931472, %v3935_v13  ;;  %v2434_v30 = vmul.f32 -0.35, %v2318_v53  ;;  %v2626_v25 = vmul.f32 0.15, %v2318_v53  ;;  %v1037_v15 = vpop.f32.mrf.mxu0  ;;  %v2205_v53 = vpop.f32.mrf.mxu3 }
 0x115   : > { %3938 = vpow2.f32 %v1404_v19  ;;  %v1446_v41 = vmul.f32 1.442695, %v1350_v29  ;;  %v1542_v42 = vmul.f32 0.15, %v1255_v4  ;;  %v3937_v45 = vpop.eup %3936  ;;  %v2140_v47 = vadd.f32 1e-12, %v2139_v17 }
 0x116   : > { %3940 = vlog2.f32 %v2203_v20  ;;  %v2509_v36 = vmul.f32 1.442695, %v2434_v30  ;;  %v2701_v60 = vmul.f32 1.442695, %v2626_v25  ;;  %v2455_v37 = vmul.f32 -0.35, %v2360_v63 }
 0x117   : > { %3942 = vpow2.f32 %v1596_v23  ;;  %v2647_v18 = vmul.f32 0.15, %v2360_v63  ;;  %v477_v38 = vadd.s32 %v5122_v51, %v412_v35  ;;  %v688_v52 = vmul.f32 %v293_v43, %v293_v43 }
 0x118   : > { %3944 = vlog2.f32 %v1035_v34  ;;  %v2551_v58 = vmul.f32 1.442695, %v2455_v37  ;;  %v1638_v56 = vmul.f32 1.442695, %v1542_v42  ;;  %v1101_v2 = vadd.f32 1e-12, %v1100_v8 }
 0x119   : > { %3946 = vpow2.f32 %v2509_v36  ;;  %v752_v0 = vsel %vm398_vm0, %v688_v52, 0.0  ;;  %v1794_v39 = vmul.f32 %v357_v49, %v357_v49  ;;  %v2743_v55 = vmul.f32 1.442695, %v2647_v18  ;;  %v4582_v37 = vld [vmem:[%s4784_s25 + $0x100] sm:$0xff]  ;;  %v294_v18 = vld [vmem:[%s4784_s25 + $0xe8] sm:$0xff] }
 0x11a   : > { %3948 = vpow2.f32 %v2701_v60  ;;  %vm541_vm10 = vcmp.lt.s32.totalorder %v477_v38, 514  ;;  %3648 = vmatmul.msk.f32.gmra.mxu0 %vm788_vm1, %v752_v0  ;;  %v713_v40 = vmul.f32 %v318_v61, %v318_v61  ;;  %v1819_v44 = vmul.f32 %v382_v1, %v382_v1  ;;  %v4583_v52 = vld [vmem:[%s4789_s28 + $0x100] sm:$0xff] }
 0x11b   : > { %v3939_v32 = vpop.eup %3938  ;;  %3950 = vpow2.f32 %v1446_v41  ;;  %v1858_v10 = vsel %vm398_vm0, %v1794_v39, 0.0  ;;  %v433_v7 = vadd.s32 256, %v5120_v50  ;;  %v1257_v5 = vmul.f32 0.6931472, %v3937_v45  ;;  %vm5517_vm11 = vmand %vm398_vm0, %vm541_vm10 }
 0x11c   : > { %v3941_v57 = vpop.eup %3940  ;;  %v1713_v59 = vmul.f32 %v4580_v14, %v3939_v32  ;;  %3952 = vlog2.f32 %v2140_v47  ;;  %3712 = vmatmul.msk.f32.gmra.mxu1 %vm788_vm1, %v1858_v10  ;;  %v777_v4 = vsel %vm398_vm0, %v713_v40, 0.0  ;;  %v1883_v28 = vsel %vm398_vm0, %v1819_v44, 0.0 }
 0x11d   : > { %v3943_v54 = vpop.eup %3942  ;;  %3954 = vpow2.f32 %v2551_v58  ;;  %v2362_v20 = vmul.f32 0.6931472, %v3941_v57  ;;  %3673 = vmatmul.msk.f32.gmra.mxu2 %vm788_vm1, %v777_v4  ;;  %3737 = vmatmul.msk.f32.gmra.mxu3 %vm788_vm1, %v1883_v28  ;;  %v1038_v25 = vadd.f32 1e-12, %v1037_v15  ;;  %v5530_v34 = vadd.s32 %v5122_v51, %v433_v7  ;;  %v4584_v28 = vld [vmem:[%s4784_s25 + $0x60] sm:$0xff] }
 0x11e   : > { %v3945_v33 = vpop.eup %3944  ;;  %3956 = vlog2.f32 %v1101_v2  ;;  %v1351_v35 = vmul.f32 -0.35, %v1257_v5  ;;  %v2206_v42 = vadd.f32 1e-12, %v2205_v53  ;;  %v1543_v49 = vmul.f32 0.15, %v1257_v5 }
 0x11f   : > { %v3947_v6 = vpop.eup %3946  ;;  %v1215_v46 = vmul.f32 0.6931472, %v3945_v33  ;;  %3958 = vpow2.f32 %v1638_v56  ;;  %v2456_v8 = vmul.f32 -0.35, %v2362_v20  ;;  %v434_v57 = vadd.s32 264, %v5120_v50  ;;  %v1103_v33 = vpop.f32.mrf.mxu2 }
 0x120   : > { %v3949_v9 = vpop.eup %3948  ;;  %v2818_v62 = vmul.f32 %v4581_v11, %v3947_v6  ;;  %3960 = vpow2.f32 %v2743_v55  ;;  %v1448_v56 = vmul.f32 1.442695, %v1351_v35  ;;  %v689_v0 = vmul.f32 %v294_v18, %v294_v18 }
 0x121   : > { %v2946_v12 = vsub.f32 %v3943_v54, %v3949_v9  ;;  %v1330_v16 = vmul.f32 -0.35, %v1215_v46  ;;  %v3951_v19 = vpop.eup %3950  ;;  %v1522_v63 = vmul.f32 0.15, %v1215_v46  ;;  %v2553_v39 = vmul.f32 1.442695, %v2456_v8 }
 0x122   : > { %v2882_v13 = vsub.f32 %v1713_v59, %v2818_v62  ;;  %v3953_v23 = vpop.eup %3952  ;;  %v1734_v41 = vmul.f32 %v4582_v37, %v3951_v19  ;;  %v2142_v59 = vpop.f32.mrf.mxu1  ;;  %v2648_v1 = vmul.f32 0.15, %v2362_v20  ;;  %v1640_v55 = vmul.f32 1.442695, %v1543_v49  ;;  %v358_v9 = vld [vmem:[%s4789_s28 + $0xe8] sm:$0xff] }
 0x123   : > { %v3279_v22 = vmul.f32 %v2946_v12, %v2946_v12  ;;  %v1406_v27 = vmul.f32 1.442695, %v1330_v16  ;;  %v2320_v30 = vmul.f32 0.6931472, %v3953_v23  ;;  %v3955_v31 = vpop.eup %3954  ;;  %v1598_v32 = vmul.f32 1.442695, %v1522_v63  ;;  %v2208_v23 = vpop.f32.mrf.mxu3 }
 0x124   : > { %v3011_v26 = vmul.f32 %v2882_v13, %v2882_v13  ;;  %v3957_v17 = vpop.eup %3956  ;;  %v2839_v54 = vmul.f32 %v4583_v52, %v3955_v31  ;;  %v5548_v46 = vadd.s32 %v5122_v51, %v434_v57  ;;  %vm562_vm12 = vcmp.lt.s32.totalorder %v5530_v34, 514  ;;  %v319_v12 = vld [vmem:[%s4784_s25 + $0x1b0] sm:$0xff]  ;;  %v1040_v13 = vpop.f32.mrf.mxu0 }
 0x125   : > { %v3343_v29 = vsel %vm5517_vm11, %v3279_v22, 0.0  ;;  %3962 = vpow2.f32 %v1406_v27  ;;  %v3959_v38 = vpop.eup %3958  ;;  %v2435_v58 = vmul.f32 -0.35, %v2320_v30  ;;  %v1259_v2 = vmul.f32 0.6931472, %v3957_v17  ;;  %v383_v16 = vld [vmem:[%s4789_s28 + $0x1b0] sm:$0xff]  ;;  %vm5586_vm15 = vmand %vm398_vm0, %vm562_vm12 }
 0x126   : > { %v3075_v36 = vsel %vm5517_vm11, %v3011_v26, 0.0  ;;  %v3417_v60 = vsel %vm788_vm1, %v3343_v29, 0.0  ;;  %3964 = vlog2.f32 %v1038_v25  ;;  %v3961_v61 = vpop.eup %3960  ;;  %v2903_v62 = vsub.f32 %v1734_v41, %v2839_v54  ;;  %v4585_v17 = vld [vmem:[%s4789_s28 + $0x60] sm:$0xff] }
 0x127   : > { %v3149_v43 = vsel %vm788_vm1, %v3075_v36, 0.0  ;;  %v5538_v45 = vadd.f32 %v3417_v60, %v5486_v24  ;;  %v2627_v24 = vmul.f32 0.15, %v2320_v30  ;;  %3966 = vlog2.f32 %v2206_v42  ;;  %v1106_v18 = vpop.f32.mrf.mxu2 }
 0x128   : > { %v5541_v47 = vadd.f32 %v3149_v43, %v5488_v21  ;;  %v413_v21 = vadd.s32 96, %v5120_v50  ;;  %v2511_v14 = vmul.f32 1.442695, %v2435_v58  ;;  %3968 = vpow2.f32 %v1598_v32 }
 0x129   : > { %v2703_v6 = vmul.f32 1.442695, %v2627_v24  ;;  %v2967_v10 = vsub.f32 %v3959_v38, %v3961_v61  ;;  %v2143_v40 = vadd.f32 1e-12, %v2142_v59  ;;  %v1352_v7 = vmul.f32 -0.35, %v1259_v2 }
 0x12a   : > { %3970 = vpow2.f32 %v2511_v14  ;;  %v478_v5 = vadd.s32 %v5122_v51, %v413_v21  ;;  %v753_v48 = vsel %vm398_vm0, %v689_v0, 0.0  ;;  %v2745_v4 = vmul.f32 1.442695, %v2648_v1  ;;  %v4586_v14 = vld [vmem:[%s4784_s25 + $0x108] sm:$0xff]  ;;  %v2145_v1 = vpop.f32.mrf.mxu1 }
 0x12b   : > { %v3963_v11 = vpop.eup %3962  ;;  %3972 = vpow2.f32 %v2703_v6  ;;  %3649 = vmatmul.msk.f32.gmra.mxu0 %vm788_vm1, %v753_v48  ;;  %v1795_v19 = vmul.f32 %v358_v9, %v358_v9  ;;  %v1104_v22 = vadd.f32 1e-12, %v1103_v33  ;;  %v714_v53 = vmul.f32 %v319_v12, %v319_v12  ;;  %v4590_v6 = vld [vmem:[%s4784_s25 + $0x70] sm:$0xff] }
 0x12c   : > { %v3965_v44 = vpop.eup %3964  ;;  %3974 = vpow2.f32 %v1448_v56  ;;  %v1820_v26 = vmul.f32 %v383_v16, %v383_v16  ;;  %v1544_v63 = vmul.f32 0.15, %v1259_v2  ;;  %v1714_v29 = vmul.f32 %v4584_v28, %v3963_v11 }
 0x12d   : > { %3976 = vpow2.f32 %v2553_v39  ;;  %v1217_v15 = vmul.f32 0.6931472, %v3965_v44  ;;  %v3967_v20 = vpop.eup %3966  ;;  %v1041_v30 = vadd.f32 1e-12, %v1040_v13  ;;  %v1450_v31 = vmul.f32 1.442695, %v1352_v7  ;;  %v2211_v13 = vpop.f32.mrf.mxu3 }
 0x12e   : > { %3978 = vpow2.f32 %v1640_v55  ;;  %v3969_v27 = vpop.eup %3968  ;;  %vm542_vm13 = vcmp.lt.s32.totalorder %v478_v5, 514  ;;  %v1859_v35 = vsel %vm398_vm0, %v1795_v19, 0.0  ;;  %v778_v36 = vsel %vm398_vm0, %v714_v53, 0.0  ;;  %v4587_v55 = vld [vmem:[%s4789_s28 + $0x108] sm:$0xff] }
 0x12f   : > { %3980 = vlog2.f32 %v2143_v40  ;;  %v1331_v41 = vmul.f32 -0.35, %v1217_v15  ;;  %3713 = vmatmul.msk.f32.gmra.mxu1 %vm788_vm1, %v1859_v35  ;;  %3674 = vmatmul.msk.f32.gmra.mxu2 %vm788_vm1, %v778_v36  ;;  %v1884_v42 = vsel %vm398_vm0, %v1820_v26, 0.0  ;;  %v5569_v8 = vadd.s32 272, %v5120_v50  ;;  %vm5575_vm14 = vmand %vm398_vm0, %vm542_vm13 }
 0x130   : > { %v3971_v25 = vpop.eup %3970  ;;  %3982 = vpow2.f32 %v2745_v4  ;;  %v2364_v32 = vmul.f32 0.6931472, %v3967_v20  ;;  %3738 = vmatmul.msk.f32.gmra.mxu3 %vm788_vm1, %v1884_v42  ;;  %v2209_v57 = vadd.f32 1e-12, %v2208_v23  ;;  %v1523_v54 = vmul.f32 0.15, %v1217_v15 }
 0x131   : > { %v3973_v60 = vpop.eup %3972  ;;  %v2819_v37 = vmul.f32 %v4585_v17, %v3971_v25  ;;  %3984 = vlog2.f32 %v1104_v22  ;;  %v5579_v2 = vmul.f32 %v2903_v62, %v2903_v62  ;;  %v3300_v24 = vmul.f32 %v2967_v10, %v2967_v10  ;;  %v5608_v25 = vpop.f32.mrf.mxu2 }
 0x132   : > { %v3975_v43 = vpop.eup %3974  ;;  %v2947_v38 = vsub.f32 %v3969_v27, %v3973_v60  ;;  %3986 = vlog2.f32 %v1041_v30  ;;  %v1642_v61 = vmul.f32 1.442695, %v1544_v63  ;;  %v1408_v39 = vmul.f32 1.442695, %v1331_v41 }
 0x133   : > { %v3977_v49 = vpop.eup %3976  ;;  %v2883_v52 = vsub.f32 %v1714_v29, %v2819_v37  ;;  %v1735_v59 = vmul.f32 %v4586_v14, %v3975_v43  ;;  %3988 = vpow2.f32 %v1450_v31  ;;  %v2457_v11 = vmul.f32 -0.35, %v2364_v32 }
 0x134   : > { %v3979_v56 = vpop.eup %3978  ;;  %v3280_v33 = vmul.f32 %v2947_v38, %v2947_v38  ;;  %v2840_v9 = vmul.f32 %v4587_v55, %v3977_v49  ;;  %3990 = vlog2.f32 %v2209_v57  ;;  %v1600_v16 = vmul.f32 1.442695, %v1523_v54  ;;  %v295_v38 = vld [vmem:[%s4784_s25 + $0xf0] sm:$0xff]  ;;  %v320_v54 = vld [vmem:[%s4784_s25 + $0x1b8] sm:$0xff] }
 0x135   : > { %v3981_v21 = vpop.eup %3980  ;;  %v3012_v0 = vmul.f32 %v2883_v52, %v2883_v52  ;;  %v2649_v7 = vmul.f32 0.15, %v2364_v32  ;;  %v2146_v4 = vadd.f32 1e-12, %v2145_v1  ;;  %v3364_v19 = vsel %vm5586_vm15, %v3300_v24, 0.0  ;;  %v359_v49 = vld [vmem:[%s4789_s28 + $0xf0] sm:$0xff]  ;;  %v5636_v1 = vpop.f32.mrf.mxu3 }
 0x136   : > { %v3344_v62 = vsel %vm5575_vm14, %v3280_v33, 0.0  ;;  %v2322_v10 = vmul.f32 0.6931472, %v3981_v21  ;;  %v3983_v40 = vpop.eup %3982  ;;  %3992 = vpow2.f32 %v1408_v39  ;;  %v2904_v23 = vsub.f32 %v1735_v59, %v2840_v9 }
 0x137   : > { %v3076_v12 = vsel %vm5575_vm14, %v3012_v0, 0.0  ;;  %v3419_v34 = vsel %vm788_vm1, %v3344_v62, 0.0  ;;  %v3985_v44 = vpop.eup %3984  ;;  %v2968_v53 = vsub.f32 %v3979_v56, %v3983_v40  ;;  %3994 = vpow2.f32 %v1642_v61  ;;  %v384_v56 = vld [vmem:[%s4789_s28 + $0x1b8] sm:$0xff]  ;;  %v4588_v0 = vld [vmem:[%s4784_s25 + $0x68] sm:$0xff] }
 0x138   : > { %v3151_v5 = vsel %vm788_vm1, %v3076_v12, 0.0  ;;  %v5598_v48 = vadd.f32 %v3419_v34, %v5538_v45  ;;  %v3987_v15 = vpop.eup %3986  ;;  %v2436_v22 = vmul.f32 -0.35, %v2322_v10  ;;  %v2555_v26 = vmul.f32 1.442695, %v2457_v11  ;;  %v4589_v34 = vld [vmem:[%s4789_s28 + $0x68] sm:$0xff] }
 0x139   : > { %v5603_v20 = vadd.f32 %v3151_v5, %v5541_v47  ;;  %v5605_v27 = vpop.eup %3988  ;;  %3996 = vpow2.f32 %v1600_v16  ;;  %v414_v45 = vadd.s32 104, %v5120_v50  ;;  %v2628_v28 = vmul.f32 0.15, %v2322_v10 }
 0x13a   : > { %v2513_v63 = vmul.f32 1.442695, %v2436_v22  ;;  %v2747_v29 = vmul.f32 1.442695, %v2649_v7  ;;  %v1261_v30 = vmul.f32 0.6931472, %v3985_v44  ;;  %3998 = vlog2.f32 %v2146_v4  ;;  %v3991_v47 = vpop.eup %3990 }
 0x13b   : > { %v1219_v31 = vmul.f32 0.6931472, %v3987_v15  ;;  %v3096_v35 = vsel %vm5586_vm15, %v5579_v2, 0.0  ;;  %v1107_v36 = vadd.f32 1e-12, %v1106_v18  ;;  %v5614_v17 = vsel %vm788_vm1, %v3364_v19, 0.0 }
 0x13c   : > { %4000 = vpow2.f32 %v2513_v63  ;;  %v2705_v60 = vmul.f32 1.442695, %v2628_v28  ;;  %v5618_v37 = vadd.s32 %v5122_v51, %v5569_v8  ;;  %v3993_v42 = vpop.eup %3992  ;;  %v5620_v43 = vmul.f32 %v2968_v53, %v2968_v53  ;;  %v1043_v28 = vpop.f32.mrf.mxu0 }
 0x13d   : > { %4002 = vpow2.f32 %v2555_v26  ;;  %v1332_v41 = vmul.f32 -0.35, %v1219_v31  ;;  %v5623_v32 = vadd.s32 280, %v5120_v50  ;;  %v479_v18 = vadd.s32 %v5122_v51, %v414_v45  ;;  %v5628_v57 = vpop.eup %3994  ;;  %v5651_v45 = vpop.f32.mrf.mxu2 }
 0x13e   : > { %4004 = vpow2.f32 %v2705_v60  ;;  %vm563_vm2 = vcmp.lt.s32.totalorder %v5548_v46, 514  ;;  %v5631_v8 = vmul.f32 %v2904_v23, %v2904_v23  ;;  %v1353_v58 = vmul.f32 -0.35, %v1261_v30 }
 0x13f   : > { %4006 = vpow2.f32 %v2747_v29  ;;  %v1524_v52 = vmul.f32 0.15, %v1219_v31  ;;  %v3997_v24 = vpop.eup %3996  ;;  %v1545_v61 = vmul.f32 0.15, %v1261_v30  ;;  %v2366_v33 = vmul.f32 0.6931472, %v3991_v47  ;;  %vm5673_vm5 = vmand %vm398_vm0, %vm563_vm2 }
 0x140   : > { %4008 = vlog2.f32 %v1107_v36  ;;  %v1410_v21 = vmul.f32 1.442695, %v1332_v41  ;;  %v3999_v14 = vpop.eup %3998  ;;  %v2212_v59 = vadd.f32 1e-12, %v2211_v13  ;;  %v1715_v39 = vmul.f32 %v4588_v0, %v3993_v42 }
 0x141   : > { %v690_v55 = vmul.f32 %v295_v38, %v295_v38  ;;  %v1796_v9 = vmul.f32 %v359_v49, %v359_v49  ;;  %vm543_vm3 = vcmp.lt.s32.totalorder %v479_v18, 514  ;;  %v2324_v62 = vmul.f32 0.6931472, %v3999_v14 }
 0x142   : > { %v4001_v11 = vpop.eup %4000  ;;  %v715_v10 = vmul.f32 %v320_v54, %v320_v54  ;;  %v1821_v40 = vmul.f32 %v384_v56, %v384_v56  ;;  %v1602_v44 = vmul.f32 1.442695, %v1524_v52  ;;  %4010 = vpow2.f32 %v1410_v21  ;;  %vm5659_vm4 = vmand %vm398_vm0, %vm543_vm3  ;;  %v2148_v52 = vpop.f32.mrf.mxu1 }
 0x143   : > { %v5638_v12 = vpop.eup %4002  ;;  %v2820_v16 = vmul.f32 %v4589_v34, %v4001_v11  ;;  %v754_v7 = vsel %vm398_vm0, %v690_v55, 0.0  ;;  %v1860_v5 = vsel %vm398_vm0, %v1796_v9, 0.0  ;;  %v2437_v4 = vmul.f32 -0.35, %v2324_v62  ;;  %v4591_v34 = vld [vmem:[%s4784_s25 + $0x110] sm:$0xff] }
 0x144   : > { %v4005_v13 = vpop.eup %4004  ;;  %v2629_v15 = vmul.f32 0.15, %v2324_v62  ;;  %3650 = vmatmul.msk.f32.gmra.mxu0 %vm788_vm1, %v754_v7  ;;  %3714 = vmatmul.msk.f32.gmra.mxu1 %vm788_vm1, %v1860_v5  ;;  %v779_v19 = vsel %vm398_vm0, %v715_v10, 0.0  ;;  %v2458_v23 = vmul.f32 -0.35, %v2366_v33  ;;  %v1885_v63 = vsel %vm398_vm0, %v1821_v40, 0.0 }
 0x145   : > { %v5649_v22 = vpop.eup %4006  ;;  %v2884_v53 = vsub.f32 %v1715_v39, %v2820_v16  ;;  %v2948_v26 = vsub.f32 %v3997_v24, %v4005_v13  ;;  %3675 = vmatmul.msk.f32.gmra.mxu2 %vm788_vm1, %v779_v19  ;;  %4012 = vlog2.f32 %v2212_v59  ;;  %v415_v31 = vadd.s32 112, %v5120_v50  ;;  %3739 = vmatmul.msk.f32.gmra.mxu3 %vm788_vm1, %v1885_v63  ;;  %v5686_v39 = vpop.f32.mrf.mxu3  ;;  %v360_v7 = vld [vmem:[%s4789_s28 + $0xf8] sm:$0xff]  ;;  %v321_v5 = vld [vmem:[%s4784_s25 + $0x1c0] sm:$0xff]  ;;  %v4593_v19 = vld [vmem:[%s4789_s28 + $0x70] sm:$0xff] }
 0x146   : > { %v4009_v29 = vpop.eup %4008  ;;  %v2515_v47 = vmul.f32 1.442695, %v2437_v4  ;;  %v2707_v36 = vmul.f32 1.442695, %v2629_v15  ;;  %v1452_v60 = vmul.f32 1.442695, %v1353_v58  ;;  %4014 = vpow2.f32 %v1602_v44 }
 0x147   : > { %v3013_v41 = vmul.f32 %v2884_v53, %v2884_v53  ;;  %v3281_v42 = vmul.f32 %v2948_v26, %v2948_v26  ;;  %v1644_v38 = vmul.f32 1.442695, %v1545_v61  ;;  %v2650_v49 = vmul.f32 0.15, %v2366_v33  ;;  %v296_v44 = vld [vmem:[%s4784_s25 + $0xf8] sm:$0xff]  ;;  %v4592_v4 = vld [vmem:[%s4789_s28 + $0x110] sm:$0xff] }
 0x148   : > { %4016 = vpow2.f32 %v2515_v47  ;;  %v1044_v18 = vadd.f32 1e-12, %v1043_v28  ;;  %v1263_v54 = vmul.f32 0.6931472, %v4009_v29  ;;  %v4011_v21 = vpop.eup %4010  ;;  %v2557_v61 = vmul.f32 1.442695, %v2458_v23  ;;  %v5716_v23 = vpop.f32.mrf.mxu2 }
 0x149   : > { %v3077_v56 = vsel %vm5659_vm4, %v3013_v41, 0.0  ;;  %v3345_v24 = vsel %vm5659_vm4, %v3281_v42, 0.0  ;;  %4018 = vpow2.f32 %v2707_v36  ;;  %v480_v59 = vadd.s32 %v5122_v51, %v415_v31  ;;  %v385_v31 = vld [vmem:[%s4789_s28 + $0x1c0] sm:$0xff] }
 0x14a   : > { %v3153_v33 = vsel %vm788_vm1, %v3077_v56, 0.0  ;;  %v3421_v14 = vsel %vm788_vm1, %v3345_v24, 0.0  ;;  %4020 = vpow2.f32 %v1452_v60  ;;  %v2149_v55 = vadd.f32 1e-12, %v2148_v52 }
 0x14b   : > { %v5681_v0 = vadd.f32 %v3153_v33, %v5603_v20  ;;  %v5684_v46 = vadd.f32 %v3421_v14, %v5598_v48  ;;  %v4013_v9 = vpop.eup %4012  ;;  %v5693_v11 = vsel %vm788_vm1, %v3096_v35, 0.0  ;;  %v5697_v20 = vadd.s32 %v5122_v51, %v5623_v32 }
 0x14c   : > { %v2749_v62 = vmul.f32 1.442695, %v2650_v49  ;;  %4022 = vlog2.f32 %v1044_v18  ;;  %v4015_v48 = vpop.eup %4014  ;;  %v3365_v10 = vsel %vm5673_vm5, %v5620_v43, 0.0  ;;  %v1354_v2 = vmul.f32 -0.35, %v1263_v54 }
 0x14d   : > { %4024 = vpow2.f32 %v1644_v38  ;;  %v1716_v35 = vmul.f32 %v4590_v6, %v4011_v21  ;;  %v1736_v32 = vmul.f32 %v4591_v34, %v5605_v27  ;;  %v1110_v16 = vadd.f32 1e-12, %v5608_v25  ;;  %v1046_v6 = vpop.f32.mrf.mxu0 }
 0x14e   : > { %v4017_v40 = vpop.eup %4016  ;;  %4026 = vpow2.f32 %v2557_v61  ;;  %vm544_vm6 = vcmp.lt.s32.totalorder %v480_v59, 514  ;;  %v3097_v43 = vsel %vm5673_vm5, %v5631_v8, 0.0  ;;  %vm564_vm7 = vcmp.lt.s32.totalorder %v5618_v37, 514  ;;  %v5741_v59 = vpop.f32.mrf.mxu3 }
 0x14f   : > { %v4019_v13 = vpop.eup %4018  ;;  %v2841_v15 = vmul.f32 %v4592_v4, %v5638_v12  ;;  %v2821_v27 = vmul.f32 %v4593_v19, %v4017_v40  ;;  %4028 = vlog2.f32 %v2149_v55  ;;  %v2969_v25 = vsub.f32 %v5628_v57, %v5649_v22  ;;  %vm5723_vm8 = vmand %vm398_vm0, %vm544_vm6  ;;  %v4594_v19 = vld [vmem:[%s4784_s25 + $0x118] sm:$0xff] }
 0x150   : > { %4030 = vpow2.f32 %v2749_v62  ;;  %v2368_v53 = vmul.f32 0.6931472, %v4013_v9  ;;  %v2949_v26 = vsub.f32 %v4015_v48, %v4019_v13  ;;  %v4021_v63 = vpop.eup %4020  ;;  %v691_v28 = vmul.f32 %v296_v44, %v296_v44  ;;  %vm5766_vm9 = vmand %vm398_vm0, %vm564_vm7 }
 0x151   : > { %v2885_v12 = vsub.f32 %v1716_v35, %v2821_v27  ;;  %v1797_v29 = vmul.f32 %v360_v7, %v360_v7  ;;  %v716_v30 = vmul.f32 %v321_v5, %v321_v5  ;;  %v1454_v36 = vmul.f32 1.442695, %v1354_v2 }
 0x152   : > { %v4023_v47 = vpop.eup %4022  ;;  %v1546_v60 = vmul.f32 0.15, %v1263_v54  ;;  %4032 = vlog2.f32 %v1110_v16  ;;  %v3282_v57 = vmul.f32 %v2949_v26, %v2949_v26  ;;  %v755_v38 = vsel %vm398_vm0, %v691_v28, 0.0  ;;  %v4595_v26 = vld [vmem:[%s4789_s28 + $0x118] sm:$0xff] }
 0x153   : > { %v4025_v22 = vpop.eup %4024  ;;  %v3014_v41 = vmul.f32 %v2885_v12, %v2885_v12  ;;  %v1221_v42 = vmul.f32 0.6931472, %v4023_v47  ;;  %v1861_v49 = vsel %vm398_vm0, %v1797_v29, 0.0  ;;  %v2459_v52 = vmul.f32 -0.35, %v2368_v53  ;;  %3651 = vmatmul.msk.f32.gmra.mxu0 %vm788_vm1, %v755_v38 }
 0x154   : > { %v4027_v18 = vpop.eup %4026  ;;  %v3346_v56 = vsel %vm5723_vm8, %v3282_v57, 0.0  ;;  %3715 = vmatmul.msk.f32.gmra.mxu1 %vm788_vm1, %v1861_v49  ;;  %v780_v54 = vsel %vm398_vm0, %v716_v30, 0.0  ;;  %v1822_v24 = vmul.f32 %v385_v31, %v385_v31  ;;  %v5745_v9 = vsel %vm788_vm1, %v3365_v10, 0.0 }
 0x155   : > { %v4029_v21 = vpop.eup %4028  ;;  %v3078_v58 = vsel %vm5723_vm8, %v3014_v41, 0.0  ;;  %v3423_v61 = vsel %vm788_vm1, %v3346_v56, 0.0  ;;  %v1333_v33 = vmul.f32 -0.35, %v1221_v42  ;;  %v1525_v14 = vmul.f32 0.15, %v1221_v42  ;;  %3676 = vmatmul.msk.f32.gmra.mxu2 %vm788_vm1, %v780_v54 }
 0x156   : > { %v4031_v55 = vpop.eup %4030  ;;  %v2905_v62 = vsub.f32 %v1736_v32, %v2841_v15  ;;  %v3155_v48 = vsel %vm788_vm1, %v3078_v58, 0.0  ;;  %v5749_v2 = vadd.f32 %v3423_v61, %v5684_v46  ;;  %v1646_v35 = vmul.f32 1.442695, %v1546_v60  ;;  %v1118_v15 = vpop.f32.mrf.mxu2  ;;  %v322_v41 = vld [vmem:[%s4784_s25 + $0x1c8] sm:$0xff] }
 0x157   : > { %v2651_v40 = vmul.f32 0.15, %v2368_v53  ;;  %v5752_v34 = vadd.f32 %v3155_v48, %v5681_v0  ;;  %v1412_v16 = vmul.f32 1.442695, %v1333_v33  ;;  %v5755_v7 = vsel %vm788_vm1, %v3097_v43, 0.0  ;;  %v2151_v53 = vpop.f32.mrf.mxu1  ;;  %v386_v56 = vld [vmem:[%s4789_s28 + $0x1c8] sm:$0xff] }
 0x158   : > { %v4033_v44 = vpop.eup %4032  ;;  %v437_v10 = vadd.s32 288, %v5120_v50  ;;  %v2559_v32 = vmul.f32 1.442695, %v2459_v52  ;;  %v2326_v5 = vmul.f32 0.6931472, %v4029_v21  ;;  %v5758_v13 = vmul.f32 %v2969_v25, %v2969_v25  ;;  %v2223_v52 = vpop.f32.mrf.mxu3 }
 0x159   : > { %4034 = vpow2.f32 %v1454_v36  ;;  %v1604_v46 = vmul.f32 1.442695, %v1525_v14  ;;  %v1886_v4 = vsel %vm398_vm0, %v1822_v24, 0.0  ;;  %v5770_v43 = vmul.f32 %v2905_v62, %v2905_v62  ;;  %v1049_v21 = vpop.f32.mrf.mxu0 }
 0x15a   : > { %v1737_v27 = vmul.f32 %v4594_v19, %v4021_v63  ;;  %vm565_vm10 = vcmp.lt.s32.totalorder %v5697_v20, 514  ;;  %4036 = vpow2.f32 %v1412_v16  ;;  %v2438_v25 = vmul.f32 -0.35, %v2326_v5  ;;  %3740 = vmatmul.msk.f32.gmra.mxu3 %vm788_vm1, %v1886_v4  ;;  %v4597_v19 = vld [vmem:[%s4789_s28 + $0x78] sm:$0xff] }
 0x15b   : > { %v2842_v8 = vmul.f32 %v4595_v26, %v4027_v18  ;;  %4038 = vpow2.f32 %v1646_v35  ;;  %v2751_v37 = vmul.f32 1.442695, %v2651_v40  ;;  %v2630_v12 = vmul.f32 0.15, %v2326_v5  ;;  %v4596_v35 = vld [vmem:[%s4784_s25 + $0x78] sm:$0xff]  ;;  %vm5807_vm12 = vmand %vm398_vm0, %vm565_vm10 }
 0x15c   : > { %4040 = vpow2.f32 %v2559_v32  ;;  %v1265_v28 = vmul.f32 0.6931472, %v4033_v44  ;;  %v416_v29 = vadd.s32 120, %v5120_v50  ;;  %v2517_v30 = vmul.f32 1.442695, %v2438_v25 }
 0x15d   : > { %v3366_v63 = vsel %vm5766_vm9, %v5758_v13, 0.0  ;;  %v5781_v31 = vadd.s32 %v5122_v51, %v437_v10  ;;  %4042 = vpow2.f32 %v1604_v46  ;;  %v2709_v47 = vmul.f32 1.442695, %v2630_v12  ;;  %v387_v12 = vld [vmem:[%s4789_s28 + $0x1d0] sm:$0xff] }
 0x15e   : > { %v2970_v36 = vsub.f32 %v4025_v22, %v4031_v55  ;;  %v2215_v60 = vadd.f32 1e-12, %v5636_v1  ;;  %4044 = vpow2.f32 %v2517_v30  ;;  %v1047_v57 = vadd.f32 1e-12, %v1046_v6  ;;  %v1121_v10 = vpop.f32.mrf.mxu2 }
 0x15f   : > { %v5785_v42 = vpop.eup %4034  ;;  %v3098_v38 = vsel %vm5766_vm9, %v5770_v43, 0.0  ;;  %v2906_v49 = vsub.f32 %v1737_v27, %v2842_v8  ;;  %v1113_v18 = vadd.f32 1e-12, %v5651_v45  ;;  %4046 = vpow2.f32 %v2709_v47  ;;  %v2154_v46 = vpop.f32.mrf.mxu1 }
 0x160   : > { %v4037_v54 = vpop.eup %4036  ;;  %4048 = vpow2.f32 %v2751_v37  ;;  %v1355_v22 = vmul.f32 -0.35, %v1265_v28  ;;  %v481_v1 = vadd.s32 %v5122_v51, %v416_v29  ;;  %v1119_v24 = vadd.f32 1e-12, %v1118_v15 }
 0x161   : > { %v5793_v58 = vpop.eup %4038  ;;  %v1547_v61 = vmul.f32 0.15, %v1265_v28  ;;  %4050 = vlog2.f32 %v1047_v57  ;;  %v2152_v33 = vadd.f32 1e-12, %v2151_v53  ;;  %v717_v14 = vmul.f32 %v322_v41, %v322_v41 }
 0x162   : > { %v5795_v55 = vpop.eup %4040  ;;  %v3303_v45 = vmul.f32 %v2970_v36, %v2970_v36  ;;  %4052 = vlog2.f32 %v2215_v60  ;;  %v2224_v62 = vadd.f32 1e-12, %v2223_v52  ;;  %v1823_v48 = vmul.f32 %v386_v56, %v386_v56 }
 0x163   : > { %v4043_v6 = vpop.eup %4042  ;;  %4054 = vlog2.f32 %v1113_v18  ;;  %v1717_v40 = vmul.f32 %v4596_v35, %v4037_v54  ;;  %v781_v16 = vsel %vm398_vm0, %v717_v14, 0.0  ;;  %v1050_v44 = vadd.f32 1e-12, %v1049_v21 }
 0x164   : > { %v4045_v32 = vpop.eup %4044  ;;  %v1456_v5 = vmul.f32 1.442695, %v1355_v22  ;;  %vm545_vm11 = vcmp.lt.s32.totalorder %v481_v1, 514  ;;  %4056 = vlog2.f32 %v1119_v24  ;;  %3677 = vmatmul.msk.f32.gmra.mxu2 %vm788_vm1, %v781_v16  ;;  %v1887_v13 = vsel %vm398_vm0, %v1823_v48, 0.0  ;;  %v323_v48 = vld [vmem:[%s4784_s25 + $0x1d0] sm:$0xff] }
 0x165   : > { %v4047_v4 = vpop.eup %4046  ;;  %v5811_v0 = vmul.f32 %v2906_v49, %v2906_v49  ;;  %v1648_v43 = vmul.f32 1.442695, %v1547_v61  ;;  %v2822_v27 = vmul.f32 %v4597_v19, %v4045_v32  ;;  %4058 = vlog2.f32 %v2152_v33  ;;  %3741 = vmatmul.msk.f32.gmra.mxu3 %vm788_vm1, %v1887_v13  ;;  %vm5826_vm13 = vmand %vm398_vm0, %vm545_vm11  ;;  %v2226_v49 = vpop.f32.mrf.mxu3 }
 0x166   : > { %v5815_v25 = vpop.eup %4048  ;;  %v5818_v53 = vsel %vm788_vm1, %v3366_v63, 0.0  ;;  %v2950_v20 = vsub.f32 %v4043_v6, %v4047_v4  ;;  %4060 = vlog2.f32 %v2224_v62  ;;  %v1122_v26 = vadd.f32 1e-12, %v1121_v10 }
 0x167   : > { %v4051_v8 = vpop.eup %4050  ;;  %v5821_v37 = vsel %vm788_vm1, %v3098_v38, 0.0  ;;  %v2886_v28 = vsub.f32 %v1717_v40, %v2822_v27  ;;  %4062 = vlog2.f32 %v1050_v44  ;;  %v2155_v29 = vadd.f32 1e-12, %v2154_v46 }
 0x168   : > { %v4053_v30 = vpop.eup %4052  ;;  %v3367_v63 = vsel %vm5807_vm12, %v3303_v45, 0.0  ;;  %4064 = vpow2.f32 %v1456_v5  ;;  %v3283_v47 = vmul.f32 %v2950_v20, %v2950_v20  ;;  %v1223_v36 = vmul.f32 0.6931472, %v4051_v8 }
 0x169   : > { %v4055_v60 = vpop.eup %4054  ;;  %v3099_v57 = vsel %vm5807_vm12, %v5811_v0, 0.0  ;;  %4066 = vpow2.f32 %v1648_v43  ;;  %v3015_v41 = vmul.f32 %v2886_v28, %v2886_v28  ;;  %v417_v38 = vadd.s32 128, %v5120_v50 }
 0x16a   : > { %v4057_v18 = vpop.eup %4056  ;;  %v3347_v52 = vsel %vm5826_vm13, %v3283_v47, 0.0  ;;  %v1334_v56 = vmul.f32 -0.35, %v1223_v36  ;;  %v1526_v54 = vmul.f32 0.15, %v1223_v36  ;;  %4068 = vlog2.f32 %v1122_v26 }
 0x16b   : > { %v4059_v22 = vpop.eup %4058  ;;  %v5839_v1 = vsel %vm788_vm1, %v3367_v63, 0.0  ;;  %v3079_v24 = vsel %vm5826_vm13, %v3015_v41, 0.0  ;;  %v3425_v21 = vsel %vm788_vm1, %v3347_v52, 0.0  ;;  %4070 = vlog2.f32 %v2155_v29 }
 0x16c   : > { %v4061_v61 = vpop.eup %4060  ;;  %v5844_v33 = vmul.f32 0.6931472, %v4053_v30  ;;  %v3157_v14 = vsel %vm788_vm1, %v3079_v24, 0.0  ;;  %v5848_v45 = vadd.f32 %v3425_v21, %v5749_v2  ;;  %v2227_v62 = vadd.f32 1e-12, %v2226_v49 }
 0x16d   : > { %v4063_v6 = vpop.eup %4062  ;;  %v5851_v35 = vmul.f32 0.6931472, %v4055_v60  ;;  %v5854_v40 = vadd.f32 %v3157_v14, %v5752_v34  ;;  %v1414_v16 = vmul.f32 1.442695, %v1334_v56  ;;  %v1271_v44 = vmul.f32 0.6931472, %v4057_v18 }
 0x16e   : > { %v5856_v10 = vpop.eup %4064  ;;  %v5859_v32 = vadd.f32 1e-12, %v5686_v39  ;;  %v1606_v5 = vmul.f32 1.442695, %v1526_v54  ;;  %v5862_v2 = vadd.s32 %v5122_v51, %v417_v38  ;;  %v2328_v13 = vmul.f32 0.6931472, %v4059_v22 }
 0x16f   : > { %v5864_v46 = vpop.eup %4066  ;;  %v1358_v4 = vmul.f32 -0.35, %v1271_v44  ;;  %v1550_v43 = vmul.f32 0.15, %v1271_v44  ;;  %v2376_v19 = vmul.f32 0.6931472, %v4061_v61  ;;  %v718_v34 = vmul.f32 %v323_v48, %v323_v48 }
 0x170   : > { %v4069_v27 = vpop.eup %4068  ;;  %v2439_v20 = vmul.f32 -0.35, %v2328_v13  ;;  %v2631_v26 = vmul.f32 0.15, %v2328_v13  ;;  %v1225_v8 = vmul.f32 0.6931472, %v4063_v6  ;;  %4072 = vlog2.f32 %v2227_v62 }
 0x171   : > { %v4071_v28 = vpop.eup %4070  ;;  %4074 = vpow2.f32 %v1414_v16  ;;  %v1462_v39 = vmul.f32 1.442695, %v1358_v4  ;;  %v1654_v29 = vmul.f32 1.442695, %v1550_v43  ;;  %v2463_v30 = vmul.f32 -0.35, %v2376_v19 }
 0x172   : > { %4076 = vpow2.f32 %v1606_v5  ;;  %v2519_v63 = vmul.f32 1.442695, %v2439_v20  ;;  %v2711_v47 = vmul.f32 1.442695, %v2631_v26  ;;  %v2655_v36 = vmul.f32 0.15, %v2376_v19 }
 0x173   : > { %4078 = vpow2.f32 %v1462_v39  ;;  %v2567_v60 = vmul.f32 1.442695, %v2463_v30  ;;  %v1335_v41 = vmul.f32 -0.35, %v1225_v8  ;;  %v1527_v38 = vmul.f32 0.15, %v1225_v8  ;;  %v1052_v39 = vpop.f32.mrf.mxu0 }
 0x174   : > { %4080 = vpow2.f32 %v1654_v29  ;;  %v2759_v49 = vmul.f32 1.442695, %v2655_v36  ;;  %v1273_v18 = vmul.f32 0.6931472, %v4069_v27  ;;  %v2330_v52 = vmul.f32 0.6931472, %v4071_v28 }
 0x175   : > { %4082 = vpow2.f32 %v2519_v63  ;;  %v1416_v56 = vmul.f32 1.442695, %v1335_v41  ;;  %v1608_v54 = vmul.f32 1.442695, %v1527_v38  ;;  %v1824_v22 = vmul.f32 %v387_v12, %v387_v12  ;;  %v4598_v8 = vld [vmem:[%s4784_s25 + $0x80] sm:$0xff] }
 0x176   : > { %v4073_v24 = vpop.eup %4072  ;;  %4084 = vpow2.f32 %v2711_v47  ;;  %v1359_v21 = vmul.f32 -0.35, %v1273_v18  ;;  %v1551_v61 = vmul.f32 0.15, %v1273_v18  ;;  %v2440_v14 = vmul.f32 -0.35, %v2330_v52  ;;  %v1124_v18 = vpop.f32.mrf.mxu2 }
 0x177   : > { %v4075_v62 = vpop.eup %4074  ;;  %4086 = vpow2.f32 %v2567_v60  ;;  %v2632_v48 = vmul.f32 0.15, %v2330_v52  ;;  %v2378_v6 = vmul.f32 0.6931472, %v4073_v24  ;;  %v782_v16 = vsel %vm398_vm0, %v718_v34, 0.0  ;;  %v4599_v36 = vld [vmem:[%s4784_s25 + $0x140] sm:$0xff] }
 0x178   : > { %v4077_v44 = vpop.eup %4076  ;;  %v5870_v5 = vmul.f32 -0.35, %v5844_v33  ;;  %4088 = vpow2.f32 %v2759_v49  ;;  %v1464_v13 = vmul.f32 1.442695, %v1359_v21  ;;  %v1656_v4 = vmul.f32 1.442695, %v1551_v61  ;;  %3678 = vmatmul.msk.f32.gmra.mxu2 %vm788_vm1, %v782_v16 }
 0x179   : > { %v4079_v43 = vpop.eup %4078  ;;  %4090 = vpow2.f32 %v1416_v56  ;;  %v2521_v19 = vmul.f32 1.442695, %v2440_v14  ;;  %v2464_v27 = vmul.f32 -0.35, %v2378_v6  ;;  %v2656_v20 = vmul.f32 0.15, %v2378_v6 }
 0x17a   : > { %v4081_v26 = vpop.eup %4080  ;;  %v1718_v12 = vmul.f32 %v4598_v8, %v4075_v62  ;;  %4092 = vpow2.f32 %v1608_v54  ;;  %v2713_v34 = vmul.f32 1.442695, %v2632_v48  ;;  %v1888_v28 = vsel %vm398_vm0, %v1824_v22, 0.0  ;;  %v4600_v41 = vld [vmem:[%s4789_s28 + $0x80] sm:$0xff]  ;;  %v324_v6 = vld [vmem:[%s4784_s25 + $0x1d8] sm:$0xff] }
 0x17b   : > { %v4083_v29 = vpop.eup %4082  ;;  %vm546_vm14 = vcmp.lt.s32.totalorder %v5862_v2, 514  ;;  %4094 = vpow2.f32 %v1464_v13  ;;  %v418_v30 = vadd.s32 136, %v5120_v50  ;;  %v2569_v63 = vmul.f32 1.442695, %v2464_v27  ;;  %3742 = vmatmul.msk.f32.gmra.mxu3 %vm788_vm1, %v1888_v28  ;;  %v4601_v62 = vld [vmem:[%s4789_s28 + $0x140] sm:$0xff]  ;;  %v2229_v2 = vpop.f32.mrf.mxu3  ;;  %v388_v8 = vld [vmem:[%s4789_s28 + $0x1d8] sm:$0xff] }
 0x17c   : > { %v4085_v47 = vpop.eup %4084  ;;  %v1742_v60 = vmul.f32 %v4599_v36, %v4079_v43  ;;  %v2823_v38 = vmul.f32 %v4600_v41, %v4083_v29  ;;  %4096 = vpow2.f32 %v1656_v4  ;;  %v2761_v49 = vmul.f32 1.442695, %v2656_v20  ;;  %vm5889_vm15 = vmand %vm398_vm0, %vm546_vm14 }
 0x17d   : > { %v4087_v52 = vpop.eup %4086  ;;  %v2652_v56 = vmul.f32 0.15, %v5844_v33  ;;  %v2951_v54 = vsub.f32 %v4077_v44, %v4085_v47  ;;  %4098 = vpow2.f32 %v2521_v19  ;;  %v1053_v22 = vadd.f32 1e-12, %v1052_v39  ;;  %v2157_v33 = vpop.f32.mrf.mxu1 }
 0x17e   : > { %v4089_v24 = vpop.eup %4088  ;;  %v5883_v21 = vmul.f32 -0.35, %v5851_v35  ;;  %v2887_v14 = vsub.f32 %v1718_v12, %v2823_v38  ;;  %v2847_v48 = vmul.f32 %v4601_v62, %v4087_v52  ;;  %4100 = vpow2.f32 %v2713_v34 }
 0x17f   : > { %v4091_v16 = vpop.eup %4090  ;;  %v3284_v44 = vmul.f32 %v2951_v54, %v2951_v54  ;;  %v5895_v13 = vsub.f32 %v4081_v26, %v4089_v24  ;;  %v483_v4 = vadd.s32 %v5122_v51, %v418_v30  ;;  %4102 = vpow2.f32 %v2569_v63  ;;  %v4602_v63 = vld [vmem:[%s4784_s25 + $0x88] sm:$0xff] }
 0x180   : > { %v4093_v43 = vpop.eup %4092  ;;  %v3016_v19 = vmul.f32 %v2887_v14, %v2887_v14  ;;  %v5898_v27 = vsub.f32 %v1742_v60, %v2847_v48  ;;  %4104 = vpow2.f32 %v2761_v49  ;;  %v1125_v20 = vadd.f32 1e-12, %v1124_v18  ;;  %v4603_v54 = vld [vmem:[%s4784_s25 + $0x148] sm:$0xff]  ;;  %v1055_v14 = vpop.f32.mrf.mxu0 }
 0x181   : > { %v4095_v12 = vpop.eup %4094  ;;  %v3348_v34 = vsel %vm5889_vm15, %v3284_v44, 0.0  ;;  %4106 = vlog2.f32 %v1053_v22  ;;  %v2158_v26 = vadd.f32 1e-12, %v2157_v33  ;;  %v719_v28 = vmul.f32 %v324_v6, %v324_v6  ;;  %v4604_v24 = vld [vmem:[%s4789_s28 + $0x88] sm:$0xff] }
 0x182   : > { %v4097_v39 = vpop.eup %4096  ;;  %v3080_v29 = vsel %vm5889_vm15, %v3016_v19, 0.0  ;;  %v3427_v30 = vsel %vm788_vm1, %v3348_v34, 0.0  ;;  %v1719_v47 = vmul.f32 %v4602_v63, %v4091_v16  ;;  %v2230_v36 = vadd.f32 1e-12, %v2229_v2  ;;  %v4605_v44 = vld [vmem:[%s4789_s28 + $0x148] sm:$0xff] }
 0x183   : > { %v4099_v60 = vpop.eup %4098  ;;  %v3159_v41 = vsel %vm788_vm1, %v3080_v29, 0.0  ;;  %v3428_v38 = vadd.f32 %v3427_v30, %v5848_v45  ;;  %vm547_vm2 = vcmp.lt.s32.totalorder %v483_v4, 514  ;;  %v1825_v49 = vmul.f32 %v388_v8, %v388_v8 }
 0x184   : > { %v4101_v18 = vpop.eup %4100  ;;  %v3160_v52 = vadd.f32 %v3159_v41, %v5854_v40  ;;  %v1743_v22 = vmul.f32 %v4603_v54, %v4095_v12  ;;  %v2824_v61 = vmul.f32 %v4604_v24, %v4099_v60  ;;  %4108 = vlog2.f32 %v1125_v20  ;;  %vm5916_vm3 = vmand %vm398_vm0, %vm547_vm2  ;;  %v1127_v20 = vpop.f32.mrf.mxu2  ;;  %v4606_v54 = vld [vmem:[%s4784_s25 + $0x120] sm:$0xff] }
 0x185   : > { %v4103_v62 = vpop.eup %4102  ;;  %v2561_v48 = vmul.f32 1.442695, %v5870_v5  ;;  %v2753_v33 = vmul.f32 1.442695, %v2652_v56  ;;  %v2952_v6 = vsub.f32 %v4093_v43, %v4101_v18  ;;  %4110 = vlog2.f32 %v2158_v26 }
 0x186   : > { %v4105_v16 = vpop.eup %4104  ;;  %v2888_v40 = vsub.f32 %v1719_v47, %v2824_v61  ;;  %v2848_v2 = vmul.f32 %v4605_v44, %v4103_v62  ;;  %4112 = vlog2.f32 %v2230_v36  ;;  %v783_v19 = vsel %vm398_vm0, %v719_v28, 0.0  ;;  %v4607_v62 = vld [vmem:[%s4789_s28 + $0x120] sm:$0xff] }
 0x187   : > { %v4107_v5 = vpop.eup %4106  ;;  %v3285_v56 = vmul.f32 %v2952_v6, %v2952_v6  ;;  %v5923_v43 = vsub.f32 %v4097_v39, %v4105_v16  ;;  %3679 = vmatmul.msk.f32.gmra.mxu2 %vm788_vm1, %v783_v19  ;;  %v1889_v4 = vsel %vm398_vm0, %v1825_v49, 0.0  ;;  %v1056_v8 = vadd.f32 1e-12, %v1055_v14  ;;  %v2160_v14 = vpop.f32.mrf.mxu1  ;;  %v325_v44 = vld [vmem:[%s4784_s25 + $0x1e0] sm:$0xff] }
 0x188   : > { %4114 = vlog2.f32 %v5859_v32  ;;  %v3017_v12 = vmul.f32 %v2888_v40, %v2888_v40  ;;  %v5929_v34 = vsub.f32 %v1743_v22, %v2848_v2  ;;  %v1227_v26 = vmul.f32 0.6931472, %v4107_v5  ;;  %3743 = vmatmul.msk.f32.gmra.mxu3 %vm788_vm1, %v1889_v4 }
 0x189   : > { %4116 = vpow2.f32 %v2561_v48  ;;  %v1458_v28 = vmul.f32 1.442695, %v5883_v21  ;;  %v3349_v39 = vsel %vm5916_vm3, %v3285_v56, 0.0  ;;  %v1128_v29 = vadd.f32 1e-12, %v1127_v20 }
 0x18a   : > { %v4109_v30 = vpop.eup %4108  ;;  %v3081_v63 = vsel %vm5916_vm3, %v3017_v12, 0.0  ;;  %v3429_v32 = vsel %vm788_vm1, %v3349_v39, 0.0  ;;  %v1336_v47 = vmul.f32 -0.35, %v1227_v26  ;;  %4118 = vlog2.f32 %v1056_v8 }
 0x18b   : > { %v4111_v36 = vpop.eup %4110  ;;  %v1116_v60 = vadd.f32 1e-12, %v5716_v23  ;;  %v3161_v41 = vsel %vm788_vm1, %v3081_v63, 0.0  ;;  %v5940_v49 = vadd.f32 %v3429_v32, %v3428_v38  ;;  %v1528_v21 = vmul.f32 0.15, %v1227_v26 }
 0x18c   : > { %v4113_v18 = vpop.eup %4112  ;;  %v1738_v22 = vmul.f32 %v4606_v54, %v5785_v42  ;;  %4120 = vpow2.f32 %v2753_v33  ;;  %v5944_v24 = vadd.f32 %v3161_v41, %v3160_v52  ;;  %v1418_v61 = vmul.f32 1.442695, %v1336_v47  ;;  %v2232_v41 = vpop.f32.mrf.mxu3 }
 0x18d   : > { %v2843_v48 = vmul.f32 %v4607_v62, %v5795_v55  ;;  %v2971_v23 = vsub.f32 %v5793_v58, %v5815_v25  ;;  %4122 = vpow2.f32 %v1458_v28  ;;  %v1275_v38 = vmul.f32 0.6931472, %v4109_v30  ;;  %v389_v28 = vld [vmem:[%s4789_s28 + $0x1e0] sm:$0xff] }
 0x18e   : > { %v4115_v6 = vpop.eup %4114  ;;  %v1610_v16 = vmul.f32 1.442695, %v1528_v21  ;;  %v2332_v45 = vmul.f32 0.6931472, %v4111_v36  ;;  %v2380_v40 = vmul.f32 0.6931472, %v4113_v18  ;;  %4124 = vlog2.f32 %v1128_v29 }
 0x18f   : > { %v5951_v42 = vpop.eup %4116  ;;  %4126 = vlog2.f32 %v1116_v60  ;;  %v1360_v52 = vmul.f32 -0.35, %v1275_v38  ;;  %v1552_v33 = vmul.f32 0.15, %v1275_v38  ;;  %v2161_v2 = vadd.f32 1e-12, %v2160_v14 }
 0x190   : > { %v4119_v19 = vpop.eup %4118  ;;  %4128 = vpow2.f32 %v1418_v61  ;;  %v2441_v55 = vmul.f32 -0.35, %v2332_v45  ;;  %v2633_v20 = vmul.f32 0.15, %v2332_v45  ;;  %v2465_v58 = vmul.f32 -0.35, %v2380_v40 }
 0x191   : > { %v1466_v25 = vmul.f32 1.442695, %v1360_v52  ;;  %v1658_v5 = vmul.f32 1.442695, %v1552_v33  ;;  %v2657_v56 = vmul.f32 0.15, %v2380_v40  ;;  %4130 = vlog2.f32 %v2161_v2 }
 0x192   : > { %v5953_v4 = vpop.eup %4120  ;;  %4132 = vpow2.f32 %v1610_v16  ;;  %v419_v8 = vadd.s32 144, %v5120_v50  ;;  %v2523_v12 = vmul.f32 1.442695, %v2441_v55  ;;  %v2715_v26 = vmul.f32 1.442695, %v2633_v20 }
 0x193   : > { %v5957_v39 = vpop.eup %4122  ;;  %4134 = vpow2.f32 %v1466_v25  ;;  %v2571_v29 = vmul.f32 1.442695, %v2465_v58  ;;  %v1229_v30 = vmul.f32 0.6931472, %v4119_v19  ;;  %v720_v63 = vmul.f32 %v325_v44, %v325_v44 }
 0x194   : > { %v4125_v32 = vpop.eup %4124  ;;  %v5959_v47 = vsub.f32 %v1738_v22, %v2843_v48  ;;  %v5962_v36 = vadd.s32 296, %v5120_v50  ;;  %4136 = vpow2.f32 %v1658_v5  ;;  %v2763_v60 = vmul.f32 1.442695, %v2657_v56 }
 0x195   : > { %v5964_v21 = vpop.eup %4126  ;;  %4138 = vpow2.f32 %v2523_v12  ;;  %v1337_v18 = vmul.f32 -0.35, %v1229_v30  ;;  %v1529_v54 = vmul.f32 0.15, %v1229_v30  ;;  %v1826_v61 = vmul.f32 %v389_v28, %v389_v28  ;;  %v1130_v12 = vpop.f32.mrf.mxu2  ;;  %v4609_v28 = vld [vmem:[%s4784_s25 + $0x150] sm:$0xff] }
 0x196   : > { %v4129_v14 = vpop.eup %4128  ;;  %v5966_v62 = vmul.f32 %v2971_v23, %v2971_v23  ;;  %v5969_v38 = vmul.f32 0.15, %v5851_v35  ;;  %v484_v22 = vadd.s32 %v5122_v51, %v419_v8  ;;  %4140 = vpow2.f32 %v2715_v26  ;;  %v1058_v35 = vpop.f32.mrf.mxu0 }
 0x197   : > { %v4131_v48 = vpop.eup %4130  ;;  %4142 = vpow2.f32 %v2571_v29  ;;  %v1420_v16 = vmul.f32 1.442695, %v1337_v18  ;;  %v1277_v45 = vmul.f32 0.6931472, %v4125_v32  ;;  %v784_v40 = vsel %vm398_vm0, %v720_v63, 0.0  ;;  %v4610_v32 = vld [vmem:[%s4789_s28 + $0x90] sm:$0xff] }
 0x198   : > { %v4133_v44 = vpop.eup %4132  ;;  %v5974_v52 = vmul.f32 0.6931472, %v4115_v6  ;;  %4144 = vpow2.f32 %v2763_v60  ;;  %v1612_v23 = vmul.f32 1.442695, %v1529_v54  ;;  %v2334_v33 = vmul.f32 0.6931472, %v4131_v48  ;;  %3680 = vmatmul.msk.f32.gmra.mxu2 %vm788_vm1, %v784_v40 }
 0x199   : > { %v4135_v2 = vpop.eup %4134  ;;  %v2221_v19 = vadd.f32 1e-12, %v5741_v59  ;;  %v420_v55 = vadd.s32 152, %v5120_v50  ;;  %v2233_v20 = vadd.f32 1e-12, %v2232_v41  ;;  %v1890_v58 = vsel %vm398_vm0, %v1826_v61, 0.0 }
 0x19a   : > { %v4137_v25 = vpop.eup %4136  ;;  %v4608_v6 = vld [vmem:[%s4784_s25 + $0x90] sm:$0xff]  ;;  %4146 = vpow2.f32 %v1420_v16  ;;  %v2442_v56 = vmul.f32 -0.35, %v2334_v33  ;;  %v2634_v8 = vmul.f32 0.15, %v2334_v33  ;;  %3744 = vmatmul.msk.f32.gmra.mxu3 %vm788_vm1, %v1890_v58  ;;  %v1744_v29 = vmul.f32 %v4609_v28, %v4135_v2  ;;  %v2163_v16 = vpop.f32.mrf.mxu1 }
 0x19b   : > { %v1720_v5 = vmul.f32 %v4608_v6, %v4129_v14  ;;  %v4139_v26 = vpop.eup %4138  ;;  %vm548_vm4 = vcmp.lt.s32.totalorder %v484_v22, 514  ;;  %v1361_v59 = vmul.f32 -0.35, %v1277_v45  ;;  %v1059_v30 = vadd.f32 1e-12, %v1058_v35  ;;  %v4611_v2 = vld [vmem:[%s4789_s28 + $0x150] sm:$0xff]  ;;  %v2235_v6 = vpop.f32.mrf.mxu3 }
 0x19c   : > { %v4141_v63 = vpop.eup %4140  ;;  %v2825_v60 = vmul.f32 %v4610_v32, %v4139_v26  ;;  %4148 = vpow2.f32 %v1612_v23  ;;  %v2525_v41 = vmul.f32 1.442695, %v2442_v56  ;;  %v2717_v18 = vmul.f32 1.442695, %v2634_v8  ;;  %vm5989_vm5 = vmand %vm398_vm0, %vm548_vm4 }
 0x19d   : > { %v4143_v54 = vpop.eup %4142  ;;  %v2953_v61 = vsub.f32 %v4133_v44, %v4141_v63  ;;  %v485_v14 = vadd.s32 %v5122_v51, %v420_v55  ;;  %4150 = vlog2.f32 %v2233_v20  ;;  %v1131_v48 = vadd.f32 1e-12, %v1130_v12 }
 0x19e   : > { %v4145_v40 = vpop.eup %4144  ;;  %v2889_v35 = vsub.f32 %v1720_v5, %v2825_v60  ;;  %v2849_v23 = vmul.f32 %v4611_v2, %v4143_v54  ;;  %v1553_v58 = vmul.f32 0.15, %v1277_v45  ;;  %4152 = vpow2.f32 %v2525_v41  ;;  %v4612_v60 = vld [vmem:[%s4784_s25 + $0x98] sm:$0xff] }
 0x19f   : > { %v3286_v44 = vmul.f32 %v2953_v61, %v2953_v61  ;;  %v5994_v56 = vsub.f32 %v4137_v25, %v4145_v40  ;;  %v1468_v55 = vmul.f32 1.442695, %v1361_v59  ;;  %4154 = vpow2.f32 %v2717_v18  ;;  %v326_v18 = vld [vmem:[%s4784_s25 + $0x1e8] sm:$0xff] }
 0x1a0   : > { %v4147_v20 = vpop.eup %4146  ;;  %v3018_v8 = vmul.f32 %v2889_v35, %v2889_v35  ;;  %v5996_v22 = vsub.f32 %v1744_v29, %v2849_v23  ;;  %4156 = vlog2.f32 %v1059_v30  ;;  %v2164_v12 = vadd.f32 1e-12, %v2163_v16  ;;  %v4613_v35 = vld [vmem:[%s4789_s28 + $0x98] sm:$0xff] }
 0x1a1   : > { %v5999_v5 = vmul.f32 -0.35, %v5974_v52  ;;  %v3350_v45 = vsel %vm5989_vm5, %v3286_v44, 0.0  ;;  %4158 = vlog2.f32 %v1131_v48  ;;  %v2236_v26 = vadd.f32 1e-12, %v2235_v6  ;;  %v390_v48 = vld [vmem:[%s4789_s28 + $0x1e8] sm:$0xff] }
 0x1a2   : > { %v4149_v25 = vpop.eup %4148  ;;  %4160 = vlog2.f32 %v2221_v19  ;;  %v3082_v28 = vsel %vm5989_vm5, %v3018_v8, 0.0  ;;  %v3431_v29 = vsel %vm788_vm1, %v3350_v45, 0.0  ;;  %v1660_v59 = vmul.f32 1.442695, %v1553_v58 }
 0x1a3   : > { %v4151_v30 = vpop.eup %4150  ;;  %v3163_v63 = vsel %vm788_vm1, %v3082_v28, 0.0  ;;  %v3432_v32 = vadd.f32 %v3431_v29, %v5940_v49  ;;  %v1721_v41 = vmul.f32 %v4612_v60, %v4147_v20  ;;  %4162 = vpow2.f32 %v1468_v55 }
 0x1a4   : > { %v4153_v54 = vpop.eup %4152  ;;  %v3164_v19 = vadd.f32 %v3163_v63, %v5944_v24  ;;  %vm549_vm6 = vcmp.lt.s32.totalorder %v485_v14, 514  ;;  %v2382_v61 = vmul.f32 0.6931472, %v4151_v30  ;;  %4164 = vlog2.f32 %v2164_v12 }
 0x1a5   : > { %v4155_v16 = vpop.eup %4154  ;;  %v6013_v40 = vmul.f32 0.15, %v5974_v52  ;;  %v6016_v33 = vmul.f32 0.6931472, %v5964_v21  ;;  %v2826_v49 = vmul.f32 %v4613_v35, %v4153_v54  ;;  %4166 = vlog2.f32 %v2236_v26  ;;  %vm6022_vm7 = vmand %vm398_vm0, %vm549_vm6  ;;  %v1133_v35 = vpop.f32.mrf.mxu2 }
 0x1a6   : > { %v4157_v2 = vpop.eup %4156  ;;  %v2954_v23 = vsub.f32 %v4149_v25, %v4155_v16  ;;  %v2466_v58 = vmul.f32 -0.35, %v2382_v61  ;;  %v2658_v6 = vmul.f32 0.15, %v2382_v61  ;;  %v721_v44 = vmul.f32 %v326_v18, %v326_v18 }
 0x1a7   : > { %v4159_v24 = vpop.eup %4158  ;;  %4168 = vpow2.f32 %v1660_v59  ;;  %v2890_v52 = vsub.f32 %v1721_v41, %v2826_v49  ;;  %v1231_v21 = vmul.f32 0.6931472, %v4157_v2  ;;  %v1827_v20 = vmul.f32 %v390_v48, %v390_v48 }
 0x1a8   : > { %v4161_v8 = vpop.eup %4160  ;;  %vm566_vm8 = vcmp.lt.s32.totalorder %v5781_v31, 514  ;;  %v3287_v12 = vmul.f32 %v2954_v23, %v2954_v23  ;;  %v2573_v45 = vmul.f32 1.442695, %v2466_v58  ;;  %v2765_v26 = vmul.f32 1.442695, %v2658_v6 }
 0x1a9   : > { %v1279_v25 = vmul.f32 0.6931472, %v4159_v24  ;;  %v4163_v28 = vpop.eup %4162  ;;  %v3019_v29 = vmul.f32 %v2890_v52, %v2890_v52  ;;  %v1338_v59 = vmul.f32 -0.35, %v1231_v21  ;;  %v1530_v14 = vmul.f32 0.15, %v1231_v21  ;;  %vm6054_vm9 = vmand %vm398_vm0, %vm566_vm8 }
 0x1aa   : > { %v785_v30 = vsel %vm398_vm0, %v721_v44, 0.0  ;;  %v4165_v63 = vpop.eup %4164  ;;  %v3351_v60 = vsel %vm6022_vm7, %v3287_v12, 0.0  ;;  %4170 = vpow2.f32 %v2573_v45  ;;  %v6038_v44 = vmul.f32 0.6931472, %v4161_v8 }
 0x1ab   : > { %v1362_v41 = vmul.f32 -0.35, %v1279_v25  ;;  %v1554_v18 = vmul.f32 0.15, %v1279_v25  ;;  %3681 = vmatmul.msk.f32.gmra.mxu2 %vm788_vm1, %v785_v30  ;;  %v4167_v54 = vpop.eup %4166  ;;  %v3083_v61 = vsel %vm6022_vm7, %v3019_v29, 0.0  ;;  %v3433_v48 = vsel %vm788_vm1, %v3351_v60, 0.0 }
 0x1ac   : > { %4172 = vpow2.f32 %v2765_v26  ;;  %v1422_v16 = vmul.f32 1.442695, %v1338_v59  ;;  %v3165_v49 = vsel %vm788_vm1, %v3083_v61, 0.0  ;;  %v6036_v2 = vadd.f32 %v3433_v48, %v3432_v32  ;;  %v4614_v26 = vld [vmem:[%s4784_s25 + $0x158] sm:$0xff] }
 0x1ad   : > { %v1614_v23 = vmul.f32 1.442695, %v1530_v14  ;;  %v1470_v58 = vmul.f32 1.442695, %v1362_v41  ;;  %v4169_v6 = vpop.eup %4168  ;;  %v6040_v24 = vadd.f32 %v3165_v49, %v3164_v19  ;;  %v1662_v52 = vmul.f32 1.442695, %v1554_v18  ;;  %v2238_v18 = vpop.f32.mrf.mxu3 }
 0x1ae   : > { %v2336_v55 = vmul.f32 0.6931472, %v4165_v63  ;;  %4174 = vpow2.f32 %v1422_v16  ;;  %v2384_v21 = vmul.f32 0.6931472, %v4167_v54  ;;  %v1891_v12 = vsel %vm398_vm0, %v1827_v20, 0.0  ;;  %v4615_v63 = vld [vmem:[%s4789_s28 + $0x158] sm:$0xff] }
 0x1af   : > { %v1134_v45 = vadd.f32 1e-12, %v1133_v35  ;;  %v1745_v25 = vmul.f32 %v4614_v26, %v4163_v28  ;;  %4176 = vpow2.f32 %v1614_v23  ;;  %3745 = vmatmul.msk.f32.gmra.mxu3 %vm788_vm1, %v1891_v12  ;;  %v421_v19 = vadd.s32 160, %v5120_v50  ;;  %v327_v23 = vld [vmem:[%s4784_s25 + $0x1f0] sm:$0xff] }
 0x1b0   : > { %v2443_v32 = vmul.f32 -0.35, %v2336_v55  ;;  %v2635_v29 = vmul.f32 0.15, %v2336_v55  ;;  %v4171_v8 = vpop.eup %4170  ;;  %4178 = vpow2.f32 %v1470_v58  ;;  %v2467_v59 = vmul.f32 -0.35, %v2384_v21 }
 0x1b1   : > { %v2659_v14 = vmul.f32 0.15, %v2384_v21  ;;  %v2850_v60 = vmul.f32 %v4615_v63, %v4171_v8  ;;  %4180 = vpow2.f32 %v1662_v52  ;;  %v2563_v16 = vmul.f32 1.442695, %v5999_v5 }
 0x1b2   : > { %v4173_v30 = vpop.eup %4172  ;;  %v2527_v20 = vmul.f32 1.442695, %v2443_v32  ;;  %v2719_v41 = vmul.f32 1.442695, %v2635_v29  ;;  %v2575_v54 = vmul.f32 1.442695, %v2467_v59  ;;  %4182 = vlog2.f32 %v1134_v45 }
 0x1b3   : > { %v6048_v28 = vsub.f32 %v4169_v6, %v4173_v30  ;;  %v2767_v61 = vmul.f32 1.442695, %v2659_v14  ;;  %v1357_v35 = vmul.f32 -0.35, %v6016_v33  ;;  %v6060_v49 = vsub.f32 %v1745_v25, %v2850_v60  ;;  %v391_v45 = vld [vmem:[%s4789_s28 + $0x1f0] sm:$0xff] }
 0x1b4   : > { %4184 = vpow2.f32 %v2527_v20  ;;  %v4175_v58 = vpop.eup %4174  ;;  %v6068_v31 = vsel %vm788_vm1, %v3099_v57, 0.0  ;;  %v6072_v6 = vadd.s32 %v5122_v51, %v5962_v36  ;;  %v2239_v5 = vadd.f32 1e-12, %v2238_v18  ;;  %v4618_v18 = vld [vmem:[%s4789_s28 + $0xa0] sm:$0xff] }
 0x1b5   : > { %4186 = vpow2.f32 %v2719_v41  ;;  %v4177_v52 = vpop.eup %4176  ;;  %v6076_v55 = vmul.f32 %v5959_v47, %v5959_v47  ;;  %v2462_v21 = vmul.f32 -0.35, %v6038_v44  ;;  %v486_v15 = vadd.s32 %v5122_v51, %v421_v19  ;;  %v4616_v19 = vld [vmem:[%s4784_s25 + $0xa0] sm:$0xff] }
 0x1b6   : > { %4188 = vpow2.f32 %v2575_v54  ;;  %v4179_v0 = vpop.eup %4178  ;;  %v3368_v57 = vsel %vm6054_vm9, %v5966_v62, 0.0  ;;  %v1650_v36 = vmul.f32 1.442695, %v5969_v38  ;;  %v722_v12 = vmul.f32 %v327_v23, %v327_v23 }
 0x1b7   : > { %4190 = vpow2.f32 %v2767_v61  ;;  %v4181_v26 = vpop.eup %4180  ;;  %v439_v47 = vadd.s32 304, %v5120_v50  ;;  %v2755_v25 = vmul.f32 1.442695, %v6013_v40  ;;  %v1460_v32 = vmul.f32 1.442695, %v1357_v35 }
 0x1b8   : > { %4192 = vpow2.f32 %v2563_v16  ;;  %v4183_v29 = vpop.eup %4182  ;;  %v1549_v8 = vmul.f32 0.15, %v6016_v33  ;;  %v1722_v59 = vmul.f32 %v4616_v19, %v4175_v58  ;;  %v786_v38 = vsel %vm398_vm0, %v722_v12, 0.0  ;;  %v4617_v33 = vld [vmem:[%s4784_s25 + $0x160] sm:$0xff] }
 0x1b9   : > { %4194 = vlog2.f32 %v2239_v5  ;;  %v2565_v30 = vmul.f32 1.442695, %v2462_v21  ;;  %vm550_vm10 = vcmp.lt.s32.totalorder %v486_v15, 514  ;;  %v1281_v63 = vmul.f32 0.6931472, %v4183_v29  ;;  %3682 = vmatmul.msk.f32.gmra.mxu2 %vm788_vm1, %v786_v38 }
 0x1ba   : > { %v4185_v14 = vpop.eup %4184  ;;  %v1828_v60 = vmul.f32 %v391_v45, %v391_v45  ;;  %4196 = vpow2.f32 %v1650_v36  ;;  %v2654_v20 = vmul.f32 0.15, %v6038_v44  ;;  %v1746_v41 = vmul.f32 %v4617_v33, %v4179_v0  ;;  %vm6103_vm11 = vmand %vm398_vm0, %vm550_vm10  ;;  %v4619_v0 = vld [vmem:[%s4789_s28 + $0x160] sm:$0xff] }
 0x1bb   : > { %v4187_v40 = vpop.eup %4186  ;;  %v2827_v54 = vmul.f32 %v4618_v18, %v4185_v14  ;;  %4198 = vpow2.f32 %v2755_v25  ;;  %v1363_v35 = vmul.f32 -0.35, %v1281_v63  ;;  %v3100_v5 = vsel %vm6054_vm9, %v6076_v55, 0.0 }
 0x1bc   : > { %v4189_v61 = vpop.eup %4188  ;;  %v2955_v16 = vsub.f32 %v4177_v52, %v4187_v40  ;;  %v1892_v23 = vsel %vm398_vm0, %v1828_v60, 0.0  ;;  %4200 = vpow2.f32 %v1460_v32  ;;  %v1652_v12 = vmul.f32 1.442695, %v1549_v8  ;;  %v1136_v32 = vpop.f32.mrf.mxu2  ;;  %v4620_v40 = vld [vmem:[%s4784_s25 + $0x128] sm:$0xff] }
 0x1bd   : > { %v4191_v58 = vpop.eup %4190  ;;  %v2891_v21 = vsub.f32 %v1722_v59, %v2827_v54  ;;  %v2851_v52 = vmul.f32 %v4619_v0, %v4189_v61  ;;  %3746 = vmatmul.msk.f32.gmra.mxu3 %vm788_vm1, %v1892_v23  ;;  %4202 = vpow2.f32 %v2565_v30  ;;  %vm567_vm12 = vcmp.lt.s32.totalorder %v6072_v6, 514  ;;  %v4622_v23 = vld [vmem:[%s4784_s25 + $0x130] sm:$0xff] }
 0x1be   : > { %v4193_v36 = vpop.eup %4192  ;;  %v3288_v45 = vmul.f32 %v2955_v16, %v2955_v16  ;;  %v6109_v25 = vsub.f32 %v4181_v26, %v4191_v58  ;;  %v2757_v29 = vmul.f32 1.442695, %v2654_v20  ;;  %v1555_v59 = vmul.f32 0.15, %v1281_v63  ;;  %v4623_v58 = vld [vmem:[%s4789_s28 + $0x130] sm:$0xff]  ;;  %vm6157_vm14 = vmand %vm398_vm0, %vm567_vm12 }
 0x1bf   : > { %v4195_v15 = vpop.eup %4194  ;;  %v3020_v19 = vmul.f32 %v2891_v21, %v2891_v21  ;;  %v6112_v38 = vsub.f32 %v1746_v41, %v2851_v52  ;;  %v6115_v14 = vadd.s32 %v5122_v51, %v439_v47  ;;  %v1472_v30 = vmul.f32 1.442695, %v1363_v35  ;;  %v4621_v47 = vld [vmem:[%s4789_s28 + $0x128] sm:$0xff] }
 0x1c0   : > { %v3352_v8 = vsel %vm6103_vm11, %v3288_v45, 0.0  ;;  %v2386_v26 = vmul.f32 0.6931472, %v4195_v15  ;;  %v4197_v60 = vpop.eup %4196  ;;  %v1739_v33 = vmul.f32 %v4620_v40, %v5856_v10  ;;  %v1137_v63 = vadd.f32 1e-12, %v1136_v32  ;;  %v328_v45 = vld [vmem:[%s4784_s25 + $0x1f8] sm:$0xff] }
 0x1c1   : > { %v3084_v20 = vsel %vm6103_vm11, %v3020_v19, 0.0  ;;  %v3435_v41 = vsel %vm788_vm1, %v3352_v8, 0.0  ;;  %v4199_v18 = vpop.eup %4198  ;;  %v2844_v54 = vmul.f32 %v4621_v47, %v5951_v42  ;;  %4204 = vpow2.f32 %v1652_v12  ;;  %v2241_v12 = vpop.f32.mrf.mxu3  ;;  %v4624_v8 = vld [vmem:[%s4784_s25 + $0x138] sm:$0xff] }
 0x1c2   : > { %v3167_v61 = vsel %vm788_vm1, %v3084_v20, 0.0  ;;  %v6128_v16 = vadd.f32 %v3435_v41, %v6036_v2  ;;  %v4201_v35 = vpop.eup %4200  ;;  %v1740_v10 = vmul.f32 %v4622_v23, %v5957_v39  ;;  %v2845_v44 = vmul.f32 %v4623_v58, %v4193_v36  ;;  %v1061_v2 = vpop.f32.mrf.mxu0 }
 0x1c3   : > { %4206 = vpow2.f32 %v2757_v29  ;;  %v6134_v21 = vadd.f32 %v3167_v61, %v6040_v24  ;;  %v4203_v0 = vpop.eup %4202  ;;  %v6141_v42 = vsel %vm788_vm1, %v3368_v57, 0.0  ;;  %v1664_v39 = vmul.f32 1.442695, %v1555_v59  ;;  %v392_v29 = vld [vmem:[%s4789_s28 + $0x1f8] sm:$0xff]  ;;  %v2166_v23 = vpop.f32.mrf.mxu1 }
 0x1c4   : > { %4208 = vpow2.f32 %v1472_v30  ;;  %v2468_v52 = vmul.f32 -0.35, %v2386_v26  ;;  %v2972_v36 = vsub.f32 %v5864_v46, %v5953_v4  ;;  %vm568_vm13 = vcmp.lt.s32.totalorder %v6115_v14, 514  ;;  %v4625_v30 = vld [vmem:[%s4789_s28 + $0x138] sm:$0xff] }
 0x1c5   : > { %v2660_v24 = vmul.f32 0.15, %v2386_v26  ;;  %4210 = vlog2.f32 %v1137_v63  ;;  %v2908_v62 = vsub.f32 %v1739_v33, %v2844_v54  ;;  %v2973_v32 = vsub.f32 %v4197_v60, %v4199_v18  ;;  %vm6171_vm15 = vmand %vm398_vm0, %vm568_vm13 }
 0x1c6   : > { %v440_v57 = vadd.s32 312, %v5120_v50  ;;  %v2577_v15 = vmul.f32 1.442695, %v2468_v52  ;;  %v2909_v19 = vsub.f32 %v1740_v10, %v2845_v44  ;;  %v1741_v59 = vmul.f32 %v4624_v8, %v4201_v35 }
 0x1c7   : > { %v2846_v40 = vmul.f32 %v4625_v30, %v4203_v0  ;;  %v2769_v20 = vmul.f32 1.442695, %v2660_v24  ;;  %v4205_v41 = vpop.eup %4204  ;;  %v441_v46 = vadd.s32 320, %v5120_v50  ;;  %4212 = vpow2.f32 %v1664_v39  ;;  %v1139_v30 = vpop.f32.mrf.mxu2 }
 0x1c8   : > { %v2242_v4 = vadd.f32 1e-12, %v2241_v12  ;;  %v723_v26 = vmul.f32 %v328_v45, %v328_v45  ;;  %v3305_v47 = vmul.f32 %v2972_v36, %v2972_v36  ;;  %v442_v60 = vadd.s32 328, %v5120_v50 }
 0x1c9   : > { %v4207_v63 = vpop.eup %4206  ;;  %4214 = vpow2.f32 %v2577_v15  ;;  %v1829_v33 = vmul.f32 %v392_v29, %v392_v29  ;;  %v3037_v61 = vmul.f32 %v2908_v62, %v2908_v62  ;;  %v505_v35 = vadd.s32 %v5122_v51, %v440_v57  ;;  %v4626_v29 = vld [vmem:[%s4784_s25 + $0x168] sm:$0xff] }
 0x1ca   : > { %v4209_v18 = vpop.eup %4208  ;;  %4216 = vpow2.f32 %v2769_v20  ;;  %v787_v10 = vsel %vm398_vm0, %v723_v26, 0.0  ;;  %v3306_v44 = vmul.f32 %v2973_v32, %v2973_v32  ;;  %v2910_v0 = vsub.f32 %v1741_v59, %v2846_v40 }
 0x1cb   : > { %v4211_v58 = vpop.eup %4210  ;;  %v1062_v39 = vadd.f32 1e-12, %v1061_v2  ;;  %3683 = vmatmul.msk.f32.gmra.mxu2 %vm788_vm1, %v787_v10  ;;  %v1893_v6 = vsel %vm398_vm0, %v1829_v33, 0.0  ;;  %v3038_v36 = vmul.f32 %v2909_v19, %v2909_v19  ;;  %v506_v24 = vadd.s32 %v5122_v51, %v441_v46  ;;  %v1064_v19 = vpop.f32.mrf.mxu0 }
 0x1cc   : > { %v1283_v12 = vmul.f32 0.6931472, %v4211_v58  ;;  %4218 = vlog2.f32 %v2242_v4  ;;  %3747 = vmatmul.msk.f32.gmra.mxu3 %vm788_vm1, %v1893_v6  ;;  %v6182_v2 = vsel %vm788_vm1, %v3100_v5, 0.0  ;;  %v3369_v14 = vsel %vm6157_vm14, %v3305_v47, 0.0  ;;  %v4627_v4 = vld [vmem:[%s4789_s28 + $0x168] sm:$0xff] }
 0x1cd   : > { %v507_v45 = vadd.s32 %v5122_v51, %v442_v60  ;;  %v2167_v62 = vadd.f32 1e-12, %v2166_v23  ;;  %v4213_v32 = vpop.eup %4212  ;;  %v3101_v57 = vsel %vm6157_vm14, %v3037_v61, 0.0  ;;  %vm569_vm2 = vcmp.lt.s32.totalorder %v505_v35, 514 }
 0x1ce   : > { %v2974_v15 = vsub.f32 %v4205_v41, %v4207_v63  ;;  %v1747_v48 = vmul.f32 %v4626_v29, %v4209_v18  ;;  %v3370_v5 = vsel %vm6171_vm15, %v3306_v44, 0.0  ;;  %v3039_v8 = vmul.f32 %v2910_v0, %v2910_v0  ;;  %vm6201_vm5 = vmand %vm398_vm0, %vm569_vm2  ;;  %v2169_v29 = vpop.f32.mrf.mxu1 }
 0x1cf   : > { %v4215_v55 = vpop.eup %4214  ;;  %4220 = vlog2.f32 %v1062_v39  ;;  %v1364_v59 = vmul.f32 -0.35, %v1283_v12  ;;  %v3102_v20 = vsel %vm6171_vm15, %v3038_v36, 0.0  ;;  %vm570_vm3 = vcmp.lt.s32.totalorder %v506_v24, 514 }
 0x1d0   : > { %v4217_v40 = vpop.eup %4216  ;;  %v443_v46 = vadd.s32 336, %v5120_v50  ;;  %v2852_v41 = vmul.f32 %v4627_v4, %v4215_v55  ;;  %vm571_vm4 = vcmp.lt.s32.totalorder %v507_v45, 514  ;;  %4222 = vlog2.f32 %v2167_v62  ;;  %vm6223_vm6 = vmand %vm398_vm0, %vm570_vm3  ;;  %v2244_v4 = vpop.f32.mrf.mxu3 }
 0x1d1   : > { %v6196_v26 = vsub.f32 %v4213_v32, %v4217_v40  ;;  %v1065_v63 = vadd.f32 1e-12, %v1064_v19  ;;  %v3307_v33 = vmul.f32 %v2974_v15, %v2974_v15  ;;  %v1556_v54 = vmul.f32 0.15, %v1283_v12  ;;  %vm6243_vm7 = vmand %vm398_vm0, %vm571_vm4 }
 0x1d2   : > { %v4219_v47 = vpop.eup %4218  ;;  %v6205_v18 = vsub.f32 %v1747_v48, %v2852_v41  ;;  %v1140_v61 = vadd.f32 1e-12, %v1139_v30  ;;  %v3103_v23 = vsel %vm6201_vm5, %v3039_v8, 0.0  ;;  %v3308_v10 = vmul.f32 %v5895_v13, %v5895_v13 }
 0x1d3   : > { %v1474_v58 = vmul.f32 1.442695, %v1364_v59  ;;  %v2388_v44 = vmul.f32 0.6931472, %v4219_v47  ;;  %v6212_v35 = vsel %vm788_vm1, %v3101_v57, 0.0  ;;  %v6215_v0 = vsel %vm788_vm1, %v3369_v14, 0.0 }
 0x1d4   : > { %v6218_v39 = vsel %vm788_vm1, %v3370_v5, 0.0  ;;  %v508_v13 = vadd.s32 %v5122_v51, %v443_v46  ;;  %v6229_v36 = vsel %vm788_vm1, %v3102_v20, 0.0  ;;  %v3040_v12 = vmul.f32 %v5898_v27, %v5898_v27 }
 0x1d5   : > { %v4221_v52 = vpop.eup %4220  ;;  %v3309_v14 = vmul.f32 %v5923_v43, %v5923_v43  ;;  %4224 = vlog2.f32 %v1065_v63  ;;  %v6236_v24 = vsel %vm788_vm1, %v3103_v23, 0.0  ;;  %v3371_v62 = vsel %vm6201_vm5, %v3307_v33, 0.0 }
 0x1d6   : > { %7401 = vst [vmem:[#allocation5_spill] sm:$0xff] %v6236_v24  ;;  %v1666_v57 = vmul.f32 1.442695, %v1556_v54  ;;  %4226 = vlog2.f32 %v1140_v61  ;;  %v4223_v27 = vpop.eup %4222  ;;  %v3372_v43 = vsel %vm6223_vm6, %v3308_v10, 0.0  ;;  %v444_v15 = vadd.s32 344, %v5120_v50 }
 0x1d7   : > { %4228 = vpow2.f32 %v1474_v58  ;;  %v2469_v48 = vmul.f32 -0.35, %v2388_v44  ;;  %v3041_v45 = vmul.f32 %v5929_v34, %v5929_v34  ;;  %vm572_vm8 = vcmp.lt.s32.totalorder %v508_v13, 514 }
 0x1d8   : > { %v1233_v19 = vmul.f32 0.6931472, %v4221_v52  ;;  %v2661_v55 = vmul.f32 0.15, %v2388_v44  ;;  %v3104_v5 = vsel %vm6223_vm6, %v3040_v12, 0.0  ;;  %v3373_v8 = vsel %vm6243_vm7, %v3309_v14, 0.0  ;;  %vm6267_vm9 = vmand %vm398_vm0, %vm572_vm8  ;;  %v1142_v14 = vpop.f32.mrf.mxu2 }
 0x1d9   : > { %v3310_v59 = vmul.f32 %v5994_v56, %v5994_v56  ;;  %v2579_v30 = vmul.f32 1.442695, %v2469_v48  ;;  %v2338_v40 = vmul.f32 0.6931472, %v4223_v27  ;;  %4230 = vpow2.f32 %v1666_v57 }
 0x1da   : > { %v2170_v20 = vadd.f32 1e-12, %v2169_v29  ;;  %v2771_v46 = vmul.f32 1.442695, %v2661_v55  ;;  %v6259_v34 = vsel %vm788_vm1, %v3371_v62, 0.0  ;;  %v6262_v63 = vsel %vm788_vm1, %v3372_v43, 0.0 }
 0x1db   : > { %v4225_v41 = vpop.eup %4224  ;;  %7404 = vst [vmem:[#allocation6_spill] sm:$0xff] %v6259_v34  ;;  %v509_v56 = vadd.s32 %v5122_v51, %v444_v15  ;;  %4232 = vpow2.f32 %v2579_v30  ;;  %v3105_v33 = vsel %vm6243_vm7, %v3041_v45, 0.0  ;;  %v445_v54 = vadd.s32 352, %v5120_v50  ;;  %v4633_v34 = vld [vmem:[%s4789_s28 + $0x178] sm:$0xff] }
 0x1dc   : > { %7405 = vst [vmem:[#allocation7_spill] sm:$0xff] %v6262_v63  ;;  %v4227_v60 = vpop.eup %4226  ;;  %v1339_v61 = vmul.f32 -0.35, %v1233_v19  ;;  %4234 = vpow2.f32 %v2771_v46  ;;  %v6276_v10 = vsel %vm788_vm1, %v3104_v5, 0.0  ;;  %v6279_v58 = vsel %vm788_vm1, %v3373_v8, 0.0  ;;  %v4629_v46 = vld [vmem:[%s4789_s28 + $0x170] sm:$0xff] }
 0x1dd   : > { %v4229_v23 = vpop.eup %4228  ;;  %7408 = vst [vmem:[#allocation8_spill] sm:$0xff] %v6276_v10  ;;  %v3042_v44 = vmul.f32 %v5996_v22, %v5996_v22  ;;  %v1531_v6 = vmul.f32 0.15, %v1233_v19  ;;  %v3374_v13 = vsel %vm6267_vm9, %v3310_v59, 0.0  ;;  %v2444_v52 = vmul.f32 -0.35, %v2338_v40 }
 0x1de   : > { %7409 = vst [vmem:[#allocation9_spill] sm:$0xff] %v6279_v58  ;;  %v1235_v12 = vmul.f32 0.6931472, %v4225_v41  ;;  %4236 = vlog2.f32 %v2170_v20  ;;  %v6286_v62 = vsel %vm788_vm1, %v3105_v33, 0.0  ;;  %vm573_vm10 = vcmp.lt.s32.totalorder %v509_v56, 514  ;;  %v4628_v22 = vld [vmem:[%s4784_s25 + $0x170] sm:$0xff]  ;;  %v1067_v41 = vpop.f32.mrf.mxu0 }
 0x1df   : > { %7410 = vst [vmem:[#allocation10_spill] sm:$0xff] %v6286_v62  ;;  %v2636_v32 = vmul.f32 0.15, %v2338_v40  ;;  %v2245_v57 = vadd.f32 1e-12, %v2244_v4  ;;  %v4231_v27 = vpop.eup %4230  ;;  %v510_v43 = vadd.s32 %v5122_v51, %v445_v54  ;;  %v1748_v29 = vmul.f32 %v4628_v22, %v4229_v23  ;;  %vm6310_vm11 = vmand %vm398_vm0, %vm573_vm10 }
 0x1e0   : > { %v1424_v15 = vmul.f32 1.442695, %v1339_v61  ;;  %v1285_v48 = vmul.f32 0.6931472, %v4227_v60  ;;  %v3106_v19 = vsel %vm6267_vm9, %v3042_v44, 0.0  ;;  %v6293_v55 = vsel %vm788_vm1, %v3374_v13, 0.0 }
 0x1e1   : > { %v4233_v45 = vpop.eup %4232  ;;  %7411 = vst [vmem:[#allocation11_spill] sm:$0xff] %v6293_v55  ;;  %v1616_v5 = vmul.f32 1.442695, %v1531_v6  ;;  %v422_v8 = vadd.s32 168, %v5120_v50  ;;  %v2529_v30 = vmul.f32 1.442695, %v2444_v52  ;;  %v3311_v60 = vmul.f32 %v6048_v28, %v6048_v28  ;;  %v2247_v6 = vpop.f32.mrf.mxu3 }
 0x1e2   : > { %v4235_v59 = vpop.eup %4234  ;;  %v446_v40 = vadd.s32 360, %v5120_v50  ;;  %v1340_v20 = vmul.f32 -0.35, %v1235_v12  ;;  %v2853_v4 = vmul.f32 %v4629_v46, %v4233_v45  ;;  %v2721_v33 = vmul.f32 1.442695, %v2636_v32 }
 0x1e3   : > { %v6300_v47 = vsub.f32 %v4231_v27, %v4235_v59  ;;  %4238 = vlog2.f32 %v2245_v57  ;;  %v1365_v23 = vmul.f32 -0.35, %v1285_v48  ;;  %v1143_v44 = vadd.f32 1e-12, %v1142_v14  ;;  %v2172_v27 = vpop.f32.mrf.mxu1 }
 0x1e4   : > { %v4237_v54 = vpop.eup %4236  ;;  %4240 = vpow2.f32 %v1424_v15  ;;  %v6302_v61 = vsub.f32 %v1748_v29, %v2853_v4  ;;  %v6305_v13 = vsel %vm788_vm1, %v3106_v19, 0.0  ;;  %vm574_vm12 = vcmp.lt.s32.totalorder %v510_v43, 514 }
 0x1e5   : > { %7412 = vst [vmem:[#allocation12_spill] sm:$0xff] %v6305_v13  ;;  %4242 = vpow2.f32 %v1616_v5  ;;  %v1068_v28 = vadd.f32 1e-12, %v1067_v41  ;;  %v6315_v32 = vadd.s32 %v5122_v51, %v422_v8  ;;  %v1426_v57 = vmul.f32 1.442695, %v1340_v20  ;;  %v1145_v5 = vpop.f32.mrf.mxu2  ;;  %vm6334_vm13 = vmand %vm398_vm0, %vm574_vm12 }
 0x1e6   : > { %4244 = vpow2.f32 %v2529_v30  ;;  %v1557_v14 = vmul.f32 0.15, %v1285_v48  ;;  %v6319_v15 = vmul.f32 %v6060_v49, %v6060_v49  ;;  %v2340_v56 = vmul.f32 0.6931472, %v4237_v54 }
 0x1e7   : > { %4246 = vpow2.f32 %v2721_v33  ;;  %v2248_v22 = vadd.f32 1e-12, %v2247_v6  ;;  %v3375_v29 = vsel %vm6310_vm11, %v3311_v60, 0.0  ;;  %v6324_v45 = vadd.s32 %v5122_v51, %v446_v40 }
 0x1e8   : > { %v1476_v19 = vmul.f32 1.442695, %v1365_v23  ;;  %4248 = vlog2.f32 %v1143_v44  ;;  %v6328_v48 = vmul.f32 %v6109_v25, %v6109_v25  ;;  %v423_v49 = vadd.s32 176, %v5120_v50 }
 0x1e9   : > { %v4239_v8 = vpop.eup %4238  ;;  %4250 = vlog2.f32 %v1068_v28  ;;  %v2173_v59 = vadd.f32 1e-12, %v2172_v27  ;;  %v1532_v40 = vmul.f32 0.15, %v1235_v12  ;;  %v1668_v46 = vmul.f32 1.442695, %v1557_v14 }
 0x1ea   : > { %v4241_v30 = vpop.eup %4240  ;;  %4252 = vpow2.f32 %v1426_v57  ;;  %v2390_v4 = vmul.f32 0.6931472, %v4239_v8  ;;  %v6340_v25 = vmul.f32 %v6112_v38, %v6112_v38  ;;  %v2445_v60 = vmul.f32 -0.35, %v2340_v56  ;;  %v4630_v38 = vld [vmem:[%s4784_s25 + $0xa8] sm:$0xff] }
 0x1eb   : > { %v4243_v41 = vpop.eup %4242  ;;  %4254 = vlog2.f32 %v2248_v22  ;;  %v1146_v33 = vadd.f32 1e-12, %v1145_v5  ;;  %v2637_v43 = vmul.f32 0.15, %v2340_v56  ;;  %v6346_v28 = vsel %vm788_vm1, %v3375_v29, 0.0  ;;  %v2250_v22 = vpop.f32.mrf.mxu3 }
 0x1ec   : > { %v4245_v54 = vpop.eup %4244  ;;  %4256 = vpow2.f32 %v1476_v19  ;;  %v2470_v23 = vmul.f32 -0.35, %v2390_v4  ;;  %v2662_v44 = vmul.f32 0.15, %v2390_v4  ;;  %7417 = vst [vmem:[#allocation13_spill] sm:$0xff] %v6346_v28  ;;  %vm551_vm14 = vcmp.lt.s32.totalorder %v6315_v32, 514  ;;  %v2175_v29 = vpop.f32.mrf.mxu1 }
 0x1ed   : > { %v4247_v6 = vpop.eup %4246  ;;  %4258 = vlog2.f32 %v2173_v59  ;;  %v1618_v14 = vmul.f32 1.442695, %v1532_v40  ;;  %v2531_v5 = vmul.f32 1.442695, %v2445_v60  ;;  %v1723_v12 = vmul.f32 %v4630_v38, %v4241_v30  ;;  %vm6371_vm2 = vmand %vm398_vm0, %vm551_vm14 }
 0x1ee   : > { %v4249_v57 = vpop.eup %4248  ;;  %4260 = vpow2.f32 %v1668_v46  ;;  %v2581_v27 = vmul.f32 1.442695, %v2470_v23  ;;  %v2773_v56 = vmul.f32 1.442695, %v2662_v44  ;;  %v6359_v59 = vadd.s32 %v5122_v51, %v423_v49  ;;  %v1070_v46 = vpop.f32.mrf.mxu0  ;;  %v4631_v44 = vld [vmem:[%s4789_s28 + $0xa8] sm:$0xff] }
 0x1ef   : > { %v4251_v19 = vpop.eup %4250  ;;  %v1287_v8 = vmul.f32 0.6931472, %v4249_v57  ;;  %4262 = vlog2.f32 %v1146_v33  ;;  %v2723_v40 = vmul.f32 1.442695, %v2637_v43  ;;  %v2828_v28 = vmul.f32 %v4631_v44, %v4245_v54 }
 0x1f0   : > { %v6355_v4 = vpop.eup %4252  ;;  %4264 = vpow2.f32 %v2581_v27  ;;  %v447_v13 = vadd.s32 368, %v5120_v50  ;;  %v2251_v60 = vadd.f32 1e-12, %v2250_v22  ;;  %v2956_v33 = vsub.f32 %v4243_v41, %v4247_v6  ;;  %v4632_v6 = vld [vmem:[%s4784_s25 + $0x178] sm:$0xff] }
 0x1f1   : > { %v4255_v23 = vpop.eup %4254  ;;  %4266 = vpow2.f32 %v2773_v56  ;;  %v424_v30 = vadd.s32 184, %v5120_v50  ;;  %v1366_v38 = vmul.f32 -0.35, %v1287_v8  ;;  %vm575_vm15 = vcmp.lt.s32.totalorder %v6324_v45, 514  ;;  %v4636_v45 = vld [vmem:[%s4784_s25 + $0x180] sm:$0xff] }
 0x1f2   : > { %v4257_v57 = vpop.eup %4256  ;;  %4268 = vpow2.f32 %v1618_v14  ;;  %v1237_v43 = vmul.f32 0.6931472, %v4251_v19  ;;  %v1071_v27 = vadd.f32 1e-12, %v1070_v46  ;;  %v1558_v55 = vmul.f32 0.15, %v1287_v8  ;;  %vm6418_vm4 = vmand %vm398_vm0, %vm575_vm15 }
 0x1f3   : > { %v4259_v49 = vpop.eup %4258  ;;  %4270 = vpow2.f32 %v2531_v5  ;;  %v1478_v44 = vmul.f32 1.442695, %v1366_v38  ;;  %v2176_v56 = vadd.f32 1e-12, %v2175_v29  ;;  %v2392_v22 = vmul.f32 0.6931472, %v4255_v23 }
 0x1f4   : > { %v4261_v54 = vpop.eup %4260  ;;  %4272 = vpow2.f32 %v2723_v40  ;;  %v2892_v41 = vsub.f32 %v1723_v12, %v2828_v28  ;;  %v1749_v14 = vmul.f32 %v4632_v6, %v4257_v57  ;;  %v1670_v58 = vmul.f32 1.442695, %v1558_v55  ;;  %v4635_v12 = vld [vmem:[%s4789_s28 + $0xb0] sm:$0xff] }
 0x1f5   : > { %v4263_v62 = vpop.eup %4262  ;;  %4274 = vlog2.f32 %v2251_v60  ;;  %v3289_v63 = vmul.f32 %v2956_v33, %v2956_v33  ;;  %v2471_v24 = vmul.f32 -0.35, %v2392_v22  ;;  %v2663_v5 = vmul.f32 0.15, %v2392_v22 }
 0x1f6   : > { %v4265_v10 = vpop.eup %4264  ;;  %4276 = vpow2.f32 %v1478_v44  ;;  %v1341_v46 = vmul.f32 -0.35, %v1237_v43  ;;  %v2342_v8 = vmul.f32 0.6931472, %v4259_v49  ;;  %v3021_v57 = vmul.f32 %v2892_v41, %v2892_v41 }
 0x1f7   : > { %v4267_v19 = vpop.eup %4266  ;;  %v2854_v40 = vmul.f32 %v4633_v34, %v4265_v10  ;;  %4278 = vlog2.f32 %v1071_v27  ;;  %v2583_v28 = vmul.f32 1.442695, %v2471_v24  ;;  %v2775_v23 = vmul.f32 1.442695, %v2663_v5 }
 0x1f8   : > { %v4269_v29 = vpop.eup %4268  ;;  %v6375_v55 = vsub.f32 %v4261_v54, %v4267_v19  ;;  %4280 = vlog2.f32 %v2176_v56  ;;  %v1533_v33 = vmul.f32 0.15, %v1237_v43  ;;  %v7420_v10 = vsel %vm6310_vm11, %v6319_v15, 0.0 }
 0x1f9   : > { %v4271_v60 = vpop.eup %4270  ;;  %v6377_v38 = vsub.f32 %v1749_v14, %v2854_v40  ;;  %4282 = vpow2.f32 %v1670_v58  ;;  %v6384_v32 = vsel %vm788_vm1, %v7420_v10, 0.0  ;;  %v7422_v49 = vsel %vm6334_vm13, %v6328_v48, 0.0  ;;  %v4634_v40 = vld [vmem:[%s4784_s25 + $0xb0] sm:$0xff] }
 0x1fa   : > { %v4273_v34 = vpop.eup %4272  ;;  %7421 = vst [vmem:[#allocation14_spill] sm:$0xff] %v6384_v32  ;;  %v6391_v24 = vsel %vm788_vm1, %v7422_v49, 0.0  ;;  %4284 = vpow2.f32 %v2583_v28  ;;  %v1289_v43 = vmul.f32 0.6931472, %v4263_v62  ;;  %v7423_v58 = vsel %vm6334_vm13, %v6340_v25, 0.0 }
 0x1fb   : > { %v4275_v27 = vpop.eup %4274  ;;  %v6398_v52 = vsel %vm788_vm1, %v7423_v58, 0.0  ;;  %v3353_v15 = vsel %vm6371_vm2, %v3289_v63, 0.0  ;;  %v6403_v54 = vadd.s32 %v5122_v51, %v447_v13  ;;  %4286 = vpow2.f32 %v2775_v23  ;;  %v1073_v58 = vpop.f32.mrf.mxu0 }
 0x1fc   : > { %7424 = vst [vmem:[#allocation15_spill] sm:$0xff] %v6398_v52  ;;  %v4277_v48 = vpop.eup %4276  ;;  %v1428_v44 = vmul.f32 1.442695, %v1341_v46  ;;  %v6406_v56 = vadd.s32 %v5122_v51, %v424_v30  ;;  %v2446_v62 = vmul.f32 -0.35, %v2342_v8  ;;  %v3085_v22 = vsel %vm6371_vm2, %v3021_v57, 0.0 }
 0x1fd   : > { %v1367_v20 = vmul.f32 -0.35, %v1289_v43  ;;  %v4279_v25 = vpop.eup %4278  ;;  %v3313_v63 = vmul.f32 %v6196_v26, %v6196_v26  ;;  %vm552_vm3 = vcmp.lt.s32.totalorder %v6359_v59, 514  ;;  %v1620_v13 = vmul.f32 1.442695, %v1533_v33 }
 0x1fe   : > { %v2638_v41 = vmul.f32 0.15, %v2342_v8  ;;  %v4281_v6 = vpop.eup %4280  ;;  %v3437_v30 = vsel %vm788_vm1, %v3353_v15, 0.0  ;;  %v3045_v5 = vmul.f32 %v6205_v18, %v6205_v18  ;;  %v448_v26 = vadd.s32 376, %v5120_v50  ;;  %vm6456_vm6 = vmand %vm398_vm0, %vm552_vm3 }
 0x1ff   : > { %v1480_v19 = vmul.f32 1.442695, %v1367_v20  ;;  %v4283_v46 = vpop.eup %4282  ;;  %v1724_v8 = vmul.f32 %v4634_v40, %v6355_v4  ;;  %v2829_v28 = vmul.f32 %v4635_v12, %v4271_v60  ;;  %v1750_v23 = vmul.f32 %v4636_v45, %v4277_v48  ;;  %v4637_v4 = vld [vmem:[%s4789_s28 + $0x180] sm:$0xff]  ;;  %v1148_v48 = vpop.f32.mrf.mxu2 }
 0x200   : > { %v2394_v57 = vmul.f32 0.6931472, %v4275_v27  ;;  %v4285_v33 = vpop.eup %4284  ;;  %v3169_v10 = vsel %vm788_vm1, %v3085_v22, 0.0  ;;  %4288 = vpow2.f32 %v1428_v44  ;;  %v2533_v49 = vmul.f32 1.442695, %v2446_v62 }
 0x201   : > { %v1559_v18 = vmul.f32 0.15, %v1289_v43  ;;  %v4287_v15 = vpop.eup %4286  ;;  %v3377_v20 = vsel %vm6418_vm4, %v3313_v63, 0.0  ;;  %4290 = vpow2.f32 %v1620_v13  ;;  %v2725_v52 = vmul.f32 1.442695, %v2638_v41 }
 0x202   : > { %v2855_v40 = vmul.f32 %v4637_v4, %v4285_v33  ;;  %v2957_v32 = vsub.f32 %v4269_v29, %v4273_v34  ;;  %vm576_vm5 = vcmp.lt.s32.totalorder %v6403_v54, 514  ;;  %v6434_v60 = vsub.f32 %v4283_v46, %v4287_v15 }
 0x203   : > { %4292 = vpow2.f32 %v1480_v19  ;;  %v2472_v27 = vmul.f32 -0.35, %v2394_v57  ;;  %v2893_v44 = vsub.f32 %v1724_v8, %v2829_v28  ;;  %v1239_v62 = vmul.f32 0.6931472, %v4279_v25  ;;  %v2178_v28 = vpop.f32.mrf.mxu1  ;;  %vm6478_vm8 = vmand %vm398_vm0, %vm576_vm5 }
 0x204   : > { %v6436_v22 = vsub.f32 %v1750_v23, %v2855_v40  ;;  %v1074_v43 = vadd.f32 1e-12, %v1073_v58  ;;  %4294 = vpow2.f32 %v2533_v49  ;;  %v2344_v12 = vmul.f32 0.6931472, %v4281_v6  ;;  %v2253_v23 = vpop.f32.mrf.mxu3  ;;  %v4638_v40 = vld [vmem:[%s4784_s25 + $0x188] sm:$0xff] }
 0x205   : > { %v1672_v63 = vmul.f32 1.442695, %v1559_v18  ;;  %v2585_v13 = vmul.f32 1.442695, %v2472_v27  ;;  %4296 = vpow2.f32 %v2725_v52  ;;  %v6439_v41 = vadd.s32 %v5122_v51, %v448_v26 }
 0x206   : > { %v2664_v29 = vmul.f32 0.15, %v2394_v57  ;;  %v1149_v34 = vadd.f32 1e-12, %v1148_v48  ;;  %v4289_v46 = vpop.eup %4288  ;;  %v6442_v19 = vadd.f32 %v3169_v10, %v6134_v21  ;;  %v6445_v8 = vadd.f32 %v3437_v30, %v6128_v16 }
 0x207   : > { %v3109_v25 = vsel %vm6418_vm4, %v3045_v5, 0.0  ;;  %4298 = vpow2.f32 %v2585_v13  ;;  %v4291_v6 = vpop.eup %4290  ;;  %v6450_v52 = vsel %vm788_vm1, %v3377_v20, 0.0  ;;  %v3290_v26 = vmul.f32 %v2957_v32, %v2957_v32 }
 0x208   : > { %v1342_v45 = vmul.f32 -0.35, %v1239_v62  ;;  %4300 = vlog2.f32 %v1074_v43  ;;  %v3022_v21 = vmul.f32 %v2893_v44, %v2893_v44  ;;  %vm553_vm7 = vcmp.lt.s32.totalorder %v6406_v56, 514  ;;  %v4639_v43 = vld [vmem:[%s4784_s25 + $0xb8] sm:$0xff] }
 0x209   : > { %v4293_v57 = vpop.eup %4292  ;;  %v2447_v30 = vmul.f32 -0.35, %v2344_v12  ;;  %4302 = vpow2.f32 %v1672_v63  ;;  %v2777_v14 = vmul.f32 1.442695, %v2664_v29  ;;  %v6462_v32 = vsel %vm788_vm1, %v3109_v25, 0.0  ;;  %vm6508_vm10 = vmand %vm398_vm0, %vm553_vm7 }
 0x20a   : > { %7429 = vst [vmem:[#allocation16_spill] sm:$0xff] %v6462_v32  ;;  %v1534_v5 = vmul.f32 0.15, %v1239_v62  ;;  %v2179_v33 = vadd.f32 1e-12, %v2178_v28  ;;  %4304 = vlog2.f32 %v1149_v34  ;;  %v4295_v59 = vpop.eup %4294  ;;  %v425_v10 = vadd.s32 192, %v5120_v50 }
 0x20b   : > { %v2639_v49 = vmul.f32 0.15, %v2344_v12  ;;  %4306 = vpow2.f32 %v2777_v14  ;;  %v2254_v58 = vadd.f32 1e-12, %v2253_v23  ;;  %v4297_v18 = vpop.eup %4296  ;;  %v3354_v15 = vsel %vm6456_vm6, %v3290_v26, 0.0  ;;  %v4640_v28 = vld [vmem:[%s4789_s28 + $0x188] sm:$0xff] }
 0x20c   : > { %v1430_v20 = vmul.f32 1.442695, %v1342_v45  ;;  %v449_v4 = vadd.s32 384, %v5120_v50  ;;  %v1751_v27 = vmul.f32 %v4638_v40, %v4293_v57  ;;  %v3086_v44 = vsel %vm6456_vm6, %v3022_v21, 0.0  ;;  %v4641_v45 = vld [vmem:[%s4789_s28 + $0xb8] sm:$0xff] }
 0x20d   : > { %v4299_v48 = vpop.eup %4298  ;;  %v3314_v62 = vmul.f32 %v6300_v47, %v6300_v47  ;;  %v1725_v12 = vmul.f32 %v4639_v43, %v4289_v46  ;;  %v2535_v63 = vmul.f32 1.442695, %v2447_v30  ;;  %v3046_v34 = vmul.f32 %v6302_v61, %v6302_v61  ;;  %v1076_v30 = vpop.f32.mrf.mxu0 }
 0x20e   : > { %v4301_v13 = vpop.eup %4300  ;;  %v1622_v25 = vmul.f32 1.442695, %v1534_v5  ;;  %4308 = vlog2.f32 %v2179_v33  ;;  %v2856_v26 = vmul.f32 %v4640_v28, %v4299_v48  ;;  %v2830_v46 = vmul.f32 %v4641_v45, %v4295_v59 }
 0x20f   : > { %v4303_v47 = vpop.eup %4302  ;;  %v2958_v23 = vsub.f32 %v4291_v6, %v4297_v18  ;;  %v2727_v57 = vmul.f32 1.442695, %v2639_v49  ;;  %4310 = vlog2.f32 %v2254_v58  ;;  %v3439_v16 = vsel %vm788_vm1, %v3354_v15, 0.0 }
 0x210   : > { %v4305_v54 = vpop.eup %4304  ;;  %vm577_vm9 = vcmp.lt.s32.totalorder %v6439_v41, 514  ;;  %4312 = vpow2.f32 %v1430_v20  ;;  %v6489_v21 = vadd.s32 %v5122_v51, %v425_v10  ;;  %v6491_v61 = vsub.f32 %v1751_v27, %v2856_v26  ;;  %v1151_v10 = vpop.f32.mrf.mxu2 }
 0x211   : > { %v4307_v14 = vpop.eup %4306  ;;  %v3171_v5 = vsel %vm788_vm1, %v3086_v44, 0.0  ;;  %v3378_v6 = vsel %vm6478_vm8, %v3314_v62, 0.0  ;;  %4314 = vpow2.f32 %v2535_v63  ;;  %v1291_v33 = vmul.f32 0.6931472, %v4305_v54  ;;  %vm6539_vm12 = vmand %vm398_vm0, %vm577_vm9 }
 0x212   : > { %v3110_v59 = vsel %vm6478_vm8, %v3046_v34, 0.0  ;;  %4316 = vpow2.f32 %v1622_v25  ;;  %v426_v49 = vadd.s32 200, %v5120_v50  ;;  %v6499_v58 = vsub.f32 %v4303_v47, %v4307_v14 }
 0x213   : > { %v2894_v18 = vsub.f32 %v1725_v12, %v2830_v46  ;;  %v3291_v15 = vmul.f32 %v2958_v23, %v2958_v23  ;;  %4318 = vpow2.f32 %v2727_v57  ;;  %v1368_v20 = vmul.f32 -0.35, %v1291_v33  ;;  %v2181_v12 = vpop.f32.mrf.mxu1 }
 0x214   : > { %v4309_v40 = vpop.eup %4308  ;;  %v6502_v27 = vadd.f32 %v3439_v16, %v6445_v8  ;;  %v6513_v44 = vadd.s32 %v5122_v51, %v449_v4  ;;  %v1241_v62 = vmul.f32 0.6931472, %v4301_v13  ;;  %v1077_v43 = vadd.f32 1e-12, %v1076_v30 }
 0x215   : > { %v4311_v63 = vpop.eup %4310  ;;  %v6516_v29 = vadd.f32 %v3171_v5, %v6442_v19  ;;  %v6519_v8 = vsel %vm788_vm1, %v3378_v6, 0.0  ;;  %v1560_v56 = vmul.f32 0.15, %v1291_v33  ;;  %v1152_v34 = vadd.f32 1e-12, %v1151_v10  ;;  %v4642_v6 = vld [vmem:[%s4784_s25 + $0xc0] sm:$0xff] }
 0x216   : > { %v4313_v25 = vpop.eup %4312  ;;  %v6522_v28 = vsel %vm788_vm1, %v3110_v59, 0.0  ;;  %vm554_vm11 = vcmp.lt.s32.totalorder %v6489_v21, 514  ;;  %v6526_v4 = vadd.s32 %v5122_v51, %v426_v49  ;;  %v450_v13 = vadd.s32 392, %v5120_v50  ;;  %v4643_v49 = vld [vmem:[%s4789_s28 + $0xc0] sm:$0xff] }
 0x217   : > { %7434 = vst [vmem:[#allocation17_spill] sm:$0xff] %v6522_v28  ;;  %v1482_v26 = vmul.f32 1.442695, %v1368_v20  ;;  %v4315_v19 = vpop.eup %4314  ;;  %v3023_v47 = vmul.f32 %v2894_v18, %v2894_v18  ;;  %v3355_v45 = vsel %vm6508_vm10, %v3291_v15, 0.0  ;;  %v2346_v46 = vmul.f32 0.6931472, %v4309_v40  ;;  %v1079_v20 = vpop.f32.mrf.mxu0  ;;  %vm6565_vm14 = vmand %vm398_vm0, %vm554_vm11 }
 0x218   : > { %v2182_v23 = vadd.f32 1e-12, %v2181_v12  ;;  %v4317_v57 = vpop.eup %4316  ;;  %v1343_v54 = vmul.f32 -0.35, %v1241_v62  ;;  %v1535_v16 = vmul.f32 0.15, %v1241_v62  ;;  %4320 = vlog2.f32 %v1077_v43  ;;  %v2256_v40 = vpop.f32.mrf.mxu3 }
 0x219   : > { %v2396_v30 = vmul.f32 0.6931472, %v4311_v63  ;;  %v4319_v14 = vpop.eup %4318  ;;  %v3315_v5 = vmul.f32 %v6375_v55, %v6375_v55  ;;  %v1726_v33 = vmul.f32 %v4642_v6, %v4313_v25  ;;  %v1674_v59 = vmul.f32 1.442695, %v1560_v56 }
 0x21a   : > { %4322 = vlog2.f32 %v1152_v34  ;;  %v2831_v10 = vmul.f32 %v4643_v49, %v4315_v19  ;;  %v3047_v55 = vmul.f32 %v6377_v38, %v6377_v38  ;;  %vm578_vm13 = vcmp.lt.s32.totalorder %v6513_v44, 514 }
 0x21b   : > { %4324 = vpow2.f32 %v1482_v26  ;;  %v2473_v18 = vmul.f32 -0.35, %v2396_v30  ;;  %v2665_v15 = vmul.f32 0.15, %v2396_v30  ;;  %v2448_v43 = vmul.f32 -0.35, %v2346_v46  ;;  %vm6586_vm15 = vmand %vm398_vm0, %vm578_vm13 }
 0x21c   : > { %v6547_v12 = vadd.s32 %v5122_v51, %v450_v13  ;;  %4326 = vlog2.f32 %v2182_v23  ;;  %v2959_v63 = vsub.f32 %v4317_v57, %v4319_v14  ;;  %v1432_v56 = vmul.f32 1.442695, %v1343_v54  ;;  %v2184_v13 = vpop.f32.mrf.mxu1 }
 0x21d   : > { %v2587_v34 = vmul.f32 1.442695, %v2473_v18  ;;  %v2779_v41 = vmul.f32 1.442695, %v2665_v15  ;;  %v3087_v25 = vsel %vm6508_vm10, %v3023_v47, 0.0  ;;  %v3441_v26 = vsel %vm788_vm1, %v3355_v45, 0.0  ;;  %v1154_v18 = vpop.f32.mrf.mxu2 }
 0x21e   : > { %4328 = vpow2.f32 %v1674_v59  ;;  %v1080_v19 = vadd.f32 1e-12, %v1079_v20  ;;  %v4321_v30 = vpop.eup %4320  ;;  %v3379_v38 = vsel %vm6539_vm12, %v3315_v5, 0.0  ;;  %v2895_v6 = vsub.f32 %v1726_v33, %v2831_v10 }
 0x21f   : > { %v1624_v49 = vmul.f32 1.442695, %v1535_v16  ;;  %4330 = vpow2.f32 %v2587_v34  ;;  %v3111_v57 = vsel %vm6539_vm12, %v3047_v55, 0.0  ;;  %v2537_v54 = vmul.f32 1.442695, %v2448_v43  ;;  %v4644_v55 = vld [vmem:[%s4784_s25 + $0x190] sm:$0xff] }
 0x220   : > { %v4323_v23 = vpop.eup %4322  ;;  %v2640_v14 = vmul.f32 0.15, %v2346_v46  ;;  %4332 = vpow2.f32 %v2779_v41  ;;  %v3173_v47 = vsel %vm788_vm1, %v3087_v25, 0.0  ;;  %v3442_v45 = vadd.f32 %v3441_v26, %v6502_v27 }
 0x221   : > { %v4325_v48 = vpop.eup %4324  ;;  %v3292_v59 = vmul.f32 %v2959_v63, %v2959_v63  ;;  %4334 = vpow2.f32 %v1432_v56  ;;  %v6559_v16 = vsel %vm788_vm1, %v3379_v38, 0.0  ;;  %v1243_v46 = vmul.f32 0.6931472, %v4321_v30 }
 0x222   : > { %v4327_v5 = vpop.eup %4326  ;;  %7437 = vst [vmem:[#allocation18_spill] sm:$0xff] %v6559_v16  ;;  %4336 = vlog2.f32 %v1080_v19  ;;  %v2185_v10 = vadd.f32 1e-12, %v2184_v13  ;;  %v6570_v27 = vsel %vm788_vm1, %v3111_v57, 0.0  ;;  %v3024_v15 = vmul.f32 %v2895_v6, %v2895_v6  ;;  %v2259_v19 = vpop.f32.mrf.mxu3  ;;  %v4645_v6 = vld [vmem:[%s4789_s28 + $0x190] sm:$0xff] }
 0x223   : > { %7440 = vst [vmem:[#allocation19_spill] sm:$0xff] %v6570_v27  ;;  %4338 = vpow2.f32 %v1624_v49  ;;  %v2257_v20 = vadd.f32 1e-12, %v2256_v40  ;;  %v2729_v21 = vmul.f32 1.442695, %v2640_v14  ;;  %v1752_v43 = vmul.f32 %v4644_v55, %v4325_v48 }
 0x224   : > { %v4329_v62 = vpop.eup %4328  ;;  %4340 = vpow2.f32 %v2537_v54  ;;  %v1293_v63 = vmul.f32 0.6931472, %v4323_v23  ;;  %v3356_v34 = vsel %vm6565_vm14, %v3292_v59, 0.0  ;;  %v3316_v41 = vmul.f32 %v6434_v60, %v6434_v60 }
 0x225   : > { %v4331_v56 = vpop.eup %4330  ;;  %v2348_v25 = vmul.f32 0.6931472, %v4327_v5  ;;  %v1155_v26 = vadd.f32 1e-12, %v1154_v18  ;;  %v3048_v40 = vmul.f32 %v6436_v22, %v6436_v22  ;;  %v1344_v38 = vmul.f32 -0.35, %v1243_v46 }
 0x226   : > { %v4333_v30 = vpop.eup %4332  ;;  %v2857_v49 = vmul.f32 %v4645_v6, %v4331_v56  ;;  %4342 = vlog2.f32 %v2185_v10  ;;  %v3088_v23 = vsel %vm6565_vm14, %v3024_v15, 0.0  ;;  %v1536_v57 = vmul.f32 0.15, %v1243_v46 }
 0x227   : > { %v4335_v13 = vpop.eup %4334  ;;  %v6590_v54 = vsub.f32 %v4329_v62, %v4333_v30  ;;  %4344 = vlog2.f32 %v2257_v20  ;;  %v1369_v48 = vmul.f32 -0.35, %v1293_v63  ;;  %v2260_v59 = vadd.f32 1e-12, %v2259_v19 }
 0x228   : > { %v4337_v22 = vpop.eup %4336  ;;  %4346 = vpow2.f32 %v2729_v21  ;;  %v6592_v14 = vsub.f32 %v1752_v43, %v2857_v49  ;;  %v3443_v33 = vsel %vm788_vm1, %v3356_v34, 0.0  ;;  %v427_v44 = vadd.s32 208, %v5120_v50  ;;  %v1082_v34 = vpop.f32.mrf.mxu0 }
 0x229   : > { %v4339_v5 = vpop.eup %4338  ;;  %v2449_v10 = vmul.f32 -0.35, %v2348_v25  ;;  %4348 = vlog2.f32 %v1155_v26  ;;  %v3175_v46 = vsel %vm788_vm1, %v3088_v23, 0.0  ;;  %v3112_v15 = vsel %vm6586_vm15, %v3048_v40, 0.0  ;;  %v4646_v26 = vld [vmem:[%s4784_s25 + $0xc8] sm:$0xff] }
 0x22a   : > { %v4341_v18 = vpop.eup %4340  ;;  %v3380_v20 = vsel %vm6586_vm15, %v3316_v41, 0.0  ;;  %v1434_v62 = vmul.f32 1.442695, %v1344_v38  ;;  %v3174_v21 = vadd.f32 %v3173_v47, %v6516_v29  ;;  %v1626_v55 = vmul.f32 1.442695, %v1536_v57 }
 0x22b   : > { %v1245_v43 = vmul.f32 0.6931472, %v4337_v22  ;;  %v1561_v56 = vmul.f32 0.15, %v1293_v63  ;;  %v6602_v30 = vadd.f32 %v3443_v33, %v3442_v45  ;;  %v1727_v6 = vmul.f32 %v4646_v26, %v4335_v13 }
 0x22c   : > { %v4343_v19 = vpop.eup %4342  ;;  %vm555_vm2 = vcmp.lt.s32.totalorder %v6526_v4, 514  ;;  %v1484_v49 = vmul.f32 1.442695, %v1369_v48  ;;  %4350 = vlog2.f32 %v2260_v59  ;;  %v6606_v23 = vadd.f32 %v3175_v46, %v3174_v21  ;;  %v2187_v59 = vpop.f32.mrf.mxu1  ;;  %v4647_v21 = vld [vmem:[%s4789_s28 + $0xc8] sm:$0xff] }
 0x22d   : > { %v4345_v40 = vpop.eup %4344  ;;  %v6609_v41 = vsel %vm788_vm1, %v3112_v15, 0.0  ;;  %v6612_v29 = vsel %vm788_vm1, %v3380_v20, 0.0  ;;  %v2539_v47 = vmul.f32 1.442695, %v2449_v10  ;;  %4352 = vpow2.f32 %v1434_v62  ;;  %vm6628_vm4 = vmand %vm398_vm0, %vm555_vm2 }
 0x22e   : > { %7443 = vst [vmem:[#allocation20_spill] sm:$0xff] %v6609_v41  ;;  %v4347_v63 = vpop.eup %4346  ;;  %v2641_v45 = vmul.f32 0.15, %v2348_v25  ;;  %v2398_v38 = vmul.f32 0.6931472, %v4345_v40  ;;  %4354 = vpow2.f32 %v1626_v55  ;;  %v2832_v20 = vmul.f32 %v4647_v21, %v4341_v18 }
 0x22f   : > { %7444 = vst [vmem:[#allocation21_spill] sm:$0xff] %v6612_v29  ;;  %v1083_v13 = vadd.f32 1e-12, %v1082_v34  ;;  %v4349_v60 = vpop.eup %4348  ;;  %v1345_v57 = vmul.f32 -0.35, %v1245_v43  ;;  %4356 = vpow2.f32 %v1484_v49  ;;  %v2960_v26 = vsub.f32 %v4339_v5, %v4347_v63 }
 0x230   : > { %v1676_v22 = vmul.f32 1.442695, %v1561_v56  ;;  %v2350_v48 = vmul.f32 0.6931472, %v4343_v19  ;;  %v2474_v33 = vmul.f32 -0.35, %v2398_v38  ;;  %4358 = vpow2.f32 %v2539_v47 }
 0x231   : > { %v2666_v46 = vmul.f32 0.15, %v2398_v38  ;;  %v1295_v15 = vmul.f32 0.6931472, %v4349_v60  ;;  %v1537_v10 = vmul.f32 0.15, %v1245_v43  ;;  %4360 = vlog2.f32 %v1083_v13 }
 0x232   : > { %v4351_v41 = vpop.eup %4350  ;;  %v2589_v62 = vmul.f32 1.442695, %v2474_v33  ;;  %v2188_v34 = vadd.f32 1e-12, %v2187_v59  ;;  %v2731_v40 = vmul.f32 1.442695, %v2641_v45  ;;  %4362 = vpow2.f32 %v1676_v22  ;;  %v6622_v59 = vpop.f32.mrf.mxu2 }
 0x233   : > { %v2781_v25 = vmul.f32 1.442695, %v2666_v46  ;;  %v451_v55 = vadd.s32 400, %v5120_v50  ;;  %v2450_v56 = vmul.f32 -0.35, %v2350_v48  ;;  %v4353_v19 = vpop.eup %4352  ;;  %vm579_vm3 = vcmp.lt.s32.totalorder %v6547_v12, 514  ;;  %v1085_v46 = vpop.f32.mrf.mxu0 }
 0x234   : > { %v1436_v49 = vmul.f32 1.442695, %v1345_v57  ;;  %4364 = vpow2.f32 %v2589_v62  ;;  %v1370_v38 = vmul.f32 -0.35, %v1295_v15  ;;  %v1562_v18 = vmul.f32 0.15, %v1295_v15  ;;  %v6617_v5 = vpop.eup %4354  ;;  %vm6658_vm6 = vmand %vm398_vm0, %vm579_vm3 }
 0x235   : > { %v2896_v43 = vsub.f32 %v1727_v6, %v2832_v20  ;;  %v6620_v47 = vadd.s32 %v5122_v51, %v427_v44  ;;  %4366 = vpow2.f32 %v2781_v25  ;;  %v2400_v63 = vmul.f32 0.6931472, %v4351_v41  ;;  %v4357_v45 = vpop.eup %4356  ;;  %v4648_v62 = vld [vmem:[%s4784_s25 + $0x198] sm:$0xff] }
 0x236   : > { %v3293_v13 = vmul.f32 %v2960_v26, %v2960_v26  ;;  %v1628_v60 = vmul.f32 1.442695, %v1537_v10  ;;  %v1486_v22 = vmul.f32 1.442695, %v1370_v38  ;;  %4368 = vlog2.f32 %v2188_v34  ;;  %v4359_v57 = vpop.eup %4358  ;;  %v2190_v38 = vpop.f32.mrf.mxu1 }
 0x237   : > { %4370 = vpow2.f32 %v2731_v40  ;;  %v6633_v44 = vadd.s32 %v5122_v51, %v451_v55  ;;  %v2541_v41 = vmul.f32 1.442695, %v2450_v56  ;;  %v2475_v33 = vmul.f32 -0.35, %v2400_v63  ;;  %v4361_v15 = vpop.eup %4360  ;;  %v6636_v40 = vpop.f32.mrf.mxu3 }
 0x238   : > { %4372 = vpow2.f32 %v1436_v49  ;;  %v2642_v21 = vmul.f32 0.15, %v2350_v48  ;;  %v1678_v20 = vmul.f32 1.442695, %v1562_v18  ;;  %v2667_v26 = vmul.f32 0.15, %v2400_v63  ;;  %v4363_v4 = vpop.eup %4362 }
 0x239   : > { %v3025_v10 = vmul.f32 %v2896_v43, %v2896_v43  ;;  %v1753_v25 = vmul.f32 %v4648_v62, %v4357_v45  ;;  %4374 = vpow2.f32 %v1486_v22  ;;  %v2591_v34 = vmul.f32 1.442695, %v2475_v33  ;;  %v4649_v63 = vld [vmem:[%s4789_s28 + $0x198] sm:$0xff] }
 0x23a   : > { %v4365_v55 = vpop.eup %4364  ;;  %v3357_v56 = vsel %vm6628_vm4, %v3293_v13, 0.0  ;;  %4376 = vpow2.f32 %v1628_v60  ;;  %v428_v49 = vadd.s32 216, %v5120_v50  ;;  %v2783_v48 = vmul.f32 1.442695, %v2667_v26 }
 0x23b   : > { %v4367_v18 = vpop.eup %4366  ;;  %4378 = vpow2.f32 %v2541_v41  ;;  %v2858_v43 = vmul.f32 %v4649_v63, %v4365_v55  ;;  %v1247_v27 = vmul.f32 0.6931472, %v4361_v15  ;;  %v1086_v45 = vadd.f32 1e-12, %v1085_v46  ;;  %v4650_v15 = vld [vmem:[%s4784_s25 + $0xd0] sm:$0xff] }
 0x23c   : > { %v4369_v22 = vpop.eup %4368  ;;  %v3049_v33 = vmul.f32 %v6491_v61, %v6491_v61  ;;  %v2733_v62 = vmul.f32 1.442695, %v2642_v21  ;;  %v6644_v28 = vsub.f32 %v4363_v4, %v4367_v18  ;;  %4380 = vpow2.f32 %v1678_v20  ;;  %v4651_v46 = vld [vmem:[%s4789_s28 + $0xd0] sm:$0xff]  ;;  %v1088_v18 = vpop.f32.mrf.mxu0 }
 0x23d   : > { %v4371_v13 = vpop.eup %4370  ;;  %v3089_v60 = vsel %vm6628_vm4, %v3025_v10, 0.0  ;;  %v6648_v26 = vsub.f32 %v1753_v25, %v2858_v43  ;;  %4382 = vpow2.f32 %v2591_v34  ;;  %v2191_v41 = vadd.f32 1e-12, %v2190_v38  ;;  %v6669_v25 = vpop.f32.mrf.mxu2 }
 0x23e   : > { %v4373_v55 = vpop.eup %4372  ;;  %v1728_v63 = vmul.f32 %v4650_v15, %v4353_v19  ;;  %vm556_vm5 = vcmp.lt.s32.totalorder %v6620_v47, 514  ;;  %v2833_v32 = vmul.f32 %v4651_v46, %v4359_v57  ;;  %4384 = vpow2.f32 %v2783_v48 }
 0x23f   : > { %v4375_v61 = vpop.eup %4374  ;;  %v3445_v21 = vsel %vm788_vm1, %v3357_v56, 0.0  ;;  %vm580_vm7 = vcmp.lt.s32.totalorder %v6633_v44, 514  ;;  %v1346_v20 = vmul.f32 -0.35, %v1247_v27  ;;  %v2352_v19 = vmul.f32 0.6931472, %v4369_v22  ;;  %vm6696_vm9 = vmand %vm398_vm0, %vm556_vm5 }
 0x240   : > { %4386 = vlog2.f32 %v1086_v45  ;;  %v4377_v4 = vpop.eup %4376  ;;  %v3177_v57 = vsel %vm788_vm1, %v3089_v60, 0.0  ;;  %v3113_v10 = vsel %vm6658_vm6, %v3049_v33, 0.0  ;;  %v6667_v12 = vadd.s32 %v5122_v51, %v428_v49  ;;  %v4652_v33 = vld [vmem:[%s4784_s25 + $0x1a0] sm:$0xff]  ;;  %vm6720_vm10 = vmand %vm398_vm0, %vm580_vm7 }
 0x241   : > { %4388 = vpow2.f32 %v2733_v62  ;;  %v4379_v34 = vpop.eup %4378  ;;  %v2961_v38 = vsub.f32 %v6617_v5, %v4371_v13  ;;  %v1538_v56 = vmul.f32 0.15, %v1247_v27  ;;  %v1158_v48 = vadd.f32 1e-12, %v6622_v59  ;;  %v2193_v13 = vpop.f32.mrf.mxu1 }
 0x242   : > { %4390 = vlog2.f32 %v2191_v41  ;;  %v4381_v43 = vpop.eup %4380  ;;  %v6674_v45 = vadd.f32 %v3445_v21, %v6602_v30  ;;  %v2897_v22 = vsub.f32 %v1728_v63, %v2833_v32  ;;  %v452_v49 = vadd.s32 408, %v5120_v50  ;;  %v6683_v41 = vpop.f32.mrf.mxu3  ;;  %v4653_v63 = vld [vmem:[%s4789_s28 + $0x1a0] sm:$0xff] }
 0x243   : > { %v1754_v62 = vmul.f32 %v4652_v33, %v4375_v61  ;;  %v4383_v60 = vpop.eup %4382  ;;  %v6679_v15 = vadd.f32 %v3177_v57, %v6606_v23  ;;  %v3317_v27 = vmul.f32 %v6499_v58, %v6499_v58  ;;  %v1438_v5 = vmul.f32 1.442695, %v1346_v20 }
 0x244   : > { %v2451_v59 = vmul.f32 -0.35, %v2352_v19  ;;  %v4385_v30 = vpop.eup %4384  ;;  %v6686_v46 = vsel %vm788_vm1, %v3113_v10, 0.0  ;;  %vm557_vm8 = vcmp.lt.s32.totalorder %v6667_v12, 514  ;;  %v2643_v32 = vmul.f32 0.15, %v2352_v19 }
 0x245   : > { %7449 = vst [vmem:[#allocation22_spill] sm:$0xff] %v6686_v46  ;;  %v2859_v61 = vmul.f32 %v4653_v63, %v4383_v60  ;;  %v1089_v23 = vadd.f32 1e-12, %v1088_v18  ;;  %v3294_v57 = vmul.f32 %v2961_v38, %v2961_v38  ;;  %v1630_v58 = vmul.f32 1.442695, %v1538_v56  ;;  %v4654_v56 = vld [vmem:[%s4784_s25 + $0xd8] sm:$0xff]  ;;  %vm6746_vm11 = vmand %vm398_vm0, %vm557_vm8 }
 0x246   : > { %v4387_v21 = vpop.eup %4386  ;;  %v6690_v20 = vsub.f32 %v4381_v43, %v4385_v30  ;;  %4392 = vlog2.f32 %v1158_v48  ;;  %v3026_v19 = vmul.f32 %v2897_v22, %v2897_v22  ;;  %v429_v60 = vadd.s32 224, %v5120_v50  ;;  %v4655_v30 = vld [vmem:[%s4789_s28 + $0xd8] sm:$0xff] }
 0x247   : > { %v4389_v33 = vpop.eup %4388  ;;  %v6701_v63 = vsub.f32 %v1754_v62, %v2859_v61  ;;  %v2194_v18 = vadd.f32 1e-12, %v2193_v13  ;;  %v1729_v43 = vmul.f32 %v4654_v56, %v4373_v55  ;;  %v2834_v48 = vmul.f32 %v4655_v30, %v4379_v34 }
 0x248   : > { %v4391_v38 = vpop.eup %4390  ;;  %4394 = vpow2.f32 %v1438_v5  ;;  %v2543_v46 = vmul.f32 1.442695, %v2451_v59  ;;  %v6706_v47 = vadd.s32 %v5122_v51, %v452_v49  ;;  %v2735_v29 = vmul.f32 1.442695, %v2643_v32 }
 0x249   : > { %v1249_v16 = vmul.f32 0.6931472, %v4387_v21  ;;  %4396 = vlog2.f32 %v1089_v23  ;;  %v3381_v22 = vsel %vm6658_vm6, %v3317_v27, 0.0  ;;  %v3358_v62 = vsel %vm6696_vm9, %v3294_v57, 0.0  ;;  %v6724_v27 = vpop.f32.mrf.mxu2 }
 0x24a   : > { %v3318_v13 = vmul.f32 %v6590_v54, %v6590_v54  ;;  %4398 = vpow2.f32 %v1630_v58  ;;  %v3090_v55 = vsel %vm6696_vm9, %v3026_v19, 0.0  ;;  %v2962_v6 = vsub.f32 %v4377_v4, %v4389_v33 }
 0x24b   : > { %v2354_v49 = vmul.f32 0.6931472, %v4391_v38  ;;  %4400 = vlog2.f32 %v2194_v18  ;;  %v2898_v59 = vsub.f32 %v1729_v43, %v2834_v48  ;;  %v6727_v54 = vadd.s32 %v5122_v51, %v429_v60 }
 0x24c   : > { %v4393_v5 = vpop.eup %4392  ;;  %4402 = vpow2.f32 %v2543_v46  ;;  %v453_v32 = vadd.s32 416, %v5120_v50  ;;  %v6731_v44 = vsel %vm788_vm1, %v3381_v22, 0.0  ;;  %v3050_v61 = vmul.f32 %v6592_v14, %v6592_v14  ;;  %v6739_v46 = vpop.f32.mrf.mxu3 }
 0x24d   : > { %7454 = vst [vmem:[#allocation23_spill] sm:$0xff] %v6731_v44  ;;  %4404 = vpow2.f32 %v2735_v29  ;;  %v1347_v4 = vmul.f32 -0.35, %v1249_v16  ;;  %v3179_v21 = vsel %vm788_vm1, %v3090_v55, 0.0  ;;  %v3447_v57 = vsel %vm788_vm1, %v3358_v62, 0.0 }
 0x24e   : > { %v4395_v23 = vpop.eup %4394  ;;  %v3382_v58 = vsel %vm6720_vm10, %v3318_v13, 0.0  ;;  %v1539_v33 = vmul.f32 0.15, %v1249_v16  ;;  %v3295_v19 = vmul.f32 %v2962_v6, %v2962_v6  ;;  %v1297_v60 = vmul.f32 0.6931472, %v4393_v5 }
 0x24f   : > { %v4397_v10 = vpop.eup %4396  ;;  %v2452_v18 = vmul.f32 -0.35, %v2354_v49  ;;  %v2263_v38 = vadd.f32 1e-12, %v6636_v40  ;;  %v3027_v56 = vmul.f32 %v2898_v59, %v2898_v59  ;;  %vm558_vm12 = vcmp.lt.s32.totalorder %v6727_v54, 514 }
 0x250   : > { %v4399_v14 = vpop.eup %4398  ;;  %v6752_v16 = vadd.s32 %v5122_v51, %v453_v32  ;;  %v2644_v43 = vmul.f32 0.15, %v2354_v49  ;;  %v6755_v48 = vadd.f32 %v3179_v21, %v6679_v15  ;;  %v3448_v40 = vadd.f32 %v3447_v57, %v6674_v45  ;;  %v1091_v15 = vpop.f32.mrf.mxu0  ;;  %v4656_v57 = vld [vmem:[%s4784_s25 + $0xe0] sm:$0xff]  ;;  %vm6795_vm15 = vmand %vm398_vm0, %vm558_vm12 }
 0x251   : > { %v4401_v30 = vpop.eup %4400  ;;  %v3114_v12 = vsel %vm6720_vm10, %v3050_v61, 0.0  ;;  %vm581_vm13 = vcmp.lt.s32.totalorder %v6706_v47, 514  ;;  %v1440_v22 = vmul.f32 1.442695, %v1347_v4  ;;  %v6762_v13 = vsel %vm788_vm1, %v3382_v58, 0.0  ;;  %v6774_v44 = vpop.f32.mrf.mxu2 }
 0x252   : > { %v4403_v62 = vpop.eup %4402  ;;  %7457 = vst [vmem:[#allocation24_spill] sm:$0xff] %v6762_v13  ;;  %v1632_v55 = vmul.f32 1.442695, %v1539_v33  ;;  %v430_v6 = vadd.s32 232, %v5120_v50  ;;  %v1251_v49 = vmul.f32 0.6931472, %v4397_v10  ;;  %4406 = vlog2.f32 %v2263_v38  ;;  %vm6803_vm2 = vmand %vm398_vm0, %vm581_vm13 }
 0x253   : > { %v4405_v5 = vpop.eup %4404  ;;  %v3359_v45 = vsel %vm6746_vm11, %v3295_v19, 0.0  ;;  %v1371_v34 = vmul.f32 -0.35, %v1297_v60  ;;  %v2545_v59 = vmul.f32 1.442695, %v2452_v18  ;;  %v6768_v32 = vsel %vm788_vm1, %v3114_v12, 0.0 }
 0x254   : > { %7458 = vst [vmem:[#allocation25_spill] sm:$0xff] %v6768_v32  ;;  %v3091_v61 = vsel %vm6746_vm11, %v3027_v56, 0.0  ;;  %v2737_v4 = vmul.f32 1.442695, %v2644_v43  ;;  %v2356_v21 = vmul.f32 0.6931472, %v4401_v30  ;;  %v1730_v58 = vmul.f32 %v4656_v57, %v4395_v23  ;;  %v2196_v30 = vpop.f32.mrf.mxu1 }
 0x255   : > { %v4657_v33 = vld [vmem:[%s4789_s28 + $0xe0] sm:$0xff]  ;;  %4408 = vpow2.f32 %v1440_v22  ;;  %v1092_v13 = vadd.f32 1e-12, %v1091_v15  ;;  %v3449_v19 = vsel %vm788_vm1, %v3359_v45, 0.0  ;;  %v2963_v18 = vsub.f32 %v4399_v14, %v4405_v5  ;;  %v6783_v22 = vpop.f32.mrf.mxu3 }
 0x256   : > { %v2835_v10 = vmul.f32 %v4657_v33, %v4403_v62  ;;  %4410 = vpow2.f32 %v1632_v55  ;;  %v1348_v38 = vmul.f32 -0.35, %v1251_v49  ;;  %v1488_v12 = vmul.f32 1.442695, %v1371_v34 }
 0x257   : > { %v6778_v32 = vadd.s32 %v5122_v51, %v430_v6  ;;  %4412 = vpow2.f32 %v2545_v59  ;;  %v454_v29 = vadd.s32 424, %v5120_v50  ;;  %v3181_v23 = vsel %vm788_vm1, %v3091_v61, 0.0 }
 0x258   : > { %4414 = vpow2.f32 %v2737_v4  ;;  %v1161_v56 = vadd.f32 1e-12, %v6669_v25  ;;  %v2453_v43 = vmul.f32 -0.35, %v2356_v21  ;;  %v4407_v62 = vpop.eup %4406  ;;  %v6785_v14 = vadd.f32 %v3449_v19, %v3448_v40 }
 0x259   : > { %v2899_v55 = vsub.f32 %v1730_v58, %v2835_v10  ;;  %vm582_vm14 = vcmp.lt.s32.totalorder %v6752_v16, 514  ;;  %v2266_v6 = vadd.f32 1e-12, %v6683_v41  ;;  %4416 = vlog2.f32 %v1092_v13 }
 0x25a   : > { %v3296_v15 = vmul.f32 %v2963_v18, %v2963_v18  ;;  %v1563_v5 = vmul.f32 0.15, %v1297_v60  ;;  %v1442_v45 = vmul.f32 1.442695, %v1348_v38  ;;  %v1540_v34 = vmul.f32 0.15, %v1251_v49  ;;  %vm6846_vm4 = vmand %vm398_vm0, %vm582_vm14 }
 0x25b   : > { %v4409_v59 = vpop.eup %4408  ;;  %v3319_v25 = vmul.f32 %v6644_v28, %v6644_v28  ;;  %4418 = vpow2.f32 %v1488_v12  ;;  %v2645_v61 = vmul.f32 0.15, %v2356_v21  ;;  %v2197_v41 = vadd.f32 1e-12, %v2196_v30  ;;  %v6819_v12 = vpop.f32.mrf.mxu2 }
 0x25c   : > { %v4411_v13 = vpop.eup %4410  ;;  %v3051_v28 = vmul.f32 %v6648_v26, %v6648_v26  ;;  %vm559_vm3 = vcmp.lt.s32.totalorder %v6778_v32, 514  ;;  %v2402_v54 = vmul.f32 0.6931472, %v4407_v62  ;;  %4420 = vlog2.f32 %v1161_v56  ;;  %v4661_v32 = vld [vmem:[%s4784_s25 + $0xf0] sm:$0xff] }
 0x25d   : > { %v2547_v49 = vmul.f32 1.442695, %v2453_v43  ;;  %v4413_v4 = vpop.eup %4412  ;;  %v3182_v21 = vadd.f32 %v3181_v23, %v6755_v48  ;;  %v3028_v57 = vmul.f32 %v2899_v55, %v2899_v55  ;;  %v431_v47 = vadd.s32 240, %v5120_v50  ;;  %v4658_v55 = vld [vmem:[%s4784_s25 + $0xe8] sm:$0xff]  ;;  %vm6869_vm6 = vmand %vm398_vm0, %vm559_vm3 }
 0x25e   : > { %4422 = vlog2.f32 %v2266_v6  ;;  %v4415_v58 = vpop.eup %4414  ;;  %v3360_v33 = vsel %vm6795_vm15, %v3296_v15, 0.0  ;;  %v6815_v10 = vadd.s32 %v5122_v51, %v454_v29  ;;  %v1634_v26 = vmul.f32 1.442695, %v1540_v34 }
 0x25f   : > { %4424 = vpow2.f32 %v1442_v45  ;;  %v4417_v19 = vpop.eup %4416  ;;  %v3383_v18 = vsel %vm6803_vm2, %v3319_v25, 0.0  ;;  %v1680_v48 = vmul.f32 1.442695, %v1563_v5  ;;  %v2739_v38 = vmul.f32 1.442695, %v2645_v61  ;;  %v4659_v45 = vld [vmem:[%s4789_s28 + $0xe8] sm:$0xff] }
 0x260   : > { %4426 = vlog2.f32 %v2197_v41  ;;  %v3115_v23 = vsel %vm6803_vm2, %v3051_v28, 0.0  ;;  %v2476_v56 = vmul.f32 -0.35, %v2402_v54  ;;  %v1253_v29 = vmul.f32 0.6931472, %v4417_v19  ;;  %v6831_v41 = vpop.f32.mrf.mxu3 }
 0x261   : > { %4428 = vpow2.f32 %v2547_v49  ;;  %v4419_v43 = vpop.eup %4418  ;;  %v3092_v30 = vsel %vm6795_vm15, %v3028_v57, 0.0  ;;  %v3451_v62 = vsel %vm788_vm1, %v3360_v33, 0.0  ;;  %v1731_v6 = vmul.f32 %v4658_v55, %v4409_v59  ;;  %v4660_v33 = vld [vmem:[%s4784_s25 + $0x1a8] sm:$0xff] }
 0x262   : > { %v6828_v15 = vadd.s32 %v5122_v51, %v431_v47  ;;  %v4421_v5 = vpop.eup %4420  ;;  %v2836_v34 = vmul.f32 %v4659_v45, %v4413_v4  ;;  %v2964_v25 = vsub.f32 %v4411_v13, %v4415_v58  ;;  %4430 = vpow2.f32 %v1634_v26 }
 0x263   : > { %v1349_v61 = vmul.f32 -0.35, %v1253_v29  ;;  %v6834_v40 = vsel %vm788_vm1, %v3383_v18, 0.0  ;;  %v3320_v28 = vmul.f32 %v6690_v20, %v6690_v20  ;;  %v2668_v59 = vmul.f32 0.15, %v2402_v54 }
 0x264   : > { %v4423_v60 = vpop.eup %4422  ;;  %4432 = vpow2.f32 %v2739_v38  ;;  %v6839_v57 = vsel %vm788_vm1, %v3115_v23, 0.0  ;;  %v3183_v13 = vsel %vm788_vm1, %v3092_v30, 0.0  ;;  %v6852_v47 = vmul.f32 %v6701_v63, %v6701_v63 }
 0x265   : > { %v4425_v49 = vpop.eup %4424  ;;  %v2593_v20 = vmul.f32 1.442695, %v2476_v56  ;;  %v6855_v58 = vadd.f32 %v3451_v62, %v6785_v14  ;;  %4434 = vpow2.f32 %v1680_v48  ;;  %v6858_v26 = vmul.f32 %v4660_v33, %v4419_v43 }
 0x266   : > { %v4427_v54 = vpop.eup %4426  ;;  %v1541_v16 = vmul.f32 0.15, %v1253_v29  ;;  %v2900_v18 = vsub.f32 %v1731_v6, %v2836_v34  ;;  %v3297_v38 = vmul.f32 %v2964_v25, %v2964_v25  ;;  %vm560_vm5 = vcmp.lt.s32.totalorder %v6828_v15, 514  ;;  %v4662_v34 = vld [vmem:[%s4789_s28 + $0xf0] sm:$0xff] }
 0x267   : > { %v4429_v19 = vpop.eup %4428  ;;  %v1444_v23 = vmul.f32 1.442695, %v1349_v61  ;;  %v2358_v63 = vmul.f32 0.6931472, %v4427_v54  ;;  %v6861_v30 = vadd.f32 %v3183_v13, %v3182_v21  ;;  %v3384_v14 = vsel %vm6846_vm4, %v3320_v28, 0.0  ;;  %v6880_v13 = vpop.f32.mrf.mxu2  ;;  %vm6903_vm7 = vmand %vm398_vm0, %vm560_vm5 }
 0x268   : > { %v2785_v56 = vmul.f32 1.442695, %v2668_v59  ;;  %v1299_v29 = vmul.f32 0.6931472, %v4421_v5  ;;  %v4431_v43 = vpop.eup %4430  ;;  %v3116_v62 = vsel %vm6846_vm4, %v6852_v47, 0.0  ;;  %4436 = vpow2.f32 %v2593_v20 }
 0x269   : > { %v455_v21 = vadd.s32 432, %v5120_v50  ;;  %v1164_v55 = vadd.f32 1e-12, %v6724_v27  ;;  %v1732_v45 = vmul.f32 %v4661_v32, %v4425_v49  ;;  %v2837_v25 = vmul.f32 %v4662_v34, %v4429_v19 }
 0x26a   : > { %v4433_v6 = vpop.eup %4432  ;;  %v2404_v61 = vmul.f32 0.6931472, %v4423_v60  ;;  %v1636_v28 = vmul.f32 1.442695, %v1541_v16  ;;  %v3029_v5 = vmul.f32 %v2900_v18, %v2900_v18  ;;  %v3361_v59 = vsel %vm6869_vm6, %v3297_v38, 0.0  ;;  %v6886_v16 = vpop.f32.mrf.mxu3 }
 0x26b   : > { %4438 = vpow2.f32 %v1444_v23  ;;  %v2454_v4 = vmul.f32 -0.35, %v2358_v63  ;;  %v4435_v47 = vpop.eup %4434  ;;  %v1372_v20 = vmul.f32 -0.35, %v1299_v29  ;;  %v432_v27 = vadd.s32 248, %v5120_v50 }
 0x26c   : > { %4440 = vpow2.f32 %v2785_v56  ;;  %v2646_v54 = vmul.f32 0.15, %v2358_v63  ;;  %v2965_v33 = vsub.f32 %v4431_v43, %v4433_v6  ;;  %v2269_v60 = vadd.f32 1e-12, %v6739_v46 }
 0x26d   : > { %4442 = vlog2.f32 %v1164_v55  ;;  %v2549_v49 = vmul.f32 1.442695, %v2454_v4  ;;  %v2901_v19 = vsub.f32 %v1732_v45, %v2837_v25  ;;  %v2477_v18 = vmul.f32 -0.35, %v2404_v61 }
 0x26e   : > { %4444 = vpow2.f32 %v1636_v28  ;;  %v2741_v32 = vmul.f32 1.442695, %v2646_v54  ;;  %v4437_v38 = vpop.eup %4436  ;;  %v6889_v23 = vsel %vm788_vm1, %v3384_v14, 0.0  ;;  %v3093_v56 = vsel %vm6869_vm6, %v3029_v5, 0.0 }
 0x26f   : > { %v1564_v34 = vmul.f32 0.15, %v1299_v29  ;;  %4446 = vpow2.f32 %v2549_v49  ;;  %v3453_v63 = vsel %vm788_vm1, %v3361_v59, 0.0  ;;  %v1490_v43 = vmul.f32 1.442695, %v1372_v20  ;;  %v6915_v49 = vpop.f32.mrf.mxu2 }
 0x270   : > { %v497_v46 = vadd.s32 %v5122_v51, %v432_v27  ;;  %4448 = vpow2.f32 %v2741_v32  ;;  %v3298_v6 = vmul.f32 %v2965_v33, %v2965_v33  ;;  %v2669_v45 = vmul.f32 0.15, %v2404_v61  ;;  %v4663_v27 = vld [vmem:[%s4784_s25 + $0xf8] sm:$0xff] }
 0x271   : > { %v4439_v55 = vpop.eup %4438  ;;  %4450 = vlog2.f32 %v2269_v60  ;;  %v1167_v25 = vadd.f32 1e-12, %v6774_v44  ;;  %v6897_v28 = vsel %vm788_vm1, %v3116_v62, 0.0  ;;  %v3030_v29 = vmul.f32 %v2901_v19, %v2901_v19  ;;  %v4664_v60 = vld [vmem:[%s4789_s28 + $0x1a8] sm:$0xff] }
 0x272   : > { %v4441_v14 = vpop.eup %4440  ;;  %v6908_v61 = vadd.s32 %v5122_v51, %v455_v21  ;;  %v2595_v5 = vmul.f32 1.442695, %v2477_v18  ;;  %v3185_v44 = vsel %vm788_vm1, %v3093_v56, 0.0  ;;  %v3454_v62 = vadd.f32 %v3453_v63, %v6855_v58 }
 0x273   : > { %v4443_v59 = vpop.eup %4442  ;;  %v1682_v4 = vmul.f32 1.442695, %v1564_v34  ;;  %v2272_v15 = vadd.f32 1e-12, %v6783_v22  ;;  %4452 = vpow2.f32 %v1490_v43  ;;  %v1733_v54 = vmul.f32 %v4663_v27, %v4439_v55  ;;  %v4665_v34 = vld [vmem:[%s4789_s28 + $0xf8] sm:$0xff] }
 0x274   : > { %v4445_v20 = vpop.eup %4444  ;;  %vm561_vm8 = vcmp.lt.s32.totalorder %v497_v46, 514  ;;  %v456_v33 = vadd.s32 440, %v5120_v50  ;;  %v2860_v19 = vmul.f32 %v4664_v60, %v4437_v38  ;;  %v3362_v18 = vsel %vm6903_vm7, %v3298_v6, 0.0  ;;  %v6925_v60 = vpop.f32.mrf.mxu3 }
 0x275   : > { %v4447_v21 = vpop.eup %4446  ;;  %v2787_v58 = vmul.f32 1.442695, %v2669_v45  ;;  %4454 = vlog2.f32 %v1167_v25  ;;  %v2988_v22 = vsub.f32 %v4435_v47, %v4441_v14  ;;  %v3094_v56 = vsel %vm6903_vm7, %v3030_v29, 0.0  ;;  %vm6932_vm10 = vmand %vm398_vm0, %vm561_vm8 }
 0x276   : > { %v4449_v32 = vpop.eup %4448  ;;  %4456 = vpow2.f32 %v2595_v5  ;;  %v2838_v63 = vmul.f32 %v4665_v34, %v4447_v21  ;;  %v3186_v55 = vadd.f32 %v3185_v44, %v6861_v30  ;;  %v1170_v38 = vadd.f32 1e-12, %v6819_v12  ;;  %v4666_v34 = vld [vmem:[%s4784_s25 + $0x1b0] sm:$0xff] }
 0x277   : > { %v4451_v43 = vpop.eup %4450  ;;  %v2966_v27 = vsub.f32 %v4445_v20, %v4449_v32  ;;  %4458 = vlog2.f32 %v2272_v15  ;;  %vm583_vm9 = vcmp.lt.s32.totalorder %v6815_v10, 514  ;;  %v3455_v47 = vsel %vm788_vm1, %v3362_v18, 0.0 }
 0x278   : > { %4460 = vpow2.f32 %v1682_v4  ;;  %v1301_v6 = vmul.f32 0.6931472, %v4443_v59  ;;  %v2902_v30 = vsub.f32 %v1733_v54, %v2838_v63  ;;  %v3187_v25 = vsel %vm788_vm1, %v3094_v56, 0.0  ;;  %vm6969_vm12 = vmand %vm398_vm0, %vm583_vm9 }
 0x279   : > { %4462 = vpow2.f32 %v2787_v58  ;;  %v3299_v12 = vmul.f32 %v2966_v27, %v2966_v27  ;;  %v6938_v14 = vadd.s32 %v5122_v51, %v456_v33  ;;  %v4453_v48 = vpop.eup %4452  ;;  %v2924_v29 = vsub.f32 %v6858_v26, %v2860_v19  ;;  %v6953_v27 = vpop.f32.mrf.mxu2 }
 0x27a   : > { %v6941_v5 = vmul.f32 %v2988_v22, %v2988_v22  ;;  %v3031_v46 = vmul.f32 %v2902_v30, %v2902_v30  ;;  %v2406_v59 = vmul.f32 0.6931472, %v4451_v43  ;;  %v3456_v4 = vadd.f32 %v3455_v47, %v3454_v62  ;;  %v4667_v30 = vld [vmem:[%s4789_s28 + $0x1b0] sm:$0xff] }
 0x27b   : > { %v4455_v44 = vpop.eup %4454  ;;  %v3363_v15 = vsel %vm6932_vm10, %v3299_v12, 0.0  ;;  %4464 = vlog2.f32 %v1170_v38  ;;  %v2275_v20 = vadd.f32 1e-12, %v6831_v41  ;;  %v3188_v21 = vadd.f32 %v3187_v25, %v3186_v55 }
 0x27c   : > { %v4457_v54 = vpop.eup %4456  ;;  %v1373_v33 = vmul.f32 -0.35, %v1301_v6  ;;  %v3095_v18 = vsel %vm6932_vm10, %v3031_v46, 0.0  ;;  %v3457_v26 = vsel %vm788_vm1, %v3363_v15, 0.0  ;;  %v1565_v58 = vmul.f32 0.15, %v1301_v6 }
 0x27d   : > { %v4459_v19 = vpop.eup %4458  ;;  %v3189_v32 = vsel %vm788_vm1, %v3095_v18, 0.0  ;;  %v3458_v62 = vadd.f32 %v3457_v26, %v3456_v4  ;;  %v1173_v22 = vadd.f32 1e-12, %v6880_v13  ;;  %v1756_v63 = vmul.f32 %v4666_v34, %v4453_v48 }
 0x27e   : > { %v4461_v56 = vpop.eup %4460  ;;  %vm584_vm11 = vcmp.lt.s32.totalorder %v6908_v61, 514  ;;  %v3190_v41 = vadd.f32 %v3189_v32, %v3188_v21  ;;  %v2478_v43 = vmul.f32 -0.35, %v2406_v59  ;;  %v1303_v55 = vmul.f32 0.6931472, %v4455_v44  ;;  %v6962_v21 = vpop.f32.mrf.mxu3 }
 0x27f   : > { %v4463_v38 = vpop.eup %4462  ;;  %v3460_v47 = vadd.f32 %v5614_v17, %v3458_v62  ;;  %v2670_v6 = vmul.f32 0.15, %v2406_v59  ;;  %4466 = vlog2.f32 %v2275_v20  ;;  %v2278_v45 = vadd.f32 1e-12, %v6886_v16  ;;  %vm6991_vm13 = vmand %vm398_vm0, %vm584_vm11 }
 0x280   : > { %v2861_v25 = vmul.f32 %v4667_v30, %v4457_v54  ;;  %v1492_v13 = vmul.f32 1.442695, %v1373_v33  ;;  %v3192_v12 = vadd.f32 %v5693_v11, %v3190_v41  ;;  %v2408_v48 = vmul.f32 0.6931472, %v4459_v19 }
 0x281   : > { %v4465_v46 = vpop.eup %4464  ;;  %v6959_v4 = vmul.f32 %v2924_v29, %v2924_v29  ;;  %v1684_v15 = vmul.f32 1.442695, %v1565_v58  ;;  %v3462_v44 = vadd.f32 %v5745_v9, %v3460_v47  ;;  %4468 = vlog2.f32 %v1173_v22 }
 0x282   : > { %v2989_v17 = vsub.f32 %v4461_v56, %v4463_v38  ;;  %v3194_v59 = vadd.f32 %v5755_v7, %v3192_v12  ;;  %v2597_v20 = vmul.f32 1.442695, %v2478_v43  ;;  %v1374_v16 = vmul.f32 -0.35, %v1303_v55 }
 0x283   : > { %v3464_v29 = vadd.f32 %v5818_v53, %v3462_v44  ;;  %v2789_v54 = vmul.f32 1.442695, %v2670_v6  ;;  %v1566_v9 = vmul.f32 0.15, %v1303_v55  ;;  %4470 = vlog2.f32 %v2278_v45  ;;  %v6985_v55 = vpop.f32.mrf.mxu2 }
 0x284   : > { %v2925_v33 = vsub.f32 %v1756_v63, %v2861_v25  ;;  %4472 = vpow2.f32 %v1492_v13  ;;  %v3196_v18 = vadd.f32 %v5821_v37, %v3194_v59  ;;  %v2671_v7 = vmul.f32 0.15, %v2408_v48 }
 0x285   : > { %v4467_v26 = vpop.eup %4466  ;;  %4474 = vpow2.f32 %v1684_v15  ;;  %v3466_v10 = vadd.f32 %v5839_v1, %v3464_v29  ;;  %v2479_v19 = vmul.f32 -0.35, %v2408_v48  ;;  %v1305_v58 = vmul.f32 0.6931472, %v4465_v46 }
 0x286   : > { %v3385_v32 = vsel %vm6969_vm12, %v6941_v5, 0.0  ;;  %v3198_v53 = vadd.f32 %v6068_v31, %v3196_v18  ;;  %4476 = vpow2.f32 %v2597_v20  ;;  %v1494_v62 = vmul.f32 1.442695, %v1374_v16  ;;  %v7007_v46 = vpop.f32.mrf.mxu3  ;;  %v7475_v20 = vld [vmem:[#allocation6_spill] sm:$0xff] }
 0x287   : > { %v4469_v22 = vpop.eup %4468  ;;  %v3468_v56 = vadd.f32 %v6141_v42, %v3466_v10  ;;  %4478 = vpow2.f32 %v2789_v54  ;;  %v1686_v37 = vmul.f32 1.442695, %v1566_v9  ;;  %v457_v34 = vadd.s32 448, %v5120_v50  ;;  %v7476_v9 = vld [vmem:[#allocation5_spill] sm:$0xff] }
 0x288   : > { %v6982_v63 = vmul.f32 %v2989_v17, %v2989_v17  ;;  %v3200_v1 = vadd.f32 %v6182_v2, %v3198_v53  ;;  %v2791_v41 = vmul.f32 1.442695, %v2671_v7  ;;  %v2410_v43 = vmul.f32 0.6931472, %v4467_v26  ;;  %v4668_v26 = vld [vmem:[%s4784_s25 + $0x1b8] sm:$0xff] }
 0x289   : > { %v4471_v38 = vpop.eup %4470  ;;  %v6995_v42 = vmul.f32 %v2925_v33, %v2925_v33  ;;  %v3470_v47 = vadd.f32 %v6215_v0, %v3468_v56  ;;  %v2599_v6 = vmul.f32 1.442695, %v2479_v19  ;;  %v1375_v45 = vmul.f32 -0.35, %v1305_v58  ;;  %v7477_v19 = vld [vmem:[#allocation7_spill] sm:$0xff]  ;;  %v7478_v56 = vld [vmem:[#allocation8_spill] sm:$0xff] }
 0x28a   : > { %v4473_v2 = vpop.eup %4472  ;;  %v3202_v30 = vadd.f32 %v6212_v35, %v3200_v1  ;;  %vm585_vm14 = vcmp.lt.s32.totalorder %v6938_v14, 514  ;;  %4480 = vpow2.f32 %v1494_v62  ;;  %v1567_v25 = vmul.f32 0.15, %v1305_v58  ;;  %v4669_v58 = vld [vmem:[%s4789_s28 + $0x1b8] sm:$0xff] }
 0x28b   : > { %v1307_v61 = vmul.f32 0.6931472, %v4469_v22  ;;  %v4475_v13 = vpop.eup %4474  ;;  %v3117_v12 = vsel %vm6969_vm12, %v6959_v4, 0.0  ;;  %v3472_v48 = vadd.f32 %v6218_v39, %v3470_v47  ;;  %4482 = vpow2.f32 %v1686_v37  ;;  %v7479_v47 = vld [vmem:[#allocation9_spill] sm:$0xff]  ;;  %vm7040_vm2 = vmand %vm398_vm0, %vm585_vm14 }
 0x28c   : > { %v7005_v0 = vadd.s32 %v5122_v51, %v457_v34  ;;  %v4477_v35 = vpop.eup %4476  ;;  %v3386_v15 = vsel %vm6991_vm13, %v6982_v63, 0.0  ;;  %v3204_v44 = vadd.f32 %v6229_v36, %v3202_v30  ;;  %4484 = vpow2.f32 %v2791_v41 }
 0x28d   : > { %v2480_v17 = vmul.f32 -0.35, %v2410_v43  ;;  %v4479_v59 = vpop.eup %4478  ;;  %v3474_v39 = vadd.f32 %v7475_v20, %v3472_v48  ;;  %4486 = vpow2.f32 %v2599_v6  ;;  %v1496_v16 = vmul.f32 1.442695, %v1375_v45 }
 0x28e   : > { %v2672_v29 = vmul.f32 0.15, %v2410_v43  ;;  %v3118_v54 = vsel %vm6991_vm13, %v6995_v42, 0.0  ;;  %v3206_v33 = vadd.f32 %v7476_v9, %v3204_v44  ;;  %v1688_v18 = vmul.f32 1.442695, %v1567_v25  ;;  %v7480_v25 = vld [vmem:[#allocation10_spill] sm:$0xff]  ;;  %v1184_v44 = vpop.f32.mrf.mxu2 }
 0x28f   : > { %v1376_v7 = vmul.f32 -0.35, %v1307_v61  ;;  %v1757_v10 = vmul.f32 %v4668_v26, %v4473_v2  ;;  %v3476_v36 = vadd.f32 %v7477_v19, %v3474_v39  ;;  %v2862_v53 = vmul.f32 %v4669_v58, %v4477_v35  ;;  %v7482_v39 = vld [vmem:[#allocation12_spill] sm:$0xff]  ;;  %v7483_v9 = vld [vmem:[#allocation13_spill] sm:$0xff] }
 0x290   : > { %vm586_vm15 = vcmp.lt.s32.totalorder %v7005_v0, 514  ;;  %v1176_v62 = vadd.f32 1e-12, %v6915_v49  ;;  %v4481_v22 = vpop.eup %4480  ;;  %v3208_v37 = vadd.f32 %v7478_v56, %v3206_v33  ;;  %v2990_v34 = vsub.f32 %v4475_v13, %v4479_v59  ;;  %v7481_v13 = vld [vmem:[#allocation11_spill] sm:$0xff]  ;;  %v4670_v26 = vld [vmem:[%s4784_s25 + $0x1c0] sm:$0xff] }
 0x291   : > { %v2601_v1 = vmul.f32 1.442695, %v2480_v17  ;;  %v7024_v41 = vmul.f32 0.6931472, %v4471_v38  ;;  %v4483_v43 = vpop.eup %4482  ;;  %v3478_v6 = vadd.f32 %v7479_v47, %v3476_v36  ;;  %4488 = vpow2.f32 %v1496_v16  ;;  %v4671_v19 = vld [vmem:[%s4789_s28 + $0x1c0] sm:$0xff]  ;;  %vm7087_vm3 = vmand %vm398_vm0, %vm586_vm15 }
 0x292   : > { %v2793_v45 = vmul.f32 1.442695, %v2672_v29  ;;  %v2281_v2 = vadd.f32 1e-12, %v6925_v60  ;;  %v4485_v30 = vpop.eup %4484  ;;  %v3210_v48 = vadd.f32 %v7480_v25, %v3208_v37  ;;  %4490 = vpow2.f32 %v1688_v18 }
 0x293   : > { %v1498_v35 = vmul.f32 1.442695, %v1376_v7  ;;  %v1568_v49 = vmul.f32 0.15, %v1307_v61  ;;  %v4487_v20 = vpop.eup %4486  ;;  %v3480_v17 = vadd.f32 %v7481_v13, %v3478_v6  ;;  %v2926_v38 = vsub.f32 %v1757_v10, %v2862_v53  ;;  %v2289_v7 = vpop.f32.mrf.mxu3 }
 0x294   : > { %4492 = vlog2.f32 %v1176_v62  ;;  %v1179_v59 = vadd.f32 1e-12, %v6953_v27  ;;  %v7032_v16 = vadd.f32 %v7482_v39, %v3210_v48  ;;  %v3323_v60 = vmul.f32 %v2990_v34, %v2990_v34 }
 0x295   : > { %4494 = vpow2.f32 %v2601_v1  ;;  %v2481_v29 = vmul.f32 -0.35, %v7024_v41  ;;  %v3482_v33 = vadd.f32 %v7483_v9, %v3480_v17  ;;  %v2991_v18 = vsub.f32 %v4483_v43, %v4485_v30  ;;  %v7488_v30 = vld [vmem:[#allocation18_spill] sm:$0xff] }
 0x296   : > { %4496 = vlog2.f32 %v2281_v2  ;;  %v2284_v27 = vadd.f32 1e-12, %v6962_v21  ;;  %v1758_v10 = vmul.f32 %v4670_v26, %v4481_v22  ;;  %v2863_v36 = vmul.f32 %v4671_v19, %v4487_v20 }
 0x297   : > { %4498 = vpow2.f32 %v2793_v45  ;;  %v1690_v58 = vmul.f32 1.442695, %v1568_v49  ;;  %v4489_v53 = vpop.eup %4488  ;;  %v7047_v62 = vmul.f32 %v2926_v38, %v2926_v38  ;;  %v3484_v14 = vadd.f32 %v6391_v24, %v3482_v33  ;;  %v1187_v45 = vpop.f32.mrf.mxu2 }
 0x298   : > { %4500 = vlog2.f32 %v1179_v59  ;;  %v1182_v56 = vadd.f32 1e-12, %v6985_v55  ;;  %v4491_v37 = vpop.eup %4490  ;;  %v7056_v21 = vsel %vm788_vm1, %v3117_v12, 0.0  ;;  %v7063_v22 = vsel %vm788_vm1, %v3385_v32, 0.0 }
 0x299   : > { %v3387_v24 = vsel %vm7040_vm2, %v3323_v60, 0.0  ;;  %4502 = vpow2.f32 %v1498_v35  ;;  %v3486_v34 = vadd.f32 %v6450_v52, %v3484_v14  ;;  %v3324_v1 = vmul.f32 %v2991_v18, %v2991_v18  ;;  %v4673_v35 = vld [vmem:[%s4789_s28 + $0x1c8] sm:$0xff] }
 0x29a   : > { %v4493_v55 = vpop.eup %4492  ;;  %4504 = vlog2.f32 %v2284_v27  ;;  %v2287_v4 = vadd.f32 1e-12, %v7007_v46  ;;  %v7074_v5 = vsel %vm788_vm1, %v3118_v54, 0.0  ;;  %v7081_v11 = vsel %vm788_vm1, %v3386_v15, 0.0  ;;  %v4672_v54 = vld [vmem:[%s4784_s25 + $0x1c8] sm:$0xff] }
 0x29b   : > { %v4495_v12 = vpop.eup %4494  ;;  %v2927_v32 = vsub.f32 %v1758_v10, %v2863_v36  ;;  %4506 = vpow2.f32 %v1690_v58  ;;  %v3119_v31 = vsel %vm7040_vm2, %v7047_v62, 0.0  ;;  %v3488_v63 = vadd.f32 %v6519_v8, %v3486_v34  ;;  %v2292_v9 = vpop.f32.mrf.mxu3 }
 0x29c   : > { %v4497_v42 = vpop.eup %4496  ;;  %v2603_v46 = vmul.f32 1.442695, %v2481_v29  ;;  %4508 = vlog2.f32 %v1182_v56  ;;  %v7096_v0 = vsel %vm788_vm1, %v3387_v24, 0.0  ;;  %v1759_v43 = vmul.f32 %v4672_v54, %v4489_v53 }
 0x29d   : > { %v4499_v15 = vpop.eup %4498  ;;  %v1309_v47 = vmul.f32 0.6931472, %v4493_v55  ;;  %v1185_v6 = vadd.f32 1e-12, %v1184_v44  ;;  %v3490_v25 = vadd.f32 %v7488_v30, %v3488_v63  ;;  %v3388_v48 = vsel %vm7087_vm3, %v3324_v1, 0.0  ;;  %v7489_v44 = vld [vmem:[#allocation21_spill] sm:$0xff] }
 0x29e   : > { %v4501_v2 = vpop.eup %4500  ;;  %v2864_v49 = vmul.f32 %v4673_v35, %v4495_v12  ;;  %4510 = vlog2.f32 %v2287_v4  ;;  %v7103_v20 = vmul.f32 %v2927_v32, %v2927_v32  ;;  %v2673_v13 = vmul.f32 0.15, %v7024_v41  ;;  %v7490_v41 = vld [vmem:[#allocation23_spill] sm:$0xff]  ;;  %v7491_v55 = vld [vmem:[#allocation24_spill] sm:$0xff] }
 0x29f   : > { %v4503_v8 = vpop.eup %4502  ;;  %v2414_v17 = vmul.f32 0.6931472, %v4497_v42  ;;  %v2290_v38 = vadd.f32 1e-12, %v2289_v7  ;;  %v3492_v39 = vadd.f32 %v7489_v44, %v3490_v25  ;;  %v2992_v60 = vsub.f32 %v4491_v37, %v4499_v15  ;;  %v4674_v7 = vld [vmem:[%s4784_s25 + $0x1d0] sm:$0xff] }
 0x2a0   : > { %v4505_v59 = vpop.eup %4504  ;;  %4512 = vpow2.f32 %v2603_v46  ;;  %v1188_v29 = vadd.f32 1e-12, %v1187_v45  ;;  %v7110_v18 = vsel %vm788_vm1, %v3388_v48, 0.0  ;;  %v1377_v27 = vmul.f32 -0.35, %v1309_v47 }
 0x2a1   : > { %v7107_v33 = vpop.eup %4506  ;;  %v1311_v26 = vmul.f32 0.6931472, %v4501_v2  ;;  %4514 = vlog2.f32 %v1185_v6  ;;  %v3494_v19 = vadd.f32 %v7490_v41, %v3492_v39  ;;  %v2928_v36 = vsub.f32 %v1759_v43, %v2864_v49 }
 0x2a2   : > { %v4509_v10 = vpop.eup %4508  ;;  %v7114_v58 = vmul.f32 %v4674_v7, %v4503_v8  ;;  %v1569_v53 = vmul.f32 0.15, %v1309_v47  ;;  %v2482_v14 = vmul.f32 -0.35, %v2414_v17  ;;  %v2416_v56 = vmul.f32 0.6931472, %v4505_v59 }
 0x2a3   : > { %4516 = vlog2.f32 %v2290_v38  ;;  %v2293_v37 = vadd.f32 1e-12, %v2292_v9  ;;  %v3496_v34 = vadd.f32 %v7491_v55, %v3494_v19  ;;  %v2795_v1 = vmul.f32 1.442695, %v2673_v13  ;;  %v4675_v8 = vld [vmem:[%s4789_s28 + $0x1d0] sm:$0xff] }
 0x2a4   : > { %v4511_v24 = vpop.eup %4510  ;;  %v2674_v4 = vmul.f32 0.15, %v2414_v17  ;;  %4518 = vlog2.f32 %v1188_v29  ;;  %v7117_v12 = vmul.f32 %v2992_v60, %v2992_v60  ;;  %v1500_v32 = vmul.f32 1.442695, %v1377_v27 }
 0x2a5   : > { %v1378_v42 = vmul.f32 -0.35, %v1311_v26  ;;  %v1313_v63 = vmul.f32 0.6931472, %v4509_v10  ;;  %v3498_v15 = vadd.f32 %v6834_v40, %v3496_v34  ;;  %v7120_v54 = vmul.f32 %v2928_v36, %v2928_v36  ;;  %v7492_v36 = vld [vmem:[#allocation14_spill] sm:$0xff] }
 0x2a6   : > { %v4513_v46 = vpop.eup %4512  ;;  %v1692_v43 = vmul.f32 1.442695, %v1569_v53  ;;  %v1570_v47 = vmul.f32 0.15, %v1311_v26  ;;  %v2605_v45 = vmul.f32 1.442695, %v2482_v14  ;;  %4520 = vlog2.f32 %v2293_v37 }
 0x2a7   : > { %v4515_v6 = vpop.eup %4514  ;;  %v2483_v2 = vmul.f32 -0.35, %v2416_v56  ;;  %v2418_v30 = vmul.f32 0.6931472, %v4511_v24  ;;  %v7123_v25 = vadd.f32 %v6889_v23, %v3498_v15  ;;  %4522 = vpow2.f32 %v2795_v1  ;;  %v7493_v1 = vld [vmem:[#allocation15_spill] sm:$0xff] }
 0x2a8   : > { %v2797_v48 = vmul.f32 1.442695, %v2674_v4  ;;  %v2675_v35 = vmul.f32 0.15, %v2416_v56  ;;  %v7126_v13 = vmul.f32 %v4675_v8, %v4513_v46  ;;  %4524 = vpow2.f32 %v1500_v32 }
 0x2a9   : > { %v4517_v49 = vpop.eup %4516  ;;  %v1502_v40 = vmul.f32 1.442695, %v1378_v42  ;;  %v1379_v17 = vmul.f32 -0.35, %v1313_v63  ;;  %4526 = vpow2.f32 %v1692_v43  ;;  %v1694_v59 = vmul.f32 1.442695, %v1570_v47 }
 0x2aa   : > { %v4519_v38 = vpop.eup %4518  ;;  %v1571_v44 = vmul.f32 0.15, %v1313_v63  ;;  %v1315_v39 = vmul.f32 0.6931472, %v4515_v6  ;;  %4528 = vpow2.f32 %v2605_v45  ;;  %v2607_v60 = vmul.f32 1.442695, %v2483_v2 }
 0x2ab   : > { %v2484_v29 = vmul.f32 -0.35, %v2418_v30  ;;  %v458_v23 = vadd.s32 456, %v5120_v50  ;;  %4530 = vpow2.f32 %v2797_v48  ;;  %v2799_v9 = vmul.f32 1.442695, %v2675_v35  ;;  %v7494_v47 = vld [vmem:[#allocation16_spill] sm:$0xff] }
 0x2ac   : > { %v2676_v27 = vmul.f32 0.15, %v2418_v30  ;;  %v2420_v26 = vmul.f32 0.6931472, %v4517_v49  ;;  %v4521_v10 = vpop.eup %4520  ;;  %4532 = vpow2.f32 %v1502_v40  ;;  %v1504_v41 = vmul.f32 1.442695, %v1379_v17 }
 0x2ad   : > { %v1317_v19 = vmul.f32 0.6931472, %v4519_v38  ;;  %v3214_v7 = vadd.f32 %v7492_v36, %v7032_v16  ;;  %v4523_v53 = vpop.eup %4522  ;;  %4534 = vpow2.f32 %v1694_v59  ;;  %v1696_v14 = vmul.f32 1.442695, %v1571_v44  ;;  %v7495_v40 = vld [vmem:[#allocation17_spill] sm:$0xff] }
 0x2ae   : > { %v1380_v56 = vmul.f32 -0.35, %v1315_v39  ;;  %v7131_v37 = vmul.f32 0.6931472, %v4521_v10  ;;  %v4525_v24 = vpop.eup %4524  ;;  %4536 = vpow2.f32 %v2607_v60  ;;  %v2609_v55 = vmul.f32 1.442695, %v2484_v29 }
 0x2af   : > { %v1572_v34 = vmul.f32 0.15, %v1315_v39  ;;  %v3216_v4 = vadd.f32 %v7493_v1, %v3214_v7  ;;  %v4527_v32 = vpop.eup %4526  ;;  %4538 = vpow2.f32 %v2799_v9  ;;  %v2801_v42 = vmul.f32 1.442695, %v2676_v27  ;;  %v7496_v10 = vld [vmem:[#allocation19_spill] sm:$0xff] }
 0x2b0   : > { %v2485_v63 = vmul.f32 -0.35, %v2420_v26  ;;  %v459_v46 = vadd.s32 464, %v5120_v50  ;;  %v4529_v15 = vpop.eup %4528  ;;  %4540 = vpow2.f32 %v1504_v41  ;;  %v1381_v16 = vmul.f32 -0.35, %v1317_v19 }
 0x2b1   : > { %v460_v43 = vadd.s32 472, %v5120_v50  ;;  %v3218_v6 = vadd.f32 %v7494_v47, %v3216_v4  ;;  %v4531_v45 = vpop.eup %4530  ;;  %4542 = vpow2.f32 %v1696_v14  ;;  %v1506_v2 = vmul.f32 1.442695, %v1380_v56  ;;  %v4676_v47 = vld [vmem:[%s4784_s25 + $0x1d8] sm:$0xff] }
 0x2b2   : > { %v2486_v30 = vmul.f32 -0.35, %v7131_v37  ;;  %v461_v48 = vadd.s32 480, %v5120_v50  ;;  %v4533_v35 = vpop.eup %4532  ;;  %4544 = vpow2.f32 %v2609_v55  ;;  %v1698_v49 = vmul.f32 1.442695, %v1572_v34  ;;  %v7497_v34 = vld [vmem:[#allocation20_spill] sm:$0xff] }
 0x2b3   : > { %v2677_v8 = vmul.f32 0.15, %v2420_v26  ;;  %v3220_v17 = vadd.f32 %v7495_v40, %v3218_v6  ;;  %v7140_v38 = vpop.eup %4534  ;;  %4546 = vpow2.f32 %v2801_v42  ;;  %v2611_v59 = vmul.f32 1.442695, %v2485_v63  ;;  %v7498_v42 = vld [vmem:[#allocation22_spill] sm:$0xff] }
 0x2b4   : > { %v462_v44 = vadd.s32 488, %v5120_v50  ;;  %v523_v39 = vadd.s32 %v5122_v51, %v458_v23  ;;  %v4537_v60 = vpop.eup %4536  ;;  %v3502_v29 = vadd.f32 %v7063_v22, %v7123_v25  ;;  %v1508_v9 = vmul.f32 1.442695, %v1381_v16 }
 0x2b5   : > { %v1573_v27 = vmul.f32 0.15, %v1317_v19  ;;  %v3222_v41 = vadd.f32 %v7496_v10, %v3220_v17  ;;  %v7147_v36 = vpop.eup %4538  ;;  %v2993_v26 = vsub.f32 %v7107_v33, %v4523_v53  ;;  %4548 = vpow2.f32 %v1506_v2 }
 0x2b6   : > { %v2613_v7 = vmul.f32 1.442695, %v2486_v30  ;;  %v7151_v14 = vadd.s32 %v5122_v51, %v459_v46  ;;  %v4541_v56 = vpop.eup %4540  ;;  %v2994_v55 = vsub.f32 %v4527_v32, %v4531_v45  ;;  %4550 = vpow2.f32 %v1698_v49  ;;  %v4677_v45 = vld [vmem:[%s4789_s28 + $0x1d8] sm:$0xff] }
 0x2b7   : > { %v2803_v23 = vmul.f32 1.442695, %v2677_v8  ;;  %v3224_v22 = vadd.f32 %v7497_v34, %v3222_v41  ;;  %v7154_v25 = vpop.eup %4542  ;;  %4552 = vpow2.f32 %v2611_v59  ;;  %v463_v19 = vadd.s32 496, %v5120_v50  ;;  %v4678_v59 = vld [vmem:[%s4784_s25 + $0x1e0] sm:$0xff]  ;;  %v4683_v34 = vld [vmem:[%s4789_s28 + $0x1f0] sm:$0xff] }
 0x2b8   : > { %v464_v33 = vadd.s32 504, %v5120_v50  ;;  %v7159_v53 = vadd.s32 %v5122_v51, %v460_v43  ;;  %v4545_v1 = vpop.eup %4544  ;;  %v3504_v4 = vadd.f32 %v7081_v11, %v3502_v29  ;;  %4554 = vpow2.f32 %v1508_v9  ;;  %v7499_v43 = vld [vmem:[#allocation25_spill] sm:$0xff] }
 0x2b9   : > { %v1700_v32 = vmul.f32 1.442695, %v1573_v27  ;;  %v3226_v63 = vadd.f32 %v7498_v42, %v3224_v22  ;;  %v7163_v46 = vpop.eup %4546  ;;  %v7165_v16 = vmul.f32 %v2993_v26, %v2993_v26  ;;  %v1761_v6 = vmul.f32 %v4676_v47, %v4525_v24  ;;  %v4680_v41 = vld [vmem:[%s4789_s28 + $0x1e0] sm:$0xff]  ;;  %v4681_v26 = vld [vmem:[%s4789_s28 + $0x1e8] sm:$0xff]  ;;  %v4684_v42 = vld [vmem:[%s4784_s25 + $0x1f8] sm:$0xff] }
 0x2ba   : > { %v2866_v2 = vmul.f32 %v4677_v45, %v4529_v15  ;;  %4556 = vpow2.f32 %v2613_v7  ;;  %v7169_v50 = vmul.f32 %v2994_v55, %v2994_v55  ;;  %vm587_vm4 = vcmp.lt.s32.totalorder %v523_v39, 514 }
 0x2bb   : > { %4558 = vpow2.f32 %v2803_v23  ;;  %v3228_v11 = vadd.f32 %v7499_v43, %v3226_v63  ;;  %v4549_v30 = vpop.eup %4548  ;;  %v7173_v49 = vadd.s32 %v5122_v51, %v461_v48  ;;  %v7176_v8 = vadd.s32 %v5122_v51, %v462_v44  ;;  %vm7193_vm5 = vmand %vm398_vm0, %vm587_vm4  ;;  %v4685_v63 = vld [vmem:[%s4789_s28 + $0x1f8] sm:$0xff] }
 0x2bc   : > { %v7179_v24 = vadd.s32 %v5122_v51, %v463_v19  ;;  %v7182_v15 = vadd.s32 %v5122_v51, %v464_v33  ;;  %v7184_v40 = vpop.eup %4550  ;;  %v3506_v17 = vadd.f32 %v7096_v0, %v3504_v4  ;;  %4560 = vpow2.f32 %v1700_v32  ;;  %v4679_v51 = vld [vmem:[%s4784_s25 + $0x1e8] sm:$0xff] }
 0x2bd   : > { %v1762_v29 = vmul.f32 %v4678_v59, %v4533_v35  ;;  %v3230_v48 = vadd.f32 %v6839_v57, %v3228_v11  ;;  %v4553_v9 = vpop.eup %4552  ;;  %v2678_v44 = vmul.f32 0.15, %v7131_v37  ;;  %v1763_v10 = vmul.f32 %v4679_v51, %v4541_v56  ;;  %v4682_v56 = vld [vmem:[%s4784_s25 + $0x1f0] sm:$0xff] }
 0x2be   : > { %v2867_v0 = vmul.f32 %v4680_v41, %v4537_v60  ;;  %v2868_v35 = vmul.f32 %v4681_v26, %v4545_v1  ;;  %v4555_v7 = vpop.eup %4554  ;;  %vm588_vm6 = vcmp.lt.s32.totalorder %v7151_v14, 514  ;;  %vm589_vm7 = vcmp.lt.s32.totalorder %v7159_v53, 514 }
 0x2bf   : > { %v2929_v57 = vsub.f32 %v7114_v58, %v7126_v13  ;;  %v3232_v37 = vadd.f32 %v6897_v28, %v3230_v48  ;;  %vm590_vm8 = vcmp.lt.s32.totalorder %v7173_v49, 514  ;;  %vm591_vm9 = vcmp.lt.s32.totalorder %v7176_v8, 514  ;;  %vm7218_vm10 = vmand %vm398_vm0, %vm588_vm6 }
 0x2c0   : > { %v4557_v39 = vpop.eup %4556  ;;  %v1764_v60 = vmul.f32 %v4682_v56, %v4549_v30  ;;  %v2930_v55 = vsub.f32 %v1761_v6, %v2866_v2  ;;  %v2869_v22 = vmul.f32 %v4683_v34, %v4553_v9  ;;  %v3389_v58 = vsel %vm7193_vm5, %v7117_v12, 0.0  ;;  %vm7241_vm11 = vmand %vm398_vm0, %vm589_vm7 }
 0x2c1   : > { %v4559_v23 = vpop.eup %4558  ;;  %v3234_v19 = vadd.f32 %v7056_v21, %v3232_v37  ;;  %v3508_v28 = vadd.f32 %v7110_v18, %v3506_v17  ;;  %v2805_v13 = vmul.f32 1.442695, %v2678_v44  ;;  %v2931_v1 = vsub.f32 %v1762_v29, %v2867_v0  ;;  %vm7268_vm14 = vmand %vm398_vm0, %vm590_vm8 }
 0x2c2   : > { %v2932_v4 = vsub.f32 %v1763_v10, %v2868_v35  ;;  %v3120_v21 = vsel %vm7087_vm3, %v7103_v20, 0.0  ;;  %v4561_v32 = vpop.eup %4560  ;;  %v1765_v12 = vmul.f32 %v4684_v42, %v4555_v7  ;;  %v2870_v18 = vmul.f32 %v4685_v63, %v4557_v39  ;;  %vm7277_vm15 = vmand %vm398_vm0, %vm591_vm9 }
 0x2c3   : > { %v3058_v47 = vmul.f32 %v2929_v57, %v2929_v57  ;;  %v3236_v14 = vadd.f32 %v7074_v5, %v3234_v19  ;;  %v3059_v6 = vmul.f32 %v2930_v55, %v2930_v55  ;;  %v3121_v45 = vsel %vm7193_vm5, %v7120_v54, 0.0 }
 0x2c4   : > { %v3237_v52 = vsel %vm788_vm1, %v3119_v31, 0.0  ;;  %v3509_v20 = vsel %vm788_vm1, %v3389_v58, 0.0  ;;  %v2995_v54 = vsub.f32 %v7140_v38, %v7147_v36  ;;  %v3390_v61 = vsel %vm7218_vm10, %v7165_v16, 0.0 }
 0x2c5   : > { %v3238_v5 = vadd.f32 %v3237_v52, %v3236_v14  ;;  %v3510_v62 = vadd.f32 %v3509_v20, %v3508_v28  ;;  %4562 = vpow2.f32 %v2805_v13  ;;  %v2933_v31 = vsub.f32 %v1764_v60, %v2869_v22 }
 0x2c6   : > { %v3060_v43 = vmul.f32 %v2931_v1, %v2931_v1  ;;  %v3239_v53 = vsel %vm788_vm1, %v3120_v21, 0.0  ;;  %v2934_v11 = vsub.f32 %v1765_v12, %v2870_v18  ;;  %v3061_v30 = vmul.f32 %v2932_v4, %v2932_v4 }
 0x2c7   : > { %v3122_v17 = vsel %vm7218_vm10, %v3058_v47, 0.0  ;;  %v3240_v59 = vadd.f32 %v3239_v53, %v3238_v5  ;;  %v3123_v29 = vsel %vm7241_vm11, %v3059_v6, 0.0  ;;  %v3241_v38 = vsel %vm788_vm1, %v3121_v45, 0.0 }
 0x2c8   : > { %v3391_v36 = vsel %vm7241_vm11, %v7169_v50, 0.0  ;;  %v3511_v16 = vsel %vm788_vm1, %v3390_v61, 0.0  ;;  %v2996_v9 = vsub.f32 %v7154_v25, %v7163_v46  ;;  %v3328_v44 = vmul.f32 %v2995_v54, %v2995_v54 }
 0x2c9   : > { %v3242_v48 = vadd.f32 %v3241_v38, %v3240_v59  ;;  %v3512_v27 = vadd.f32 %v3511_v16, %v3510_v62  ;;  %vm592_vm12 = vcmp.lt.s32.totalorder %v7179_v24, 514  ;;  %vm593_vm13 = vcmp.lt.s32.totalorder %v7182_v15, 514 }
 0x2ca   : > { %v3243_v50 = vsel %vm788_vm1, %v3122_v17, 0.0  ;;  %v3062_v46 = vmul.f32 %v2933_v31, %v2933_v31  ;;  %v3063_v24 = vmul.f32 %v2934_v11, %v2934_v11  ;;  %v3124_v49 = vsel %vm7268_vm14, %v3060_v43, 0.0  ;;  %vm7290_vm2 = vmand %vm398_vm0, %vm592_vm12 }
 0x2cb   : > { %v3244_v10 = vadd.f32 %v3243_v50, %v3242_v48  ;;  %v4563_v41 = vpop.eup %4562  ;;  %v3125_v0 = vsel %vm7277_vm15, %v3061_v30, 0.0  ;;  %v3245_v26 = vsel %vm788_vm1, %v3123_v29, 0.0  ;;  %v2997_v8 = vsub.f32 %v7184_v40, %v4559_v23  ;;  %vm7300_vm3 = vmand %vm398_vm0, %vm593_vm13 }
 0x2cc   : > { %v3513_v35 = vsel %vm788_vm1, %v3391_v36, 0.0  ;;  %v3329_v37 = vmul.f32 %v2996_v9, %v2996_v9  ;;  %v3392_v39 = vsel %vm7268_vm14, %v3328_v44, 0.0  ;;  %v3247_v60 = vsel %vm788_vm1, %v3124_v49, 0.0 }
 0x2cd   : > { %v3246_v57 = vadd.f32 %v3245_v26, %v3244_v10  ;;  %v3514_v56 = vadd.f32 %v3513_v35, %v3512_v27  ;;  %v3126_v55 = vsel %vm7290_vm2, %v3062_v46, 0.0  ;;  %v3127_v23 = vsel %vm7300_vm3, %v3063_v24, 0.0 }
 0x2ce   : > { %v2998_v22 = vsub.f32 %v4561_v32, %v4563_v41  ;;  %v3249_v19 = vsel %vm788_vm1, %v3125_v0, 0.0  ;;  %v3515_v15 = vsel %vm788_vm1, %v3392_v39, 0.0  ;;  %v3330_v3 = vmul.f32 %v2997_v8, %v2997_v8 }
 0x2cf   : > { %v3248_v34 = vadd.f32 %v3247_v60, %v3246_v57  ;;  %v3393_v28 = vsel %vm7277_vm15, %v3329_v37, 0.0  ;;  %v3516_v13 = vadd.f32 %v3515_v15, %v3514_v56  ;;  %v3251_v33 = vsel %vm788_vm1, %v3126_v55, 0.0 }
 0x2d0   : > { %v3253_v1 = vsel %vm788_vm1, %v3127_v23, 0.0  ;;  %v3331_v21 = vmul.f32 %v2998_v22, %v2998_v22  ;;  %v3517_v42 = vsel %vm788_vm1, %v3393_v28, 0.0  ;;  %v3394_v12 = vsel %vm7290_vm2, %v3330_v3, 0.0 }
 0x2d1   : > { %v3250_v58 = vadd.f32 %v3249_v19, %v3248_v34  ;;  %v3518_v63 = vadd.f32 %v3517_v42, %v3516_v13  ;;  %v3519_v47 = vsel %vm788_vm1, %v3394_v12, 0.0 }
 0x2d2   : > { %v3395_v18 = vsel %vm7300_vm3, %v3331_v21, 0.0 }
 0x2d3   : > { %v3252_v4 = vadd.f32 %v3251_v33, %v3250_v58  ;;  %v3520_v14 = vadd.f32 %v3519_v47, %v3518_v63  ;;  %v3521_v6 = vsel %vm788_vm1, %v3395_v18, 0.0 }
 0x2d5   : > { %v3254_v32 = vadd.f32 %v3253_v1, %v3252_v4  ;;  %v3522_v45 = vadd.f32 %v3521_v6, %v3520_v14 }
 0x2d7   : > { %3255 = vadd.xlane.f32.xlu0 %v3254_v32 }
 0x2df   : > { %3523 = vadd.xlane.f32.xlu0 %v3522_v45 }
 0x34a   : > { %v3256_v52 = vpop.xlane.xlu0 %3255 }
 0x34b   : > { %v3257_v20 = vrot.slane %v3256_v52, 4 }
 0x34d   : > { %v3258_v2 = vadd.f32 %v3257_v20, %v3256_v52 }
 0x34f   : > { %v3259_v5 = vrot.slane %v3258_v2, 2 }
 0x351   : > { %v3260_v54 = vadd.f32 %v3259_v5, %v3258_v2 }
 0x352   : > { %v3524_v61 = vpop.xlane.xlu0 %3523 }
 0x353   : > { %v3525_v62 = vrot.slane %v3524_v61, 4  ;;  %v3261_v31 = vrot.slane %v3260_v54, 1 }
 0x355   : > { %v3526_v43 = vadd.f32 %v3525_v62, %v3524_v61  ;;  %v3262_v53 = vadd.f32 %v3261_v31, %v3260_v54 }
 0x357   : > { %v3527_v11 = vrot.slane %v3526_v43, 2  ;;  %3758 = vpush %v3262_v53 }
 0x359   : > { %v3528_v30 = vadd.f32 %v3527_v11, %v3526_v43 }
 0x35b   : > { %v3529_v17 = vrot.slane %v3528_v30, 1 }
 0x35d   : > { %v3530_v59 = vadd.f32 %v3529_v17, %v3528_v30 }
 0x35f   : > { %3760 = vpush %v3530_v59 }
 0x388   : > { %s3759_s5 = spop %3758 }
 0x389   : > { %s3264_s6 = sadd.f32 %s3759_s5, %s2999_s4 }
 0x38b   : > { %3266 = sst [smem:[#allocation2]] %s3264_s6 }
 0x390   : > { %s3761_s11 = spop %3760 }
 0x391   : > { %s3532_s12 = smul.f32 0.5, %s3761_s11 }
 0x393   : > { %s3533_s17 = sadd.f32 %s3748_s7, %s3532_s12 }
 0x395   : > { %3535 = sst [smem:[#allocation2 + $0x1]] %s3533_s17 }
 0x396   : > { %3765 = dma.smem_to_vmem (%p3768_p6), %s4729_s18, 16, %s3543_s10, [#allocation3]  }
 0x397   : > { %4713 = dma.done.wait (%p3768_p6), [#allocation3], 16  }
 0x398   : > { %4715 = vsyncadd (%p3768_p6), [#allocation3], 4294967280 }
 0x399   : > { %3551 = sfence }
 0x39a PF: > { %s14_s14 = sadd.s32 1, %s4726_s14   ;;  %s7514_s12 = smov %s4722_s13 }
 0x39b   : > { %p11_p7 = scmp.ge.s32.totalorder %s14_s14, 4   ;;  %s7515_s13 = smov %s7517_s16 }
 0x39d   :  { %13 = sbr.rel (!%p11_p7) target bundleno = 2 (0x2), region = 70 }
 0x3a2   :  { %3557 = vsyncpa [#allocation3], 1 }
 0x3a3   :  { %3559 = vsyncpa [#allocation3 + $0x1], 1 }

</bundles_post_ra>
